<compile_context>
chip_gen: v7x
topology: tpu7x:2x2x1
jax: 0.10.0
libtpu: 0.0.40
codegen_flags: <defaults>
</compile_context>

<pallas_src>
import math

import jax
import jax.numpy as jnp
from jax.experimental import pallas as pl
from jax.experimental.pallas import tpu as pltpu

# ----------------------------- configuration --------------------------------
PATCH = 14
IMG = 28
NUM_PATCHES = (IMG // PATCH) ** 2          # 4
NUM_REG = 4
SEQ_VIS = 1 + NUM_REG + NUM_PATCHES        # 9 tokens (CLS + registers + patches)
VIS_DIM = 64
VIS_HEADS = 4
VIS_DEPTH = 2

VOCAB = 100
VOCAB_PAD = 128                            # lane-aligned one-hot gather
MAX_POS = 32
TXT_LEN = 8
TXT_DIM = 32
TXT_HEADS = 2
TXT_DEPTH = 2

FUSION_DIM = max(VIS_DIM, TXT_DIM)         # 64
VIS_COEF = 0.75
TXT_COEF = 0.25

BF16 = jnp.bfloat16

# --------------------------- in-kernel helpers --------------------------------


def _gelu(x):
    # TODO(synk): PyTorch nn.GELU() defaults to the exact erf form; the tanh
    # approximation is used here for robust Mosaic lowering.
    return jax.nn.gelu(x, approximate=True)


def _mm(a, b):
    """a (M,K) @ b (K,N): bf16 MXU operands, f32 accumulation.

    Weights are stored in bf16 already, so only activations get cast here.
    """
    return jax.lax.dot_general(
        a.astype(BF16), b.astype(BF16),
        dimension_numbers=(((a.ndim - 1,), (0,)), ((), ())),
        preferred_element_type=jnp.float32)


def _mmT(a, b):
    """a (M,K) @ b (N,K)^T -> (M,N); contraction on last dims (no explicit .T)."""
    return jax.lax.dot_general(
        a.astype(BF16), b.astype(BF16),
        dimension_numbers=(((1,), (1,)), ((), ())),
        preferred_element_type=jnp.float32)


def _ln(x, g, b, eps):
    mu = jnp.mean(x, axis=-1, keepdims=True)
    xc = x - mu
    var = jnp.mean(xc * xc, axis=-1, keepdims=True)
    return xc * jax.lax.rsqrt(var + eps) * g + b


def _softmax_rows(s):
    s = s - jnp.max(s, axis=-1, keepdims=True)
    p = jnp.exp(s)
    return p * pl.reciprocal(jnp.sum(p, axis=-1, keepdims=True), approx=True)


def _const_spec(arr):
    """Full-array block, constant across the (size-1) grid (DMA'd once)."""
    zeros = (0,) * arr.ndim
    return pl.BlockSpec(arr.shape, lambda i, _z=zeros: _z)


# --------------------------- kernel argument order ----------------------------

_W_ORDER = (
    # vision tower
    "patch_w", "patch_b", "cls", "reg", "pos",
    "v_n1_g", "v_n1_b", "v_qkv_w", "v_qkv_b", "v_proj_w", "v_proj_b", "v_ls1",
    "v_n2_g", "v_n2_b", "v_fc1_w", "v_fc1_b", "v_fc2_w", "v_fc2_b", "v_ls2",
    "v_norm_g", "v_norm_b",
    # text tower
    "word_emb", "pos_type", "t_emb_g", "t_emb_b",
    "t_q_w", "t_q_b", "t_k_w", "t_k_b", "t_v_w", "t_v_b", "t_o_w", "t_o_b",
    "t_ln1_g", "t_ln1_b", "t_i_w", "t_i_b", "t_d_w", "t_d_b",
    "t_ln2_g", "t_ln2_b",
    # fusion + regression head
    "txt_proj_w", "txt_proj_b",
    "head_w0", "head_b0", "head_w1", "head_b1", "head_w2", "head_b2",
    "head_w3", "head_b3", "head_w4", "head_b4",
)


# ------------------------------ fused Pallas kernel ---------------------------


def _fused_kernel(*refs):
    """Vision tower + text tower + fusion/regression head in one grid step."""
    patches_ref, ids_ref = refs[0], refs[1]
    o_ref = refs[-1]
    w = dict(zip(_W_ORDER, refs[2:-1]))

    B = patches_ref.shape[0] // NUM_PATCHES          # static at trace time

    # ======================= vision tower (DINOv2-style) ======================
    D, H = VIS_DIM, VIS_HEADS
    Dh = D // H
    scale = 1.0 / math.sqrt(Dh)

    pos = w["pos"][...]                                               # (1+NP, D)
    cls_tok = w["cls"][...] + pos[0:1, :]                             # (1, D)
    reg_tok = w["reg"][...]                                           # (NUM_REG, D)
    tok = _mm(patches_ref[...], w["patch_w"][...]) + w["patch_b"][...]  # (B*NP, D)

    # Assemble [CLS | registers | patches+pos] per batch in vregs (no scratch).
    rows = []
    for b in range(B):
        rows.append(cls_tok)
        rows.append(reg_tok)
        rows.append(tok[b * NUM_PATCHES:(b + 1) * NUM_PATCHES, :] + pos[1:, :])
    x = jnp.concatenate(rows, axis=0)                                 # (B*SEQ, D)

    for d in range(VIS_DEPTH):
        h = _ln(x, w["v_n1_g"][d], w["v_n1_b"][d], 1e-6)
        qkv = _mm(h, w["v_qkv_w"][d]) + w["v_qkv_b"][d]               # (B*SEQ, 3D)
        att = []
        for b in range(B):
            r0 = b * SEQ_VIS
            heads = []
            for hd in range(H):
                c0 = hd * Dh
                q = qkv[r0:r0 + SEQ_VIS, c0:c0 + Dh]
                k = qkv[r0:r0 + SEQ_VIS, D + c0:D + c0 + Dh]
                v = qkv[r0:r0 + SEQ_VIS, 2 * D + c0:2 * D + c0 + Dh]
                p = _softmax_rows(_mmT(q, k) * scale)                 # (SEQ, SEQ)
                heads.append(_mm(p, v))                               # (SEQ, Dh)
            att.append(jnp.concatenate(heads, axis=-1))               # (SEQ, D)
        a = jnp.concatenate(att, axis=0)                              # (B*SEQ, D)
        a = _mm(a, w["v_proj_w"][d]) + w["v_proj_b"][d]
        x = x + w["v_ls1"][d] * a                                     # LayerScale
        h = _ln(x, w["v_n2_g"][d], w["v_n2_b"][d], 1e-6)
        h = _gelu(_mm(h, w["v_fc1_w"][d]) + w["v_fc1_b"][d])
        h = _mm(h, w["v_fc2_w"][d]) + w["v_fc2_b"][d]
        x = x + w["v_ls2"][d] * h

    x = _ln(x, w["v_norm_g"][...], w["v_norm_b"][...], 1e-6)
    v_feat = jnp.concatenate(
        [x[b * SEQ_VIS:b * SEQ_VIS + 1, :] for b in range(B)], axis=0)  # (B, 64)

    # ===================== text tower (MiniLM/BERT-style) =====================
    Dt, Ht = TXT_DIM, TXT_HEADS
    Dth = Dt // Ht
    tscale = 1.0 / math.sqrt(Dth)
    S = TXT_LEN

    # In-kernel embedding gather: one-hot (B*S, 128) @ word_emb (128, 32).
    ids = ids_ref[...]                                                # (B*S, 1)
    vocab_iota = jax.lax.broadcasted_iota(jnp.int32, (B * S, VOCAB_PAD), 1)
    onehot = jnp.where(ids == vocab_iota, 1.0, 0.0)                   # (B*S, 128)
    tok_emb = _mm(onehot, w["word_emb"][...])                         # (B*S, 32)
    pe = jnp.concatenate([w["pos_type"][...]] * B, axis=0)            # (B*S, 32)
    xt = _ln(tok_emb + pe, w["t_emb_g"][...], w["t_emb_b"][...], 1e-12)

    for d in range(TXT_DEPTH):
        q = _mm(xt, w["t_q_w"][d]) + w["t_q_b"][d]
        k = _mm(xt, w["t_k_w"][d]) + w["t_k_b"][d]
        v = _mm(xt, w["t_v_w"][d]) + w["t_v_b"][d]
        # TODO(synk): unmasked softmax (fixed-length, un-padded sequences).
        att = []
        for b in range(B):
            r0 = b * S
            heads = []
            for hd in range(Ht):
                c0 = hd * Dth
                p = _softmax_rows(
                    _mmT(q[r0:r0 + S, c0:c0 + Dth],
                         k[r0:r0 + S, c0:c0 + Dth]) * tscale)
                heads.append(_mm(p, v[r0:r0 + S, c0:c0 + Dth]))
            att.append(jnp.concatenate(heads, axis=-1))               # (S, 32)
        a = jnp.concatenate(att, axis=0)                              # (B*S, 32)
        a = _mm(a, w["t_o_w"][d]) + w["t_o_b"][d]
        xt = _ln(xt + a, w["t_ln1_g"][d], w["t_ln1_b"][d], 1e-12)
        hh = _gelu(_mm(xt, w["t_i_w"][d]) + w["t_i_b"][d])
        hh = _mm(hh, w["t_d_w"][d]) + w["t_d_b"][d]
        xt = _ln(xt + hh, w["t_ln2_g"][d], w["t_ln2_b"][d], 1e-12)

    # TODO(synk): original code applies txt_proj to the raw ModelOutput object
    # (a bug); mean pooling over tokens is used here as the sentence embedding.
    t_feat = jnp.concatenate(
        [jnp.mean(xt[b * S:(b + 1) * S, :], axis=0, keepdims=True)
         for b in range(B)], axis=0)                                  # (B, 32)

    # ====================== fusion + regression head ==========================
    t = _mm(t_feat, w["txt_proj_w"][...]) + w["txt_proj_b"][...]      # (B, 64)
    z = VIS_COEF * v_feat + TXT_COEF * t                              # vis_proj=Id
    hh = _gelu(_mm(z, w["head_w0"][...]) + w["head_b0"][...])         # (B, 256)
    hh = _gelu(_mm(hh, w["head_w1"][...]) + w["head_b1"][...])        # (B, 128)
    hh = _gelu(_mm(hh, w["head_w2"][...]) + w["head_b2"][...])        # (B, 64)
    hh = _gelu(_mm(hh, w["head_w3"][...]) + w["head_b3"][...])        # (B, 32)
    hh = jnp.maximum(_mm(hh, w["head_w4"][...]) + w["head_b4"][...], 0.0)
    o_ref[...] = hh.astype(o_ref.dtype)                               # (B, 1)


# ------------------------------ parameter init -------------------------------

_BASE_KEY = jax.random.PRNGKey(0)
_COUNTER = [0]


def _init(shape, scale=0.02, dtype=jnp.float32):
    _COUNTER[0] += 1
    k = jax.random.fold_in(_BASE_KEY, _COUNTER[0])
    return (jax.random.normal(k, shape, jnp.float32) * scale).astype(dtype)


def make_params():
    """All weights. Matmul weight matrices are pre-cast to bf16 once."""
    dpv, mlp_v = VIS_DEPTH, 4 * VIS_DIM
    dpt, ffn_t = TXT_DEPTH, 4 * TXT_DIM
    p = {
        # ---- vision tower ----
        "patch_w": _init((3 * PATCH * PATCH, VIS_DIM), dtype=BF16),
        "patch_b": jnp.zeros((1, VIS_DIM), jnp.float32),
        "cls": _init((1, VIS_DIM)),
        "reg": _init((NUM_REG, VIS_DIM)),
        "pos": _init((1 + NUM_PATCHES, VIS_DIM)),
        "v_n1_g": jnp.ones((dpv, 1, VIS_DIM), jnp.float32),
        "v_n1_b": jnp.zeros((dpv, 1, VIS_DIM), jnp.float32),
        "v_qkv_w": _init((dpv, VIS_DIM, 3 * VIS_DIM), dtype=BF16),
        "v_qkv_b": jnp.zeros((dpv, 1, 3 * VIS_DIM), jnp.float32),
        "v_proj_w": _init((dpv, VIS_DIM, VIS_DIM), dtype=BF16),
        "v_proj_b": jnp.zeros((dpv, 1, VIS_DIM), jnp.float32),
        "v_ls1": jnp.ones((dpv, 1, VIS_DIM), jnp.float32),
        "v_n2_g": jnp.ones((dpv, 1, VIS_DIM), jnp.float32),
        "v_n2_b": jnp.zeros((dpv, 1, VIS_DIM), jnp.float32),
        "v_fc1_w": _init((dpv, VIS_DIM, mlp_v), dtype=BF16),
        "v_fc1_b": jnp.zeros((dpv, 1, mlp_v), jnp.float32),
        "v_fc2_w": _init((dpv, mlp_v, VIS_DIM), dtype=BF16),
        "v_fc2_b": jnp.zeros((dpv, 1, VIS_DIM), jnp.float32),
        "v_ls2": jnp.ones((dpv, 1, VIS_DIM), jnp.float32),
        "v_norm_g": jnp.ones((1, VIS_DIM), jnp.float32),
        "v_norm_b": jnp.zeros((1, VIS_DIM), jnp.float32),
        # ---- text tower ----
        "t_emb_g": jnp.ones((1, TXT_DIM), jnp.float32),
        "t_emb_b": jnp.zeros((1, TXT_DIM), jnp.float32),
        "t_q_w": _init((dpt, TXT_DIM, TXT_DIM), dtype=BF16),
        "t_q_b": jnp.zeros((dpt, 1, TXT_DIM), jnp.float32),
        "t_k_w": _init((dpt, TXT_DIM, TXT_DIM), dtype=BF16),
        "t_k_b": jnp.zeros((dpt, 1, TXT_DIM), jnp.float32),
        "t_v_w": _init((dpt, TXT_DIM, TXT_DIM), dtype=BF16),
        "t_v_b": jnp.zeros((dpt, 1, TXT_DIM), jnp.float32),
        "t_o_w": _init((dpt, TXT_DIM, TXT_DIM), dtype=BF16),
        "t_o_b": jnp.zeros((dpt, 1, TXT_DIM), jnp.float32),
        "t_ln1_g": jnp.ones((dpt, 1, TXT_DIM), jnp.float32),
        "t_ln1_b": jnp.zeros((dpt, 1, TXT_DIM), jnp.float32),
        "t_i_w": _init((dpt, TXT_DIM, ffn_t), dtype=BF16),
        "t_i_b": jnp.zeros((dpt, 1, ffn_t), jnp.float32),
        "t_d_w": _init((dpt, ffn_t, TXT_DIM), dtype=BF16),
        "t_d_b": jnp.zeros((dpt, 1, TXT_DIM), jnp.float32),
        "t_ln2_g": jnp.ones((dpt, 1, TXT_DIM), jnp.float32),
        "t_ln2_b": jnp.zeros((dpt, 1, TXT_DIM), jnp.float32),
        # ---- fusion + regression head ----
        "txt_proj_w": _init((TXT_DIM, FUSION_DIM), dtype=BF16),
        "txt_proj_b": jnp.zeros((1, FUSION_DIM), jnp.float32),
    }
    # word embedding table, zero-padded to 128 rows (lane-aligned one-hot gather)
    word = _init((VOCAB, TXT_DIM))
    p["word_emb"] = jnp.pad(word, ((0, VOCAB_PAD - VOCAB), (0, 0))).astype(BF16)
    # position[:S] + token-type-0 embedding, precomputed once (host side)
    pos_emb = _init((MAX_POS, TXT_DIM))
    type_emb = _init((2, TXT_DIM))
    p["pos_type"] = pos_emb[:TXT_LEN] + type_emb[0][None, :]
    # regression head 64 -> 256 -> 128 -> 64 -> 32 -> 1
    dims = [FUSION_DIM, 256, 128, 64, 32, 1]
    for i in range(5):
        p[f"head_w{i}"] = _init((dims[i], dims[i + 1]), dtype=BF16)
        p[f"head_b{i}"] = jnp.zeros((1, dims[i + 1]), jnp.float32)
    return p


# ------------------------------ model forward --------------------------------


def dino_with_embed_forward(image, token_ids, params):
    """Single fused pallas_call: vision + text towers + fusion/regression head."""
    B, C, Himg, Wimg = image.shape
    gh, gw = Himg // PATCH, Wimg // PATCH
    # im2col for the patch-embed matmul (stays in XLA glue; pure layout).
    patches = image.reshape(B, C, gh, PATCH, gw, PATCH)
    patches = patches.transpose(0, 2, 4, 1, 3, 5).reshape(
        B * gh * gw, C * PATCH * PATCH)                    # (B*NP, 588)
    ids = token_ids.astype(jnp.int32).reshape(B * TXT_LEN, 1)

    weights = [params[name] for name in _W_ORDER]
    out = pl.pallas_call(
        _fused_kernel,
        grid=(1,),
        in_specs=[_const_spec(patches), _const_spec(ids)]
                 + [_const_spec(v) for v in weights],
        out_specs=pl.BlockSpec((B, 1), lambda i: (0, 0)),
        out_shape=jax.ShapeDtypeStruct((B, 1), jnp.float32),
        compiler_params=pltpu.CompilerParams(
            dimension_semantics=("arbitrary",)),
    )(patches, ids, *weights)
    return out


# ----------------------------------- main ------------------------------------

if __name__ == "__main__":
    params = make_params()

    key = jax.random.PRNGKey(0)
    image = jax.random.normal(jax.random.fold_in(key, 10_000),
                              (2, 3, IMG, IMG), jnp.float32)     # NCHW like PyTorch
    token_ids = jax.random.randint(jax.random.fold_in(key, 10_001),
                                   (2, TXT_LEN), 0, VOCAB)

    fwd = jax.jit(lambda img, ids: dino_with_embed_forward(img, ids, params))

    out = jax.block_until_ready(fwd(image, token_ids))
    assert out.shape == (2, 1) and out.dtype == jnp.float32
    assert bool(jnp.all(out >= 0.0))   # final ReLU
    print("KERNEL_OK")
</pallas_src>

<mosaic_0001>
module attributes {stable_mosaic.version = 11 : i64} {
  func.func @_fused_kernel(%arg0: i32, %arg1: memref<8x588xf32, #tpu.memory_space<vmem>>, %arg2: memref<16x1xi32, #tpu.memory_space<vmem>>, %arg3: memref<588x64xbf16, #tpu.memory_space<vmem>>, %arg4: memref<1x64xf32, #tpu.memory_space<vmem>>, %arg5: memref<1x64xf32, #tpu.memory_space<vmem>>, %arg6: memref<4x64xf32, #tpu.memory_space<vmem>>, %arg7: memref<5x64xf32, #tpu.memory_space<vmem>>, %arg8: memref<2x1x64xf32, #tpu.memory_space<vmem>>, %arg9: memref<2x1x64xf32, #tpu.memory_space<vmem>>, %arg10: memref<2x64x192xbf16, #tpu.memory_space<vmem>>, %arg11: memref<2x1x192xf32, #tpu.memory_space<vmem>>, %arg12: memref<2x64x64xbf16, #tpu.memory_space<vmem>>, %arg13: memref<2x1x64xf32, #tpu.memory_space<vmem>>, %arg14: memref<2x1x64xf32, #tpu.memory_space<vmem>>, %arg15: memref<2x1x64xf32, #tpu.memory_space<vmem>>, %arg16: memref<2x1x64xf32, #tpu.memory_space<vmem>>, %arg17: memref<2x64x256xbf16, #tpu.memory_space<vmem>>, %arg18: memref<2x1x256xf32, #tpu.memory_space<vmem>>, %arg19: memref<2x256x64xbf16, #tpu.memory_space<vmem>>, %arg20: memref<2x1x64xf32, #tpu.memory_space<vmem>>, %arg21: memref<2x1x64xf32, #tpu.memory_space<vmem>>, %arg22: memref<1x64xf32, #tpu.memory_space<vmem>>, %arg23: memref<1x64xf32, #tpu.memory_space<vmem>>, %arg24: memref<128x32xbf16, #tpu.memory_space<vmem>>, %arg25: memref<8x32xf32, #tpu.memory_space<vmem>>, %arg26: memref<1x32xf32, #tpu.memory_space<vmem>>, %arg27: memref<1x32xf32, #tpu.memory_space<vmem>>, %arg28: memref<2x32x32xbf16, #tpu.memory_space<vmem>>, %arg29: memref<2x1x32xf32, #tpu.memory_space<vmem>>, %arg30: memref<2x32x32xbf16, #tpu.memory_space<vmem>>, %arg31: memref<2x1x32xf32, #tpu.memory_space<vmem>>, %arg32: memref<2x32x32xbf16, #tpu.memory_space<vmem>>, %arg33: memref<2x1x32xf32, #tpu.memory_space<vmem>>, %arg34: memref<2x32x32xbf16, #tpu.memory_space<vmem>>, %arg35: memref<2x1x32xf32, #tpu.memory_space<vmem>>, %arg36: memref<2x1x32xf32, #tpu.memory_space<vmem>>, %arg37: memref<2x1x32xf32, #tpu.memory_space<vmem>>, %arg38: memref<2x32x128xbf16, #tpu.memory_space<vmem>>, %arg39: memref<2x1x128xf32, #tpu.memory_space<vmem>>, %arg40: memref<2x128x32xbf16, #tpu.memory_space<vmem>>, %arg41: memref<2x1x32xf32, #tpu.memory_space<vmem>>, %arg42: memref<2x1x32xf32, #tpu.memory_space<vmem>>, %arg43: memref<2x1x32xf32, #tpu.memory_space<vmem>>, %arg44: memref<32x64xbf16, #tpu.memory_space<vmem>>, %arg45: memref<1x64xf32, #tpu.memory_space<vmem>>, %arg46: memref<64x256xbf16, #tpu.memory_space<vmem>>, %arg47: memref<1x256xf32, #tpu.memory_space<vmem>>, %arg48: memref<256x128xbf16, #tpu.memory_space<vmem>>, %arg49: memref<1x128xf32, #tpu.memory_space<vmem>>, %arg50: memref<128x64xbf16, #tpu.memory_space<vmem>>, %arg51: memref<1x64xf32, #tpu.memory_space<vmem>>, %arg52: memref<64x32xbf16, #tpu.memory_space<vmem>>, %arg53: memref<1x32xf32, #tpu.memory_space<vmem>>, %arg54: memref<32x1xbf16, #tpu.memory_space<vmem>>, %arg55: memref<1x1xf32, #tpu.memory_space<vmem>>, %arg56: memref<2x1xf32, #tpu.memory_space<vmem>>) attributes {dimension_semantics = [#tpu.dimension_semantics<arbitrary>], iteration_bounds = array<i64: 1>, scalar_prefetch = 0 : i64, scratch_operands = 0 : i64, tpu.core_type = #tpu.core_type<tc>, window_params = [{pipeline_mode = #tpu.pipeline_mode<synchronous>, transform_indices = @transform_0, window_bounds = array<i64: 8, 588>}, {pipeline_mode = #tpu.pipeline_mode<synchronous>, transform_indices = @transform_1, window_bounds = array<i64: 16, 1>}, {pipeline_mode = #tpu.pipeline_mode<synchronous>, transform_indices = @transform_2, window_bounds = array<i64: 588, 64>}, {pipeline_mode = #tpu.pipeline_mode<synchronous>, transform_indices = @transform_3, window_bounds = array<i64: 1, 64>}, {pipeline_mode = #tpu.pipeline_mode<synchronous>, transform_indices = @transform_4, window_bounds = array<i64: 1, 64>}, {pipeline_mode = #tpu.pipeline_mode<synchronous>, transform_indices = @transform_5, window_bounds = array<i64: 4, 64>}, {pipeline_mode = #tpu.pipeline_mode<synchronous>, transform_indices = @transform_6, window_bounds = array<i64: 5, 64>}, {pipeline_mode = #tpu.pipeline_mode<synchronous>, transform_indices = @transform_7, window_bounds = array<i64: 2, 1, 64>}, {pipeline_mode = #tpu.pipeline_mode<synchronous>, transform_indices = @transform_8, window_bounds = array<i64: 2, 1, 64>}, {pipeline_mode = #tpu.pipeline_mode<synchronous>, transform_indices = @transform_9, window_bounds = array<i64: 2, 64, 192>}, {pipeline_mode = #tpu.pipeline_mode<synchronous>, transform_indices = @transform_10, window_bounds = array<i64: 2, 1, 192>}, {pipeline_mode = #tpu.pipeline_mode<synchronous>, transform_indices = @transform_11, window_bounds = array<i64: 2, 64, 64>}, {pipeline_mode = #tpu.pipeline_mode<synchronous>, transform_indices = @transform_12, window_bounds = array<i64: 2, 1, 64>}, {pipeline_mode = #tpu.pipeline_mode<synchronous>, transform_indices = @transform_13, window_bounds = array<i64: 2, 1, 64>}, {pipeline_mode = #tpu.pipeline_mode<synchronous>, transform_indices = @transform_14, window_bounds = array<i64: 2, 1, 64>}, {pipeline_mode = #tpu.pipeline_mode<synchronous>, transform_indices = @transform_15, window_bounds = array<i64: 2, 1, 64>}, {pipeline_mode = #tpu.pipeline_mode<synchronous>, transform_indices = @transform_16, window_bounds = array<i64: 2, 64, 256>}, {pipeline_mode = #tpu.pipeline_mode<synchronous>, transform_indices = @transform_17, window_bounds = array<i64: 2, 1, 256>}, {pipeline_mode = #tpu.pipeline_mode<synchronous>, transform_indices = @transform_18, window_bounds = array<i64: 2, 256, 64>}, {pipeline_mode = #tpu.pipeline_mode<synchronous>, transform_indices = @transform_19, window_bounds = array<i64: 2, 1, 64>}, {pipeline_mode = #tpu.pipeline_mode<synchronous>, transform_indices = @transform_20, window_bounds = array<i64: 2, 1, 64>}, {pipeline_mode = #tpu.pipeline_mode<synchronous>, transform_indices = @transform_21, window_bounds = array<i64: 1, 64>}, {pipeline_mode = #tpu.pipeline_mode<synchronous>, transform_indices = @transform_22, window_bounds = array<i64: 1, 64>}, {pipeline_mode = #tpu.pipeline_mode<synchronous>, transform_indices = @transform_23, window_bounds = array<i64: 128, 32>}, {pipeline_mode = #tpu.pipeline_mode<synchronous>, transform_indices = @transform_24, window_bounds = array<i64: 8, 32>}, {pipeline_mode = #tpu.pipeline_mode<synchronous>, transform_indices = @transform_25, window_bounds = array<i64: 1, 32>}, {pipeline_mode = #tpu.pipeline_mode<synchronous>, transform_indices = @transform_26, window_bounds = array<i64: 1, 32>}, {pipeline_mode = #tpu.pipeline_mode<synchronous>, transform_indices = @transform_27, window_bounds = array<i64: 2, 32, 32>}, {pipeline_mode = #tpu.pipeline_mode<synchronous>, transform_indices = @transform_28, window_bounds = array<i64: 2, 1, 32>}, {pipeline_mode = #tpu.pipeline_mode<synchronous>, transform_indices = @transform_29, window_bounds = array<i64: 2, 32, 32>}, {pipeline_mode = #tpu.pipeline_mode<synchronous>, transform_indices = @transform_30, window_bounds = array<i64: 2, 1, 32>}, {pipeline_mode = #tpu.pipeline_mode<synchronous>, transform_indices = @transform_31, window_bounds = array<i64: 2, 32, 32>}, {pipeline_mode = #tpu.pipeline_mode<synchronous>, transform_indices = @transform_32, window_bounds = array<i64: 2, 1, 32>}, {pipeline_mode = #tpu.pipeline_mode<synchronous>, transform_indices = @transform_33, window_bounds = array<i64: 2, 32, 32>}, {pipeline_mode = #tpu.pipeline_mode<synchronous>, transform_indices = @transform_34, window_bounds = array<i64: 2, 1, 32>}, {pipeline_mode = #tpu.pipeline_mode<synchronous>, transform_indices = @transform_35, window_bounds = array<i64: 2, 1, 32>}, {pipeline_mode = #tpu.pipeline_mode<synchronous>, transform_indices = @transform_36, window_bounds = array<i64: 2, 1, 32>}, {pipeline_mode = #tpu.pipeline_mode<synchronous>, transform_indices = @transform_37, window_bounds = array<i64: 2, 32, 128>}, {pipeline_mode = #tpu.pipeline_mode<synchronous>, transform_indices = @transform_38, window_bounds = array<i64: 2, 1, 128>}, {pipeline_mode = #tpu.pipeline_mode<synchronous>, transform_indices = @transform_39, window_bounds = array<i64: 2, 128, 32>}, {pipeline_mode = #tpu.pipeline_mode<synchronous>, transform_indices = @transform_40, window_bounds = array<i64: 2, 1, 32>}, {pipeline_mode = #tpu.pipeline_mode<synchronous>, transform_indices = @transform_41, window_bounds = array<i64: 2, 1, 32>}, {pipeline_mode = #tpu.pipeline_mode<synchronous>, transform_indices = @transform_42, window_bounds = array<i64: 2, 1, 32>}, {pipeline_mode = #tpu.pipeline_mode<synchronous>, transform_indices = @transform_43, window_bounds = array<i64: 32, 64>}, {pipeline_mode = #tpu.pipeline_mode<synchronous>, transform_indices = @transform_44, window_bounds = array<i64: 1, 64>}, {pipeline_mode = #tpu.pipeline_mode<synchronous>, transform_indices = @transform_45, window_bounds = array<i64: 64, 256>}, {pipeline_mode = #tpu.pipeline_mode<synchronous>, transform_indices = @transform_46, window_bounds = array<i64: 1, 256>}, {pipeline_mode = #tpu.pipeline_mode<synchronous>, transform_indices = @transform_47, window_bounds = array<i64: 256, 128>}, {pipeline_mode = #tpu.pipeline_mode<synchronous>, transform_indices = @transform_48, window_bounds = array<i64: 1, 128>}, {pipeline_mode = #tpu.pipeline_mode<synchronous>, transform_indices = @transform_49, window_bounds = array<i64: 128, 64>}, {pipeline_mode = #tpu.pipeline_mode<synchronous>, transform_indices = @transform_50, window_bounds = array<i64: 1, 64>}, {pipeline_mode = #tpu.pipeline_mode<synchronous>, transform_indices = @transform_51, window_bounds = array<i64: 64, 32>}, {pipeline_mode = #tpu.pipeline_mode<synchronous>, transform_indices = @transform_52, window_bounds = array<i64: 1, 32>}, {pipeline_mode = #tpu.pipeline_mode<synchronous>, transform_indices = @transform_53, window_bounds = array<i64: 32, 1>}, {pipeline_mode = #tpu.pipeline_mode<synchronous>, transform_indices = @transform_54, window_bounds = array<i64: 1, 1>}, {pipeline_mode = #tpu.pipeline_mode<synchronous>, transform_indices = @transform_55, window_bounds = array<i64: 2, 1>}]} {
    %c0 = arith.constant 0 : index
    %c0_0 = arith.constant 0 : index
    %0 = vector.load %arg7[%c0, %c0_0] : memref<5x64xf32, #tpu.memory_space<vmem>>, vector<5x64xf32>
    %c0_1 = arith.constant 0 : index
    %c0_2 = arith.constant 0 : index
    %1 = vector.load %arg5[%c0_1, %c0_2] : memref<1x64xf32, #tpu.memory_space<vmem>>, vector<1x64xf32>
    %2 = vector.extract_strided_slice %0 {offsets = [0, 0], sizes = [1, 64], strides = [1, 1]} : vector<5x64xf32> to vector<1x64xf32>
    %3 = arith.addf %1, %2 : vector<1x64xf32>
    %c0_3 = arith.constant 0 : index
    %c0_4 = arith.constant 0 : index
    %4 = vector.load %arg6[%c0_3, %c0_4] : memref<4x64xf32, #tpu.memory_space<vmem>>, vector<4x64xf32>
    %c0_5 = arith.constant 0 : index
    %c0_6 = arith.constant 0 : index
    %5 = vector.load %arg1[%c0_5, %c0_6] : memref<8x588xf32, #tpu.memory_space<vmem>>, vector<8x588xf32>
    %c0_7 = arith.constant 0 : index
    %c0_8 = arith.constant 0 : index
    %6 = vector.load %arg3[%c0_7, %c0_8] : memref<588x64xbf16, #tpu.memory_space<vmem>>, vector<588x64xbf16>
    %7 = arith.truncf %5 : vector<8x588xf32> to vector<8x588xbf16>
    %cst = arith.constant dense<0.000000e+00> : vector<8x64xf32>
    %8 = tpu.matmul %7, %6, %cst {dimension_numbers = #tpu.dot_dimension_numbers<[1], [0], [0], [1], [0, 0, 1, 1], [], []>} : vector<8x588xbf16>, vector<588x64xbf16>, vector<8x64xf32> -> vector<8x64xf32>
    %c0_9 = arith.constant 0 : index
    %c0_10 = arith.constant 0 : index
    %9 = vector.load %arg4[%c0_9, %c0_10] : memref<1x64xf32, #tpu.memory_space<vmem>>, vector<1x64xf32>
    %10 = vector.broadcast %9 : vector<1x64xf32> to vector<8x64xf32>
    %11 = arith.addf %8, %10 : vector<8x64xf32>
    %12 = vector.extract_strided_slice %11 {offsets = [0, 0], sizes = [4, 64], strides = [1, 1]} : vector<8x64xf32> to vector<4x64xf32>
    %13 = vector.extract_strided_slice %0 {offsets = [1, 0], sizes = [4, 64], strides = [1, 1]} : vector<5x64xf32> to vector<4x64xf32>
    %14 = arith.addf %12, %13 : vector<4x64xf32>
    %15 = vector.extract_strided_slice %11 {offsets = [4, 0], sizes = [4, 64], strides = [1, 1]} : vector<8x64xf32> to vector<4x64xf32>
    %16 = vector.extract_strided_slice %0 {offsets = [1, 0], sizes = [4, 64], strides = [1, 1]} : vector<5x64xf32> to vector<4x64xf32>
    %17 = arith.addf %15, %16 : vector<4x64xf32>
    %18 = tpu.concatenate %3, %4, %14, %3, %4, %17 in 0 : vector<1x64xf32>, vector<4x64xf32>, vector<4x64xf32>, vector<1x64xf32>, vector<4x64xf32>, vector<4x64xf32> -> vector<18x64xf32>
    %c0_11 = arith.constant 0 : index
    %c0_12 = arith.constant 0 : index
    %c0_13 = arith.constant 0 : index
    %19 = vector.load %arg8[%c0_11, %c0_12, %c0_13] : memref<2x1x64xf32, #tpu.memory_space<vmem>>, vector<1x1x64xf32>
    %20 = vector.shape_cast %19 : vector<1x1x64xf32> to vector<1x64xf32>
    %c0_14 = arith.constant 0 : index
    %c0_15 = arith.constant 0 : index
    %c0_16 = arith.constant 0 : index
    %21 = vector.load %arg9[%c0_14, %c0_15, %c0_16] : memref<2x1x64xf32, #tpu.memory_space<vmem>>, vector<1x1x64xf32>
    %22 = vector.shape_cast %21 : vector<1x1x64xf32> to vector<1x64xf32>
    %cst_17 = arith.constant dense<0.000000e+00> : vector<18xf32>
    %23 = vector.multi_reduction <add>, %18, %cst_17 [1] : vector<18x64xf32> to vector<18xf32>
    %24 = vector.shape_cast %23 : vector<18xf32> to vector<18x1xf32>
    %cst_18 = arith.constant 6.400000e+01 : f32
    %25 = vector.broadcast %cst_18 : f32 to vector<18x1xf32>
    %26 = arith.divf %24, %25 : vector<18x1xf32>
    %27 = vector.broadcast %26 : vector<18x1xf32> to vector<18x64xf32>
    %28 = arith.subf %18, %27 : vector<18x64xf32>
    %29 = arith.mulf %28, %28 : vector<18x64xf32>
    %cst_19 = arith.constant dense<0.000000e+00> : vector<18xf32>
    %30 = vector.multi_reduction <add>, %29, %cst_19 [1] : vector<18x64xf32> to vector<18xf32>
    %31 = vector.shape_cast %30 : vector<18xf32> to vector<18x1xf32>
    %cst_20 = arith.constant 6.400000e+01 : f32
    %32 = vector.broadcast %cst_20 : f32 to vector<18x1xf32>
    %33 = arith.divf %31, %32 : vector<18x1xf32>
    %cst_21 = arith.constant 9.99999997E-7 : f32
    %34 = vector.broadcast %cst_21 : f32 to vector<18x1xf32>
    %35 = arith.addf %33, %34 : vector<18x1xf32>
    %36 = math.rsqrt %35 : vector<18x1xf32>
    %37 = vector.broadcast %36 : vector<18x1xf32> to vector<18x64xf32>
    %38 = arith.mulf %28, %37 : vector<18x64xf32>
    %39 = vector.broadcast %20 : vector<1x64xf32> to vector<18x64xf32>
    %40 = arith.mulf %38, %39 : vector<18x64xf32>
    %41 = vector.broadcast %22 : vector<1x64xf32> to vector<18x64xf32>
    %42 = arith.addf %40, %41 : vector<18x64xf32>
    %c0_22 = arith.constant 0 : index
    %c0_23 = arith.constant 0 : index
    %c0_24 = arith.constant 0 : index
    %43 = vector.load %arg10[%c0_22, %c0_23, %c0_24] : memref<2x64x192xbf16, #tpu.memory_space<vmem>>, vector<1x64x192xbf16>
    %44 = vector.shape_cast %43 : vector<1x64x192xbf16> to vector<64x192xbf16>
    %45 = arith.truncf %42 : vector<18x64xf32> to vector<18x64xbf16>
    %cst_25 = arith.constant dense<0.000000e+00> : vector<18x192xf32>
    %46 = tpu.matmul %45, %44, %cst_25 {dimension_numbers = #tpu.dot_dimension_numbers<[1], [0], [0], [1], [0, 0, 1, 1], [], []>} : vector<18x64xbf16>, vector<64x192xbf16>, vector<18x192xf32> -> vector<18x192xf32>
    %c0_26 = arith.constant 0 : index
    %c0_27 = arith.constant 0 : index
    %c0_28 = arith.constant 0 : index
    %47 = vector.load %arg11[%c0_26, %c0_27, %c0_28] : memref<2x1x192xf32, #tpu.memory_space<vmem>>, vector<1x1x192xf32>
    %48 = vector.shape_cast %47 : vector<1x1x192xf32> to vector<1x192xf32>
    %49 = vector.broadcast %48 : vector<1x192xf32> to vector<18x192xf32>
    %50 = arith.addf %46, %49 : vector<18x192xf32>
    %51 = vector.extract_strided_slice %50 {offsets = [0, 0], sizes = [9, 16], strides = [1, 1]} : vector<18x192xf32> to vector<9x16xf32>
    %52 = vector.extract_strided_slice %50 {offsets = [0, 64], sizes = [9, 16], strides = [1, 1]} : vector<18x192xf32> to vector<9x16xf32>
    %53 = vector.extract_strided_slice %50 {offsets = [0, 128], sizes = [9, 16], strides = [1, 1]} : vector<18x192xf32> to vector<9x16xf32>
    %54 = arith.truncf %51 : vector<9x16xf32> to vector<9x16xbf16>
    %55 = arith.truncf %52 : vector<9x16xf32> to vector<9x16xbf16>
    %cst_29 = arith.constant dense<0.000000e+00> : vector<9x9xf32>
    %56 = tpu.matmul %54, %55, %cst_29 {dimension_numbers = #tpu.dot_dimension_numbers<[1], [1], [0], [0], [0, 0, 1, 0], [], []>} : vector<9x16xbf16>, vector<9x16xbf16>, vector<9x9xf32> -> vector<9x9xf32>
    %cst_30 = arith.constant 2.500000e-01 : f32
    %57 = vector.broadcast %cst_30 : f32 to vector<9x9xf32>
    %58 = arith.mulf %56, %57 : vector<9x9xf32>
    %cst_31 = arith.constant dense<0xFF800000> : vector<9xf32>
    %59 = vector.multi_reduction <maximumf>, %58, %cst_31 [1] : vector<9x9xf32> to vector<9xf32>
    %60 = vector.shape_cast %59 : vector<9xf32> to vector<9x1xf32>
    %61 = vector.broadcast %60 : vector<9x1xf32> to vector<9x9xf32>
    %62 = arith.subf %58, %61 : vector<9x9xf32>
    %63 = math.exp %62 : vector<9x9xf32>
    %cst_32 = arith.constant dense<0.000000e+00> : vector<9xf32>
    %64 = vector.multi_reduction <add>, %63, %cst_32 [1] : vector<9x9xf32> to vector<9xf32>
    %65 = vector.shape_cast %64 : vector<9xf32> to vector<9x1xf32>
    %66 = tpu.reciprocal %65 {approx = true} : vector<9x1xf32> -> vector<9x1xf32>
    %67 = vector.broadcast %66 : vector<9x1xf32> to vector<9x9xf32>
    %68 = arith.mulf %63, %67 : vector<9x9xf32>
    %69 = arith.truncf %68 : vector<9x9xf32> to vector<9x9xbf16>
    %70 = arith.truncf %53 : vector<9x16xf32> to vector<9x16xbf16>
    %cst_33 = arith.constant dense<0.000000e+00> : vector<9x16xf32>
    %71 = tpu.matmul %69, %70, %cst_33 {dimension_numbers = #tpu.dot_dimension_numbers<[1], [0], [0], [1], [0, 0, 1, 1], [], []>} : vector<9x9xbf16>, vector<9x16xbf16>, vector<9x16xf32> -> vector<9x16xf32>
    %72 = vector.extract_strided_slice %50 {offsets = [0, 16], sizes = [9, 16], strides = [1, 1]} : vector<18x192xf32> to vector<9x16xf32>
    %73 = vector.extract_strided_slice %50 {offsets = [0, 80], sizes = [9, 16], strides = [1, 1]} : vector<18x192xf32> to vector<9x16xf32>
    %74 = vector.extract_strided_slice %50 {offsets = [0, 144], sizes = [9, 16], strides = [1, 1]} : vector<18x192xf32> to vector<9x16xf32>
    %75 = arith.truncf %72 : vector<9x16xf32> to vector<9x16xbf16>
    %76 = arith.truncf %73 : vector<9x16xf32> to vector<9x16xbf16>
    %cst_34 = arith.constant dense<0.000000e+00> : vector<9x9xf32>
    %77 = tpu.matmul %75, %76, %cst_34 {dimension_numbers = #tpu.dot_dimension_numbers<[1], [1], [0], [0], [0, 0, 1, 0], [], []>} : vector<9x16xbf16>, vector<9x16xbf16>, vector<9x9xf32> -> vector<9x9xf32>
    %cst_35 = arith.constant 2.500000e-01 : f32
    %78 = vector.broadcast %cst_35 : f32 to vector<9x9xf32>
    %79 = arith.mulf %77, %78 : vector<9x9xf32>
    %cst_36 = arith.constant dense<0xFF800000> : vector<9xf32>
    %80 = vector.multi_reduction <maximumf>, %79, %cst_36 [1] : vector<9x9xf32> to vector<9xf32>
    %81 = vector.shape_cast %80 : vector<9xf32> to vector<9x1xf32>
    %82 = vector.broadcast %81 : vector<9x1xf32> to vector<9x9xf32>
    %83 = arith.subf %79, %82 : vector<9x9xf32>
    %84 = math.exp %83 : vector<9x9xf32>
    %cst_37 = arith.constant dense<0.000000e+00> : vector<9xf32>
    %85 = vector.multi_reduction <add>, %84, %cst_37 [1] : vector<9x9xf32> to vector<9xf32>
    %86 = vector.shape_cast %85 : vector<9xf32> to vector<9x1xf32>
    %87 = tpu.reciprocal %86 {approx = true} : vector<9x1xf32> -> vector<9x1xf32>
    %88 = vector.broadcast %87 : vector<9x1xf32> to vector<9x9xf32>
    %89 = arith.mulf %84, %88 : vector<9x9xf32>
    %90 = arith.truncf %89 : vector<9x9xf32> to vector<9x9xbf16>
    %91 = arith.truncf %74 : vector<9x16xf32> to vector<9x16xbf16>
    %cst_38 = arith.constant dense<0.000000e+00> : vector<9x16xf32>
    %92 = tpu.matmul %90, %91, %cst_38 {dimension_numbers = #tpu.dot_dimension_numbers<[1], [0], [0], [1], [0, 0, 1, 1], [], []>} : vector<9x9xbf16>, vector<9x16xbf16>, vector<9x16xf32> -> vector<9x16xf32>
    %93 = vector.extract_strided_slice %50 {offsets = [0, 32], sizes = [9, 16], strides = [1, 1]} : vector<18x192xf32> to vector<9x16xf32>
    %94 = vector.extract_strided_slice %50 {offsets = [0, 96], sizes = [9, 16], strides = [1, 1]} : vector<18x192xf32> to vector<9x16xf32>
    %95 = vector.extract_strided_slice %50 {offsets = [0, 160], sizes = [9, 16], strides = [1, 1]} : vector<18x192xf32> to vector<9x16xf32>
    %96 = arith.truncf %93 : vector<9x16xf32> to vector<9x16xbf16>
    %97 = arith.truncf %94 : vector<9x16xf32> to vector<9x16xbf16>
    %cst_39 = arith.constant dense<0.000000e+00> : vector<9x9xf32>
    %98 = tpu.matmul %96, %97, %cst_39 {dimension_numbers = #tpu.dot_dimension_numbers<[1], [1], [0], [0], [0, 0, 1, 0], [], []>} : vector<9x16xbf16>, vector<9x16xbf16>, vector<9x9xf32> -> vector<9x9xf32>
    %cst_40 = arith.constant 2.500000e-01 : f32
    %99 = vector.broadcast %cst_40 : f32 to vector<9x9xf32>
    %100 = arith.mulf %98, %99 : vector<9x9xf32>
    %cst_41 = arith.constant dense<0xFF800000> : vector<9xf32>
    %101 = vector.multi_reduction <maximumf>, %100, %cst_41 [1] : vector<9x9xf32> to vector<9xf32>
    %102 = vector.shape_cast %101 : vector<9xf32> to vector<9x1xf32>
    %103 = vector.broadcast %102 : vector<9x1xf32> to vector<9x9xf32>
    %104 = arith.subf %100, %103 : vector<9x9xf32>
    %105 = math.exp %104 : vector<9x9xf32>
    %cst_42 = arith.constant dense<0.000000e+00> : vector<9xf32>
    %106 = vector.multi_reduction <add>, %105, %cst_42 [1] : vector<9x9xf32> to vector<9xf32>
    %107 = vector.shape_cast %106 : vector<9xf32> to vector<9x1xf32>
    %108 = tpu.reciprocal %107 {approx = true} : vector<9x1xf32> -> vector<9x1xf32>
    %109 = vector.broadcast %108 : vector<9x1xf32> to vector<9x9xf32>
    %110 = arith.mulf %105, %109 : vector<9x9xf32>
    %111 = arith.truncf %110 : vector<9x9xf32> to vector<9x9xbf16>
    %112 = arith.truncf %95 : vector<9x16xf32> to vector<9x16xbf16>
    %cst_43 = arith.constant dense<0.000000e+00> : vector<9x16xf32>
    %113 = tpu.matmul %111, %112, %cst_43 {dimension_numbers = #tpu.dot_dimension_numbers<[1], [0], [0], [1], [0, 0, 1, 1], [], []>} : vector<9x9xbf16>, vector<9x16xbf16>, vector<9x16xf32> -> vector<9x16xf32>
    %114 = vector.extract_strided_slice %50 {offsets = [0, 48], sizes = [9, 16], strides = [1, 1]} : vector<18x192xf32> to vector<9x16xf32>
    %115 = vector.extract_strided_slice %50 {offsets = [0, 112], sizes = [9, 16], strides = [1, 1]} : vector<18x192xf32> to vector<9x16xf32>
    %116 = vector.extract_strided_slice %50 {offsets = [0, 176], sizes = [9, 16], strides = [1, 1]} : vector<18x192xf32> to vector<9x16xf32>
    %117 = arith.truncf %114 : vector<9x16xf32> to vector<9x16xbf16>
    %118 = arith.truncf %115 : vector<9x16xf32> to vector<9x16xbf16>
    %cst_44 = arith.constant dense<0.000000e+00> : vector<9x9xf32>
    %119 = tpu.matmul %117, %118, %cst_44 {dimension_numbers = #tpu.dot_dimension_numbers<[1], [1], [0], [0], [0, 0, 1, 0], [], []>} : vector<9x16xbf16>, vector<9x16xbf16>, vector<9x9xf32> -> vector<9x9xf32>
    %cst_45 = arith.constant 2.500000e-01 : f32
    %120 = vector.broadcast %cst_45 : f32 to vector<9x9xf32>
    %121 = arith.mulf %119, %120 : vector<9x9xf32>
    %cst_46 = arith.constant dense<0xFF800000> : vector<9xf32>
    %122 = vector.multi_reduction <maximumf>, %121, %cst_46 [1] : vector<9x9xf32> to vector<9xf32>
    %123 = vector.shape_cast %122 : vector<9xf32> to vector<9x1xf32>
    %124 = vector.broadcast %123 : vector<9x1xf32> to vector<9x9xf32>
    %125 = arith.subf %121, %124 : vector<9x9xf32>
    %126 = math.exp %125 : vector<9x9xf32>
    %cst_47 = arith.constant dense<0.000000e+00> : vector<9xf32>
    %127 = vector.multi_reduction <add>, %126, %cst_47 [1] : vector<9x9xf32> to vector<9xf32>
    %128 = vector.shape_cast %127 : vector<9xf32> to vector<9x1xf32>
    %129 = tpu.reciprocal %128 {approx = true} : vector<9x1xf32> -> vector<9x1xf32>
    %130 = vector.broadcast %129 : vector<9x1xf32> to vector<9x9xf32>
    %131 = arith.mulf %126, %130 : vector<9x9xf32>
    %132 = arith.truncf %131 : vector<9x9xf32> to vector<9x9xbf16>
    %133 = arith.truncf %116 : vector<9x16xf32> to vector<9x16xbf16>
    %cst_48 = arith.constant dense<0.000000e+00> : vector<9x16xf32>
    %134 = tpu.matmul %132, %133, %cst_48 {dimension_numbers = #tpu.dot_dimension_numbers<[1], [0], [0], [1], [0, 0, 1, 1], [], []>} : vector<9x9xbf16>, vector<9x16xbf16>, vector<9x16xf32> -> vector<9x16xf32>
    %135 = tpu.concatenate %71, %92, %113, %134 in 1 : vector<9x16xf32>, vector<9x16xf32>, vector<9x16xf32>, vector<9x16xf32> -> vector<9x64xf32>
    %136 = vector.extract_strided_slice %50 {offsets = [9, 0], sizes = [9, 16], strides = [1, 1]} : vector<18x192xf32> to vector<9x16xf32>
    %137 = vector.extract_strided_slice %50 {offsets = [9, 64], sizes = [9, 16], strides = [1, 1]} : vector<18x192xf32> to vector<9x16xf32>
    %138 = vector.extract_strided_slice %50 {offsets = [9, 128], sizes = [9, 16], strides = [1, 1]} : vector<18x192xf32> to vector<9x16xf32>
    %139 = arith.truncf %136 : vector<9x16xf32> to vector<9x16xbf16>
    %140 = arith.truncf %137 : vector<9x16xf32> to vector<9x16xbf16>
    %cst_49 = arith.constant dense<0.000000e+00> : vector<9x9xf32>
    %141 = tpu.matmul %139, %140, %cst_49 {dimension_numbers = #tpu.dot_dimension_numbers<[1], [1], [0], [0], [0, 0, 1, 0], [], []>} : vector<9x16xbf16>, vector<9x16xbf16>, vector<9x9xf32> -> vector<9x9xf32>
    %cst_50 = arith.constant 2.500000e-01 : f32
    %142 = vector.broadcast %cst_50 : f32 to vector<9x9xf32>
    %143 = arith.mulf %141, %142 : vector<9x9xf32>
    %cst_51 = arith.constant dense<0xFF800000> : vector<9xf32>
    %144 = vector.multi_reduction <maximumf>, %143, %cst_51 [1] : vector<9x9xf32> to vector<9xf32>
    %145 = vector.shape_cast %144 : vector<9xf32> to vector<9x1xf32>
    %146 = vector.broadcast %145 : vector<9x1xf32> to vector<9x9xf32>
    %147 = arith.subf %143, %146 : vector<9x9xf32>
    %148 = math.exp %147 : vector<9x9xf32>
    %cst_52 = arith.constant dense<0.000000e+00> : vector<9xf32>
    %149 = vector.multi_reduction <add>, %148, %cst_52 [1] : vector<9x9xf32> to vector<9xf32>
    %150 = vector.shape_cast %149 : vector<9xf32> to vector<9x1xf32>
    %151 = tpu.reciprocal %150 {approx = true} : vector<9x1xf32> -> vector<9x1xf32>
    %152 = vector.broadcast %151 : vector<9x1xf32> to vector<9x9xf32>
    %153 = arith.mulf %148, %152 : vector<9x9xf32>
    %154 = arith.truncf %153 : vector<9x9xf32> to vector<9x9xbf16>
    %155 = arith.truncf %138 : vector<9x16xf32> to vector<9x16xbf16>
    %cst_53 = arith.constant dense<0.000000e+00> : vector<9x16xf32>
    %156 = tpu.matmul %154, %155, %cst_53 {dimension_numbers = #tpu.dot_dimension_numbers<[1], [0], [0], [1], [0, 0, 1, 1], [], []>} : vector<9x9xbf16>, vector<9x16xbf16>, vector<9x16xf32> -> vector<9x16xf32>
    %157 = vector.extract_strided_slice %50 {offsets = [9, 16], sizes = [9, 16], strides = [1, 1]} : vector<18x192xf32> to vector<9x16xf32>
    %158 = vector.extract_strided_slice %50 {offsets = [9, 80], sizes = [9, 16], strides = [1, 1]} : vector<18x192xf32> to vector<9x16xf32>
    %159 = vector.extract_strided_slice %50 {offsets = [9, 144], sizes = [9, 16], strides = [1, 1]} : vector<18x192xf32> to vector<9x16xf32>
    %160 = arith.truncf %157 : vector<9x16xf32> to vector<9x16xbf16>
    %161 = arith.truncf %158 : vector<9x16xf32> to vector<9x16xbf16>
    %cst_54 = arith.constant dense<0.000000e+00> : vector<9x9xf32>
    %162 = tpu.matmul %160, %161, %cst_54 {dimension_numbers = #tpu.dot_dimension_numbers<[1], [1], [0], [0], [0, 0, 1, 0], [], []>} : vector<9x16xbf16>, vector<9x16xbf16>, vector<9x9xf32> -> vector<9x9xf32>
    %cst_55 = arith.constant 2.500000e-01 : f32
    %163 = vector.broadcast %cst_55 : f32 to vector<9x9xf32>
    %164 = arith.mulf %162, %163 : vector<9x9xf32>
    %cst_56 = arith.constant dense<0xFF800000> : vector<9xf32>
    %165 = vector.multi_reduction <maximumf>, %164, %cst_56 [1] : vector<9x9xf32> to vector<9xf32>
    %166 = vector.shape_cast %165 : vector<9xf32> to vector<9x1xf32>
    %167 = vector.broadcast %166 : vector<9x1xf32> to vector<9x9xf32>
    %168 = arith.subf %164, %167 : vector<9x9xf32>
    %169 = math.exp %168 : vector<9x9xf32>
    %cst_57 = arith.constant dense<0.000000e+00> : vector<9xf32>
    %170 = vector.multi_reduction <add>, %169, %cst_57 [1] : vector<9x9xf32> to vector<9xf32>
    %171 = vector.shape_cast %170 : vector<9xf32> to vector<9x1xf32>
    %172 = tpu.reciprocal %171 {approx = true} : vector<9x1xf32> -> vector<9x1xf32>
    %173 = vector.broadcast %172 : vector<9x1xf32> to vector<9x9xf32>
    %174 = arith.mulf %169, %173 : vector<9x9xf32>
    %175 = arith.truncf %174 : vector<9x9xf32> to vector<9x9xbf16>
    %176 = arith.truncf %159 : vector<9x16xf32> to vector<9x16xbf16>
    %cst_58 = arith.constant dense<0.000000e+00> : vector<9x16xf32>
    %177 = tpu.matmul %175, %176, %cst_58 {dimension_numbers = #tpu.dot_dimension_numbers<[1], [0], [0], [1], [0, 0, 1, 1], [], []>} : vector<9x9xbf16>, vector<9x16xbf16>, vector<9x16xf32> -> vector<9x16xf32>
    %178 = vector.extract_strided_slice %50 {offsets = [9, 32], sizes = [9, 16], strides = [1, 1]} : vector<18x192xf32> to vector<9x16xf32>
    %179 = vector.extract_strided_slice %50 {offsets = [9, 96], sizes = [9, 16], strides = [1, 1]} : vector<18x192xf32> to vector<9x16xf32>
    %180 = vector.extract_strided_slice %50 {offsets = [9, 160], sizes = [9, 16], strides = [1, 1]} : vector<18x192xf32> to vector<9x16xf32>
    %181 = arith.truncf %178 : vector<9x16xf32> to vector<9x16xbf16>
    %182 = arith.truncf %179 : vector<9x16xf32> to vector<9x16xbf16>
    %cst_59 = arith.constant dense<0.000000e+00> : vector<9x9xf32>
    %183 = tpu.matmul %181, %182, %cst_59 {dimension_numbers = #tpu.dot_dimension_numbers<[1], [1], [0], [0], [0, 0, 1, 0], [], []>} : vector<9x16xbf16>, vector<9x16xbf16>, vector<9x9xf32> -> vector<9x9xf32>
    %cst_60 = arith.constant 2.500000e-01 : f32
    %184 = vector.broadcast %cst_60 : f32 to vector<9x9xf32>
    %185 = arith.mulf %183, %184 : vector<9x9xf32>
    %cst_61 = arith.constant dense<0xFF800000> : vector<9xf32>
    %186 = vector.multi_reduction <maximumf>, %185, %cst_61 [1] : vector<9x9xf32> to vector<9xf32>
    %187 = vector.shape_cast %186 : vector<9xf32> to vector<9x1xf32>
    %188 = vector.broadcast %187 : vector<9x1xf32> to vector<9x9xf32>
    %189 = arith.subf %185, %188 : vector<9x9xf32>
    %190 = math.exp %189 : vector<9x9xf32>
    %cst_62 = arith.constant dense<0.000000e+00> : vector<9xf32>
    %191 = vector.multi_reduction <add>, %190, %cst_62 [1] : vector<9x9xf32> to vector<9xf32>
    %192 = vector.shape_cast %191 : vector<9xf32> to vector<9x1xf32>
    %193 = tpu.reciprocal %192 {approx = true} : vector<9x1xf32> -> vector<9x1xf32>
    %194 = vector.broadcast %193 : vector<9x1xf32> to vector<9x9xf32>
    %195 = arith.mulf %190, %194 : vector<9x9xf32>
    %196 = arith.truncf %195 : vector<9x9xf32> to vector<9x9xbf16>
    %197 = arith.truncf %180 : vector<9x16xf32> to vector<9x16xbf16>
    %cst_63 = arith.constant dense<0.000000e+00> : vector<9x16xf32>
    %198 = tpu.matmul %196, %197, %cst_63 {dimension_numbers = #tpu.dot_dimension_numbers<[1], [0], [0], [1], [0, 0, 1, 1], [], []>} : vector<9x9xbf16>, vector<9x16xbf16>, vector<9x16xf32> -> vector<9x16xf32>
    %199 = vector.extract_strided_slice %50 {offsets = [9, 48], sizes = [9, 16], strides = [1, 1]} : vector<18x192xf32> to vector<9x16xf32>
    %200 = vector.extract_strided_slice %50 {offsets = [9, 112], sizes = [9, 16], strides = [1, 1]} : vector<18x192xf32> to vector<9x16xf32>
    %201 = vector.extract_strided_slice %50 {offsets = [9, 176], sizes = [9, 16], strides = [1, 1]} : vector<18x192xf32> to vector<9x16xf32>
    %202 = arith.truncf %199 : vector<9x16xf32> to vector<9x16xbf16>
    %203 = arith.truncf %200 : vector<9x16xf32> to vector<9x16xbf16>
    %cst_64 = arith.constant dense<0.000000e+00> : vector<9x9xf32>
    %204 = tpu.matmul %202, %203, %cst_64 {dimension_numbers = #tpu.dot_dimension_numbers<[1], [1], [0], [0], [0, 0, 1, 0], [], []>} : vector<9x16xbf16>, vector<9x16xbf16>, vector<9x9xf32> -> vector<9x9xf32>
    %cst_65 = arith.constant 2.500000e-01 : f32
    %205 = vector.broadcast %cst_65 : f32 to vector<9x9xf32>
    %206 = arith.mulf %204, %205 : vector<9x9xf32>
    %cst_66 = arith.constant dense<0xFF800000> : vector<9xf32>
    %207 = vector.multi_reduction <maximumf>, %206, %cst_66 [1] : vector<9x9xf32> to vector<9xf32>
    %208 = vector.shape_cast %207 : vector<9xf32> to vector<9x1xf32>
    %209 = vector.broadcast %208 : vector<9x1xf32> to vector<9x9xf32>
    %210 = arith.subf %206, %209 : vector<9x9xf32>
    %211 = math.exp %210 : vector<9x9xf32>
    %cst_67 = arith.constant dense<0.000000e+00> : vector<9xf32>
    %212 = vector.multi_reduction <add>, %211, %cst_67 [1] : vector<9x9xf32> to vector<9xf32>
    %213 = vector.shape_cast %212 : vector<9xf32> to vector<9x1xf32>
    %214 = tpu.reciprocal %213 {approx = true} : vector<9x1xf32> -> vector<9x1xf32>
    %215 = vector.broadcast %214 : vector<9x1xf32> to vector<9x9xf32>
    %216 = arith.mulf %211, %215 : vector<9x9xf32>
    %217 = arith.truncf %216 : vector<9x9xf32> to vector<9x9xbf16>
    %218 = arith.truncf %201 : vector<9x16xf32> to vector<9x16xbf16>
    %cst_68 = arith.constant dense<0.000000e+00> : vector<9x16xf32>
    %219 = tpu.matmul %217, %218, %cst_68 {dimension_numbers = #tpu.dot_dimension_numbers<[1], [0], [0], [1], [0, 0, 1, 1], [], []>} : vector<9x9xbf16>, vector<9x16xbf16>, vector<9x16xf32> -> vector<9x16xf32>
    %220 = tpu.concatenate %156, %177, %198, %219 in 1 : vector<9x16xf32>, vector<9x16xf32>, vector<9x16xf32>, vector<9x16xf32> -> vector<9x64xf32>
    %221 = tpu.concatenate %135, %220 in 0 : vector<9x64xf32>, vector<9x64xf32> -> vector<18x64xf32>
    %c0_69 = arith.constant 0 : index
    %c0_70 = arith.constant 0 : index
    %c0_71 = arith.constant 0 : index
    %222 = vector.load %arg12[%c0_69, %c0_70, %c0_71] : memref<2x64x64xbf16, #tpu.memory_space<vmem>>, vector<1x64x64xbf16>
    %223 = vector.shape_cast %222 : vector<1x64x64xbf16> to vector<64x64xbf16>
    %224 = arith.truncf %221 : vector<18x64xf32> to vector<18x64xbf16>
    %cst_72 = arith.constant dense<0.000000e+00> : vector<18x64xf32>
    %225 = tpu.matmul %224, %223, %cst_72 {dimension_numbers = #tpu.dot_dimension_numbers<[1], [0], [0], [1], [0, 0, 1, 1], [], []>} : vector<18x64xbf16>, vector<64x64xbf16>, vector<18x64xf32> -> vector<18x64xf32>
    %c0_73 = arith.constant 0 : index
    %c0_74 = arith.constant 0 : index
    %c0_75 = arith.constant 0 : index
    %226 = vector.load %arg13[%c0_73, %c0_74, %c0_75] : memref<2x1x64xf32, #tpu.memory_space<vmem>>, vector<1x1x64xf32>
    %227 = vector.shape_cast %226 : vector<1x1x64xf32> to vector<1x64xf32>
    %228 = vector.broadcast %227 : vector<1x64xf32> to vector<18x64xf32>
    %229 = arith.addf %225, %228 : vector<18x64xf32>
    %c0_76 = arith.constant 0 : index
    %c0_77 = arith.constant 0 : index
    %c0_78 = arith.constant 0 : index
    %230 = vector.load %arg14[%c0_76, %c0_77, %c0_78] : memref<2x1x64xf32, #tpu.memory_space<vmem>>, vector<1x1x64xf32>
    %231 = vector.shape_cast %230 : vector<1x1x64xf32> to vector<1x64xf32>
    %232 = vector.broadcast %231 : vector<1x64xf32> to vector<18x64xf32>
    %233 = arith.mulf %232, %229 : vector<18x64xf32>
    %234 = arith.addf %18, %233 : vector<18x64xf32>
    %c0_79 = arith.constant 0 : index
    %c0_80 = arith.constant 0 : index
    %c0_81 = arith.constant 0 : index
    %235 = vector.load %arg15[%c0_79, %c0_80, %c0_81] : memref<2x1x64xf32, #tpu.memory_space<vmem>>, vector<1x1x64xf32>
    %236 = vector.shape_cast %235 : vector<1x1x64xf32> to vector<1x64xf32>
    %c0_82 = arith.constant 0 : index
    %c0_83 = arith.constant 0 : index
    %c0_84 = arith.constant 0 : index
    %237 = vector.load %arg16[%c0_82, %c0_83, %c0_84] : memref<2x1x64xf32, #tpu.memory_space<vmem>>, vector<1x1x64xf32>
    %238 = vector.shape_cast %237 : vector<1x1x64xf32> to vector<1x64xf32>
    %cst_85 = arith.constant dense<0.000000e+00> : vector<18xf32>
    %239 = vector.multi_reduction <add>, %234, %cst_85 [1] : vector<18x64xf32> to vector<18xf32>
    %240 = vector.shape_cast %239 : vector<18xf32> to vector<18x1xf32>
    %cst_86 = arith.constant 6.400000e+01 : f32
    %241 = vector.broadcast %cst_86 : f32 to vector<18x1xf32>
    %242 = arith.divf %240, %241 : vector<18x1xf32>
    %243 = vector.broadcast %242 : vector<18x1xf32> to vector<18x64xf32>
    %244 = arith.subf %234, %243 : vector<18x64xf32>
    %245 = arith.mulf %244, %244 : vector<18x64xf32>
    %cst_87 = arith.constant dense<0.000000e+00> : vector<18xf32>
    %246 = vector.multi_reduction <add>, %245, %cst_87 [1] : vector<18x64xf32> to vector<18xf32>
    %247 = vector.shape_cast %246 : vector<18xf32> to vector<18x1xf32>
    %cst_88 = arith.constant 6.400000e+01 : f32
    %248 = vector.broadcast %cst_88 : f32 to vector<18x1xf32>
    %249 = arith.divf %247, %248 : vector<18x1xf32>
    %cst_89 = arith.constant 9.99999997E-7 : f32
    %250 = vector.broadcast %cst_89 : f32 to vector<18x1xf32>
    %251 = arith.addf %249, %250 : vector<18x1xf32>
    %252 = math.rsqrt %251 : vector<18x1xf32>
    %253 = vector.broadcast %252 : vector<18x1xf32> to vector<18x64xf32>
    %254 = arith.mulf %244, %253 : vector<18x64xf32>
    %255 = vector.broadcast %236 : vector<1x64xf32> to vector<18x64xf32>
    %256 = arith.mulf %254, %255 : vector<18x64xf32>
    %257 = vector.broadcast %238 : vector<1x64xf32> to vector<18x64xf32>
    %258 = arith.addf %256, %257 : vector<18x64xf32>
    %c0_90 = arith.constant 0 : index
    %c0_91 = arith.constant 0 : index
    %c0_92 = arith.constant 0 : index
    %259 = vector.load %arg17[%c0_90, %c0_91, %c0_92] : memref<2x64x256xbf16, #tpu.memory_space<vmem>>, vector<1x64x256xbf16>
    %260 = vector.shape_cast %259 : vector<1x64x256xbf16> to vector<64x256xbf16>
    %261 = arith.truncf %258 : vector<18x64xf32> to vector<18x64xbf16>
    %cst_93 = arith.constant dense<0.000000e+00> : vector<18x256xf32>
    %262 = tpu.matmul %261, %260, %cst_93 {dimension_numbers = #tpu.dot_dimension_numbers<[1], [0], [0], [1], [0, 0, 1, 1], [], []>} : vector<18x64xbf16>, vector<64x256xbf16>, vector<18x256xf32> -> vector<18x256xf32>
    %c0_94 = arith.constant 0 : index
    %c0_95 = arith.constant 0 : index
    %c0_96 = arith.constant 0 : index
    %263 = vector.load %arg18[%c0_94, %c0_95, %c0_96] : memref<2x1x256xf32, #tpu.memory_space<vmem>>, vector<1x1x256xf32>
    %264 = vector.shape_cast %263 : vector<1x1x256xf32> to vector<1x256xf32>
    %265 = vector.broadcast %264 : vector<1x256xf32> to vector<18x256xf32>
    %266 = arith.addf %262, %265 : vector<18x256xf32>
    %267 = arith.mulf %266, %266 : vector<18x256xf32>
    %268 = arith.mulf %266, %267 : vector<18x256xf32>
    %cst_97 = arith.constant 4.471500e-02 : f32
    %269 = vector.broadcast %cst_97 : f32 to vector<18x256xf32>
    %270 = arith.mulf %269, %268 : vector<18x256xf32>
    %271 = arith.addf %266, %270 : vector<18x256xf32>
    %cst_98 = arith.constant 0.797884583 : f32
    %272 = vector.broadcast %cst_98 : f32 to vector<18x256xf32>
    %273 = arith.mulf %272, %271 : vector<18x256xf32>
    %274 = math.tanh %273 : vector<18x256xf32>
    %cst_99 = arith.constant 1.000000e+00 : f32
    %275 = vector.broadcast %cst_99 : f32 to vector<18x256xf32>
    %276 = arith.addf %275, %274 : vector<18x256xf32>
    %cst_100 = arith.constant 5.000000e-01 : f32
    %277 = vector.broadcast %cst_100 : f32 to vector<18x256xf32>
    %278 = arith.mulf %277, %276 : vector<18x256xf32>
    %279 = arith.mulf %266, %278 : vector<18x256xf32>
    %c0_101 = arith.constant 0 : index
    %c0_102 = arith.constant 0 : index
    %c0_103 = arith.constant 0 : index
    %280 = vector.load %arg19[%c0_101, %c0_102, %c0_103] : memref<2x256x64xbf16, #tpu.memory_space<vmem>>, vector<1x256x64xbf16>
    %281 = vector.shape_cast %280 : vector<1x256x64xbf16> to vector<256x64xbf16>
    %282 = arith.truncf %279 : vector<18x256xf32> to vector<18x256xbf16>
    %cst_104 = arith.constant dense<0.000000e+00> : vector<18x64xf32>
    %283 = tpu.matmul %282, %281, %cst_104 {dimension_numbers = #tpu.dot_dimension_numbers<[1], [0], [0], [1], [0, 0, 1, 1], [], []>} : vector<18x256xbf16>, vector<256x64xbf16>, vector<18x64xf32> -> vector<18x64xf32>
    %c0_105 = arith.constant 0 : index
    %c0_106 = arith.constant 0 : index
    %c0_107 = arith.constant 0 : index
    %284 = vector.load %arg20[%c0_105, %c0_106, %c0_107] : memref<2x1x64xf32, #tpu.memory_space<vmem>>, vector<1x1x64xf32>
    %285 = vector.shape_cast %284 : vector<1x1x64xf32> to vector<1x64xf32>
    %286 = vector.broadcast %285 : vector<1x64xf32> to vector<18x64xf32>
    %287 = arith.addf %283, %286 : vector<18x64xf32>
    %c0_108 = arith.constant 0 : index
    %c0_109 = arith.constant 0 : index
    %c0_110 = arith.constant 0 : index
    %288 = vector.load %arg21[%c0_108, %c0_109, %c0_110] : memref<2x1x64xf32, #tpu.memory_space<vmem>>, vector<1x1x64xf32>
    %289 = vector.shape_cast %288 : vector<1x1x64xf32> to vector<1x64xf32>
    %290 = vector.broadcast %289 : vector<1x64xf32> to vector<18x64xf32>
    %291 = arith.mulf %290, %287 : vector<18x64xf32>
    %292 = arith.addf %234, %291 : vector<18x64xf32>
    %c1 = arith.constant 1 : index
    %c0_111 = arith.constant 0 : index
    %c0_112 = arith.constant 0 : index
    %293 = vector.load %arg8[%c1, %c0_111, %c0_112] : memref<2x1x64xf32, #tpu.memory_space<vmem>>, vector<1x1x64xf32>
    %294 = vector.shape_cast %293 : vector<1x1x64xf32> to vector<1x64xf32>
    %c1_113 = arith.constant 1 : index
    %c0_114 = arith.constant 0 : index
    %c0_115 = arith.constant 0 : index
    %295 = vector.load %arg9[%c1_113, %c0_114, %c0_115] : memref<2x1x64xf32, #tpu.memory_space<vmem>>, vector<1x1x64xf32>
    %296 = vector.shape_cast %295 : vector<1x1x64xf32> to vector<1x64xf32>
    %cst_116 = arith.constant dense<0.000000e+00> : vector<18xf32>
    %297 = vector.multi_reduction <add>, %292, %cst_116 [1] : vector<18x64xf32> to vector<18xf32>
    %298 = vector.shape_cast %297 : vector<18xf32> to vector<18x1xf32>
    %cst_117 = arith.constant 6.400000e+01 : f32
    %299 = vector.broadcast %cst_117 : f32 to vector<18x1xf32>
    %300 = arith.divf %298, %299 : vector<18x1xf32>
    %301 = vector.broadcast %300 : vector<18x1xf32> to vector<18x64xf32>
    %302 = arith.subf %292, %301 : vector<18x64xf32>
    %303 = arith.mulf %302, %302 : vector<18x64xf32>
    %cst_118 = arith.constant dense<0.000000e+00> : vector<18xf32>
    %304 = vector.multi_reduction <add>, %303, %cst_118 [1] : vector<18x64xf32> to vector<18xf32>
    %305 = vector.shape_cast %304 : vector<18xf32> to vector<18x1xf32>
    %cst_119 = arith.constant 6.400000e+01 : f32
    %306 = vector.broadcast %cst_119 : f32 to vector<18x1xf32>
    %307 = arith.divf %305, %306 : vector<18x1xf32>
    %cst_120 = arith.constant 9.99999997E-7 : f32
    %308 = vector.broadcast %cst_120 : f32 to vector<18x1xf32>
    %309 = arith.addf %307, %308 : vector<18x1xf32>
    %310 = math.rsqrt %309 : vector<18x1xf32>
    %311 = vector.broadcast %310 : vector<18x1xf32> to vector<18x64xf32>
    %312 = arith.mulf %302, %311 : vector<18x64xf32>
    %313 = vector.broadcast %294 : vector<1x64xf32> to vector<18x64xf32>
    %314 = arith.mulf %312, %313 : vector<18x64xf32>
    %315 = vector.broadcast %296 : vector<1x64xf32> to vector<18x64xf32>
    %316 = arith.addf %314, %315 : vector<18x64xf32>
    %c1_121 = arith.constant 1 : index
    %c0_122 = arith.constant 0 : index
    %c0_123 = arith.constant 0 : index
    %317 = vector.load %arg10[%c1_121, %c0_122, %c0_123] : memref<2x64x192xbf16, #tpu.memory_space<vmem>>, vector<1x64x192xbf16>
    %318 = vector.shape_cast %317 : vector<1x64x192xbf16> to vector<64x192xbf16>
    %319 = arith.truncf %316 : vector<18x64xf32> to vector<18x64xbf16>
    %cst_124 = arith.constant dense<0.000000e+00> : vector<18x192xf32>
    %320 = tpu.matmul %319, %318, %cst_124 {dimension_numbers = #tpu.dot_dimension_numbers<[1], [0], [0], [1], [0, 0, 1, 1], [], []>} : vector<18x64xbf16>, vector<64x192xbf16>, vector<18x192xf32> -> vector<18x192xf32>
    %c1_125 = arith.constant 1 : index
    %c0_126 = arith.constant 0 : index
    %c0_127 = arith.constant 0 : index
    %321 = vector.load %arg11[%c1_125, %c0_126, %c0_127] : memref<2x1x192xf32, #tpu.memory_space<vmem>>, vector<1x1x192xf32>
    %322 = vector.shape_cast %321 : vector<1x1x192xf32> to vector<1x192xf32>
    %323 = vector.broadcast %322 : vector<1x192xf32> to vector<18x192xf32>
    %324 = arith.addf %320, %323 : vector<18x192xf32>
    %325 = vector.extract_strided_slice %324 {offsets = [0, 0], sizes = [9, 16], strides = [1, 1]} : vector<18x192xf32> to vector<9x16xf32>
    %326 = vector.extract_strided_slice %324 {offsets = [0, 64], sizes = [9, 16], strides = [1, 1]} : vector<18x192xf32> to vector<9x16xf32>
    %327 = vector.extract_strided_slice %324 {offsets = [0, 128], sizes = [9, 16], strides = [1, 1]} : vector<18x192xf32> to vector<9x16xf32>
    %328 = arith.truncf %325 : vector<9x16xf32> to vector<9x16xbf16>
    %329 = arith.truncf %326 : vector<9x16xf32> to vector<9x16xbf16>
    %cst_128 = arith.constant dense<0.000000e+00> : vector<9x9xf32>
    %330 = tpu.matmul %328, %329, %cst_128 {dimension_numbers = #tpu.dot_dimension_numbers<[1], [1], [0], [0], [0, 0, 1, 0], [], []>} : vector<9x16xbf16>, vector<9x16xbf16>, vector<9x9xf32> -> vector<9x9xf32>
    %cst_129 = arith.constant 2.500000e-01 : f32
    %331 = vector.broadcast %cst_129 : f32 to vector<9x9xf32>
    %332 = arith.mulf %330, %331 : vector<9x9xf32>
    %cst_130 = arith.constant dense<0xFF800000> : vector<9xf32>
    %333 = vector.multi_reduction <maximumf>, %332, %cst_130 [1] : vector<9x9xf32> to vector<9xf32>
    %334 = vector.shape_cast %333 : vector<9xf32> to vector<9x1xf32>
    %335 = vector.broadcast %334 : vector<9x1xf32> to vector<9x9xf32>
    %336 = arith.subf %332, %335 : vector<9x9xf32>
    %337 = math.exp %336 : vector<9x9xf32>
    %cst_131 = arith.constant dense<0.000000e+00> : vector<9xf32>
    %338 = vector.multi_reduction <add>, %337, %cst_131 [1] : vector<9x9xf32> to vector<9xf32>
    %339 = vector.shape_cast %338 : vector<9xf32> to vector<9x1xf32>
    %340 = tpu.reciprocal %339 {approx = true} : vector<9x1xf32> -> vector<9x1xf32>
    %341 = vector.broadcast %340 : vector<9x1xf32> to vector<9x9xf32>
    %342 = arith.mulf %337, %341 : vector<9x9xf32>
    %343 = arith.truncf %342 : vector<9x9xf32> to vector<9x9xbf16>
    %344 = arith.truncf %327 : vector<9x16xf32> to vector<9x16xbf16>
    %cst_132 = arith.constant dense<0.000000e+00> : vector<9x16xf32>
    %345 = tpu.matmul %343, %344, %cst_132 {dimension_numbers = #tpu.dot_dimension_numbers<[1], [0], [0], [1], [0, 0, 1, 1], [], []>} : vector<9x9xbf16>, vector<9x16xbf16>, vector<9x16xf32> -> vector<9x16xf32>
    %346 = vector.extract_strided_slice %324 {offsets = [0, 16], sizes = [9, 16], strides = [1, 1]} : vector<18x192xf32> to vector<9x16xf32>
    %347 = vector.extract_strided_slice %324 {offsets = [0, 80], sizes = [9, 16], strides = [1, 1]} : vector<18x192xf32> to vector<9x16xf32>
    %348 = vector.extract_strided_slice %324 {offsets = [0, 144], sizes = [9, 16], strides = [1, 1]} : vector<18x192xf32> to vector<9x16xf32>
    %349 = arith.truncf %346 : vector<9x16xf32> to vector<9x16xbf16>
    %350 = arith.truncf %347 : vector<9x16xf32> to vector<9x16xbf16>
    %cst_133 = arith.constant dense<0.000000e+00> : vector<9x9xf32>
    %351 = tpu.matmul %349, %350, %cst_133 {dimension_numbers = #tpu.dot_dimension_numbers<[1], [1], [0], [0], [0, 0, 1, 0], [], []>} : vector<9x16xbf16>, vector<9x16xbf16>, vector<9x9xf32> -> vector<9x9xf32>
    %cst_134 = arith.constant 2.500000e-01 : f32
    %352 = vector.broadcast %cst_134 : f32 to vector<9x9xf32>
    %353 = arith.mulf %351, %352 : vector<9x9xf32>
    %cst_135 = arith.constant dense<0xFF800000> : vector<9xf32>
    %354 = vector.multi_reduction <maximumf>, %353, %cst_135 [1] : vector<9x9xf32> to vector<9xf32>
    %355 = vector.shape_cast %354 : vector<9xf32> to vector<9x1xf32>
    %356 = vector.broadcast %355 : vector<9x1xf32> to vector<9x9xf32>
    %357 = arith.subf %353, %356 : vector<9x9xf32>
    %358 = math.exp %357 : vector<9x9xf32>
    %cst_136 = arith.constant dense<0.000000e+00> : vector<9xf32>
    %359 = vector.multi_reduction <add>, %358, %cst_136 [1] : vector<9x9xf32> to vector<9xf32>
    %360 = vector.shape_cast %359 : vector<9xf32> to vector<9x1xf32>
    %361 = tpu.reciprocal %360 {approx = true} : vector<9x1xf32> -> vector<9x1xf32>
    %362 = vector.broadcast %361 : vector<9x1xf32> to vector<9x9xf32>
    %363 = arith.mulf %358, %362 : vector<9x9xf32>
    %364 = arith.truncf %363 : vector<9x9xf32> to vector<9x9xbf16>
    %365 = arith.truncf %348 : vector<9x16xf32> to vector<9x16xbf16>
    %cst_137 = arith.constant dense<0.000000e+00> : vector<9x16xf32>
    %366 = tpu.matmul %364, %365, %cst_137 {dimension_numbers = #tpu.dot_dimension_numbers<[1], [0], [0], [1], [0, 0, 1, 1], [], []>} : vector<9x9xbf16>, vector<9x16xbf16>, vector<9x16xf32> -> vector<9x16xf32>
    %367 = vector.extract_strided_slice %324 {offsets = [0, 32], sizes = [9, 16], strides = [1, 1]} : vector<18x192xf32> to vector<9x16xf32>
    %368 = vector.extract_strided_slice %324 {offsets = [0, 96], sizes = [9, 16], strides = [1, 1]} : vector<18x192xf32> to vector<9x16xf32>
    %369 = vector.extract_strided_slice %324 {offsets = [0, 160], sizes = [9, 16], strides = [1, 1]} : vector<18x192xf32> to vector<9x16xf32>
    %370 = arith.truncf %367 : vector<9x16xf32> to vector<9x16xbf16>
    %371 = arith.truncf %368 : vector<9x16xf32> to vector<9x16xbf16>
    %cst_138 = arith.constant dense<0.000000e+00> : vector<9x9xf32>
    %372 = tpu.matmul %370, %371, %cst_138 {dimension_numbers = #tpu.dot_dimension_numbers<[1], [1], [0], [0], [0, 0, 1, 0], [], []>} : vector<9x16xbf16>, vector<9x16xbf16>, vector<9x9xf32> -> vector<9x9xf32>
    %cst_139 = arith.constant 2.500000e-01 : f32
    %373 = vector.broadcast %cst_139 : f32 to vector<9x9xf32>
    %374 = arith.mulf %372, %373 : vector<9x9xf32>
    %cst_140 = arith.constant dense<0xFF800000> : vector<9xf32>
    %375 = vector.multi_reduction <maximumf>, %374, %cst_140 [1] : vector<9x9xf32> to vector<9xf32>
    %376 = vector.shape_cast %375 : vector<9xf32> to vector<9x1xf32>
    %377 = vector.broadcast %376 : vector<9x1xf32> to vector<9x9xf32>
    %378 = arith.subf %374, %377 : vector<9x9xf32>
    %379 = math.exp %378 : vector<9x9xf32>
    %cst_141 = arith.constant dense<0.000000e+00> : vector<9xf32>
    %380 = vector.multi_reduction <add>, %379, %cst_141 [1] : vector<9x9xf32> to vector<9xf32>
    %381 = vector.shape_cast %380 : vector<9xf32> to vector<9x1xf32>
    %382 = tpu.reciprocal %381 {approx = true} : vector<9x1xf32> -> vector<9x1xf32>
    %383 = vector.broadcast %382 : vector<9x1xf32> to vector<9x9xf32>
    %384 = arith.mulf %379, %383 : vector<9x9xf32>
    %385 = arith.truncf %384 : vector<9x9xf32> to vector<9x9xbf16>
    %386 = arith.truncf %369 : vector<9x16xf32> to vector<9x16xbf16>
    %cst_142 = arith.constant dense<0.000000e+00> : vector<9x16xf32>
    %387 = tpu.matmul %385, %386, %cst_142 {dimension_numbers = #tpu.dot_dimension_numbers<[1], [0], [0], [1], [0, 0, 1, 1], [], []>} : vector<9x9xbf16>, vector<9x16xbf16>, vector<9x16xf32> -> vector<9x16xf32>
    %388 = vector.extract_strided_slice %324 {offsets = [0, 48], sizes = [9, 16], strides = [1, 1]} : vector<18x192xf32> to vector<9x16xf32>
    %389 = vector.extract_strided_slice %324 {offsets = [0, 112], sizes = [9, 16], strides = [1, 1]} : vector<18x192xf32> to vector<9x16xf32>
    %390 = vector.extract_strided_slice %324 {offsets = [0, 176], sizes = [9, 16], strides = [1, 1]} : vector<18x192xf32> to vector<9x16xf32>
    %391 = arith.truncf %388 : vector<9x16xf32> to vector<9x16xbf16>
    %392 = arith.truncf %389 : vector<9x16xf32> to vector<9x16xbf16>
    %cst_143 = arith.constant dense<0.000000e+00> : vector<9x9xf32>
    %393 = tpu.matmul %391, %392, %cst_143 {dimension_numbers = #tpu.dot_dimension_numbers<[1], [1], [0], [0], [0, 0, 1, 0], [], []>} : vector<9x16xbf16>, vector<9x16xbf16>, vector<9x9xf32> -> vector<9x9xf32>
    %cst_144 = arith.constant 2.500000e-01 : f32
    %394 = vector.broadcast %cst_144 : f32 to vector<9x9xf32>
    %395 = arith.mulf %393, %394 : vector<9x9xf32>
    %cst_145 = arith.constant dense<0xFF800000> : vector<9xf32>
    %396 = vector.multi_reduction <maximumf>, %395, %cst_145 [1] : vector<9x9xf32> to vector<9xf32>
    %397 = vector.shape_cast %396 : vector<9xf32> to vector<9x1xf32>
    %398 = vector.broadcast %397 : vector<9x1xf32> to vector<9x9xf32>
    %399 = arith.subf %395, %398 : vector<9x9xf32>
    %400 = math.exp %399 : vector<9x9xf32>
    %cst_146 = arith.constant dense<0.000000e+00> : vector<9xf32>
    %401 = vector.multi_reduction <add>, %400, %cst_146 [1] : vector<9x9xf32> to vector<9xf32>
    %402 = vector.shape_cast %401 : vector<9xf32> to vector<9x1xf32>
    %403 = tpu.reciprocal %402 {approx = true} : vector<9x1xf32> -> vector<9x1xf32>
    %404 = vector.broadcast %403 : vector<9x1xf32> to vector<9x9xf32>
    %405 = arith.mulf %400, %404 : vector<9x9xf32>
    %406 = arith.truncf %405 : vector<9x9xf32> to vector<9x9xbf16>
    %407 = arith.truncf %390 : vector<9x16xf32> to vector<9x16xbf16>
    %cst_147 = arith.constant dense<0.000000e+00> : vector<9x16xf32>
    %408 = tpu.matmul %406, %407, %cst_147 {dimension_numbers = #tpu.dot_dimension_numbers<[1], [0], [0], [1], [0, 0, 1, 1], [], []>} : vector<9x9xbf16>, vector<9x16xbf16>, vector<9x16xf32> -> vector<9x16xf32>
    %409 = tpu.concatenate %345, %366, %387, %408 in 1 : vector<9x16xf32>, vector<9x16xf32>, vector<9x16xf32>, vector<9x16xf32> -> vector<9x64xf32>
    %410 = vector.extract_strided_slice %324 {offsets = [9, 0], sizes = [9, 16], strides = [1, 1]} : vector<18x192xf32> to vector<9x16xf32>
    %411 = vector.extract_strided_slice %324 {offsets = [9, 64], sizes = [9, 16], strides = [1, 1]} : vector<18x192xf32> to vector<9x16xf32>
    %412 = vector.extract_strided_slice %324 {offsets = [9, 128], sizes = [9, 16], strides = [1, 1]} : vector<18x192xf32> to vector<9x16xf32>
    %413 = arith.truncf %410 : vector<9x16xf32> to vector<9x16xbf16>
    %414 = arith.truncf %411 : vector<9x16xf32> to vector<9x16xbf16>
    %cst_148 = arith.constant dense<0.000000e+00> : vector<9x9xf32>
    %415 = tpu.matmul %413, %414, %cst_148 {dimension_numbers = #tpu.dot_dimension_numbers<[1], [1], [0], [0], [0, 0, 1, 0], [], []>} : vector<9x16xbf16>, vector<9x16xbf16>, vector<9x9xf32> -> vector<9x9xf32>
    %cst_149 = arith.constant 2.500000e-01 : f32
    %416 = vector.broadcast %cst_149 : f32 to vector<9x9xf32>
    %417 = arith.mulf %415, %416 : vector<9x9xf32>
    %cst_150 = arith.constant dense<0xFF800000> : vector<9xf32>
    %418 = vector.multi_reduction <maximumf>, %417, %cst_150 [1] : vector<9x9xf32> to vector<9xf32>
    %419 = vector.shape_cast %418 : vector<9xf32> to vector<9x1xf32>
    %420 = vector.broadcast %419 : vector<9x1xf32> to vector<9x9xf32>
    %421 = arith.subf %417, %420 : vector<9x9xf32>
    %422 = math.exp %421 : vector<9x9xf32>
    %cst_151 = arith.constant dense<0.000000e+00> : vector<9xf32>
    %423 = vector.multi_reduction <add>, %422, %cst_151 [1] : vector<9x9xf32> to vector<9xf32>
    %424 = vector.shape_cast %423 : vector<9xf32> to vector<9x1xf32>
    %425 = tpu.reciprocal %424 {approx = true} : vector<9x1xf32> -> vector<9x1xf32>
    %426 = vector.broadcast %425 : vector<9x1xf32> to vector<9x9xf32>
    %427 = arith.mulf %422, %426 : vector<9x9xf32>
    %428 = arith.truncf %427 : vector<9x9xf32> to vector<9x9xbf16>
    %429 = arith.truncf %412 : vector<9x16xf32> to vector<9x16xbf16>
    %cst_152 = arith.constant dense<0.000000e+00> : vector<9x16xf32>
    %430 = tpu.matmul %428, %429, %cst_152 {dimension_numbers = #tpu.dot_dimension_numbers<[1], [0], [0], [1], [0, 0, 1, 1], [], []>} : vector<9x9xbf16>, vector<9x16xbf16>, vector<9x16xf32> -> vector<9x16xf32>
    %431 = vector.extract_strided_slice %324 {offsets = [9, 16], sizes = [9, 16], strides = [1, 1]} : vector<18x192xf32> to vector<9x16xf32>
    %432 = vector.extract_strided_slice %324 {offsets = [9, 80], sizes = [9, 16], strides = [1, 1]} : vector<18x192xf32> to vector<9x16xf32>
    %433 = vector.extract_strided_slice %324 {offsets = [9, 144], sizes = [9, 16], strides = [1, 1]} : vector<18x192xf32> to vector<9x16xf32>
    %434 = arith.truncf %431 : vector<9x16xf32> to vector<9x16xbf16>
    %435 = arith.truncf %432 : vector<9x16xf32> to vector<9x16xbf16>
    %cst_153 = arith.constant dense<0.000000e+00> : vector<9x9xf32>
    %436 = tpu.matmul %434, %435, %cst_153 {dimension_numbers = #tpu.dot_dimension_numbers<[1], [1], [0], [0], [0, 0, 1, 0], [], []>} : vector<9x16xbf16>, vector<9x16xbf16>, vector<9x9xf32> -> vector<9x9xf32>
    %cst_154 = arith.constant 2.500000e-01 : f32
    %437 = vector.broadcast %cst_154 : f32 to vector<9x9xf32>
    %438 = arith.mulf %436, %437 : vector<9x9xf32>
    %cst_155 = arith.constant dense<0xFF800000> : vector<9xf32>
    %439 = vector.multi_reduction <maximumf>, %438, %cst_155 [1] : vector<9x9xf32> to vector<9xf32>
    %440 = vector.shape_cast %439 : vector<9xf32> to vector<9x1xf32>
    %441 = vector.broadcast %440 : vector<9x1xf32> to vector<9x9xf32>
    %442 = arith.subf %438, %441 : vector<9x9xf32>
    %443 = math.exp %442 : vector<9x9xf32>
    %cst_156 = arith.constant dense<0.000000e+00> : vector<9xf32>
    %444 = vector.multi_reduction <add>, %443, %cst_156 [1] : vector<9x9xf32> to vector<9xf32>
    %445 = vector.shape_cast %444 : vector<9xf32> to vector<9x1xf32>
    %446 = tpu.reciprocal %445 {approx = true} : vector<9x1xf32> -> vector<9x1xf32>
    %447 = vector.broadcast %446 : vector<9x1xf32> to vector<9x9xf32>
    %448 = arith.mulf %443, %447 : vector<9x9xf32>
    %449 = arith.truncf %448 : vector<9x9xf32> to vector<9x9xbf16>
    %450 = arith.truncf %433 : vector<9x16xf32> to vector<9x16xbf16>
    %cst_157 = arith.constant dense<0.000000e+00> : vector<9x16xf32>
    %451 = tpu.matmul %449, %450, %cst_157 {dimension_numbers = #tpu.dot_dimension_numbers<[1], [0], [0], [1], [0, 0, 1, 1], [], []>} : vector<9x9xbf16>, vector<9x16xbf16>, vector<9x16xf32> -> vector<9x16xf32>
    %452 = vector.extract_strided_slice %324 {offsets = [9, 32], sizes = [9, 16], strides = [1, 1]} : vector<18x192xf32> to vector<9x16xf32>
    %453 = vector.extract_strided_slice %324 {offsets = [9, 96], sizes = [9, 16], strides = [1, 1]} : vector<18x192xf32> to vector<9x16xf32>
    %454 = vector.extract_strided_slice %324 {offsets = [9, 160], sizes = [9, 16], strides = [1, 1]} : vector<18x192xf32> to vector<9x16xf32>
    %455 = arith.truncf %452 : vector<9x16xf32> to vector<9x16xbf16>
    %456 = arith.truncf %453 : vector<9x16xf32> to vector<9x16xbf16>
    %cst_158 = arith.constant dense<0.000000e+00> : vector<9x9xf32>
    %457 = tpu.matmul %455, %456, %cst_158 {dimension_numbers = #tpu.dot_dimension_numbers<[1], [1], [0], [0], [0, 0, 1, 0], [], []>} : vector<9x16xbf16>, vector<9x16xbf16>, vector<9x9xf32> -> vector<9x9xf32>
    %cst_159 = arith.constant 2.500000e-01 : f32
    %458 = vector.broadcast %cst_159 : f32 to vector<9x9xf32>
    %459 = arith.mulf %457, %458 : vector<9x9xf32>
    %cst_160 = arith.constant dense<0xFF800000> : vector<9xf32>
    %460 = vector.multi_reduction <maximumf>, %459, %cst_160 [1] : vector<9x9xf32> to vector<9xf32>
    %461 = vector.shape_cast %460 : vector<9xf32> to vector<9x1xf32>
    %462 = vector.broadcast %461 : vector<9x1xf32> to vector<9x9xf32>
    %463 = arith.subf %459, %462 : vector<9x9xf32>
    %464 = math.exp %463 : vector<9x9xf32>
    %cst_161 = arith.constant dense<0.000000e+00> : vector<9xf32>
    %465 = vector.multi_reduction <add>, %464, %cst_161 [1] : vector<9x9xf32> to vector<9xf32>
    %466 = vector.shape_cast %465 : vector<9xf32> to vector<9x1xf32>
    %467 = tpu.reciprocal %466 {approx = true} : vector<9x1xf32> -> vector<9x1xf32>
    %468 = vector.broadcast %467 : vector<9x1xf32> to vector<9x9xf32>
    %469 = arith.mulf %464, %468 : vector<9x9xf32>
    %470 = arith.truncf %469 : vector<9x9xf32> to vector<9x9xbf16>
    %471 = arith.truncf %454 : vector<9x16xf32> to vector<9x16xbf16>
    %cst_162 = arith.constant dense<0.000000e+00> : vector<9x16xf32>
    %472 = tpu.matmul %470, %471, %cst_162 {dimension_numbers = #tpu.dot_dimension_numbers<[1], [0], [0], [1], [0, 0, 1, 1], [], []>} : vector<9x9xbf16>, vector<9x16xbf16>, vector<9x16xf32> -> vector<9x16xf32>
    %473 = vector.extract_strided_slice %324 {offsets = [9, 48], sizes = [9, 16], strides = [1, 1]} : vector<18x192xf32> to vector<9x16xf32>
    %474 = vector.extract_strided_slice %324 {offsets = [9, 112], sizes = [9, 16], strides = [1, 1]} : vector<18x192xf32> to vector<9x16xf32>
    %475 = vector.extract_strided_slice %324 {offsets = [9, 176], sizes = [9, 16], strides = [1, 1]} : vector<18x192xf32> to vector<9x16xf32>
    %476 = arith.truncf %473 : vector<9x16xf32> to vector<9x16xbf16>
    %477 = arith.truncf %474 : vector<9x16xf32> to vector<9x16xbf16>
    %cst_163 = arith.constant dense<0.000000e+00> : vector<9x9xf32>
    %478 = tpu.matmul %476, %477, %cst_163 {dimension_numbers = #tpu.dot_dimension_numbers<[1], [1], [0], [0], [0, 0, 1, 0], [], []>} : vector<9x16xbf16>, vector<9x16xbf16>, vector<9x9xf32> -> vector<9x9xf32>
    %cst_164 = arith.constant 2.500000e-01 : f32
    %479 = vector.broadcast %cst_164 : f32 to vector<9x9xf32>
    %480 = arith.mulf %478, %479 : vector<9x9xf32>
    %cst_165 = arith.constant dense<0xFF800000> : vector<9xf32>
    %481 = vector.multi_reduction <maximumf>, %480, %cst_165 [1] : vector<9x9xf32> to vector<9xf32>
    %482 = vector.shape_cast %481 : vector<9xf32> to vector<9x1xf32>
    %483 = vector.broadcast %482 : vector<9x1xf32> to vector<9x9xf32>
    %484 = arith.subf %480, %483 : vector<9x9xf32>
    %485 = math.exp %484 : vector<9x9xf32>
    %cst_166 = arith.constant dense<0.000000e+00> : vector<9xf32>
    %486 = vector.multi_reduction <add>, %485, %cst_166 [1] : vector<9x9xf32> to vector<9xf32>
    %487 = vector.shape_cast %486 : vector<9xf32> to vector<9x1xf32>
    %488 = tpu.reciprocal %487 {approx = true} : vector<9x1xf32> -> vector<9x1xf32>
    %489 = vector.broadcast %488 : vector<9x1xf32> to vector<9x9xf32>
    %490 = arith.mulf %485, %489 : vector<9x9xf32>
    %491 = arith.truncf %490 : vector<9x9xf32> to vector<9x9xbf16>
    %492 = arith.truncf %475 : vector<9x16xf32> to vector<9x16xbf16>
    %cst_167 = arith.constant dense<0.000000e+00> : vector<9x16xf32>
    %493 = tpu.matmul %491, %492, %cst_167 {dimension_numbers = #tpu.dot_dimension_numbers<[1], [0], [0], [1], [0, 0, 1, 1], [], []>} : vector<9x9xbf16>, vector<9x16xbf16>, vector<9x16xf32> -> vector<9x16xf32>
    %494 = tpu.concatenate %430, %451, %472, %493 in 1 : vector<9x16xf32>, vector<9x16xf32>, vector<9x16xf32>, vector<9x16xf32> -> vector<9x64xf32>
    %495 = tpu.concatenate %409, %494 in 0 : vector<9x64xf32>, vector<9x64xf32> -> vector<18x64xf32>
    %c1_168 = arith.constant 1 : index
    %c0_169 = arith.constant 0 : index
    %c0_170 = arith.constant 0 : index
    %496 = vector.load %arg12[%c1_168, %c0_169, %c0_170] : memref<2x64x64xbf16, #tpu.memory_space<vmem>>, vector<1x64x64xbf16>
    %497 = vector.shape_cast %496 : vector<1x64x64xbf16> to vector<64x64xbf16>
    %498 = arith.truncf %495 : vector<18x64xf32> to vector<18x64xbf16>
    %cst_171 = arith.constant dense<0.000000e+00> : vector<18x64xf32>
    %499 = tpu.matmul %498, %497, %cst_171 {dimension_numbers = #tpu.dot_dimension_numbers<[1], [0], [0], [1], [0, 0, 1, 1], [], []>} : vector<18x64xbf16>, vector<64x64xbf16>, vector<18x64xf32> -> vector<18x64xf32>
    %c1_172 = arith.constant 1 : index
    %c0_173 = arith.constant 0 : index
    %c0_174 = arith.constant 0 : index
    %500 = vector.load %arg13[%c1_172, %c0_173, %c0_174] : memref<2x1x64xf32, #tpu.memory_space<vmem>>, vector<1x1x64xf32>
    %501 = vector.shape_cast %500 : vector<1x1x64xf32> to vector<1x64xf32>
    %502 = vector.broadcast %501 : vector<1x64xf32> to vector<18x64xf32>
    %503 = arith.addf %499, %502 : vector<18x64xf32>
    %c1_175 = arith.constant 1 : index
    %c0_176 = arith.constant 0 : index
    %c0_177 = arith.constant 0 : index
    %504 = vector.load %arg14[%c1_175, %c0_176, %c0_177] : memref<2x1x64xf32, #tpu.memory_space<vmem>>, vector<1x1x64xf32>
    %505 = vector.shape_cast %504 : vector<1x1x64xf32> to vector<1x64xf32>
    %506 = vector.broadcast %505 : vector<1x64xf32> to vector<18x64xf32>
    %507 = arith.mulf %506, %503 : vector<18x64xf32>
    %508 = arith.addf %292, %507 : vector<18x64xf32>
    %c1_178 = arith.constant 1 : index
    %c0_179 = arith.constant 0 : index
    %c0_180 = arith.constant 0 : index
    %509 = vector.load %arg15[%c1_178, %c0_179, %c0_180] : memref<2x1x64xf32, #tpu.memory_space<vmem>>, vector<1x1x64xf32>
    %510 = vector.shape_cast %509 : vector<1x1x64xf32> to vector<1x64xf32>
    %c1_181 = arith.constant 1 : index
    %c0_182 = arith.constant 0 : index
    %c0_183 = arith.constant 0 : index
    %511 = vector.load %arg16[%c1_181, %c0_182, %c0_183] : memref<2x1x64xf32, #tpu.memory_space<vmem>>, vector<1x1x64xf32>
    %512 = vector.shape_cast %511 : vector<1x1x64xf32> to vector<1x64xf32>
    %cst_184 = arith.constant dense<0.000000e+00> : vector<18xf32>
    %513 = vector.multi_reduction <add>, %508, %cst_184 [1] : vector<18x64xf32> to vector<18xf32>
    %514 = vector.shape_cast %513 : vector<18xf32> to vector<18x1xf32>
    %cst_185 = arith.constant 6.400000e+01 : f32
    %515 = vector.broadcast %cst_185 : f32 to vector<18x1xf32>
    %516 = arith.divf %514, %515 : vector<18x1xf32>
    %517 = vector.broadcast %516 : vector<18x1xf32> to vector<18x64xf32>
    %518 = arith.subf %508, %517 : vector<18x64xf32>
    %519 = arith.mulf %518, %518 : vector<18x64xf32>
    %cst_186 = arith.constant dense<0.000000e+00> : vector<18xf32>
    %520 = vector.multi_reduction <add>, %519, %cst_186 [1] : vector<18x64xf32> to vector<18xf32>
    %521 = vector.shape_cast %520 : vector<18xf32> to vector<18x1xf32>
    %cst_187 = arith.constant 6.400000e+01 : f32
    %522 = vector.broadcast %cst_187 : f32 to vector<18x1xf32>
    %523 = arith.divf %521, %522 : vector<18x1xf32>
    %cst_188 = arith.constant 9.99999997E-7 : f32
    %524 = vector.broadcast %cst_188 : f32 to vector<18x1xf32>
    %525 = arith.addf %523, %524 : vector<18x1xf32>
    %526 = math.rsqrt %525 : vector<18x1xf32>
    %527 = vector.broadcast %526 : vector<18x1xf32> to vector<18x64xf32>
    %528 = arith.mulf %518, %527 : vector<18x64xf32>
    %529 = vector.broadcast %510 : vector<1x64xf32> to vector<18x64xf32>
    %530 = arith.mulf %528, %529 : vector<18x64xf32>
    %531 = vector.broadcast %512 : vector<1x64xf32> to vector<18x64xf32>
    %532 = arith.addf %530, %531 : vector<18x64xf32>
    %c1_189 = arith.constant 1 : index
    %c0_190 = arith.constant 0 : index
    %c0_191 = arith.constant 0 : index
    %533 = vector.load %arg17[%c1_189, %c0_190, %c0_191] : memref<2x64x256xbf16, #tpu.memory_space<vmem>>, vector<1x64x256xbf16>
    %534 = vector.shape_cast %533 : vector<1x64x256xbf16> to vector<64x256xbf16>
    %535 = arith.truncf %532 : vector<18x64xf32> to vector<18x64xbf16>
    %cst_192 = arith.constant dense<0.000000e+00> : vector<18x256xf32>
    %536 = tpu.matmul %535, %534, %cst_192 {dimension_numbers = #tpu.dot_dimension_numbers<[1], [0], [0], [1], [0, 0, 1, 1], [], []>} : vector<18x64xbf16>, vector<64x256xbf16>, vector<18x256xf32> -> vector<18x256xf32>
    %c1_193 = arith.constant 1 : index
    %c0_194 = arith.constant 0 : index
    %c0_195 = arith.constant 0 : index
    %537 = vector.load %arg18[%c1_193, %c0_194, %c0_195] : memref<2x1x256xf32, #tpu.memory_space<vmem>>, vector<1x1x256xf32>
    %538 = vector.shape_cast %537 : vector<1x1x256xf32> to vector<1x256xf32>
    %539 = vector.broadcast %538 : vector<1x256xf32> to vector<18x256xf32>
    %540 = arith.addf %536, %539 : vector<18x256xf32>
    %541 = arith.mulf %540, %540 : vector<18x256xf32>
    %542 = arith.mulf %540, %541 : vector<18x256xf32>
    %cst_196 = arith.constant 4.471500e-02 : f32
    %543 = vector.broadcast %cst_196 : f32 to vector<18x256xf32>
    %544 = arith.mulf %543, %542 : vector<18x256xf32>
    %545 = arith.addf %540, %544 : vector<18x256xf32>
    %cst_197 = arith.constant 0.797884583 : f32
    %546 = vector.broadcast %cst_197 : f32 to vector<18x256xf32>
    %547 = arith.mulf %546, %545 : vector<18x256xf32>
    %548 = math.tanh %547 : vector<18x256xf32>
    %cst_198 = arith.constant 1.000000e+00 : f32
    %549 = vector.broadcast %cst_198 : f32 to vector<18x256xf32>
    %550 = arith.addf %549, %548 : vector<18x256xf32>
    %cst_199 = arith.constant 5.000000e-01 : f32
    %551 = vector.broadcast %cst_199 : f32 to vector<18x256xf32>
    %552 = arith.mulf %551, %550 : vector<18x256xf32>
    %553 = arith.mulf %540, %552 : vector<18x256xf32>
    %c1_200 = arith.constant 1 : index
    %c0_201 = arith.constant 0 : index
    %c0_202 = arith.constant 0 : index
    %554 = vector.load %arg19[%c1_200, %c0_201, %c0_202] : memref<2x256x64xbf16, #tpu.memory_space<vmem>>, vector<1x256x64xbf16>
    %555 = vector.shape_cast %554 : vector<1x256x64xbf16> to vector<256x64xbf16>
    %556 = arith.truncf %553 : vector<18x256xf32> to vector<18x256xbf16>
    %cst_203 = arith.constant dense<0.000000e+00> : vector<18x64xf32>
    %557 = tpu.matmul %556, %555, %cst_203 {dimension_numbers = #tpu.dot_dimension_numbers<[1], [0], [0], [1], [0, 0, 1, 1], [], []>} : vector<18x256xbf16>, vector<256x64xbf16>, vector<18x64xf32> -> vector<18x64xf32>
    %c1_204 = arith.constant 1 : index
    %c0_205 = arith.constant 0 : index
    %c0_206 = arith.constant 0 : index
    %558 = vector.load %arg20[%c1_204, %c0_205, %c0_206] : memref<2x1x64xf32, #tpu.memory_space<vmem>>, vector<1x1x64xf32>
    %559 = vector.shape_cast %558 : vector<1x1x64xf32> to vector<1x64xf32>
    %560 = vector.broadcast %559 : vector<1x64xf32> to vector<18x64xf32>
    %561 = arith.addf %557, %560 : vector<18x64xf32>
    %c1_207 = arith.constant 1 : index
    %c0_208 = arith.constant 0 : index
    %c0_209 = arith.constant 0 : index
    %562 = vector.load %arg21[%c1_207, %c0_208, %c0_209] : memref<2x1x64xf32, #tpu.memory_space<vmem>>, vector<1x1x64xf32>
    %563 = vector.shape_cast %562 : vector<1x1x64xf32> to vector<1x64xf32>
    %564 = vector.broadcast %563 : vector<1x64xf32> to vector<18x64xf32>
    %565 = arith.mulf %564, %561 : vector<18x64xf32>
    %566 = arith.addf %508, %565 : vector<18x64xf32>
    %c0_210 = arith.constant 0 : index
    %c0_211 = arith.constant 0 : index
    %567 = vector.load %arg22[%c0_210, %c0_211] : memref<1x64xf32, #tpu.memory_space<vmem>>, vector<1x64xf32>
    %c0_212 = arith.constant 0 : index
    %c0_213 = arith.constant 0 : index
    %568 = vector.load %arg23[%c0_212, %c0_213] : memref<1x64xf32, #tpu.memory_space<vmem>>, vector<1x64xf32>
    %cst_214 = arith.constant dense<0.000000e+00> : vector<18xf32>
    %569 = vector.multi_reduction <add>, %566, %cst_214 [1] : vector<18x64xf32> to vector<18xf32>
    %570 = vector.shape_cast %569 : vector<18xf32> to vector<18x1xf32>
    %cst_215 = arith.constant 6.400000e+01 : f32
    %571 = vector.broadcast %cst_215 : f32 to vector<18x1xf32>
    %572 = arith.divf %570, %571 : vector<18x1xf32>
    %573 = vector.broadcast %572 : vector<18x1xf32> to vector<18x64xf32>
    %574 = arith.subf %566, %573 : vector<18x64xf32>
    %575 = arith.mulf %574, %574 : vector<18x64xf32>
    %cst_216 = arith.constant dense<0.000000e+00> : vector<18xf32>
    %576 = vector.multi_reduction <add>, %575, %cst_216 [1] : vector<18x64xf32> to vector<18xf32>
    %577 = vector.shape_cast %576 : vector<18xf32> to vector<18x1xf32>
    %cst_217 = arith.constant 6.400000e+01 : f32
    %578 = vector.broadcast %cst_217 : f32 to vector<18x1xf32>
    %579 = arith.divf %577, %578 : vector<18x1xf32>
    %cst_218 = arith.constant 9.99999997E-7 : f32
    %580 = vector.broadcast %cst_218 : f32 to vector<18x1xf32>
    %581 = arith.addf %579, %580 : vector<18x1xf32>
    %582 = math.rsqrt %581 : vector<18x1xf32>
    %583 = vector.broadcast %582 : vector<18x1xf32> to vector<18x64xf32>
    %584 = arith.mulf %574, %583 : vector<18x64xf32>
    %585 = vector.broadcast %567 : vector<1x64xf32> to vector<18x64xf32>
    %586 = arith.mulf %584, %585 : vector<18x64xf32>
    %587 = vector.broadcast %568 : vector<1x64xf32> to vector<18x64xf32>
    %588 = arith.addf %586, %587 : vector<18x64xf32>
    %589 = vector.extract_strided_slice %588 {offsets = [0, 0], sizes = [1, 64], strides = [1, 1]} : vector<18x64xf32> to vector<1x64xf32>
    %590 = vector.extract_strided_slice %588 {offsets = [9, 0], sizes = [1, 64], strides = [1, 1]} : vector<18x64xf32> to vector<1x64xf32>
    %591 = tpu.concatenate %589, %590 in 0 : vector<1x64xf32>, vector<1x64xf32> -> vector<2x64xf32>
    %c0_219 = arith.constant 0 : index
    %c0_220 = arith.constant 0 : index
    %592 = vector.load %arg2[%c0_219, %c0_220] : memref<16x1xi32, #tpu.memory_space<vmem>>, vector<16x1xi32>
    %593 = tpu.iota {dimensions = array<i32: 1>} : vector<16x128xi32>
    %594 = vector.broadcast %592 : vector<16x1xi32> to vector<16x128xi32>
    %595 = arith.cmpi eq, %594, %593 : vector<16x128xi32>
    %cst_221 = arith.constant 1.000000e+00 : f32
    %cst_222 = arith.constant 0.000000e+00 : f32
    %596 = vector.broadcast %cst_221 : f32 to vector<16x128xf32>
    %597 = vector.broadcast %cst_222 : f32 to vector<16x128xf32>
    %598 = arith.select %595, %596, %597 : vector<16x128xi1>, vector<16x128xf32>
    %c0_223 = arith.constant 0 : index
    %c0_224 = arith.constant 0 : index
    %599 = vector.load %arg24[%c0_223, %c0_224] : memref<128x32xbf16, #tpu.memory_space<vmem>>, vector<128x32xbf16>
    %600 = arith.truncf %598 : vector<16x128xf32> to vector<16x128xbf16>
    %cst_225 = arith.constant dense<0.000000e+00> : vector<16x32xf32>
    %601 = tpu.matmul %600, %599, %cst_225 {dimension_numbers = #tpu.dot_dimension_numbers<[1], [0], [0], [1], [0, 0, 1, 1], [], []>} : vector<16x128xbf16>, vector<128x32xbf16>, vector<16x32xf32> -> vector<16x32xf32>
    %c0_226 = arith.constant 0 : index
    %c0_227 = arith.constant 0 : index
    %602 = vector.load %arg25[%c0_226, %c0_227] : memref<8x32xf32, #tpu.memory_space<vmem>>, vector<8x32xf32>
    %603 = tpu.concatenate %602, %602 in 0 : vector<8x32xf32>, vector<8x32xf32> -> vector<16x32xf32>
    %604 = arith.addf %601, %603 : vector<16x32xf32>
    %c0_228 = arith.constant 0 : index
    %c0_229 = arith.constant 0 : index
    %605 = vector.load %arg26[%c0_228, %c0_229] : memref<1x32xf32, #tpu.memory_space<vmem>>, vector<1x32xf32>
    %c0_230 = arith.constant 0 : index
    %c0_231 = arith.constant 0 : index
    %606 = vector.load %arg27[%c0_230, %c0_231] : memref<1x32xf32, #tpu.memory_space<vmem>>, vector<1x32xf32>
    %cst_232 = arith.constant dense<0.000000e+00> : vector<16xf32>
    %607 = vector.multi_reduction <add>, %604, %cst_232 [1] : vector<16x32xf32> to vector<16xf32>
    %608 = vector.shape_cast %607 : vector<16xf32> to vector<16x1xf32>
    %cst_233 = arith.constant 3.200000e+01 : f32
    %609 = vector.broadcast %cst_233 : f32 to vector<16x1xf32>
    %610 = arith.divf %608, %609 : vector<16x1xf32>
    %611 = vector.broadcast %610 : vector<16x1xf32> to vector<16x32xf32>
    %612 = arith.subf %604, %611 : vector<16x32xf32>
    %613 = arith.mulf %612, %612 : vector<16x32xf32>
    %cst_234 = arith.constant dense<0.000000e+00> : vector<16xf32>
    %614 = vector.multi_reduction <add>, %613, %cst_234 [1] : vector<16x32xf32> to vector<16xf32>
    %615 = vector.shape_cast %614 : vector<16xf32> to vector<16x1xf32>
    %cst_235 = arith.constant 3.200000e+01 : f32
    %616 = vector.broadcast %cst_235 : f32 to vector<16x1xf32>
    %617 = arith.divf %615, %616 : vector<16x1xf32>
    %cst_236 = arith.constant 9.99999996E-13 : f32
    %618 = vector.broadcast %cst_236 : f32 to vector<16x1xf32>
    %619 = arith.addf %617, %618 : vector<16x1xf32>
    %620 = math.rsqrt %619 : vector<16x1xf32>
    %621 = vector.broadcast %620 : vector<16x1xf32> to vector<16x32xf32>
    %622 = arith.mulf %612, %621 : vector<16x32xf32>
    %623 = vector.broadcast %605 : vector<1x32xf32> to vector<16x32xf32>
    %624 = arith.mulf %622, %623 : vector<16x32xf32>
    %625 = vector.broadcast %606 : vector<1x32xf32> to vector<16x32xf32>
    %626 = arith.addf %624, %625 : vector<16x32xf32>
    %c0_237 = arith.constant 0 : index
    %c0_238 = arith.constant 0 : index
    %c0_239 = arith.constant 0 : index
    %627 = vector.load %arg28[%c0_237, %c0_238, %c0_239] : memref<2x32x32xbf16, #tpu.memory_space<vmem>>, vector<1x32x32xbf16>
    %628 = vector.shape_cast %627 : vector<1x32x32xbf16> to vector<32x32xbf16>
    %629 = arith.truncf %626 : vector<16x32xf32> to vector<16x32xbf16>
    %cst_240 = arith.constant dense<0.000000e+00> : vector<16x32xf32>
    %630 = tpu.matmul %629, %628, %cst_240 {dimension_numbers = #tpu.dot_dimension_numbers<[1], [0], [0], [1], [0, 0, 1, 1], [], []>} : vector<16x32xbf16>, vector<32x32xbf16>, vector<16x32xf32> -> vector<16x32xf32>
    %c0_241 = arith.constant 0 : index
    %c0_242 = arith.constant 0 : index
    %c0_243 = arith.constant 0 : index
    %631 = vector.load %arg29[%c0_241, %c0_242, %c0_243] : memref<2x1x32xf32, #tpu.memory_space<vmem>>, vector<1x1x32xf32>
    %632 = vector.shape_cast %631 : vector<1x1x32xf32> to vector<1x32xf32>
    %633 = vector.broadcast %632 : vector<1x32xf32> to vector<16x32xf32>
    %634 = arith.addf %630, %633 : vector<16x32xf32>
    %c0_244 = arith.constant 0 : index
    %c0_245 = arith.constant 0 : index
    %c0_246 = arith.constant 0 : index
    %635 = vector.load %arg30[%c0_244, %c0_245, %c0_246] : memref<2x32x32xbf16, #tpu.memory_space<vmem>>, vector<1x32x32xbf16>
    %636 = vector.shape_cast %635 : vector<1x32x32xbf16> to vector<32x32xbf16>
    %637 = arith.truncf %626 : vector<16x32xf32> to vector<16x32xbf16>
    %cst_247 = arith.constant dense<0.000000e+00> : vector<16x32xf32>
    %638 = tpu.matmul %637, %636, %cst_247 {dimension_numbers = #tpu.dot_dimension_numbers<[1], [0], [0], [1], [0, 0, 1, 1], [], []>} : vector<16x32xbf16>, vector<32x32xbf16>, vector<16x32xf32> -> vector<16x32xf32>
    %c0_248 = arith.constant 0 : index
    %c0_249 = arith.constant 0 : index
    %c0_250 = arith.constant 0 : index
    %639 = vector.load %arg31[%c0_248, %c0_249, %c0_250] : memref<2x1x32xf32, #tpu.memory_space<vmem>>, vector<1x1x32xf32>
    %640 = vector.shape_cast %639 : vector<1x1x32xf32> to vector<1x32xf32>
    %641 = vector.broadcast %640 : vector<1x32xf32> to vector<16x32xf32>
    %642 = arith.addf %638, %641 : vector<16x32xf32>
    %c0_251 = arith.constant 0 : index
    %c0_252 = arith.constant 0 : index
    %c0_253 = arith.constant 0 : index
    %643 = vector.load %arg32[%c0_251, %c0_252, %c0_253] : memref<2x32x32xbf16, #tpu.memory_space<vmem>>, vector<1x32x32xbf16>
    %644 = vector.shape_cast %643 : vector<1x32x32xbf16> to vector<32x32xbf16>
    %645 = arith.truncf %626 : vector<16x32xf32> to vector<16x32xbf16>
    %cst_254 = arith.constant dense<0.000000e+00> : vector<16x32xf32>
    %646 = tpu.matmul %645, %644, %cst_254 {dimension_numbers = #tpu.dot_dimension_numbers<[1], [0], [0], [1], [0, 0, 1, 1], [], []>} : vector<16x32xbf16>, vector<32x32xbf16>, vector<16x32xf32> -> vector<16x32xf32>
    %c0_255 = arith.constant 0 : index
    %c0_256 = arith.constant 0 : index
    %c0_257 = arith.constant 0 : index
    %647 = vector.load %arg33[%c0_255, %c0_256, %c0_257] : memref<2x1x32xf32, #tpu.memory_space<vmem>>, vector<1x1x32xf32>
    %648 = vector.shape_cast %647 : vector<1x1x32xf32> to vector<1x32xf32>
    %649 = vector.broadcast %648 : vector<1x32xf32> to vector<16x32xf32>
    %650 = arith.addf %646, %649 : vector<16x32xf32>
    %651 = vector.extract_strided_slice %634 {offsets = [0, 0], sizes = [8, 16], strides = [1, 1]} : vector<16x32xf32> to vector<8x16xf32>
    %652 = vector.extract_strided_slice %642 {offsets = [0, 0], sizes = [8, 16], strides = [1, 1]} : vector<16x32xf32> to vector<8x16xf32>
    %653 = arith.truncf %651 : vector<8x16xf32> to vector<8x16xbf16>
    %654 = arith.truncf %652 : vector<8x16xf32> to vector<8x16xbf16>
    %cst_258 = arith.constant dense<0.000000e+00> : vector<8x8xf32>
    %655 = tpu.matmul %653, %654, %cst_258 {dimension_numbers = #tpu.dot_dimension_numbers<[1], [1], [0], [0], [0, 0, 1, 0], [], []>} : vector<8x16xbf16>, vector<8x16xbf16>, vector<8x8xf32> -> vector<8x8xf32>
    %cst_259 = arith.constant 2.500000e-01 : f32
    %656 = vector.broadcast %cst_259 : f32 to vector<8x8xf32>
    %657 = arith.mulf %655, %656 : vector<8x8xf32>
    %cst_260 = arith.constant dense<0xFF800000> : vector<8xf32>
    %658 = vector.multi_reduction <maximumf>, %657, %cst_260 [1] : vector<8x8xf32> to vector<8xf32>
    %659 = vector.shape_cast %658 : vector<8xf32> to vector<8x1xf32>
    %660 = vector.broadcast %659 : vector<8x1xf32> to vector<8x8xf32>
    %661 = arith.subf %657, %660 : vector<8x8xf32>
    %662 = math.exp %661 : vector<8x8xf32>
    %cst_261 = arith.constant dense<0.000000e+00> : vector<8xf32>
    %663 = vector.multi_reduction <add>, %662, %cst_261 [1] : vector<8x8xf32> to vector<8xf32>
    %664 = vector.shape_cast %663 : vector<8xf32> to vector<8x1xf32>
    %665 = tpu.reciprocal %664 {approx = true} : vector<8x1xf32> -> vector<8x1xf32>
    %666 = vector.broadcast %665 : vector<8x1xf32> to vector<8x8xf32>
    %667 = arith.mulf %662, %666 : vector<8x8xf32>
    %668 = vector.extract_strided_slice %650 {offsets = [0, 0], sizes = [8, 16], strides = [1, 1]} : vector<16x32xf32> to vector<8x16xf32>
    %669 = arith.truncf %667 : vector<8x8xf32> to vector<8x8xbf16>
    %670 = arith.truncf %668 : vector<8x16xf32> to vector<8x16xbf16>
    %cst_262 = arith.constant dense<0.000000e+00> : vector<8x16xf32>
    %671 = tpu.matmul %669, %670, %cst_262 {dimension_numbers = #tpu.dot_dimension_numbers<[1], [0], [0], [1], [0, 0, 1, 1], [], []>} : vector<8x8xbf16>, vector<8x16xbf16>, vector<8x16xf32> -> vector<8x16xf32>
    %672 = vector.extract_strided_slice %634 {offsets = [0, 16], sizes = [8, 16], strides = [1, 1]} : vector<16x32xf32> to vector<8x16xf32>
    %673 = vector.extract_strided_slice %642 {offsets = [0, 16], sizes = [8, 16], strides = [1, 1]} : vector<16x32xf32> to vector<8x16xf32>
    %674 = arith.truncf %672 : vector<8x16xf32> to vector<8x16xbf16>
    %675 = arith.truncf %673 : vector<8x16xf32> to vector<8x16xbf16>
    %cst_263 = arith.constant dense<0.000000e+00> : vector<8x8xf32>
    %676 = tpu.matmul %674, %675, %cst_263 {dimension_numbers = #tpu.dot_dimension_numbers<[1], [1], [0], [0], [0, 0, 1, 0], [], []>} : vector<8x16xbf16>, vector<8x16xbf16>, vector<8x8xf32> -> vector<8x8xf32>
    %cst_264 = arith.constant 2.500000e-01 : f32
    %677 = vector.broadcast %cst_264 : f32 to vector<8x8xf32>
    %678 = arith.mulf %676, %677 : vector<8x8xf32>
    %cst_265 = arith.constant dense<0xFF800000> : vector<8xf32>
    %679 = vector.multi_reduction <maximumf>, %678, %cst_265 [1] : vector<8x8xf32> to vector<8xf32>
    %680 = vector.shape_cast %679 : vector<8xf32> to vector<8x1xf32>
    %681 = vector.broadcast %680 : vector<8x1xf32> to vector<8x8xf32>
    %682 = arith.subf %678, %681 : vector<8x8xf32>
    %683 = math.exp %682 : vector<8x8xf32>
    %cst_266 = arith.constant dense<0.000000e+00> : vector<8xf32>
    %684 = vector.multi_reduction <add>, %683, %cst_266 [1] : vector<8x8xf32> to vector<8xf32>
    %685 = vector.shape_cast %684 : vector<8xf32> to vector<8x1xf32>
    %686 = tpu.reciprocal %685 {approx = true} : vector<8x1xf32> -> vector<8x1xf32>
    %687 = vector.broadcast %686 : vector<8x1xf32> to vector<8x8xf32>
    %688 = arith.mulf %683, %687 : vector<8x8xf32>
    %689 = vector.extract_strided_slice %650 {offsets = [0, 16], sizes = [8, 16], strides = [1, 1]} : vector<16x32xf32> to vector<8x16xf32>
    %690 = arith.truncf %688 : vector<8x8xf32> to vector<8x8xbf16>
    %691 = arith.truncf %689 : vector<8x16xf32> to vector<8x16xbf16>
    %cst_267 = arith.constant dense<0.000000e+00> : vector<8x16xf32>
    %692 = tpu.matmul %690, %691, %cst_267 {dimension_numbers = #tpu.dot_dimension_numbers<[1], [0], [0], [1], [0, 0, 1, 1], [], []>} : vector<8x8xbf16>, vector<8x16xbf16>, vector<8x16xf32> -> vector<8x16xf32>
    %693 = tpu.concatenate %671, %692 in 1 : vector<8x16xf32>, vector<8x16xf32> -> vector<8x32xf32>
    %694 = vector.extract_strided_slice %634 {offsets = [8, 0], sizes = [8, 16], strides = [1, 1]} : vector<16x32xf32> to vector<8x16xf32>
    %695 = vector.extract_strided_slice %642 {offsets = [8, 0], sizes = [8, 16], strides = [1, 1]} : vector<16x32xf32> to vector<8x16xf32>
    %696 = arith.truncf %694 : vector<8x16xf32> to vector<8x16xbf16>
    %697 = arith.truncf %695 : vector<8x16xf32> to vector<8x16xbf16>
    %cst_268 = arith.constant dense<0.000000e+00> : vector<8x8xf32>
    %698 = tpu.matmul %696, %697, %cst_268 {dimension_numbers = #tpu.dot_dimension_numbers<[1], [1], [0], [0], [0, 0, 1, 0], [], []>} : vector<8x16xbf16>, vector<8x16xbf16>, vector<8x8xf32> -> vector<8x8xf32>
    %cst_269 = arith.constant 2.500000e-01 : f32
    %699 = vector.broadcast %cst_269 : f32 to vector<8x8xf32>
    %700 = arith.mulf %698, %699 : vector<8x8xf32>
    %cst_270 = arith.constant dense<0xFF800000> : vector<8xf32>
    %701 = vector.multi_reduction <maximumf>, %700, %cst_270 [1] : vector<8x8xf32> to vector<8xf32>
    %702 = vector.shape_cast %701 : vector<8xf32> to vector<8x1xf32>
    %703 = vector.broadcast %702 : vector<8x1xf32> to vector<8x8xf32>
    %704 = arith.subf %700, %703 : vector<8x8xf32>
    %705 = math.exp %704 : vector<8x8xf32>
    %cst_271 = arith.constant dense<0.000000e+00> : vector<8xf32>
    %706 = vector.multi_reduction <add>, %705, %cst_271 [1] : vector<8x8xf32> to vector<8xf32>
    %707 = vector.shape_cast %706 : vector<8xf32> to vector<8x1xf32>
    %708 = tpu.reciprocal %707 {approx = true} : vector<8x1xf32> -> vector<8x1xf32>
    %709 = vector.broadcast %708 : vector<8x1xf32> to vector<8x8xf32>
    %710 = arith.mulf %705, %709 : vector<8x8xf32>
    %711 = vector.extract_strided_slice %650 {offsets = [8, 0], sizes = [8, 16], strides = [1, 1]} : vector<16x32xf32> to vector<8x16xf32>
    %712 = arith.truncf %710 : vector<8x8xf32> to vector<8x8xbf16>
    %713 = arith.truncf %711 : vector<8x16xf32> to vector<8x16xbf16>
    %cst_272 = arith.constant dense<0.000000e+00> : vector<8x16xf32>
    %714 = tpu.matmul %712, %713, %cst_272 {dimension_numbers = #tpu.dot_dimension_numbers<[1], [0], [0], [1], [0, 0, 1, 1], [], []>} : vector<8x8xbf16>, vector<8x16xbf16>, vector<8x16xf32> -> vector<8x16xf32>
    %715 = vector.extract_strided_slice %634 {offsets = [8, 16], sizes = [8, 16], strides = [1, 1]} : vector<16x32xf32> to vector<8x16xf32>
    %716 = vector.extract_strided_slice %642 {offsets = [8, 16], sizes = [8, 16], strides = [1, 1]} : vector<16x32xf32> to vector<8x16xf32>
    %717 = arith.truncf %715 : vector<8x16xf32> to vector<8x16xbf16>
    %718 = arith.truncf %716 : vector<8x16xf32> to vector<8x16xbf16>
    %cst_273 = arith.constant dense<0.000000e+00> : vector<8x8xf32>
    %719 = tpu.matmul %717, %718, %cst_273 {dimension_numbers = #tpu.dot_dimension_numbers<[1], [1], [0], [0], [0, 0, 1, 0], [], []>} : vector<8x16xbf16>, vector<8x16xbf16>, vector<8x8xf32> -> vector<8x8xf32>
    %cst_274 = arith.constant 2.500000e-01 : f32
    %720 = vector.broadcast %cst_274 : f32 to vector<8x8xf32>
    %721 = arith.mulf %719, %720 : vector<8x8xf32>
    %cst_275 = arith.constant dense<0xFF800000> : vector<8xf32>
    %722 = vector.multi_reduction <maximumf>, %721, %cst_275 [1] : vector<8x8xf32> to vector<8xf32>
    %723 = vector.shape_cast %722 : vector<8xf32> to vector<8x1xf32>
    %724 = vector.broadcast %723 : vector<8x1xf32> to vector<8x8xf32>
    %725 = arith.subf %721, %724 : vector<8x8xf32>
    %726 = math.exp %725 : vector<8x8xf32>
    %cst_276 = arith.constant dense<0.000000e+00> : vector<8xf32>
    %727 = vector.multi_reduction <add>, %726, %cst_276 [1] : vector<8x8xf32> to vector<8xf32>
    %728 = vector.shape_cast %727 : vector<8xf32> to vector<8x1xf32>
    %729 = tpu.reciprocal %728 {approx = true} : vector<8x1xf32> -> vector<8x1xf32>
    %730 = vector.broadcast %729 : vector<8x1xf32> to vector<8x8xf32>
    %731 = arith.mulf %726, %730 : vector<8x8xf32>
    %732 = vector.extract_strided_slice %650 {offsets = [8, 16], sizes = [8, 16], strides = [1, 1]} : vector<16x32xf32> to vector<8x16xf32>
    %733 = arith.truncf %731 : vector<8x8xf32> to vector<8x8xbf16>
    %734 = arith.truncf %732 : vector<8x16xf32> to vector<8x16xbf16>
    %cst_277 = arith.constant dense<0.000000e+00> : vector<8x16xf32>
    %735 = tpu.matmul %733, %734, %cst_277 {dimension_numbers = #tpu.dot_dimension_numbers<[1], [0], [0], [1], [0, 0, 1, 1], [], []>} : vector<8x8xbf16>, vector<8x16xbf16>, vector<8x16xf32> -> vector<8x16xf32>
    %736 = tpu.concatenate %714, %735 in 1 : vector<8x16xf32>, vector<8x16xf32> -> vector<8x32xf32>
    %737 = tpu.concatenate %693, %736 in 0 : vector<8x32xf32>, vector<8x32xf32> -> vector<16x32xf32>
    %c0_278 = arith.constant 0 : index
    %c0_279 = arith.constant 0 : index
    %c0_280 = arith.constant 0 : index
    %738 = vector.load %arg34[%c0_278, %c0_279, %c0_280] : memref<2x32x32xbf16, #tpu.memory_space<vmem>>, vector<1x32x32xbf16>
    %739 = vector.shape_cast %738 : vector<1x32x32xbf16> to vector<32x32xbf16>
    %740 = arith.truncf %737 : vector<16x32xf32> to vector<16x32xbf16>
    %cst_281 = arith.constant dense<0.000000e+00> : vector<16x32xf32>
    %741 = tpu.matmul %740, %739, %cst_281 {dimension_numbers = #tpu.dot_dimension_numbers<[1], [0], [0], [1], [0, 0, 1, 1], [], []>} : vector<16x32xbf16>, vector<32x32xbf16>, vector<16x32xf32> -> vector<16x32xf32>
    %c0_282 = arith.constant 0 : index
    %c0_283 = arith.constant 0 : index
    %c0_284 = arith.constant 0 : index
    %742 = vector.load %arg35[%c0_282, %c0_283, %c0_284] : memref<2x1x32xf32, #tpu.memory_space<vmem>>, vector<1x1x32xf32>
    %743 = vector.shape_cast %742 : vector<1x1x32xf32> to vector<1x32xf32>
    %744 = vector.broadcast %743 : vector<1x32xf32> to vector<16x32xf32>
    %745 = arith.addf %741, %744 : vector<16x32xf32>
    %746 = arith.addf %626, %745 : vector<16x32xf32>
    %c0_285 = arith.constant 0 : index
    %c0_286 = arith.constant 0 : index
    %c0_287 = arith.constant 0 : index
    %747 = vector.load %arg36[%c0_285, %c0_286, %c0_287] : memref<2x1x32xf32, #tpu.memory_space<vmem>>, vector<1x1x32xf32>
    %748 = vector.shape_cast %747 : vector<1x1x32xf32> to vector<1x32xf32>
    %c0_288 = arith.constant 0 : index
    %c0_289 = arith.constant 0 : index
    %c0_290 = arith.constant 0 : index
    %749 = vector.load %arg37[%c0_288, %c0_289, %c0_290] : memref<2x1x32xf32, #tpu.memory_space<vmem>>, vector<1x1x32xf32>
    %750 = vector.shape_cast %749 : vector<1x1x32xf32> to vector<1x32xf32>
    %cst_291 = arith.constant dense<0.000000e+00> : vector<16xf32>
    %751 = vector.multi_reduction <add>, %746, %cst_291 [1] : vector<16x32xf32> to vector<16xf32>
    %752 = vector.shape_cast %751 : vector<16xf32> to vector<16x1xf32>
    %cst_292 = arith.constant 3.200000e+01 : f32
    %753 = vector.broadcast %cst_292 : f32 to vector<16x1xf32>
    %754 = arith.divf %752, %753 : vector<16x1xf32>
    %755 = vector.broadcast %754 : vector<16x1xf32> to vector<16x32xf32>
    %756 = arith.subf %746, %755 : vector<16x32xf32>
    %757 = arith.mulf %756, %756 : vector<16x32xf32>
    %cst_293 = arith.constant dense<0.000000e+00> : vector<16xf32>
    %758 = vector.multi_reduction <add>, %757, %cst_293 [1] : vector<16x32xf32> to vector<16xf32>
    %759 = vector.shape_cast %758 : vector<16xf32> to vector<16x1xf32>
    %cst_294 = arith.constant 3.200000e+01 : f32
    %760 = vector.broadcast %cst_294 : f32 to vector<16x1xf32>
    %761 = arith.divf %759, %760 : vector<16x1xf32>
    %cst_295 = arith.constant 9.99999996E-13 : f32
    %762 = vector.broadcast %cst_295 : f32 to vector<16x1xf32>
    %763 = arith.addf %761, %762 : vector<16x1xf32>
    %764 = math.rsqrt %763 : vector<16x1xf32>
    %765 = vector.broadcast %764 : vector<16x1xf32> to vector<16x32xf32>
    %766 = arith.mulf %756, %765 : vector<16x32xf32>
    %767 = vector.broadcast %748 : vector<1x32xf32> to vector<16x32xf32>
    %768 = arith.mulf %766, %767 : vector<16x32xf32>
    %769 = vector.broadcast %750 : vector<1x32xf32> to vector<16x32xf32>
    %770 = arith.addf %768, %769 : vector<16x32xf32>
    %c0_296 = arith.constant 0 : index
    %c0_297 = arith.constant 0 : index
    %c0_298 = arith.constant 0 : index
    %771 = vector.load %arg38[%c0_296, %c0_297, %c0_298] : memref<2x32x128xbf16, #tpu.memory_space<vmem>>, vector<1x32x128xbf16>
    %772 = vector.shape_cast %771 : vector<1x32x128xbf16> to vector<32x128xbf16>
    %773 = arith.truncf %770 : vector<16x32xf32> to vector<16x32xbf16>
    %cst_299 = arith.constant dense<0.000000e+00> : vector<16x128xf32>
    %774 = tpu.matmul %773, %772, %cst_299 {dimension_numbers = #tpu.dot_dimension_numbers<[1], [0], [0], [1], [0, 0, 1, 1], [], []>} : vector<16x32xbf16>, vector<32x128xbf16>, vector<16x128xf32> -> vector<16x128xf32>
    %c0_300 = arith.constant 0 : index
    %c0_301 = arith.constant 0 : index
    %c0_302 = arith.constant 0 : index
    %775 = vector.load %arg39[%c0_300, %c0_301, %c0_302] : memref<2x1x128xf32, #tpu.memory_space<vmem>>, vector<1x1x128xf32>
    %776 = vector.shape_cast %775 : vector<1x1x128xf32> to vector<1x128xf32>
    %777 = vector.broadcast %776 : vector<1x128xf32> to vector<16x128xf32>
    %778 = arith.addf %774, %777 : vector<16x128xf32>
    %779 = arith.mulf %778, %778 : vector<16x128xf32>
    %780 = arith.mulf %778, %779 : vector<16x128xf32>
    %cst_303 = arith.constant 4.471500e-02 : f32
    %781 = vector.broadcast %cst_303 : f32 to vector<16x128xf32>
    %782 = arith.mulf %781, %780 : vector<16x128xf32>
    %783 = arith.addf %778, %782 : vector<16x128xf32>
    %cst_304 = arith.constant 0.797884583 : f32
    %784 = vector.broadcast %cst_304 : f32 to vector<16x128xf32>
    %785 = arith.mulf %784, %783 : vector<16x128xf32>
    %786 = math.tanh %785 : vector<16x128xf32>
    %cst_305 = arith.constant 1.000000e+00 : f32
    %787 = vector.broadcast %cst_305 : f32 to vector<16x128xf32>
    %788 = arith.addf %787, %786 : vector<16x128xf32>
    %cst_306 = arith.constant 5.000000e-01 : f32
    %789 = vector.broadcast %cst_306 : f32 to vector<16x128xf32>
    %790 = arith.mulf %789, %788 : vector<16x128xf32>
    %791 = arith.mulf %778, %790 : vector<16x128xf32>
    %c0_307 = arith.constant 0 : index
    %c0_308 = arith.constant 0 : index
    %c0_309 = arith.constant 0 : index
    %792 = vector.load %arg40[%c0_307, %c0_308, %c0_309] : memref<2x128x32xbf16, #tpu.memory_space<vmem>>, vector<1x128x32xbf16>
    %793 = vector.shape_cast %792 : vector<1x128x32xbf16> to vector<128x32xbf16>
    %794 = arith.truncf %791 : vector<16x128xf32> to vector<16x128xbf16>
    %cst_310 = arith.constant dense<0.000000e+00> : vector<16x32xf32>
    %795 = tpu.matmul %794, %793, %cst_310 {dimension_numbers = #tpu.dot_dimension_numbers<[1], [0], [0], [1], [0, 0, 1, 1], [], []>} : vector<16x128xbf16>, vector<128x32xbf16>, vector<16x32xf32> -> vector<16x32xf32>
    %c0_311 = arith.constant 0 : index
    %c0_312 = arith.constant 0 : index
    %c0_313 = arith.constant 0 : index
    %796 = vector.load %arg41[%c0_311, %c0_312, %c0_313] : memref<2x1x32xf32, #tpu.memory_space<vmem>>, vector<1x1x32xf32>
    %797 = vector.shape_cast %796 : vector<1x1x32xf32> to vector<1x32xf32>
    %798 = vector.broadcast %797 : vector<1x32xf32> to vector<16x32xf32>
    %799 = arith.addf %795, %798 : vector<16x32xf32>
    %800 = arith.addf %770, %799 : vector<16x32xf32>
    %c0_314 = arith.constant 0 : index
    %c0_315 = arith.constant 0 : index
    %c0_316 = arith.constant 0 : index
    %801 = vector.load %arg42[%c0_314, %c0_315, %c0_316] : memref<2x1x32xf32, #tpu.memory_space<vmem>>, vector<1x1x32xf32>
    %802 = vector.shape_cast %801 : vector<1x1x32xf32> to vector<1x32xf32>
    %c0_317 = arith.constant 0 : index
    %c0_318 = arith.constant 0 : index
    %c0_319 = arith.constant 0 : index
    %803 = vector.load %arg43[%c0_317, %c0_318, %c0_319] : memref<2x1x32xf32, #tpu.memory_space<vmem>>, vector<1x1x32xf32>
    %804 = vector.shape_cast %803 : vector<1x1x32xf32> to vector<1x32xf32>
    %cst_320 = arith.constant dense<0.000000e+00> : vector<16xf32>
    %805 = vector.multi_reduction <add>, %800, %cst_320 [1] : vector<16x32xf32> to vector<16xf32>
    %806 = vector.shape_cast %805 : vector<16xf32> to vector<16x1xf32>
    %cst_321 = arith.constant 3.200000e+01 : f32
    %807 = vector.broadcast %cst_321 : f32 to vector<16x1xf32>
    %808 = arith.divf %806, %807 : vector<16x1xf32>
    %809 = vector.broadcast %808 : vector<16x1xf32> to vector<16x32xf32>
    %810 = arith.subf %800, %809 : vector<16x32xf32>
    %811 = arith.mulf %810, %810 : vector<16x32xf32>
    %cst_322 = arith.constant dense<0.000000e+00> : vector<16xf32>
    %812 = vector.multi_reduction <add>, %811, %cst_322 [1] : vector<16x32xf32> to vector<16xf32>
    %813 = vector.shape_cast %812 : vector<16xf32> to vector<16x1xf32>
    %cst_323 = arith.constant 3.200000e+01 : f32
    %814 = vector.broadcast %cst_323 : f32 to vector<16x1xf32>
    %815 = arith.divf %813, %814 : vector<16x1xf32>
    %cst_324 = arith.constant 9.99999996E-13 : f32
    %816 = vector.broadcast %cst_324 : f32 to vector<16x1xf32>
    %817 = arith.addf %815, %816 : vector<16x1xf32>
    %818 = math.rsqrt %817 : vector<16x1xf32>
    %819 = vector.broadcast %818 : vector<16x1xf32> to vector<16x32xf32>
    %820 = arith.mulf %810, %819 : vector<16x32xf32>
    %821 = vector.broadcast %802 : vector<1x32xf32> to vector<16x32xf32>
    %822 = arith.mulf %820, %821 : vector<16x32xf32>
    %823 = vector.broadcast %804 : vector<1x32xf32> to vector<16x32xf32>
    %824 = arith.addf %822, %823 : vector<16x32xf32>
    %c1_325 = arith.constant 1 : index
    %c0_326 = arith.constant 0 : index
    %c0_327 = arith.constant 0 : index
    %825 = vector.load %arg28[%c1_325, %c0_326, %c0_327] : memref<2x32x32xbf16, #tpu.memory_space<vmem>>, vector<1x32x32xbf16>
    %826 = vector.shape_cast %825 : vector<1x32x32xbf16> to vector<32x32xbf16>
    %827 = arith.truncf %824 : vector<16x32xf32> to vector<16x32xbf16>
    %cst_328 = arith.constant dense<0.000000e+00> : vector<16x32xf32>
    %828 = tpu.matmul %827, %826, %cst_328 {dimension_numbers = #tpu.dot_dimension_numbers<[1], [0], [0], [1], [0, 0, 1, 1], [], []>} : vector<16x32xbf16>, vector<32x32xbf16>, vector<16x32xf32> -> vector<16x32xf32>
    %c1_329 = arith.constant 1 : index
    %c0_330 = arith.constant 0 : index
    %c0_331 = arith.constant 0 : index
    %829 = vector.load %arg29[%c1_329, %c0_330, %c0_331] : memref<2x1x32xf32, #tpu.memory_space<vmem>>, vector<1x1x32xf32>
    %830 = vector.shape_cast %829 : vector<1x1x32xf32> to vector<1x32xf32>
    %831 = vector.broadcast %830 : vector<1x32xf32> to vector<16x32xf32>
    %832 = arith.addf %828, %831 : vector<16x32xf32>
    %c1_332 = arith.constant 1 : index
    %c0_333 = arith.constant 0 : index
    %c0_334 = arith.constant 0 : index
    %833 = vector.load %arg30[%c1_332, %c0_333, %c0_334] : memref<2x32x32xbf16, #tpu.memory_space<vmem>>, vector<1x32x32xbf16>
    %834 = vector.shape_cast %833 : vector<1x32x32xbf16> to vector<32x32xbf16>
    %835 = arith.truncf %824 : vector<16x32xf32> to vector<16x32xbf16>
    %cst_335 = arith.constant dense<0.000000e+00> : vector<16x32xf32>
    %836 = tpu.matmul %835, %834, %cst_335 {dimension_numbers = #tpu.dot_dimension_numbers<[1], [0], [0], [1], [0, 0, 1, 1], [], []>} : vector<16x32xbf16>, vector<32x32xbf16>, vector<16x32xf32> -> vector<16x32xf32>
    %c1_336 = arith.constant 1 : index
    %c0_337 = arith.constant 0 : index
    %c0_338 = arith.constant 0 : index
    %837 = vector.load %arg31[%c1_336, %c0_337, %c0_338] : memref<2x1x32xf32, #tpu.memory_space<vmem>>, vector<1x1x32xf32>
    %838 = vector.shape_cast %837 : vector<1x1x32xf32> to vector<1x32xf32>
    %839 = vector.broadcast %838 : vector<1x32xf32> to vector<16x32xf32>
    %840 = arith.addf %836, %839 : vector<16x32xf32>
    %c1_339 = arith.constant 1 : index
    %c0_340 = arith.constant 0 : index
    %c0_341 = arith.constant 0 : index
    %841 = vector.load %arg32[%c1_339, %c0_340, %c0_341] : memref<2x32x32xbf16, #tpu.memory_space<vmem>>, vector<1x32x32xbf16>
    %842 = vector.shape_cast %841 : vector<1x32x32xbf16> to vector<32x32xbf16>
    %843 = arith.truncf %824 : vector<16x32xf32> to vector<16x32xbf16>
    %cst_342 = arith.constant dense<0.000000e+00> : vector<16x32xf32>
    %844 = tpu.matmul %843, %842, %cst_342 {dimension_numbers = #tpu.dot_dimension_numbers<[1], [0], [0], [1], [0, 0, 1, 1], [], []>} : vector<16x32xbf16>, vector<32x32xbf16>, vector<16x32xf32> -> vector<16x32xf32>
    %c1_343 = arith.constant 1 : index
    %c0_344 = arith.constant 0 : index
    %c0_345 = arith.constant 0 : index
    %845 = vector.load %arg33[%c1_343, %c0_344, %c0_345] : memref<2x1x32xf32, #tpu.memory_space<vmem>>, vector<1x1x32xf32>
    %846 = vector.shape_cast %845 : vector<1x1x32xf32> to vector<1x32xf32>
    %847 = vector.broadcast %846 : vector<1x32xf32> to vector<16x32xf32>
    %848 = arith.addf %844, %847 : vector<16x32xf32>
    %849 = vector.extract_strided_slice %832 {offsets = [0, 0], sizes = [8, 16], strides = [1, 1]} : vector<16x32xf32> to vector<8x16xf32>
    %850 = vector.extract_strided_slice %840 {offsets = [0, 0], sizes = [8, 16], strides = [1, 1]} : vector<16x32xf32> to vector<8x16xf32>
    %851 = arith.truncf %849 : vector<8x16xf32> to vector<8x16xbf16>
    %852 = arith.truncf %850 : vector<8x16xf32> to vector<8x16xbf16>
    %cst_346 = arith.constant dense<0.000000e+00> : vector<8x8xf32>
    %853 = tpu.matmul %851, %852, %cst_346 {dimension_numbers = #tpu.dot_dimension_numbers<[1], [1], [0], [0], [0, 0, 1, 0], [], []>} : vector<8x16xbf16>, vector<8x16xbf16>, vector<8x8xf32> -> vector<8x8xf32>
    %cst_347 = arith.constant 2.500000e-01 : f32
    %854 = vector.broadcast %cst_347 : f32 to vector<8x8xf32>
    %855 = arith.mulf %853, %854 : vector<8x8xf32>
    %cst_348 = arith.constant dense<0xFF800000> : vector<8xf32>
    %856 = vector.multi_reduction <maximumf>, %855, %cst_348 [1] : vector<8x8xf32> to vector<8xf32>
    %857 = vector.shape_cast %856 : vector<8xf32> to vector<8x1xf32>
    %858 = vector.broadcast %857 : vector<8x1xf32> to vector<8x8xf32>
    %859 = arith.subf %855, %858 : vector<8x8xf32>
    %860 = math.exp %859 : vector<8x8xf32>
    %cst_349 = arith.constant dense<0.000000e+00> : vector<8xf32>
    %861 = vector.multi_reduction <add>, %860, %cst_349 [1] : vector<8x8xf32> to vector<8xf32>
    %862 = vector.shape_cast %861 : vector<8xf32> to vector<8x1xf32>
    %863 = tpu.reciprocal %862 {approx = true} : vector<8x1xf32> -> vector<8x1xf32>
    %864 = vector.broadcast %863 : vector<8x1xf32> to vector<8x8xf32>
    %865 = arith.mulf %860, %864 : vector<8x8xf32>
    %866 = vector.extract_strided_slice %848 {offsets = [0, 0], sizes = [8, 16], strides = [1, 1]} : vector<16x32xf32> to vector<8x16xf32>
    %867 = arith.truncf %865 : vector<8x8xf32> to vector<8x8xbf16>
    %868 = arith.truncf %866 : vector<8x16xf32> to vector<8x16xbf16>
    %cst_350 = arith.constant dense<0.000000e+00> : vector<8x16xf32>
    %869 = tpu.matmul %867, %868, %cst_350 {dimension_numbers = #tpu.dot_dimension_numbers<[1], [0], [0], [1], [0, 0, 1, 1], [], []>} : vector<8x8xbf16>, vector<8x16xbf16>, vector<8x16xf32> -> vector<8x16xf32>
    %870 = vector.extract_strided_slice %832 {offsets = [0, 16], sizes = [8, 16], strides = [1, 1]} : vector<16x32xf32> to vector<8x16xf32>
    %871 = vector.extract_strided_slice %840 {offsets = [0, 16], sizes = [8, 16], strides = [1, 1]} : vector<16x32xf32> to vector<8x16xf32>
    %872 = arith.truncf %870 : vector<8x16xf32> to vector<8x16xbf16>
    %873 = arith.truncf %871 : vector<8x16xf32> to vector<8x16xbf16>
    %cst_351 = arith.constant dense<0.000000e+00> : vector<8x8xf32>
    %874 = tpu.matmul %872, %873, %cst_351 {dimension_numbers = #tpu.dot_dimension_numbers<[1], [1], [0], [0], [0, 0, 1, 0], [], []>} : vector<8x16xbf16>, vector<8x16xbf16>, vector<8x8xf32> -> vector<8x8xf32>
    %cst_352 = arith.constant 2.500000e-01 : f32
    %875 = vector.broadcast %cst_352 : f32 to vector<8x8xf32>
    %876 = arith.mulf %874, %875 : vector<8x8xf32>
    %cst_353 = arith.constant dense<0xFF800000> : vector<8xf32>
    %877 = vector.multi_reduction <maximumf>, %876, %cst_353 [1] : vector<8x8xf32> to vector<8xf32>
    %878 = vector.shape_cast %877 : vector<8xf32> to vector<8x1xf32>
    %879 = vector.broadcast %878 : vector<8x1xf32> to vector<8x8xf32>
    %880 = arith.subf %876, %879 : vector<8x8xf32>
    %881 = math.exp %880 : vector<8x8xf32>
    %cst_354 = arith.constant dense<0.000000e+00> : vector<8xf32>
    %882 = vector.multi_reduction <add>, %881, %cst_354 [1] : vector<8x8xf32> to vector<8xf32>
    %883 = vector.shape_cast %882 : vector<8xf32> to vector<8x1xf32>
    %884 = tpu.reciprocal %883 {approx = true} : vector<8x1xf32> -> vector<8x1xf32>
    %885 = vector.broadcast %884 : vector<8x1xf32> to vector<8x8xf32>
    %886 = arith.mulf %881, %885 : vector<8x8xf32>
    %887 = vector.extract_strided_slice %848 {offsets = [0, 16], sizes = [8, 16], strides = [1, 1]} : vector<16x32xf32> to vector<8x16xf32>
    %888 = arith.truncf %886 : vector<8x8xf32> to vector<8x8xbf16>
    %889 = arith.truncf %887 : vector<8x16xf32> to vector<8x16xbf16>
    %cst_355 = arith.constant dense<0.000000e+00> : vector<8x16xf32>
    %890 = tpu.matmul %888, %889, %cst_355 {dimension_numbers = #tpu.dot_dimension_numbers<[1], [0], [0], [1], [0, 0, 1, 1], [], []>} : vector<8x8xbf16>, vector<8x16xbf16>, vector<8x16xf32> -> vector<8x16xf32>
    %891 = tpu.concatenate %869, %890 in 1 : vector<8x16xf32>, vector<8x16xf32> -> vector<8x32xf32>
    %892 = vector.extract_strided_slice %832 {offsets = [8, 0], sizes = [8, 16], strides = [1, 1]} : vector<16x32xf32> to vector<8x16xf32>
    %893 = vector.extract_strided_slice %840 {offsets = [8, 0], sizes = [8, 16], strides = [1, 1]} : vector<16x32xf32> to vector<8x16xf32>
    %894 = arith.truncf %892 : vector<8x16xf32> to vector<8x16xbf16>
    %895 = arith.truncf %893 : vector<8x16xf32> to vector<8x16xbf16>
    %cst_356 = arith.constant dense<0.000000e+00> : vector<8x8xf32>
    %896 = tpu.matmul %894, %895, %cst_356 {dimension_numbers = #tpu.dot_dimension_numbers<[1], [1], [0], [0], [0, 0, 1, 0], [], []>} : vector<8x16xbf16>, vector<8x16xbf16>, vector<8x8xf32> -> vector<8x8xf32>
    %cst_357 = arith.constant 2.500000e-01 : f32
    %897 = vector.broadcast %cst_357 : f32 to vector<8x8xf32>
    %898 = arith.mulf %896, %897 : vector<8x8xf32>
    %cst_358 = arith.constant dense<0xFF800000> : vector<8xf32>
    %899 = vector.multi_reduction <maximumf>, %898, %cst_358 [1] : vector<8x8xf32> to vector<8xf32>
    %900 = vector.shape_cast %899 : vector<8xf32> to vector<8x1xf32>
    %901 = vector.broadcast %900 : vector<8x1xf32> to vector<8x8xf32>
    %902 = arith.subf %898, %901 : vector<8x8xf32>
    %903 = math.exp %902 : vector<8x8xf32>
    %cst_359 = arith.constant dense<0.000000e+00> : vector<8xf32>
    %904 = vector.multi_reduction <add>, %903, %cst_359 [1] : vector<8x8xf32> to vector<8xf32>
    %905 = vector.shape_cast %904 : vector<8xf32> to vector<8x1xf32>
    %906 = tpu.reciprocal %905 {approx = true} : vector<8x1xf32> -> vector<8x1xf32>
    %907 = vector.broadcast %906 : vector<8x1xf32> to vector<8x8xf32>
    %908 = arith.mulf %903, %907 : vector<8x8xf32>
    %909 = vector.extract_strided_slice %848 {offsets = [8, 0], sizes = [8, 16], strides = [1, 1]} : vector<16x32xf32> to vector<8x16xf32>
    %910 = arith.truncf %908 : vector<8x8xf32> to vector<8x8xbf16>
    %911 = arith.truncf %909 : vector<8x16xf32> to vector<8x16xbf16>
    %cst_360 = arith.constant dense<0.000000e+00> : vector<8x16xf32>
    %912 = tpu.matmul %910, %911, %cst_360 {dimension_numbers = #tpu.dot_dimension_numbers<[1], [0], [0], [1], [0, 0, 1, 1], [], []>} : vector<8x8xbf16>, vector<8x16xbf16>, vector<8x16xf32> -> vector<8x16xf32>
    %913 = vector.extract_strided_slice %832 {offsets = [8, 16], sizes = [8, 16], strides = [1, 1]} : vector<16x32xf32> to vector<8x16xf32>
    %914 = vector.extract_strided_slice %840 {offsets = [8, 16], sizes = [8, 16], strides = [1, 1]} : vector<16x32xf32> to vector<8x16xf32>
    %915 = arith.truncf %913 : vector<8x16xf32> to vector<8x16xbf16>
    %916 = arith.truncf %914 : vector<8x16xf32> to vector<8x16xbf16>
    %cst_361 = arith.constant dense<0.000000e+00> : vector<8x8xf32>
    %917 = tpu.matmul %915, %916, %cst_361 {dimension_numbers = #tpu.dot_dimension_numbers<[1], [1], [0], [0], [0, 0, 1, 0], [], []>} : vector<8x16xbf16>, vector<8x16xbf16>, vector<8x8xf32> -> vector<8x8xf32>
    %cst_362 = arith.constant 2.500000e-01 : f32
    %918 = vector.broadcast %cst_362 : f32 to vector<8x8xf32>
    %919 = arith.mulf %917, %918 : vector<8x8xf32>
    %cst_363 = arith.constant dense<0xFF800000> : vector<8xf32>
    %920 = vector.multi_reduction <maximumf>, %919, %cst_363 [1] : vector<8x8xf32> to vector<8xf32>
    %921 = vector.shape_cast %920 : vector<8xf32> to vector<8x1xf32>
    %922 = vector.broadcast %921 : vector<8x1xf32> to vector<8x8xf32>
    %923 = arith.subf %919, %922 : vector<8x8xf32>
    %924 = math.exp %923 : vector<8x8xf32>
    %cst_364 = arith.constant dense<0.000000e+00> : vector<8xf32>
    %925 = vector.multi_reduction <add>, %924, %cst_364 [1] : vector<8x8xf32> to vector<8xf32>
    %926 = vector.shape_cast %925 : vector<8xf32> to vector<8x1xf32>
    %927 = tpu.reciprocal %926 {approx = true} : vector<8x1xf32> -> vector<8x1xf32>
    %928 = vector.broadcast %927 : vector<8x1xf32> to vector<8x8xf32>
    %929 = arith.mulf %924, %928 : vector<8x8xf32>
    %930 = vector.extract_strided_slice %848 {offsets = [8, 16], sizes = [8, 16], strides = [1, 1]} : vector<16x32xf32> to vector<8x16xf32>
    %931 = arith.truncf %929 : vector<8x8xf32> to vector<8x8xbf16>
    %932 = arith.truncf %930 : vector<8x16xf32> to vector<8x16xbf16>
    %cst_365 = arith.constant dense<0.000000e+00> : vector<8x16xf32>
    %933 = tpu.matmul %931, %932, %cst_365 {dimension_numbers = #tpu.dot_dimension_numbers<[1], [0], [0], [1], [0, 0, 1, 1], [], []>} : vector<8x8xbf16>, vector<8x16xbf16>, vector<8x16xf32> -> vector<8x16xf32>
    %934 = tpu.concatenate %912, %933 in 1 : vector<8x16xf32>, vector<8x16xf32> -> vector<8x32xf32>
    %935 = tpu.concatenate %891, %934 in 0 : vector<8x32xf32>, vector<8x32xf32> -> vector<16x32xf32>
    %c1_366 = arith.constant 1 : index
    %c0_367 = arith.constant 0 : index
    %c0_368 = arith.constant 0 : index
    %936 = vector.load %arg34[%c1_366, %c0_367, %c0_368] : memref<2x32x32xbf16, #tpu.memory_space<vmem>>, vector<1x32x32xbf16>
    %937 = vector.shape_cast %936 : vector<1x32x32xbf16> to vector<32x32xbf16>
    %938 = arith.truncf %935 : vector<16x32xf32> to vector<16x32xbf16>
    %cst_369 = arith.constant dense<0.000000e+00> : vector<16x32xf32>
    %939 = tpu.matmul %938, %937, %cst_369 {dimension_numbers = #tpu.dot_dimension_numbers<[1], [0], [0], [1], [0, 0, 1, 1], [], []>} : vector<16x32xbf16>, vector<32x32xbf16>, vector<16x32xf32> -> vector<16x32xf32>
    %c1_370 = arith.constant 1 : index
    %c0_371 = arith.constant 0 : index
    %c0_372 = arith.constant 0 : index
    %940 = vector.load %arg35[%c1_370, %c0_371, %c0_372] : memref<2x1x32xf32, #tpu.memory_space<vmem>>, vector<1x1x32xf32>
    %941 = vector.shape_cast %940 : vector<1x1x32xf32> to vector<1x32xf32>
    %942 = vector.broadcast %941 : vector<1x32xf32> to vector<16x32xf32>
    %943 = arith.addf %939, %942 : vector<16x32xf32>
    %944 = arith.addf %824, %943 : vector<16x32xf32>
    %c1_373 = arith.constant 1 : index
    %c0_374 = arith.constant 0 : index
    %c0_375 = arith.constant 0 : index
    %945 = vector.load %arg36[%c1_373, %c0_374, %c0_375] : memref<2x1x32xf32, #tpu.memory_space<vmem>>, vector<1x1x32xf32>
    %946 = vector.shape_cast %945 : vector<1x1x32xf32> to vector<1x32xf32>
    %c1_376 = arith.constant 1 : index
    %c0_377 = arith.constant 0 : index
    %c0_378 = arith.constant 0 : index
    %947 = vector.load %arg37[%c1_376, %c0_377, %c0_378] : memref<2x1x32xf32, #tpu.memory_space<vmem>>, vector<1x1x32xf32>
    %948 = vector.shape_cast %947 : vector<1x1x32xf32> to vector<1x32xf32>
    %cst_379 = arith.constant dense<0.000000e+00> : vector<16xf32>
    %949 = vector.multi_reduction <add>, %944, %cst_379 [1] : vector<16x32xf32> to vector<16xf32>
    %950 = vector.shape_cast %949 : vector<16xf32> to vector<16x1xf32>
    %cst_380 = arith.constant 3.200000e+01 : f32
    %951 = vector.broadcast %cst_380 : f32 to vector<16x1xf32>
    %952 = arith.divf %950, %951 : vector<16x1xf32>
    %953 = vector.broadcast %952 : vector<16x1xf32> to vector<16x32xf32>
    %954 = arith.subf %944, %953 : vector<16x32xf32>
    %955 = arith.mulf %954, %954 : vector<16x32xf32>
    %cst_381 = arith.constant dense<0.000000e+00> : vector<16xf32>
    %956 = vector.multi_reduction <add>, %955, %cst_381 [1] : vector<16x32xf32> to vector<16xf32>
    %957 = vector.shape_cast %956 : vector<16xf32> to vector<16x1xf32>
    %cst_382 = arith.constant 3.200000e+01 : f32
    %958 = vector.broadcast %cst_382 : f32 to vector<16x1xf32>
    %959 = arith.divf %957, %958 : vector<16x1xf32>
    %cst_383 = arith.constant 9.99999996E-13 : f32
    %960 = vector.broadcast %cst_383 : f32 to vector<16x1xf32>
    %961 = arith.addf %959, %960 : vector<16x1xf32>
    %962 = math.rsqrt %961 : vector<16x1xf32>
    %963 = vector.broadcast %962 : vector<16x1xf32> to vector<16x32xf32>
    %964 = arith.mulf %954, %963 : vector<16x32xf32>
    %965 = vector.broadcast %946 : vector<1x32xf32> to vector<16x32xf32>
    %966 = arith.mulf %964, %965 : vector<16x32xf32>
    %967 = vector.broadcast %948 : vector<1x32xf32> to vector<16x32xf32>
    %968 = arith.addf %966, %967 : vector<16x32xf32>
    %c1_384 = arith.constant 1 : index
    %c0_385 = arith.constant 0 : index
    %c0_386 = arith.constant 0 : index
    %969 = vector.load %arg38[%c1_384, %c0_385, %c0_386] : memref<2x32x128xbf16, #tpu.memory_space<vmem>>, vector<1x32x128xbf16>
    %970 = vector.shape_cast %969 : vector<1x32x128xbf16> to vector<32x128xbf16>
    %971 = arith.truncf %968 : vector<16x32xf32> to vector<16x32xbf16>
    %cst_387 = arith.constant dense<0.000000e+00> : vector<16x128xf32>
    %972 = tpu.matmul %971, %970, %cst_387 {dimension_numbers = #tpu.dot_dimension_numbers<[1], [0], [0], [1], [0, 0, 1, 1], [], []>} : vector<16x32xbf16>, vector<32x128xbf16>, vector<16x128xf32> -> vector<16x128xf32>
    %c1_388 = arith.constant 1 : index
    %c0_389 = arith.constant 0 : index
    %c0_390 = arith.constant 0 : index
    %973 = vector.load %arg39[%c1_388, %c0_389, %c0_390] : memref<2x1x128xf32, #tpu.memory_space<vmem>>, vector<1x1x128xf32>
    %974 = vector.shape_cast %973 : vector<1x1x128xf32> to vector<1x128xf32>
    %975 = vector.broadcast %974 : vector<1x128xf32> to vector<16x128xf32>
    %976 = arith.addf %972, %975 : vector<16x128xf32>
    %977 = arith.mulf %976, %976 : vector<16x128xf32>
    %978 = arith.mulf %976, %977 : vector<16x128xf32>
    %cst_391 = arith.constant 4.471500e-02 : f32
    %979 = vector.broadcast %cst_391 : f32 to vector<16x128xf32>
    %980 = arith.mulf %979, %978 : vector<16x128xf32>
    %981 = arith.addf %976, %980 : vector<16x128xf32>
    %cst_392 = arith.constant 0.797884583 : f32
    %982 = vector.broadcast %cst_392 : f32 to vector<16x128xf32>
    %983 = arith.mulf %982, %981 : vector<16x128xf32>
    %984 = math.tanh %983 : vector<16x128xf32>
    %cst_393 = arith.constant 1.000000e+00 : f32
    %985 = vector.broadcast %cst_393 : f32 to vector<16x128xf32>
    %986 = arith.addf %985, %984 : vector<16x128xf32>
    %cst_394 = arith.constant 5.000000e-01 : f32
    %987 = vector.broadcast %cst_394 : f32 to vector<16x128xf32>
    %988 = arith.mulf %987, %986 : vector<16x128xf32>
    %989 = arith.mulf %976, %988 : vector<16x128xf32>
    %c1_395 = arith.constant 1 : index
    %c0_396 = arith.constant 0 : index
    %c0_397 = arith.constant 0 : index
    %990 = vector.load %arg40[%c1_395, %c0_396, %c0_397] : memref<2x128x32xbf16, #tpu.memory_space<vmem>>, vector<1x128x32xbf16>
    %991 = vector.shape_cast %990 : vector<1x128x32xbf16> to vector<128x32xbf16>
    %992 = arith.truncf %989 : vector<16x128xf32> to vector<16x128xbf16>
    %cst_398 = arith.constant dense<0.000000e+00> : vector<16x32xf32>
    %993 = tpu.matmul %992, %991, %cst_398 {dimension_numbers = #tpu.dot_dimension_numbers<[1], [0], [0], [1], [0, 0, 1, 1], [], []>} : vector<16x128xbf16>, vector<128x32xbf16>, vector<16x32xf32> -> vector<16x32xf32>
    %c1_399 = arith.constant 1 : index
    %c0_400 = arith.constant 0 : index
    %c0_401 = arith.constant 0 : index
    %994 = vector.load %arg41[%c1_399, %c0_400, %c0_401] : memref<2x1x32xf32, #tpu.memory_space<vmem>>, vector<1x1x32xf32>
    %995 = vector.shape_cast %994 : vector<1x1x32xf32> to vector<1x32xf32>
    %996 = vector.broadcast %995 : vector<1x32xf32> to vector<16x32xf32>
    %997 = arith.addf %993, %996 : vector<16x32xf32>
    %998 = arith.addf %968, %997 : vector<16x32xf32>
    %c1_402 = arith.constant 1 : index
    %c0_403 = arith.constant 0 : index
    %c0_404 = arith.constant 0 : index
    %999 = vector.load %arg42[%c1_402, %c0_403, %c0_404] : memref<2x1x32xf32, #tpu.memory_space<vmem>>, vector<1x1x32xf32>
    %1000 = vector.shape_cast %999 : vector<1x1x32xf32> to vector<1x32xf32>
    %c1_405 = arith.constant 1 : index
    %c0_406 = arith.constant 0 : index
    %c0_407 = arith.constant 0 : index
    %1001 = vector.load %arg43[%c1_405, %c0_406, %c0_407] : memref<2x1x32xf32, #tpu.memory_space<vmem>>, vector<1x1x32xf32>
    %1002 = vector.shape_cast %1001 : vector<1x1x32xf32> to vector<1x32xf32>
    %cst_408 = arith.constant dense<0.000000e+00> : vector<16xf32>
    %1003 = vector.multi_reduction <add>, %998, %cst_408 [1] : vector<16x32xf32> to vector<16xf32>
    %1004 = vector.shape_cast %1003 : vector<16xf32> to vector<16x1xf32>
    %cst_409 = arith.constant 3.200000e+01 : f32
    %1005 = vector.broadcast %cst_409 : f32 to vector<16x1xf32>
    %1006 = arith.divf %1004, %1005 : vector<16x1xf32>
    %1007 = vector.broadcast %1006 : vector<16x1xf32> to vector<16x32xf32>
    %1008 = arith.subf %998, %1007 : vector<16x32xf32>
    %1009 = arith.mulf %1008, %1008 : vector<16x32xf32>
    %cst_410 = arith.constant dense<0.000000e+00> : vector<16xf32>
    %1010 = vector.multi_reduction <add>, %1009, %cst_410 [1] : vector<16x32xf32> to vector<16xf32>
    %1011 = vector.shape_cast %1010 : vector<16xf32> to vector<16x1xf32>
    %cst_411 = arith.constant 3.200000e+01 : f32
    %1012 = vector.broadcast %cst_411 : f32 to vector<16x1xf32>
    %1013 = arith.divf %1011, %1012 : vector<16x1xf32>
    %cst_412 = arith.constant 9.99999996E-13 : f32
    %1014 = vector.broadcast %cst_412 : f32 to vector<16x1xf32>
    %1015 = arith.addf %1013, %1014 : vector<16x1xf32>
    %1016 = math.rsqrt %1015 : vector<16x1xf32>
    %1017 = vector.broadcast %1016 : vector<16x1xf32> to vector<16x32xf32>
    %1018 = arith.mulf %1008, %1017 : vector<16x32xf32>
    %1019 = vector.broadcast %1000 : vector<1x32xf32> to vector<16x32xf32>
    %1020 = arith.mulf %1018, %1019 : vector<16x32xf32>
    %1021 = vector.broadcast %1002 : vector<1x32xf32> to vector<16x32xf32>
    %1022 = arith.addf %1020, %1021 : vector<16x32xf32>
    %1023 = vector.extract_strided_slice %1022 {offsets = [0, 0], sizes = [8, 32], strides = [1, 1]} : vector<16x32xf32> to vector<8x32xf32>
    %cst_413 = arith.constant dense<0.000000e+00> : vector<32xf32>
    %1024 = vector.multi_reduction <add>, %1023, %cst_413 [0] : vector<8x32xf32> to vector<32xf32>
    %1025 = vector.shape_cast %1024 : vector<32xf32> to vector<1x32xf32>
    %cst_414 = arith.constant 8.000000e+00 : f32
    %1026 = vector.broadcast %cst_414 : f32 to vector<1x32xf32>
    %1027 = arith.divf %1025, %1026 : vector<1x32xf32>
    %1028 = vector.extract_strided_slice %1022 {offsets = [8, 0], sizes = [8, 32], strides = [1, 1]} : vector<16x32xf32> to vector<8x32xf32>
    %cst_415 = arith.constant dense<0.000000e+00> : vector<32xf32>
    %1029 = vector.multi_reduction <add>, %1028, %cst_415 [0] : vector<8x32xf32> to vector<32xf32>
    %1030 = vector.shape_cast %1029 : vector<32xf32> to vector<1x32xf32>
    %cst_416 = arith.constant 8.000000e+00 : f32
    %1031 = vector.broadcast %cst_416 : f32 to vector<1x32xf32>
    %1032 = arith.divf %1030, %1031 : vector<1x32xf32>
    %1033 = tpu.concatenate %1027, %1032 in 0 : vector<1x32xf32>, vector<1x32xf32> -> vector<2x32xf32>
    %c0_417 = arith.constant 0 : index
    %c0_418 = arith.constant 0 : index
    %1034 = vector.load %arg44[%c0_417, %c0_418] : memref<32x64xbf16, #tpu.memory_space<vmem>>, vector<32x64xbf16>
    %1035 = arith.truncf %1033 : vector<2x32xf32> to vector<2x32xbf16>
    %cst_419 = arith.constant dense<0.000000e+00> : vector<2x64xf32>
    %1036 = tpu.matmul %1035, %1034, %cst_419 {dimension_numbers = #tpu.dot_dimension_numbers<[1], [0], [0], [1], [0, 0, 1, 1], [], []>} : vector<2x32xbf16>, vector<32x64xbf16>, vector<2x64xf32> -> vector<2x64xf32>
    %c0_420 = arith.constant 0 : index
    %c0_421 = arith.constant 0 : index
    %1037 = vector.load %arg45[%c0_420, %c0_421] : memref<1x64xf32, #tpu.memory_space<vmem>>, vector<1x64xf32>
    %1038 = vector.broadcast %1037 : vector<1x64xf32> to vector<2x64xf32>
    %1039 = arith.addf %1036, %1038 : vector<2x64xf32>
    %cst_422 = arith.constant 7.500000e-01 : f32
    %1040 = vector.broadcast %cst_422 : f32 to vector<2x64xf32>
    %1041 = arith.mulf %1040, %591 : vector<2x64xf32>
    %cst_423 = arith.constant 2.500000e-01 : f32
    %1042 = vector.broadcast %cst_423 : f32 to vector<2x64xf32>
    %1043 = arith.mulf %1042, %1039 : vector<2x64xf32>
    %1044 = arith.addf %1041, %1043 : vector<2x64xf32>
    %c0_424 = arith.constant 0 : index
    %c0_425 = arith.constant 0 : index
    %1045 = vector.load %arg46[%c0_424, %c0_425] : memref<64x256xbf16, #tpu.memory_space<vmem>>, vector<64x256xbf16>
    %1046 = arith.truncf %1044 : vector<2x64xf32> to vector<2x64xbf16>
    %cst_426 = arith.constant dense<0.000000e+00> : vector<2x256xf32>
    %1047 = tpu.matmul %1046, %1045, %cst_426 {dimension_numbers = #tpu.dot_dimension_numbers<[1], [0], [0], [1], [0, 0, 1, 1], [], []>} : vector<2x64xbf16>, vector<64x256xbf16>, vector<2x256xf32> -> vector<2x256xf32>
    %c0_427 = arith.constant 0 : index
    %c0_428 = arith.constant 0 : index
    %1048 = vector.load %arg47[%c0_427, %c0_428] : memref<1x256xf32, #tpu.memory_space<vmem>>, vector<1x256xf32>
    %1049 = vector.broadcast %1048 : vector<1x256xf32> to vector<2x256xf32>
    %1050 = arith.addf %1047, %1049 : vector<2x256xf32>
    %1051 = arith.mulf %1050, %1050 : vector<2x256xf32>
    %1052 = arith.mulf %1050, %1051 : vector<2x256xf32>
    %cst_429 = arith.constant 4.471500e-02 : f32
    %1053 = vector.broadcast %cst_429 : f32 to vector<2x256xf32>
    %1054 = arith.mulf %1053, %1052 : vector<2x256xf32>
    %1055 = arith.addf %1050, %1054 : vector<2x256xf32>
    %cst_430 = arith.constant 0.797884583 : f32
    %1056 = vector.broadcast %cst_430 : f32 to vector<2x256xf32>
    %1057 = arith.mulf %1056, %1055 : vector<2x256xf32>
    %1058 = math.tanh %1057 : vector<2x256xf32>
    %cst_431 = arith.constant 1.000000e+00 : f32
    %1059 = vector.broadcast %cst_431 : f32 to vector<2x256xf32>
    %1060 = arith.addf %1059, %1058 : vector<2x256xf32>
    %cst_432 = arith.constant 5.000000e-01 : f32
    %1061 = vector.broadcast %cst_432 : f32 to vector<2x256xf32>
    %1062 = arith.mulf %1061, %1060 : vector<2x256xf32>
    %1063 = arith.mulf %1050, %1062 : vector<2x256xf32>
    %c0_433 = arith.constant 0 : index
    %c0_434 = arith.constant 0 : index
    %1064 = vector.load %arg48[%c0_433, %c0_434] : memref<256x128xbf16, #tpu.memory_space<vmem>>, vector<256x128xbf16>
    %1065 = arith.truncf %1063 : vector<2x256xf32> to vector<2x256xbf16>
    %cst_435 = arith.constant dense<0.000000e+00> : vector<2x128xf32>
    %1066 = tpu.matmul %1065, %1064, %cst_435 {dimension_numbers = #tpu.dot_dimension_numbers<[1], [0], [0], [1], [0, 0, 1, 1], [], []>} : vector<2x256xbf16>, vector<256x128xbf16>, vector<2x128xf32> -> vector<2x128xf32>
    %c0_436 = arith.constant 0 : index
    %c0_437 = arith.constant 0 : index
    %1067 = vector.load %arg49[%c0_436, %c0_437] : memref<1x128xf32, #tpu.memory_space<vmem>>, vector<1x128xf32>
    %1068 = vector.broadcast %1067 : vector<1x128xf32> to vector<2x128xf32>
    %1069 = arith.addf %1066, %1068 : vector<2x128xf32>
    %1070 = arith.mulf %1069, %1069 : vector<2x128xf32>
    %1071 = arith.mulf %1069, %1070 : vector<2x128xf32>
    %cst_438 = arith.constant 4.471500e-02 : f32
    %1072 = vector.broadcast %cst_438 : f32 to vector<2x128xf32>
    %1073 = arith.mulf %1072, %1071 : vector<2x128xf32>
    %1074 = arith.addf %1069, %1073 : vector<2x128xf32>
    %cst_439 = arith.constant 0.797884583 : f32
    %1075 = vector.broadcast %cst_439 : f32 to vector<2x128xf32>
    %1076 = arith.mulf %1075, %1074 : vector<2x128xf32>
    %1077 = math.tanh %1076 : vector<2x128xf32>
    %cst_440 = arith.constant 1.000000e+00 : f32
    %1078 = vector.broadcast %cst_440 : f32 to vector<2x128xf32>
    %1079 = arith.addf %1078, %1077 : vector<2x128xf32>
    %cst_441 = arith.constant 5.000000e-01 : f32
    %1080 = vector.broadcast %cst_441 : f32 to vector<2x128xf32>
    %1081 = arith.mulf %1080, %1079 : vector<2x128xf32>
    %1082 = arith.mulf %1069, %1081 : vector<2x128xf32>
    %c0_442 = arith.constant 0 : index
    %c0_443 = arith.constant 0 : index
    %1083 = vector.load %arg50[%c0_442, %c0_443] : memref<128x64xbf16, #tpu.memory_space<vmem>>, vector<128x64xbf16>
    %1084 = arith.truncf %1082 : vector<2x128xf32> to vector<2x128xbf16>
    %cst_444 = arith.constant dense<0.000000e+00> : vector<2x64xf32>
    %1085 = tpu.matmul %1084, %1083, %cst_444 {dimension_numbers = #tpu.dot_dimension_numbers<[1], [0], [0], [1], [0, 0, 1, 1], [], []>} : vector<2x128xbf16>, vector<128x64xbf16>, vector<2x64xf32> -> vector<2x64xf32>
    %c0_445 = arith.constant 0 : index
    %c0_446 = arith.constant 0 : index
    %1086 = vector.load %arg51[%c0_445, %c0_446] : memref<1x64xf32, #tpu.memory_space<vmem>>, vector<1x64xf32>
    %1087 = vector.broadcast %1086 : vector<1x64xf32> to vector<2x64xf32>
    %1088 = arith.addf %1085, %1087 : vector<2x64xf32>
    %1089 = arith.mulf %1088, %1088 : vector<2x64xf32>
    %1090 = arith.mulf %1088, %1089 : vector<2x64xf32>
    %cst_447 = arith.constant 4.471500e-02 : f32
    %1091 = vector.broadcast %cst_447 : f32 to vector<2x64xf32>
    %1092 = arith.mulf %1091, %1090 : vector<2x64xf32>
    %1093 = arith.addf %1088, %1092 : vector<2x64xf32>
    %cst_448 = arith.constant 0.797884583 : f32
    %1094 = vector.broadcast %cst_448 : f32 to vector<2x64xf32>
    %1095 = arith.mulf %1094, %1093 : vector<2x64xf32>
    %1096 = math.tanh %1095 : vector<2x64xf32>
    %cst_449 = arith.constant 1.000000e+00 : f32
    %1097 = vector.broadcast %cst_449 : f32 to vector<2x64xf32>
    %1098 = arith.addf %1097, %1096 : vector<2x64xf32>
    %cst_450 = arith.constant 5.000000e-01 : f32
    %1099 = vector.broadcast %cst_450 : f32 to vector<2x64xf32>
    %1100 = arith.mulf %1099, %1098 : vector<2x64xf32>
    %1101 = arith.mulf %1088, %1100 : vector<2x64xf32>
    %c0_451 = arith.constant 0 : index
    %c0_452 = arith.constant 0 : index
    %1102 = vector.load %arg52[%c0_451, %c0_452] : memref<64x32xbf16, #tpu.memory_space<vmem>>, vector<64x32xbf16>
    %1103 = arith.truncf %1101 : vector<2x64xf32> to vector<2x64xbf16>
    %cst_453 = arith.constant dense<0.000000e+00> : vector<2x32xf32>
    %1104 = tpu.matmul %1103, %1102, %cst_453 {dimension_numbers = #tpu.dot_dimension_numbers<[1], [0], [0], [1], [0, 0, 1, 1], [], []>} : vector<2x64xbf16>, vector<64x32xbf16>, vector<2x32xf32> -> vector<2x32xf32>
    %c0_454 = arith.constant 0 : index
    %c0_455 = arith.constant 0 : index
    %1105 = vector.load %arg53[%c0_454, %c0_455] : memref<1x32xf32, #tpu.memory_space<vmem>>, vector<1x32xf32>
    %1106 = vector.broadcast %1105 : vector<1x32xf32> to vector<2x32xf32>
    %1107 = arith.addf %1104, %1106 : vector<2x32xf32>
    %1108 = arith.mulf %1107, %1107 : vector<2x32xf32>
    %1109 = arith.mulf %1107, %1108 : vector<2x32xf32>
    %cst_456 = arith.constant 4.471500e-02 : f32
    %1110 = vector.broadcast %cst_456 : f32 to vector<2x32xf32>
    %1111 = arith.mulf %1110, %1109 : vector<2x32xf32>
    %1112 = arith.addf %1107, %1111 : vector<2x32xf32>
    %cst_457 = arith.constant 0.797884583 : f32
    %1113 = vector.broadcast %cst_457 : f32 to vector<2x32xf32>
    %1114 = arith.mulf %1113, %1112 : vector<2x32xf32>
    %1115 = math.tanh %1114 : vector<2x32xf32>
    %cst_458 = arith.constant 1.000000e+00 : f32
    %1116 = vector.broadcast %cst_458 : f32 to vector<2x32xf32>
    %1117 = arith.addf %1116, %1115 : vector<2x32xf32>
    %cst_459 = arith.constant 5.000000e-01 : f32
    %1118 = vector.broadcast %cst_459 : f32 to vector<2x32xf32>
    %1119 = arith.mulf %1118, %1117 : vector<2x32xf32>
    %1120 = arith.mulf %1107, %1119 : vector<2x32xf32>
    %c0_460 = arith.constant 0 : index
    %c0_461 = arith.constant 0 : index
    %1121 = vector.load %arg54[%c0_460, %c0_461] : memref<32x1xbf16, #tpu.memory_space<vmem>>, vector<32x1xbf16>
    %1122 = arith.truncf %1120 : vector<2x32xf32> to vector<2x32xbf16>
    %cst_462 = arith.constant dense<0.000000e+00> : vector<2x1xf32>
    %1123 = tpu.matmul %1122, %1121, %cst_462 {dimension_numbers = #tpu.dot_dimension_numbers<[1], [0], [0], [1], [0, 0, 1, 1], [], []>} : vector<2x32xbf16>, vector<32x1xbf16>, vector<2x1xf32> -> vector<2x1xf32>
    %c0_463 = arith.constant 0 : index
    %c0_464 = arith.constant 0 : index
    %1124 = vector.load %arg55[%c0_463, %c0_464] : memref<1x1xf32, #tpu.memory_space<vmem>>, vector<1x1xf32>
    %1125 = vector.broadcast %1124 : vector<1x1xf32> to vector<2x1xf32>
    %1126 = arith.addf %1123, %1125 : vector<2x1xf32>
    %cst_465 = arith.constant 0.000000e+00 : f32
    %1127 = vector.broadcast %cst_465 : f32 to vector<2x1xf32>
    %1128 = arith.maximumf %1126, %1127 : vector<2x1xf32>
    %c0_466 = arith.constant 0 : index
    %c0_467 = arith.constant 0 : index
    %1129 = vector.load %arg56[%c0_466, %c0_467] : memref<2x1xf32, #tpu.memory_space<vmem>>, vector<2x1xf32>
    tpu.vector_store %arg56[%c0_466, %c0_467], %1128 {strides = array<i32>} : memref<2x1xf32, #tpu.memory_space<vmem>>, vector<2x1xf32>,
    return
  }
  func.func @transform_0(%arg0: i32) -> (i32, i32) {
    %c0_i32 = arith.constant 0 : i32
    %c0_i32_0 = arith.constant 0 : i32
    %c0_i32_1 = arith.constant 0 : i32
    return %c0_i32, %c0_i32_0 : i32, i32
  }
  func.func @transform_1(%arg0: i32) -> (i32, i32) {
    %c0_i32 = arith.constant 0 : i32
    %c0_i32_0 = arith.constant 0 : i32
    %c0_i32_1 = arith.constant 0 : i32
    return %c0_i32, %c0_i32_0 : i32, i32
  }
  func.func @transform_2(%arg0: i32) -> (i32, i32) {
    %c0_i32 = arith.constant 0 : i32
    %c0_i32_0 = arith.constant 0 : i32
    %c0_i32_1 = arith.constant 0 : i32
    return %c0_i32, %c0_i32_0 : i32, i32
  }
  func.func @transform_3(%arg0: i32) -> (i32, i32) {
    %c0_i32 = arith.constant 0 : i32
    %c0_i32_0 = arith.constant 0 : i32
    %c0_i32_1 = arith.constant 0 : i32
    return %c0_i32, %c0_i32_0 : i32, i32
  }
  func.func @transform_4(%arg0: i32) -> (i32, i32) {
    %c0_i32 = arith.constant 0 : i32
    %c0_i32_0 = arith.constant 0 : i32
    %c0_i32_1 = arith.constant 0 : i32
    return %c0_i32, %c0_i32_0 : i32, i32
  }
  func.func @transform_5(%arg0: i32) -> (i32, i32) {
    %c0_i32 = arith.constant 0 : i32
    %c0_i32_0 = arith.constant 0 : i32
    %c0_i32_1 = arith.constant 0 : i32
    return %c0_i32, %c0_i32_0 : i32, i32
  }
  func.func @transform_6(%arg0: i32) -> (i32, i32) {
    %c0_i32 = arith.constant 0 : i32
    %c0_i32_0 = arith.constant 0 : i32
    %c0_i32_1 = arith.constant 0 : i32
    return %c0_i32, %c0_i32_0 : i32, i32
  }
  func.func @transform_7(%arg0: i32) -> (i32, i32, i32) {
    %c0_i32 = arith.constant 0 : i32
    %c0_i32_0 = arith.constant 0 : i32
    %c0_i32_1 = arith.constant 0 : i32
    %c0_i32_2 = arith.constant 0 : i32
    return %c0_i32, %c0_i32_0, %c0_i32_1 : i32, i32, i32
  }
  func.func @transform_8(%arg0: i32) -> (i32, i32, i32) {
    %c0_i32 = arith.constant 0 : i32
    %c0_i32_0 = arith.constant 0 : i32
    %c0_i32_1 = arith.constant 0 : i32
    %c0_i32_2 = arith.constant 0 : i32
    return %c0_i32, %c0_i32_0, %c0_i32_1 : i32, i32, i32
  }
  func.func @transform_9(%arg0: i32) -> (i32, i32, i32) {
    %c0_i32 = arith.constant 0 : i32
    %c0_i32_0 = arith.constant 0 : i32
    %c0_i32_1 = arith.constant 0 : i32
    %c0_i32_2 = arith.constant 0 : i32
    return %c0_i32, %c0_i32_0, %c0_i32_1 : i32, i32, i32
  }
  func.func @transform_10(%arg0: i32) -> (i32, i32, i32) {
    %c0_i32 = arith.constant 0 : i32
    %c0_i32_0 = arith.constant 0 : i32
    %c0_i32_1 = arith.constant 0 : i32
    %c0_i32_2 = arith.constant 0 : i32
    return %c0_i32, %c0_i32_0, %c0_i32_1 : i32, i32, i32
  }
  func.func @transform_11(%arg0: i32) -> (i32, i32, i32) {
    %c0_i32 = arith.constant 0 : i32
    %c0_i32_0 = arith.constant 0 : i32
    %c0_i32_1 = arith.constant 0 : i32
    %c0_i32_2 = arith.constant 0 : i32
    return %c0_i32, %c0_i32_0, %c0_i32_1 : i32, i32, i32
  }
  func.func @transform_12(%arg0: i32) -> (i32, i32, i32) {
    %c0_i32 = arith.constant 0 : i32
    %c0_i32_0 = arith.constant 0 : i32
    %c0_i32_1 = arith.constant 0 : i32
    %c0_i32_2 = arith.constant 0 : i32
    return %c0_i32, %c0_i32_0, %c0_i32_1 : i32, i32, i32
  }
  func.func @transform_13(%arg0: i32) -> (i32, i32, i32) {
    %c0_i32 = arith.constant 0 : i32
    %c0_i32_0 = arith.constant 0 : i32
    %c0_i32_1 = arith.constant 0 : i32
    %c0_i32_2 = arith.constant 0 : i32
    return %c0_i32, %c0_i32_0, %c0_i32_1 : i32, i32, i32
  }
  func.func @transform_14(%arg0: i32) -> (i32, i32, i32) {
    %c0_i32 = arith.constant 0 : i32
    %c0_i32_0 = arith.constant 0 : i32
    %c0_i32_1 = arith.constant 0 : i32
    %c0_i32_2 = arith.constant 0 : i32
    return %c0_i32, %c0_i32_0, %c0_i32_1 : i32, i32, i32
  }
  func.func @transform_15(%arg0: i32) -> (i32, i32, i32) {
    %c0_i32 = arith.constant 0 : i32
    %c0_i32_0 = arith.constant 0 : i32
    %c0_i32_1 = arith.constant 0 : i32
    %c0_i32_2 = arith.constant 0 : i32
    return %c0_i32, %c0_i32_0, %c0_i32_1 : i32, i32, i32
  }
  func.func @transform_16(%arg0: i32) -> (i32, i32, i32) {
    %c0_i32 = arith.constant 0 : i32
    %c0_i32_0 = arith.constant 0 : i32
    %c0_i32_1 = arith.constant 0 : i32
    %c0_i32_2 = arith.constant 0 : i32
    return %c0_i32, %c0_i32_0, %c0_i32_1 : i32, i32, i32
  }
  func.func @transform_17(%arg0: i32) -> (i32, i32, i32) {
    %c0_i32 = arith.constant 0 : i32
    %c0_i32_0 = arith.constant 0 : i32
    %c0_i32_1 = arith.constant 0 : i32
    %c0_i32_2 = arith.constant 0 : i32
    return %c0_i32, %c0_i32_0, %c0_i32_1 : i32, i32, i32
  }
  func.func @transform_18(%arg0: i32) -> (i32, i32, i32) {
    %c0_i32 = arith.constant 0 : i32
    %c0_i32_0 = arith.constant 0 : i32
    %c0_i32_1 = arith.constant 0 : i32
    %c0_i32_2 = arith.constant 0 : i32
    return %c0_i32, %c0_i32_0, %c0_i32_1 : i32, i32, i32
  }
  func.func @transform_19(%arg0: i32) -> (i32, i32, i32) {
    %c0_i32 = arith.constant 0 : i32
    %c0_i32_0 = arith.constant 0 : i32
    %c0_i32_1 = arith.constant 0 : i32
    %c0_i32_2 = arith.constant 0 : i32
    return %c0_i32, %c0_i32_0, %c0_i32_1 : i32, i32, i32
  }
  func.func @transform_20(%arg0: i32) -> (i32, i32, i32) {
    %c0_i32 = arith.constant 0 : i32
    %c0_i32_0 = arith.constant 0 : i32
    %c0_i32_1 = arith.constant 0 : i32
    %c0_i32_2 = arith.constant 0 : i32
    return %c0_i32, %c0_i32_0, %c0_i32_1 : i32, i32, i32
  }
  func.func @transform_21(%arg0: i32) -> (i32, i32) {
    %c0_i32 = arith.constant 0 : i32
    %c0_i32_0 = arith.constant 0 : i32
    %c0_i32_1 = arith.constant 0 : i32
    return %c0_i32, %c0_i32_0 : i32, i32
  }
  func.func @transform_22(%arg0: i32) -> (i32, i32) {
    %c0_i32 = arith.constant 0 : i32
    %c0_i32_0 = arith.constant 0 : i32
    %c0_i32_1 = arith.constant 0 : i32
    return %c0_i32, %c0_i32_0 : i32, i32
  }
  func.func @transform_23(%arg0: i32) -> (i32, i32) {
    %c0_i32 = arith.constant 0 : i32
    %c0_i32_0 = arith.constant 0 : i32
    %c0_i32_1 = arith.constant 0 : i32
    return %c0_i32, %c0_i32_0 : i32, i32
  }
  func.func @transform_24(%arg0: i32) -> (i32, i32) {
    %c0_i32 = arith.constant 0 : i32
    %c0_i32_0 = arith.constant 0 : i32
    %c0_i32_1 = arith.constant 0 : i32
    return %c0_i32, %c0_i32_0 : i32, i32
  }
  func.func @transform_25(%arg0: i32) -> (i32, i32) {
    %c0_i32 = arith.constant 0 : i32
    %c0_i32_0 = arith.constant 0 : i32
    %c0_i32_1 = arith.constant 0 : i32
    return %c0_i32, %c0_i32_0 : i32, i32
  }
  func.func @transform_26(%arg0: i32) -> (i32, i32) {
    %c0_i32 = arith.constant 0 : i32
    %c0_i32_0 = arith.constant 0 : i32
    %c0_i32_1 = arith.constant 0 : i32
    return %c0_i32, %c0_i32_0 : i32, i32
  }
  func.func @transform_27(%arg0: i32) -> (i32, i32, i32) {
    %c0_i32 = arith.constant 0 : i32
    %c0_i32_0 = arith.constant 0 : i32
    %c0_i32_1 = arith.constant 0 : i32
    %c0_i32_2 = arith.constant 0 : i32
    return %c0_i32, %c0_i32_0, %c0_i32_1 : i32, i32, i32
  }
  func.func @transform_28(%arg0: i32) -> (i32, i32, i32) {
    %c0_i32 = arith.constant 0 : i32
    %c0_i32_0 = arith.constant 0 : i32
    %c0_i32_1 = arith.constant 0 : i32
    %c0_i32_2 = arith.constant 0 : i32
    return %c0_i32, %c0_i32_0, %c0_i32_1 : i32, i32, i32
  }
  func.func @transform_29(%arg0: i32) -> (i32, i32, i32) {
    %c0_i32 = arith.constant 0 : i32
    %c0_i32_0 = arith.constant 0 : i32
    %c0_i32_1 = arith.constant 0 : i32
    %c0_i32_2 = arith.constant 0 : i32
    return %c0_i32, %c0_i32_0, %c0_i32_1 : i32, i32, i32
  }
  func.func @transform_30(%arg0: i32) -> (i32, i32, i32) {
    %c0_i32 = arith.constant 0 : i32
    %c0_i32_0 = arith.constant 0 : i32
    %c0_i32_1 = arith.constant 0 : i32
    %c0_i32_2 = arith.constant 0 : i32
    return %c0_i32, %c0_i32_0, %c0_i32_1 : i32, i32, i32
  }
  func.func @transform_31(%arg0: i32) -> (i32, i32, i32) {
    %c0_i32 = arith.constant 0 : i32
    %c0_i32_0 = arith.constant 0 : i32
    %c0_i32_1 = arith.constant 0 : i32
    %c0_i32_2 = arith.constant 0 : i32
    return %c0_i32, %c0_i32_0, %c0_i32_1 : i32, i32, i32
  }
  func.func @transform_32(%arg0: i32) -> (i32, i32, i32) {
    %c0_i32 = arith.constant 0 : i32
    %c0_i32_0 = arith.constant 0 : i32
    %c0_i32_1 = arith.constant 0 : i32
    %c0_i32_2 = arith.constant 0 : i32
    return %c0_i32, %c0_i32_0, %c0_i32_1 : i32, i32, i32
  }
  func.func @transform_33(%arg0: i32) -> (i32, i32, i32) {
    %c0_i32 = arith.constant 0 : i32
    %c0_i32_0 = arith.constant 0 : i32
    %c0_i32_1 = arith.constant 0 : i32
    %c0_i32_2 = arith.constant 0 : i32
    return %c0_i32, %c0_i32_0, %c0_i32_1 : i32, i32, i32
  }
  func.func @transform_34(%arg0: i32) -> (i32, i32, i32) {
    %c0_i32 = arith.constant 0 : i32
    %c0_i32_0 = arith.constant 0 : i32
    %c0_i32_1 = arith.constant 0 : i32
    %c0_i32_2 = arith.constant 0 : i32
    return %c0_i32, %c0_i32_0, %c0_i32_1 : i32, i32, i32
  }
  func.func @transform_35(%arg0: i32) -> (i32, i32, i32) {
    %c0_i32 = arith.constant 0 : i32
    %c0_i32_0 = arith.constant 0 : i32
    %c0_i32_1 = arith.constant 0 : i32
    %c0_i32_2 = arith.constant 0 : i32
    return %c0_i32, %c0_i32_0, %c0_i32_1 : i32, i32, i32
  }
  func.func @transform_36(%arg0: i32) -> (i32, i32, i32) {
    %c0_i32 = arith.constant 0 : i32
    %c0_i32_0 = arith.constant 0 : i32
    %c0_i32_1 = arith.constant 0 : i32
    %c0_i32_2 = arith.constant 0 : i32
    return %c0_i32, %c0_i32_0, %c0_i32_1 : i32, i32, i32
  }
  func.func @transform_37(%arg0: i32) -> (i32, i32, i32) {
    %c0_i32 = arith.constant 0 : i32
    %c0_i32_0 = arith.constant 0 : i32
    %c0_i32_1 = arith.constant 0 : i32
    %c0_i32_2 = arith.constant 0 : i32
    return %c0_i32, %c0_i32_0, %c0_i32_1 : i32, i32, i32
  }
  func.func @transform_38(%arg0: i32) -> (i32, i32, i32) {
    %c0_i32 = arith.constant 0 : i32
    %c0_i32_0 = arith.constant 0 : i32
    %c0_i32_1 = arith.constant 0 : i32
    %c0_i32_2 = arith.constant 0 : i32
    return %c0_i32, %c0_i32_0, %c0_i32_1 : i32, i32, i32
  }
  func.func @transform_39(%arg0: i32) -> (i32, i32, i32) {
    %c0_i32 = arith.constant 0 : i32
    %c0_i32_0 = arith.constant 0 : i32
    %c0_i32_1 = arith.constant 0 : i32
    %c0_i32_2 = arith.constant 0 : i32
    return %c0_i32, %c0_i32_0, %c0_i32_1 : i32, i32, i32
  }
  func.func @transform_40(%arg0: i32) -> (i32, i32, i32) {
    %c0_i32 = arith.constant 0 : i32
    %c0_i32_0 = arith.constant 0 : i32
    %c0_i32_1 = arith.constant 0 : i32
    %c0_i32_2 = arith.constant 0 : i32
    return %c0_i32, %c0_i32_0, %c0_i32_1 : i32, i32, i32
  }
  func.func @transform_41(%arg0: i32) -> (i32, i32, i32) {
    %c0_i32 = arith.constant 0 : i32
    %c0_i32_0 = arith.constant 0 : i32
    %c0_i32_1 = arith.constant 0 : i32
    %c0_i32_2 = arith.constant 0 : i32
    return %c0_i32, %c0_i32_0, %c0_i32_1 : i32, i32, i32
  }
  func.func @transform_42(%arg0: i32) -> (i32, i32, i32) {
    %c0_i32 = arith.constant 0 : i32
    %c0_i32_0 = arith.constant 0 : i32
    %c0_i32_1 = arith.constant 0 : i32
    %c0_i32_2 = arith.constant 0 : i32
    return %c0_i32, %c0_i32_0, %c0_i32_1 : i32, i32, i32
  }
  func.func @transform_43(%arg0: i32) -> (i32, i32) {
    %c0_i32 = arith.constant 0 : i32
    %c0_i32_0 = arith.constant 0 : i32
    %c0_i32_1 = arith.constant 0 : i32
    return %c0_i32, %c0_i32_0 : i32, i32
  }
  func.func @transform_44(%arg0: i32) -> (i32, i32) {
    %c0_i32 = arith.constant 0 : i32
    %c0_i32_0 = arith.constant 0 : i32
    %c0_i32_1 = arith.constant 0 : i32
    return %c0_i32, %c0_i32_0 : i32, i32
  }
  func.func @transform_45(%arg0: i32) -> (i32, i32) {
    %c0_i32 = arith.constant 0 : i32
    %c0_i32_0 = arith.constant 0 : i32
    %c0_i32_1 = arith.constant 0 : i32
    return %c0_i32, %c0_i32_0 : i32, i32
  }
  func.func @transform_46(%arg0: i32) -> (i32, i32) {
    %c0_i32 = arith.constant 0 : i32
    %c0_i32_0 = arith.constant 0 : i32
    %c0_i32_1 = arith.constant 0 : i32
    return %c0_i32, %c0_i32_0 : i32, i32
  }
  func.func @transform_47(%arg0: i32) -> (i32, i32) {
    %c0_i32 = arith.constant 0 : i32
    %c0_i32_0 = arith.constant 0 : i32
    %c0_i32_1 = arith.constant 0 : i32
    return %c0_i32, %c0_i32_0 : i32, i32
  }
  func.func @transform_48(%arg0: i32) -> (i32, i32) {
    %c0_i32 = arith.constant 0 : i32
    %c0_i32_0 = arith.constant 0 : i32
    %c0_i32_1 = arith.constant 0 : i32
    return %c0_i32, %c0_i32_0 : i32, i32
  }
  func.func @transform_49(%arg0: i32) -> (i32, i32) {
    %c0_i32 = arith.constant 0 : i32
    %c0_i32_0 = arith.constant 0 : i32
    %c0_i32_1 = arith.constant 0 : i32
    return %c0_i32, %c0_i32_0 : i32, i32
  }
  func.func @transform_50(%arg0: i32) -> (i32, i32) {
    %c0_i32 = arith.constant 0 : i32
    %c0_i32_0 = arith.constant 0 : i32
    %c0_i32_1 = arith.constant 0 : i32
    return %c0_i32, %c0_i32_0 : i32, i32
  }
  func.func @transform_51(%arg0: i32) -> (i32, i32) {
    %c0_i32 = arith.constant 0 : i32
    %c0_i32_0 = arith.constant 0 : i32
    %c0_i32_1 = arith.constant 0 : i32
    return %c0_i32, %c0_i32_0 : i32, i32
  }
  func.func @transform_52(%arg0: i32) -> (i32, i32) {
    %c0_i32 = arith.constant 0 : i32
    %c0_i32_0 = arith.constant 0 : i32
    %c0_i32_1 = arith.constant 0 : i32
    return %c0_i32, %c0_i32_0 : i32, i32
  }
  func.func @transform_53(%arg0: i32) -> (i32, i32) {
    %c0_i32 = arith.constant 0 : i32
    %c0_i32_0 = arith.constant 0 : i32
    %c0_i32_1 = arith.constant 0 : i32
    return %c0_i32, %c0_i32_0 : i32, i32
  }
  func.func @transform_54(%arg0: i32) -> (i32, i32) {
    %c0_i32 = arith.constant 0 : i32
    %c0_i32_0 = arith.constant 0 : i32
    %c0_i32_1 = arith.constant 0 : i32
    return %c0_i32, %c0_i32_0 : i32, i32
  }
  func.func @transform_55(%arg0: i32) -> (i32, i32) {
    %c0_i32 = arith.constant 0 : i32
    %c0_i32_0 = arith.constant 0 : i32
    %c0_i32_1 = arith.constant 0 : i32
    return %c0_i32, %c0_i32_0 : i32, i32
  }
}

</mosaic_0001>

<bundles_post_ra>
// kernel: _lambda_.1
= control target key start
LH: loop header
LB: loop body
LE: loop exit
PB: predicated region body
PF: predicated region fallthrough
CT: control target
= control target key end

     0   :  { %s9162_s3 = smov 2   ;;  %v9163_v35 = vmov 0.0   ;;  %vm9164_vm0 = vmmov 0   ;;  %vm549_vm1 = vcmask 1045504   ;;  %vm545_vm2 = vcmask 621568   ;;  %s9165_s10 = smov 3   ;;  %s10752_s0 = inlined_call_operand.smem [shape: u32[56], index: -1, kind: input, shape index: {}] }
   0x1   :  { %s9234_s6 = sld [smem:[%s10752_s0 + %s9162_s3]]   ;;  %s9166_s14 = smov 6   ;;  %v687_v62 = vlaneseq  ;;  %vm697_vm3 = vcmask 1040384   ;;  %vm714_vm4 = vcmask 517120   ;;  %vm699_vm5 = vcmask 1044480  }
   0x2   :  { %s9263_s9 = sld [smem:[%s10752_s0]]   ;;  %s9167_s18 = smov 4   ;;  %vm707_vm6 = vcmask 523264   ;;  %vm702_vm7 = vcmask 1041408   ;;  %vm969_vm8 = vcmask 1043456   ;;  %vm890_vm9 = vcmask 130048  }
   0x3   :  { %s7255_s13 = sld [smem:[%s10752_s0 + %s9165_s10]]   ;;  %s9168_s22 = smov 5   ;;  %v9307_v63 = vshrl.u32 %v687_v62, 7  ;;  %vm940_vm10 = vcmask 72704   ;;  %vm944_vm11 = vcmask 65536   ;;  %vm1418_vm12 = vcmask 261120  }
   0x4   :  { %s7258_s17 = sld [smem:[%s10752_s0 + %s9166_s14]]   ;;  %s9169_s26 = smov 9   ;;  %vm1421_vm13 = vcmask 392192  }
   0x5   :  { %s7256_s21 = sld [smem:[%s10752_s0 + %s9167_s18]]   ;;  %s9171_s30 = smov 7  }
   0x6   :  { %s7257_s25 = sld [smem:[%s10752_s0 + %s9168_s22]]   ;;  %s9172_s4 = smov 8  }
   0x7   :  { %v8699_v0 = vld [vmem:[%s9234_s6 + $0x40] sm:$0xff]   ;;  %v8703_v4 = vld [vmem:[%s9234_s6 + $0x48] sm:$0xff]   ;;  %v8707_v8 = vld [vmem:[%s9234_s6 + $0x50] sm:$0xff]   ;;  %s9339_s29 = sld [smem:[%s10752_s0 + %s9169_s26]]   ;;  %s9173_s8 = smov 16  }
   0x8   :  { %v8700_v1 = vld [vmem:[%s9234_s6] sm:$0xff]   ;;  %7736 = vmatprep.subr.bf16.mxu0 %v8699_v0  ;;  %v8704_v5 = vld [vmem:[%s9234_s6 + $0x8] sm:$0xff]   ;;  %v8708_v9 = vld [vmem:[%s9234_s6 + $0x10] sm:$0xff]   ;;  %s9356_s3 = sld [smem:[%s10752_s0 + %s9171_s30]]   ;;  %s9174_s12 = smov 10  }
   0x9   :  { %v8701_v2 = vld [vmem:[%s9234_s6 + $0xc0] sm:$0xff]   ;;  %7737 = vmatpush3.bf16.msra.mxu0 %v8700_v1  ;;  %v8705_v6 = vld [vmem:[%s9234_s6 + $0xc8] sm:$0xff]   ;;  %v8709_v10 = vld [vmem:[%s9234_s6 + $0xd0] sm:$0xff]   ;;  %s9361_s7 = sld [smem:[%s10752_s0 + %s9172_s4]]   ;;  %s9176_s16 = smov 48  }
   0xa   :  { %v8702_v3 = vld [vmem:[%s9234_s6 + $0x80] sm:$0xff]   ;;  %7758 = vmatprep.subr.bf16.mxu1 %v8701_v2  ;;  %7738 = vmatprep.subr.bf16.mxu0 %v8703_v4  ;;  %v8706_v7 = vld [vmem:[%s9234_s6 + $0x88] sm:$0xff]   ;;  %v8710_v11 = vld [vmem:[%s9234_s6 + $0x90] sm:$0xff]   ;;  %s9374_s11 = sld [smem:[%s10752_s0 + %s9173_s8]]   ;;  %s9178_s18 = smov 112  }
   0xb   :  { %7759 = vmatpush3.bf16.msra.mxu1 %v8702_v3  ;;  %v8711_v12 = vld [vmem:[%s9234_s6 + $0x58] sm:$0xff]   ;;  %v8715_v16 = vld [vmem:[%s9234_s6 + $0x60] sm:$0xff]   ;;  %v8719_v20 = vld [vmem:[%s9234_s6 + $0x68] sm:$0xff]   ;;  %s9379_s15 = sld [smem:[%s10752_s0 + %s9174_s12]]   ;;  %s9179_s19 = smov 96  }
   0xc   :  { %7760 = vmatprep.subr.bf16.mxu1 %v8705_v6  ;;  %v8712_v13 = vld [vmem:[%s9234_s6 + $0x18] sm:$0xff]   ;;  %v8716_v17 = vld [vmem:[%s9234_s6 + $0x20] sm:$0xff]   ;;  %v8720_v21 = vld [vmem:[%s9234_s6 + $0x28] sm:$0xff]   ;;  %v9310_v6 = vsub.s32 0, %v9307_v63  ;;  %s9180_s20 = smov 32   ;;  %s9182_s22 = smov 11  }
   0xd   :  { %7739 = vmatpush3.bf16.msra.mxu0 %v8704_v5  ;;  %v8713_v14 = vld [vmem:[%s9234_s6 + $0xd8] sm:$0xff]   ;;  %v8717_v18 = vld [vmem:[%s9234_s6 + $0xe0] sm:$0xff]   ;;  %v8721_v22 = vld [vmem:[%s9234_s6 + $0xe8] sm:$0xff]   ;;  %s9183_s26 = smov 12   ;;  %s9184_s1 = smov 13  }
   0xe   :  { %7740 = vmatprep.subr.bf16.mxu0 %v8707_v8  ;;  %v8714_v15 = vld [vmem:[%s9234_s6 + $0x98] sm:$0xff]   ;;  %v8718_v19 = vld [vmem:[%s9234_s6 + $0xa0] sm:$0xff]   ;;  %v8722_v23 = vld [vmem:[%s9234_s6 + $0xa8] sm:$0xff]   ;;  %s9702_s30 = sld [smem:[%s10752_s0 + %s9183_s26]]   ;;  %s9187_s24 = smov 18  }
   0xf   :  { %7761 = vmatpush3.bf16.msra.mxu1 %v8706_v7  ;;  %v8723_v24 = vld [vmem:[%s9234_s6 + $0x70] sm:$0xff]   ;;  %v8727_v28 = vld [vmem:[%s9234_s6 + $0x78] sm:$0xff]   ;;  %v234_v31 = vld [vmem:[%s9263_s9 + $0x8] sm:$0xff]  ;;  %s9707_s5 = sld [smem:[%s10752_s0 + %s9184_s1]]   ;;  %s9188_s1 = smov 17  }
  0x10   :  { %7762 = vmatprep.subr.bf16.mxu1 %v8709_v10  ;;  %v8724_v25 = vld [vmem:[%s9234_s6 + $0x30] sm:$0xff]   ;;  %v8728_v29 = vld [vmem:[%s9234_s6 + $0x38] sm:$0xff]   ;;  %v313_v32 = vpack.c.bf16 %v234_v31, %v234_v31  ;;  %v233_v34 = vld [vmem:[%s9263_s9] sm:$0xff]  ;;  %s9759_s28 = sld [smem:[%s10752_s0 + %s9187_s24]]   ;;  %s9196_s4 = smov 29  }
  0x11   :  { %7741 = vmatpush3.bf16.msra.mxu0 %v8708_v9  ;;  %v8725_v26 = vld [vmem:[%s9234_s6 + $0xf0] sm:$0xff]   ;;  %v8729_v30 = vld [vmem:[%s9234_s6 + $0xf8] sm:$0xff]   ;;  %v312_v37 = vpack.c.bf16 %v233_v34, %v233_v34  ;;  %v8731_v39 = vld [vmem:[%s9234_s6 + $0x100] sm:$0xff]   ;;  %s10270_s10 = sld [smem:[%s10752_s0 + %s9196_s4]]  }
  0x12   :  { %7742 = vmatprep.subr.bf16.mxu0 %v8711_v12  ;;  %v8726_v27 = vld [vmem:[%s9234_s6 + $0xb0] sm:$0xff]   ;;  %v8730_v33 = vld [vmem:[%s9234_s6 + $0xb8] sm:$0xff]   ;;  %585 = vmatprep.mubr.bf16.mxu0 %v313_v32  ;;  %v8732_v42 = vld [vmem:[%s9234_s6 + $0x108] sm:$0xff]  }
  0x13   :  { %7763 = vmatpush3.bf16.msra.mxu1 %v8710_v11  ;;  %v236_v36 = vld [vmem:[%s9263_s9 + $0x18] sm:$0xff]  ;;  %v235_v40 = vld [vmem:[%s9263_s9 + $0x10] sm:$0xff]  ;;  %v8735_v45 = vld [vmem:[%s9234_s6 + $0x120] sm:$0x3f]  }
  0x14   :  { %7764 = vmatprep.subr.bf16.mxu1 %v8713_v14  ;;  %v315_v38 = vpack.c.bf16 %v236_v36, %v236_v36  ;;  %v314_v41 = vpack.c.bf16 %v235_v40, %v235_v40  ;;  %v8733_v43 = vld [vmem:[%s9234_s6 + $0x110] sm:$0xff]   ;;  %v8734_v44 = vld [vmem:[%s9234_s6 + $0x118] sm:$0xff]   ;;  %v237_v46 = vld [vmem:[%s9263_s9 + $0x20] sm:$0xff]  ;;  %v551_v47 = vsel %vm549_vm1, %v8735_v45, 0  ;;  %s9185_s6 = smov 14   ;;  %s9189_s9 = smov 19  }
  0x15   :  { %7743 = vmatpush3.bf16.msra.mxu0 %v8712_v13  ;;  %v316_v48 = vpack.c.bf16 %v237_v46, %v237_v46  ;;  %v7308_v50 = vld [vmem:[%s7255_s13] ss:$0 sm:$0xff]  ;;  %v8741_v45 = vld [vmem:[%s9339_s29 + $0x14] ss:$8 sps:$4 sm:$0xff]   ;;  %v8739_v46 = vld [vmem:[%s9339_s29 + $0x10] ss:$8 sps:$4 sm:$0xff]   ;;  %s9743_s12 = sld [smem:[%s10752_s0 + %s9185_s6]]  }
  0x16   :  { %7744 = vmatprep.subr.bf16.mxu0 %v8715_v16  ;;  %625 = vmatprep.mubr.bf16.mxu1 %v315_v38  ;;  %v229_v0 = vld [vmem:[%s7258_s17] sm:$0x1f]  ;;  %s9177_s17 = smov 64   ;;  %s9186_s13 = smov 15  }
  0x17   :  { %7765 = vmatpush3.bf16.msra.mxu1 %v8714_v15  ;;  %v230_v1 = vld [vmem:[%s7256_s21] sm:$0x1]  ;;  %v674_v3 = vrot.slane %v229_v0, 1  ;;  %v677_v4 = vrot.slane %v229_v0, 5  ;;  %s9181_s21 = smov 80   ;;  %s9748_s23 = sld [smem:[%s10752_s0 + %s9186_s13]]  }
  0x18   :  { %7766 = vmatprep.subr.bf16.mxu1 %v8717_v18  ;;  %v232_v2 = vld [vmem:[%s7257_s25] sm:$0xf]  ;;  %v231_v5 = vadd.f32 %v230_v1, %v229_v0  ;;  %s9671_s25 = sld [smem:[%s10752_s0 + %s9182_s22]]   ;;  %s9190_s22 = smov 20  }
  0x19   :  { %7745 = vmatpush3.bf16.msra.mxu0 %v8716_v17  ;;  %v681_v8 = vrot.slane %v232_v2, 7  ;;  %v692_v17 = vrot.slane %v232_v2, 6  ;;  %v7347_v1 = vld [vmem:[%s9356_s3] ss:$0 sm:$0xff]  ;;  %s9781_s6 = sld [smem:[%s10752_s0 + %s9188_s1]]   ;;  %s9197_s13 = smov 31  }
  0x1a   :  { %7746 = vmatprep.subr.bf16.mxu0 %v8719_v20  ;;  %v690_v15 = vrot.slane %v231_v5, %v9310_v6  ;;  %s9791_s14 = sld [smem:[%s10752_s0 + %s9189_s9]]   ;;  %s9206_s1 = smov 36  }
  0x1b   :  { %7767 = vmatpush3.bf16.msra.mxu1 %v8718_v19  ;;  %v698_v16 = vsel %vm697_vm3, %v231_v5, %v681_v8  ;;  %s9796_s27 = sld [smem:[%s10752_s0 + %s9190_s22]]   ;;  %s9207_s22 = smov 39  }
  0x1c   :  { %7768 = vmatprep.subr.bf16.mxu1 %v8721_v22  ;;  %s10277_s26 = sld [smem:[%s10752_s0 + %s9197_s13]]  }
  0x1d   :  { %7747 = vmatpush3.bf16.msra.mxu0 %v8720_v21  ;;  %s10330_s13 = sld [smem:[%s10752_s0 + %s9180_s20]]  }
  0x1e   :  { %7748 = vmatprep.subr.bf16.mxu0 %v8723_v24 }
  0x1f   :  { %7769 = vmatpush3.bf16.msra.mxu1 %v8722_v23 }
  0x20   :  { %7770 = vmatprep.subr.bf16.mxu1 %v8725_v26 }
  0x21   :  { %7749 = vmatpush3.bf16.msra.mxu0 %v8724_v25 }
  0x22   :  { %7750 = vmatprep.subr.bf16.mxu0 %v8727_v28 }
  0x23   :  { %7771 = vmatpush3.bf16.msra.mxu1 %v8726_v27 }
  0x24   :  { %7772 = vmatprep.subr.bf16.mxu1 %v8729_v30 }
  0x25   :  { %7751 = vmatpush3.bf16.msra.mxu0 %v8728_v29 }
  0x26   :  { %8049 = vmatprep.subr.bf16.mxu0 %v9163_v35 }
  0x27   :  { %7773 = vmatpush3.bf16.msra.mxu1 %v8730_v33 }
  0x28   :  { %586 = vmatmul.mubr.bf16.vlgmr.msra.gmra.mrb[0].mxu0 %v312_v37 }
  0x29   :  { %8050 = vmatpush3.bf16.msra.mxu0 %v8731_v39  ;;  %8059 = vmatprep.mubr.msk.bf16.mxu0 %vm9164_vm0, %v9163_v35 }
  0x2a   :  { %626 = vmatmul.mubr.bf16.vlgmr.msra.gmra.mrb[0].mxu1 %v314_v41  ;;  %8051 = vmatprep.subr.bf16.mxu0 %v9163_v35 }
  0x2d   :  { %8052 = vmatpush3.bf16.msra.mxu0 %v8732_v42 }
  0x2e   :  { %8053 = vmatprep.subr.bf16.mxu0 %v9163_v35 }
  0x31   :  { %8054 = vmatpush3.bf16.msra.mxu0 %v8733_v43  ;;  %v8738_v43 = vld [vmem:[%s9339_s29 + $0x4] ss:$8 sps:$4 sm:$0xff]  }
  0x32   :  { %8055 = vmatprep.subr.bf16.mxu0 %v9163_v35  ;;  %835 = vmatprep.subr.bf16.mxu1 %v8738_v43 }
  0x35   :  { %8056 = vmatpush3.bf16.msra.mxu0 %v8734_v44  ;;  %v8736_v44 = vld [vmem:[%s9339_s29] ss:$8 sps:$4 sm:$0xff]  }
  0x36   :  { %8057 = vmatprep.subr.bf16.mxu0 %v9163_v35  ;;  %836 = vmatpush1.bf16.msra.mxu1 %v8736_v44 }
  0x37   :  { %837 = vmatprep.subr.bf16.mxu1 %v8741_v45 }
  0x39   :  { %8058 = vmatpush3.bf16.msra.mxu0 %v551_v47  ;;  %v8744_v47 = vld [vmem:[%s9339_s29 + $0x24] ss:$8 sps:$4 sm:$0xff]  }
  0x3a   :  { %8063 = vmatprep.subr.bf16.mxu0 %v9163_v35  ;;  %838 = vmatpush1.bf16.msra.mxu1 %v8739_v46 }
  0x3b   :  { %839 = vmatprep.subr.bf16.mxu1 %v8744_v47 }
  0x3c   :  { %8060 = vmatmul.mubr.msk.bf16.vlgmr.msra.gmra.mrb[4].mxu0 %vm545_vm2, %v316_v48  ;;  %v8742_v48 = vld [vmem:[%s9339_s29 + $0x20] ss:$8 sps:$4 sm:$0xff]   ;;  %vm4779_vm2 = vcmask 64512  }
  0x3d   :  { %8065 = vmatprep.mubr.msk.bf16.mxu0 %vm9164_vm0, %v9163_v35 }
  0x3e   :  { %840 = vmatpush1.bf16.msra.mxu1 %v8742_v48 }
  0xfb   :  { %v7752_v49 = vpop.f32.mrb[0].mxu0 }
  0xfc   :  { %v7753_v51 = vpop.f32.mrb[1].mxu0 }
  0xfd   :  { %v7754_v52 = vadd.f32 %v7753_v51, %v7752_v49  ;;  %v7755_v53 = vpop.f32.mrb[2].mxu0  ;;  %v7774_v54 = vpop.f32.mrb[0].mxu1  ;;  %v8745_v49 = vld [vmem:[%s9339_s29 + $0x30] ss:$8 sps:$4 sm:$0xff]   ;;  %v9170_v51 = vmov 0  }
  0xfe   :  { %v7756_v55 = vpop.f32.mrb[3].mxu0  ;;  %v7775_v56 = vpop.f32.mrb[1].mxu1  ;;  %867 = vmatprep.mubr.bf16.mxu1 %v9170_v51  ;;  %8688 = vset.pattern.permute.xlu1 %v9170_v51 }
  0xff   :  { %v588_v57 = vadd.f32 %v7754_v52, %v7308_v50  ;;  %v7776_v58 = vadd.f32 %v7775_v56, %v7774_v54  ;;  %v7777_v59 = vpop.f32.mrb[2].mxu1  ;;  %v8747_v50 = vld [vmem:[%s9339_s29 + $0x34] ss:$8 sps:$4 sm:$0xff]   ;;  %8687 = vset.pattern.permute.xlu0 %v9170_v51 }
 0x100   :  { %v7778_v60 = vpop.f32.mrb[3].mxu1  ;;  %841 = vmatprep.subr.bf16.mxu1 %v8747_v50 }
 0x101   :  { %v628_v61 = vadd.f32 %v7776_v58, %v588_v57  ;;  %842 = vmatpush1.bf16.msra.mxu1 %v8745_v49 }
 0x102   :  { %8069 = vmatprep.subr.bf16.mxu1 %v9163_v35 }
 0x10f   :  { %v667_v7 = vpop.f32.mrb[4].mxu0 }
 0x110   :  { %v668_v9 = vadd.f32 %v667_v7, %v628_v61  ;;  %v8061_v10 = vpop.f32.mrb[5].mxu0  ;;  %v7348_v7 = vld [vmem:[%s9361_s7] ss:$0 sm:$0xff] }
 0x111   :  { %v670_v11 = vpop.f32.mrb[6].mxu0 }
 0x112   :  { %v676_v12 = vadd.f32 %v674_v3, %v668_v9  ;;  %v679_v13 = vadd.f32 %v677_v4, %v668_v9  ;;  %v8062_v14 = vpop.f32.mrb[7].mxu0 }
 0x114   :  { %v684_v18 = vrot.slane %v676_v12, 3  ;;  %v9314_v19 = vrot.slane %v679_v13, 6 }
 0x116   :  { %v715_v20 = vsel %vm714_vm4, %v9314_v19, 0.0  ;;  %v9319_v21 = vsel %vm699_vm5, %v698_v16, %v684_v18  ;;  %v701_v22 = vsel %vm697_vm3, %v684_v18, %v690_v15  ;;  %v777_v16 = vld [vmem:[%s9379_s15] sm:$0x3] }
 0x117   :  { %716 = vadd.xlane.f32.xlu1 %v715_v20  ;;  %v708_v23 = vsel %vm707_vm6, %v9319_v21, 0.0  ;;  %v703_v24 = vsel %vm702_vm7, %v701_v22, %v692_v17  ;;  %v9383_v17 = vsub.s32 1, %v9307_v63  ;;  %v782_v18 = vrot.slane %v777_v16, %v9310_v6 }
 0x118   :  { %709 = vadd.xlane.f32.xlu0 %v708_v23  ;;  %v9326_v25 = vsel %vm549_vm1, %v703_v24, %v9314_v19  ;;  %v9175_v24 = vmov 65535  }
 0x119   :  { %v711_v26 = vsel %vm707_vm6, %v9326_v25, 0.0  ;;  %v786_v22 = vrot.slane %v777_v16, %v9383_v17 }
 0x11c   :  { %712 = vadd.xlane.f32.xlu0 %v711_v26  ;;  %v970_v26 = vsel %vm969_vm8, 4294967295, %v9175_v24 }
 0x1a4   :  { %v717_v27 = vpop.xlane.xlu1 %716 }
 0x1a5   :  { %v721_v28 = vmul.f32 0.015625, %v717_v27  ;;  %v710_v29 = vpop.xlane.xlu0 %709 }
 0x1a6   :  { %v719_v30 = vmul.f32 0.015625, %v710_v29 }
 0x1a7   :  { %v724_v31 = vsub.f32 %v9314_v19, %v721_v28 }
 0x1a8   :  { %v722_v32 = vsub.f32 %v9319_v21, %v719_v30 }
 0x1a9   :  { %v713_v33 = vpop.xlane.xlu0 %712  ;;  %v727_v39 = vmul.f32 %v724_v31, %v724_v31 }
 0x1aa   :  { %v720_v34 = vmul.f32 0.015625, %v713_v33  ;;  %v725_v36 = vmul.f32 %v722_v32, %v722_v32  ;;  %v9389_v33 = vsel %vm699_vm5, %v970_v26, 0 }
 0x1ab   :  { %v734_v41 = vsel %vm714_vm4, %v727_v39, 0.0 }
 0x1ac   :  { %v723_v37 = vsub.f32 %v9326_v25, %v720_v34  ;;  %v728_v38 = vsel %vm707_vm6, %v725_v36, 0.0 }
 0x1ad   :  { %729 = vadd.xlane.f32.xlu1 %v728_v38 }
 0x1ae   :  { %v726_v40 = vmul.f32 %v723_v37, %v723_v37 }
 0x1b0   :  { %v731_v42 = vsel %vm707_vm6, %v726_v40, 0.0 }
 0x1b1   :  { %735 = vadd.xlane.f32.xlu1 %v734_v41  ;;  %732 = vadd.xlane.f32.xlu0 %v731_v42 }
 0x23a   :  { %v730_v52 = vpop.xlane.xlu1 %729 }
 0x23b   :  { %v737_v53 = vmul.f32 0.015625, %v730_v52 }
 0x23d   :  { %v740_v54 = vadd.f32 1e-06, %v737_v53 }
 0x23e   :  { %v736_v55 = vpop.xlane.xlu1 %735  ;;  %v733_v56 = vpop.xlane.xlu0 %732 }
 0x23f   :  { %8912 = vrsqrt.f32 %v740_v54  ;;  %v739_v57 = vmul.f32 0.015625, %v736_v55  ;;  %v738_v58 = vmul.f32 0.015625, %v733_v56 }
 0x241   :  { %v742_v59 = vadd.f32 1e-06, %v739_v57  ;;  %v741_v60 = vadd.f32 1e-06, %v738_v58 }
 0x243   :  { %8914 = vrsqrt.f32 %v742_v59 }
 0x244   :  { %8916 = vrsqrt.f32 %v741_v60 }
 0x249   :  { %v8913_v61 = vpop.eup %8912 }
 0x24a   :  { %v746_v0 = vmul.f32 %v8913_v61, %v722_v32 }
 0x24c   :  { %v755_v4 = vmul.f32 %v7347_v1, %v746_v0 }
 0x24d   :  { %v8915_v2 = vpop.eup %8914 }
 0x24e   :  { %v8917_v3 = vpop.eup %8916  ;;  %v748_v9 = vmul.f32 %v8915_v2, %v724_v31  ;;  %v764_v10 = vadd.f32 %v7348_v7, %v755_v4 }
 0x24f   :  { %v747_v5 = vmul.f32 %v8917_v3, %v723_v37 }
 0x250   :  { %v757_v13 = vmul.f32 %v7347_v1, %v748_v9 }
 0x251   :  { %v756_v8 = vmul.f32 %v7347_v1, %v747_v5 }
 0x252   :  { %v766_v14 = vadd.f32 %v7348_v7, %v757_v13 }
 0x253   :  { %v765_v11 = vadd.f32 %v7348_v7, %v756_v8 }
 0x254   :  { %v776_v15 = vpack.c.bf16 %v766_v14, %v766_v14 }
 0x255   :  { %v775_v12 = vpack.c.bf16 %v765_v11, %v764_v10 }
 0x257   :  { %7357 = vmatmul.mubr.msk.bf16.vlgmr.msra.gmra.mrb[4].mxu1 %vm707_vm6, %v775_v12 }
 0x258   :  { %877 = vmatprep.mubr.bf16.mxu1 %v9170_v51 }
 0x25f   :  { %7358 = vmatmul.mubr.msk.bf16.gmra.mrb[8].mxu1 %vm707_vm6, %v776_v15 }
 0x260   :  { %8071 = vmatprep.mubr.msk.bf16.mxu1 %vm9164_vm0, %v9163_v35 }
 0x32a   :  { %v869_v20 = vpop.f32.mrb[4].mxu1 }
 0x32b   :  { %v871_v23 = vpop.f32.mrb[5].mxu1  ;;  %v870_v28 = vadd.f32 %v869_v20, %v782_v18 }
 0x32c   :  { %v873_v27 = vpop.f32.mrb[6].mxu1  ;;  %v872_v31 = vadd.f32 %v871_v23, %v786_v22 }
 0x32d   :  { %v874_v29 = vadd.f32 %v873_v27, %v782_v18  ;;  %v875_v30 = vpop.f32.mrb[7].mxu1 }
 0x32e   :  { %v876_v32 = vadd.f32 %v875_v30, %v786_v22 }
 0x32f   :  { %v886_v63 = vpack.c.bf16 %v874_v29, %v870_v28 }
 0x330   :  { %v9391_v34 = vpack.c.bf16 %v876_v32, %v872_v31 }
 0x331   :  { %1018 = vrot.lane.b32.xlu1 %v886_v63, %s9176_s16  ;;  %888 = vrot.lane.b32.xlu0 %v886_v63, %s9177_s17 }
 0x332   :  { %v879_v36 = vpop.f32.mrb[8].mxu1  ;;  %v973_v37 = vand.u32 %v9389_v33, %v9391_v34 }
 0x333   :  { %v880_v38 = vadd.f32 %v879_v36, %v782_v18  ;;  %v881_v39 = vpop.f32.mrb[9].mxu1 }
 0x334   :  { %v882_v40 = vadd.f32 %v881_v39, %v786_v22  ;;  %v883_v41 = vpop.f32.mrb[10].mxu1  ;;  %8070 = vmatpush3.bf16.msra.mxu1 %v973_v37 }
 0x335   :  { %v1424_v42 = vpack.c.bf16 %v880_v38, %v874_v29  ;;  %v884_v43 = vpop.f32.mrb[11].mxu1  ;;  %1016 = vrot.lane.b32.xlu1 %v886_v63, %s9178_s18  ;;  %1142 = vrot.lane.b32.xlu0 %v886_v63, %s9179_s19 }
 0x336   :  { %v9399_v44 = vpack.c.bf16 %v882_v40, %v876_v32  ;;  %8081 = vmatprep.subr.bf16.mxu1 %v9163_v35 }
 0x337   :  { %v1428_v45 = vshll.u32 %v1424_v42, 16  ;;  %v1426_v46 = vshrl.u32 %v1424_v42, 16 }
 0x339   :  { %v1430_v47 = vrot.slane %v1428_v45, 1  ;;  %1144 = vrot.lane.b32.xlu1 %v886_v63, %s9180_s20  ;;  %1267 = vrot.lane.b32.xlu0 %v886_v63, %s9181_s21 }
 0x33b   :  { %v1431_v48 = vor.u32 %v1430_v47, %v1426_v46 }
 0x33d   :  { %1269 = vrot.lane.b32.xlu1 %v886_v63, %s9173_s8  ;;  %1563 = vrot.lane.b32.xlu0 %v1431_v48, %s9176_s16 }
 0x341   :  { %1432 = vrot.lane.b32.xlu1 %v1431_v48, %s9177_s17  ;;  %1688 = vrot.lane.b32.xlu0 %v1431_v48, %s9180_s20 }
 0x345   :  { %1561 = vrot.lane.b32.xlu1 %v1431_v48, %s9178_s18  ;;  %1813 = vrot.lane.b32.xlu0 %v1431_v48, %s9173_s8 }
 0x349   :  { %1686 = vrot.lane.b32.xlu1 %v1431_v48, %s9179_s19 }
 0x34d   :  { %1811 = vrot.lane.b32.xlu1 %v1431_v48, %s9181_s21 }
 0x3a3   :  { %v889_v49 = vpop.permute.xlu0 %888  ;;  %v1019_v52 = vpop.permute.xlu1 %1018 }
 0x3a4   :  { %v895_v50 = vsel %vm890_vm9, %v889_v49, 0  ;;  %v1024_v54 = vsel %vm890_vm9, %v1019_v52, 0 }
 0x3a5   :  { %8064 = vmatpush3.bf16.xpose.msra.mxu0 %v895_v50 }
 0x3a6   :  { %8075 = vmatprep.subr.bf16.mxu0 %v9163_v35 }
 0x3a7   :  { %v1017_v53 = vpop.permute.xlu1 %1016  ;;  %v1143_v58 = vpop.permute.xlu0 %1142 }
 0x3ab   :  { %v1145_v55 = vpop.permute.xlu1 %1144  ;;  %v1268_v61 = vpop.permute.xlu0 %1267 }
 0x3ac   :  { %8066 = vmatmul.mubr.msk.bf16.vlgmr.msra.gmra.mrb[8].mxu0 %vm890_vm9, %v886_v63  ;;  %v1150_v56 = vsel %vm890_vm9, %v1145_v55, 0 }
 0x3ad   :  { %8076 = vmatpush3.bf16.xpose.msra.mxu0 %v1024_v54  ;;  %8077 = vmatprep.mubr.msk.bf16.mxu0 %vm9164_vm0, %v9163_v35 }
 0x3ae   :  { %8087 = vmatprep.subr.bf16.mxu0 %v9163_v35 }
 0x3af   :  { %v1270_v57 = vpop.permute.xlu1 %1269  ;;  %v1564_v1 = vpop.permute.xlu0 %1563 }
 0x3b0   :  { %v1275_v59 = vsel %vm890_vm9, %v1270_v57, 0  ;;  %v1569_v2 = vsel %vm890_vm9, %v1564_v1, 0 }
 0x3b3   :  { %v1433_v60 = vpop.permute.xlu1 %1432  ;;  %v1689_v3 = vpop.permute.xlu0 %1688 }
 0x3b4   :  { %8078 = vmatmul.mubr.msk.bf16.vlgmr.msra.gmra.mrb[12].mxu0 %vm890_vm9, %v1017_v53  ;;  %v1438_v0 = vsel %vm890_vm9, %v1433_v60, 0  ;;  %v1694_v5 = vsel %vm890_vm9, %v1689_v3, 0 }
 0x3b5   :  { %8088 = vmatpush3.bf16.xpose.msra.mxu0 %v1150_v56  ;;  %8089 = vmatprep.mubr.msk.bf16.mxu0 %vm9164_vm0, %v9163_v35 }
 0x3b6   :  { %8099 = vmatprep.subr.bf16.mxu0 %v9163_v35 }
 0x3b7   :  { %v1562_v4 = vpop.permute.xlu1 %1561  ;;  %v1814_v7 = vpop.permute.xlu0 %1813 }
 0x3b8   :  { %v1819_v9 = vsel %vm890_vm9, %v1814_v7, 0 }
 0x3bb   :  { %v1687_v8 = vpop.permute.xlu1 %1686 }
 0x3bc   :  { %8090 = vmatmul.mubr.msk.bf16.vlgmr.msra.gmra.mrb[16].mxu0 %vm890_vm9, %v1143_v58 }
 0x3bd   :  { %8100 = vmatpush3.bf16.xpose.msra.mxu0 %v1275_v59  ;;  %8101 = vmatprep.mubr.msk.bf16.mxu0 %vm9164_vm0, %v9163_v35 }
 0x3be   :  { %8111 = vmatprep.subr.bf16.mxu0 %v9163_v35 }
 0x3bf   :  { %v1812_v10 = vpop.permute.xlu1 %1811 }
 0x3c4   :  { %8102 = vmatmul.mubr.msk.bf16.vlgmr.msra.gmra.mrb[20].mxu0 %vm890_vm9, %v1268_v61 }
 0x3c5   :  { %8112 = vmatpush3.bf16.xpose.msra.mxu0 %v1438_v0  ;;  %8113 = vmatprep.mubr.msk.bf16.mxu0 %vm9164_vm0, %v9163_v35 }
 0x3c6   :  { %8123 = vmatprep.subr.bf16.mxu0 %v9163_v35 }
 0x3cc   :  { %8114 = vmatmul.mubr.msk.bf16.vlgmr.msra.gmra.mrb[24].mxu0 %vm890_vm9, %v1431_v48 }
 0x3cd   :  { %8124 = vmatpush3.bf16.xpose.msra.mxu0 %v1569_v2  ;;  %8125 = vmatprep.mubr.msk.bf16.mxu0 %vm9164_vm0, %v9163_v35 }
 0x3ce   :  { %8135 = vmatprep.subr.bf16.mxu0 %v9163_v35 }
 0x3d4   :  { %8126 = vmatmul.mubr.msk.bf16.vlgmr.msra.gmra.mrb[28].mxu0 %vm890_vm9, %v1562_v4 }
 0x3d5   :  { %8136 = vmatpush3.bf16.xpose.msra.mxu0 %v1694_v5  ;;  %8137 = vmatprep.mubr.msk.bf16.mxu0 %vm9164_vm0, %v9163_v35 }
 0x3d6   :  { %8147 = vmatprep.subr.bf16.mxu0 %v9163_v35 }
 0x3dc   :  { %8138 = vmatmul.mubr.msk.bf16.vlgmr.msra.gmra.mrb[32].mxu0 %vm890_vm9, %v1687_v8 }
 0x3dd   :  { %8148 = vmatpush3.bf16.xpose.msra.mxu0 %v1819_v9  ;;  %8149 = vmatprep.mubr.msk.bf16.mxu0 %vm9164_vm0, %v9163_v35 }
 0x3e4   :  { %8150 = vmatmul.mubr.msk.bf16.vlgmr.msra.gmra.mrb[36].mxu0 %vm890_vm9, %v1812_v10 }
 0x47f   :  { %v931_v11 = vpop.f32.mrb[8].mxu0 }
 0x480   :  { %v9449_v12 = vmul.f32 0.25, %v931_v11  ;;  %v8067_v13 = vpop.f32.mrb[9].mxu0 }
 0x481   :  { %v934_v14 = vpop.f32.mrb[10].mxu0 }
 0x482   :  { %v9451_v15 = vmul.f32 0.25, %v934_v14  ;;  %v8068_v16 = vpop.f32.mrb[11].mxu0  ;;  %v941_v18 = vsel %vm940_vm10, %v9449_v12, -inf }
 0x483   :  { %942 = vmax.xlane.f32.xlu0 %v941_v18 }
 0x484   :  { %v945_v20 = vsel %vm944_vm11, %v9451_v15, -inf }
 0x485   :  { %946 = vmax.xlane.f32.xlu1 %v945_v20 }
 0x487   :  { %v1060_v22 = vpop.f32.mrb[12].mxu0 }
 0x488   :  { %v9457_v23 = vmul.f32 0.25, %v1060_v22  ;;  %v8079_v24 = vpop.f32.mrb[13].mxu0 }
 0x489   :  { %v1063_v26 = vpop.f32.mrb[14].mxu0 }
 0x48a   :  { %v9459_v27 = vmul.f32 0.25, %v1063_v26  ;;  %v8080_v28 = vpop.f32.mrb[15].mxu0  ;;  %v1069_v29 = vsel %vm940_vm10, %v9457_v23, -inf }
 0x48b   :  { %1070 = vmax.xlane.f32.xlu0 %v1069_v29 }
 0x48c   :  { %v1072_v30 = vsel %vm944_vm11, %v9459_v27, -inf }
 0x48f   :  { %1073 = vmax.xlane.f32.xlu0 %v1072_v30  ;;  %v1186_v31 = vpop.f32.mrb[16].mxu0 }
 0x490   :  { %v9465_v32 = vmul.f32 0.25, %v1186_v31  ;;  %v8091_v63 = vpop.f32.mrb[17].mxu0 }
 0x491   :  { %v1189_v36 = vpop.f32.mrb[18].mxu0 }
 0x492   :  { %v9467_v37 = vmul.f32 0.25, %v1189_v36  ;;  %v8092_v38 = vpop.f32.mrb[19].mxu0  ;;  %v1195_v39 = vsel %vm940_vm10, %v9465_v32, -inf }
 0x493   :  { %1196 = vmax.xlane.f32.xlu0 %v1195_v39 }
 0x494   :  { %v1198_v40 = vsel %vm944_vm11, %v9467_v37, -inf }
 0x495   :  { %1199 = vmax.xlane.f32.xlu1 %v1198_v40 }
 0x497   :  { %v1311_v41 = vpop.f32.mrb[20].mxu0 }
 0x498   :  { %v9473_v42 = vmul.f32 0.25, %v1311_v41  ;;  %v8103_v43 = vpop.f32.mrb[21].mxu0 }
 0x499   :  { %v1314_v45 = vpop.f32.mrb[22].mxu0 }
 0x49a   :  { %v9475_v46 = vmul.f32 0.25, %v1314_v45  ;;  %v8104_v47 = vpop.f32.mrb[23].mxu0  ;;  %v1320_v48 = vsel %vm940_vm10, %v9473_v42, -inf }
 0x49b   :  { %1321 = vmax.xlane.f32.xlu0 %v1320_v48 }
 0x49c   :  { %v1323_v49 = vsel %vm944_vm11, %v9475_v46, -inf }
 0x49d   :  { %1324 = vmax.xlane.f32.xlu1 %v1323_v49 }
 0x49f   :  { %v1474_v50 = vpop.f32.mrb[24].mxu0 }
 0x4a0   :  { %v9481_v52 = vmul.f32 0.25, %v1474_v50  ;;  %v8115_v53 = vpop.f32.mrb[25].mxu0 }
 0x4a1   :  { %v1477_v54 = vpop.f32.mrb[26].mxu0 }
 0x4a2   :  { %v9483_v55 = vmul.f32 0.25, %v1477_v54  ;;  %v8116_v56 = vpop.f32.mrb[27].mxu0  ;;  %v1483_v57 = vsel %vm940_vm10, %v9481_v52, -inf }
 0x4a3   :  { %1484 = vmax.xlane.f32.xlu0 %v1483_v57 }
 0x4a4   :  { %v1486_v58 = vsel %vm944_vm11, %v9483_v55, -inf }
 0x4a5   :  { %1487 = vmax.xlane.f32.xlu1 %v1486_v58 }
 0x4a7   :  { %v1605_v59 = vpop.f32.mrb[28].mxu0 }
 0x4a8   :  { %v9489_v60 = vmul.f32 0.25, %v1605_v59  ;;  %v8127_v61 = vpop.f32.mrb[29].mxu0 }
 0x4a9   :  { %v1608_v0 = vpop.f32.mrb[30].mxu0 }
 0x4aa   :  { %v9491_v1 = vmul.f32 0.25, %v1608_v0  ;;  %v8128_v2 = vpop.f32.mrb[31].mxu0  ;;  %v1614_v3 = vsel %vm940_vm10, %v9489_v60, -inf }
 0x4ab   :  { %1615 = vmax.xlane.f32.xlu0 %v1614_v3 }
 0x4ac   :  { %v1617_v4 = vsel %vm944_vm11, %v9491_v1, -inf }
 0x4ad   :  { %1618 = vmax.xlane.f32.xlu1 %v1617_v4 }
 0x4af   :  { %v1730_v5 = vpop.f32.mrb[32].mxu0 }
 0x4b0   :  { %v8139_v7 = vpop.f32.mrb[33].mxu0  ;;  %v9509_v24 = vmul.f32 0.25, %v1730_v5 }
 0x4b1   :  { %v1733_v8 = vpop.f32.mrb[34].mxu0 }
 0x4b2   :  { %v9497_v9 = vmul.f32 0.25, %v1733_v8  ;;  %v8140_v10 = vpop.f32.mrb[35].mxu0  ;;  %v1739_v28 = vsel %vm940_vm10, %v9509_v24, -inf }
 0x4b4   :  { %v1742_v11 = vsel %vm944_vm11, %v9497_v9, -inf }
 0x4b5   :  { %1743 = vmax.xlane.f32.xlu1 %v1742_v11 }
 0x4b7   :  { %v1855_v13 = vpop.f32.mrb[36].mxu0 }
 0x4b8   :  { %v8151_v14 = vpop.f32.mrb[37].mxu0  ;;  %v9511_v26 = vmul.f32 0.25, %v1855_v13 }
 0x4b9   :  { %v1858_v16 = vpop.f32.mrb[38].mxu0 }
 0x4ba   :  { %v9501_v18 = vmul.f32 0.25, %v1858_v16  ;;  %v8152_v20 = vpop.f32.mrb[39].mxu0  ;;  %v1864_v29 = vsel %vm940_vm10, %v9511_v26, -inf }
 0x4bc   :  { %v1867_v22 = vsel %vm944_vm11, %v9501_v18, -inf }
 0x4bd   :  { %1868 = vmax.xlane.f32.xlu1 %v1867_v22 }
 0x4c1   :  { %1093 = vrot.lane.b32.xlu0 %v9391_v34, %s9178_s18 }
 0x4ce   :  { %1218 = vrot.lane.b32.xlu1 %v9391_v34, %s9179_s19 }
 0x4e0   :  { %1740 = vmax.xlane.f32.xlu0 %v1739_v28 }
 0x4e4   :  { %1865 = vmax.xlane.f32.xlu0 %v1864_v29 }
 0x510   :  { %v943_v30 = vpop.xlane.xlu0 %942 }
 0x511   :  { %v948_v31 = vsub.f32 %v9449_v12, %v943_v30 }
 0x512   :  { %v947_v63 = vpop.xlane.xlu1 %946 }
 0x513   :  { %v950_v36 = vmul.f32 1.442695, %v948_v31  ;;  %v949_v38 = vsub.f32 %v9451_v15, %v947_v63 }
 0x515   :  { %8918 = vpow2.f32 %v950_v36  ;;  %v952_v39 = vmul.f32 1.442695, %v949_v38 }
 0x517   :  { %8920 = vpow2.f32 %v952_v39 }
 0x518   :  { %v1071_v40 = vpop.xlane.xlu0 %1070 }
 0x519   :  { %v1075_v41 = vsub.f32 %v9457_v23, %v1071_v40 }
 0x51b   :  { %v1077_v43 = vmul.f32 1.442695, %v1075_v41 }
 0x51c   :  { %v1074_v45 = vpop.xlane.xlu0 %1073 }
 0x51d   :  { %8922 = vpow2.f32 %v1077_v43  ;;  %v1076_v47 = vsub.f32 %v9459_v27, %v1074_v45 }
 0x51f   :  { %v9521_v48 = vpop.eup %8918  ;;  %v1079_v49 = vmul.f32 1.442695, %v1076_v47 }
 0x520   :  { %v1197_v50 = vpop.xlane.xlu0 %1196  ;;  %v954_v12 = vsel %vm940_vm10, %v9521_v48, 0.0 }
 0x521   :  { %v9525_v53 = vpop.eup %8920  ;;  %8924 = vpow2.f32 %v1079_v49  ;;  %v1201_v15 = vsub.f32 %v9465_v32, %v1197_v50  ;;  %955 = vadd.xlane.f32.xlu0 %v954_v12 }
 0x522   :  { %v1200_v54 = vpop.xlane.xlu1 %1199  ;;  %v957_v23 = vsel %vm944_vm11, %v9525_v53, 0.0 }
 0x523   :  { %v1203_v56 = vmul.f32 1.442695, %v1201_v15  ;;  %v1202_v27 = vsub.f32 %v9467_v37, %v1200_v54  ;;  %958 = vadd.xlane.f32.xlu1 %v957_v23 }
 0x525   :  { %8926 = vpow2.f32 %v1203_v56  ;;  %v1205_v57 = vmul.f32 1.442695, %v1202_v27 }
 0x527   :  { %v9531_v58 = vpop.eup %8922  ;;  %8928 = vpow2.f32 %v1205_v57 }
 0x528   :  { %v1322_v59 = vpop.xlane.xlu0 %1321  ;;  %v1081_v61 = vsel %vm940_vm10, %v9531_v58, 0.0 }
 0x529   :  { %v1326_v32 = vsub.f32 %v9473_v42, %v1322_v59  ;;  %1082 = vadd.xlane.f32.xlu0 %v1081_v61 }
 0x52a   :  { %v1325_v0 = vpop.xlane.xlu1 %1324 }
 0x52b   :  { %v9536_v2 = vpop.eup %8924  ;;  %v1328_v3 = vmul.f32 1.442695, %v1326_v32  ;;  %v1327_v4 = vsub.f32 %v9475_v46, %v1325_v0 }
 0x52c   :  { %v1084_v37 = vsel %vm944_vm11, %v9536_v2, 0.0 }
 0x52d   :  { %8930 = vpow2.f32 %v1328_v3  ;;  %v1330_v5 = vmul.f32 1.442695, %v1327_v4  ;;  %1085 = vadd.xlane.f32.xlu1 %v1084_v37 }
 0x52f   :  { %v9541_v7 = vpop.eup %8926  ;;  %8932 = vpow2.f32 %v1330_v5 }
 0x530   :  { %v1485_v8 = vpop.xlane.xlu0 %1484  ;;  %v1207_v42 = vsel %vm940_vm10, %v9541_v7, 0.0 }
 0x531   :  { %v9545_v10 = vpop.eup %8928  ;;  %v1489_v11 = vsub.f32 %v9481_v52, %v1485_v8  ;;  %1208 = vadd.xlane.f32.xlu0 %v1207_v42 }
 0x532   :  { %v1488_v13 = vpop.xlane.xlu1 %1487  ;;  %v1210_v46 = vsel %vm944_vm11, %v9545_v10, 0.0 }
 0x533   :  { %v1491_v14 = vmul.f32 1.442695, %v1489_v11  ;;  %v1490_v16 = vsub.f32 %v9483_v55, %v1488_v13  ;;  %1211 = vadd.xlane.f32.xlu1 %v1210_v46 }
 0x535   :  { %8934 = vpow2.f32 %v1491_v14  ;;  %v1493_v20 = vmul.f32 1.442695, %v1490_v16 }
 0x537   :  { %v9551_v22 = vpop.eup %8930  ;;  %8936 = vpow2.f32 %v1493_v20 }
 0x538   :  { %v1332_v28 = vsel %vm940_vm10, %v9551_v22, 0.0  ;;  %v1616_v41 = vpop.xlane.xlu0 %1615 }
 0x539   :  { %v9555_v29 = vpop.eup %8932  ;;  %1333 = vadd.xlane.f32.xlu0 %v1332_v28  ;;  %v1620_v43 = vsub.f32 %v9489_v60, %v1616_v41 }
 0x53a   :  { %v1619_v52 = vpop.xlane.xlu1 %1618  ;;  %v1335_v30 = vsel %vm944_vm11, %v9555_v29, 0.0 }
 0x53b   :  { %v1621_v31 = vsub.f32 %v9491_v1, %v1619_v52  ;;  %1336 = vadd.xlane.f32.xlu1 %v1335_v30  ;;  %v1622_v45 = vmul.f32 1.442695, %v1620_v43 }
 0x53c   :  { %v1094_v47 = vpop.permute.xlu0 %1093 }
 0x53d   :  { %v1624_v55 = vmul.f32 1.442695, %v1621_v31 }
 0x53f   :  { %v9560_v63 = vpop.eup %8934  ;;  %8938 = vpow2.f32 %v1624_v55 }
 0x540   :  { %v1495_v36 = vsel %vm940_vm10, %v9560_v63, 0.0  ;;  %8940 = vpow2.f32 %v1622_v45 }
 0x541   :  { %v9564_v38 = vpop.eup %8936  ;;  %1496 = vadd.xlane.f32.xlu1 %v1495_v36  ;;  %v1099_v36 = vand.u32 %v1094_v47, %v9389_v33 }
 0x542   :  { %v1498_v39 = vsel %vm944_vm11, %v9564_v38, 0.0  ;;  %v1744_v49 = vpop.xlane.xlu1 %1743 }
 0x543   :  { %v1746_v12 = vsub.f32 %v9497_v9, %v1744_v49  ;;  %v1510_v9 = vshll.u32 %v9399_v44, 16 }
 0x545   :  { %1499 = vadd.xlane.f32.xlu1 %v1498_v39  ;;  %v1749_v56 = vmul.f32 1.442695, %v1746_v12  ;;  %v1512_v4 = vrot.slane %v1510_v9, 1 }
 0x549   :  { %v9568_v40 = vpop.eup %8938 }
 0x54a   :  { %v1629_v1 = vsel %vm944_vm11, %v9568_v40, 0.0  ;;  %v9575_v50 = vpop.eup %8940  ;;  %v1869_v27 = vpop.xlane.xlu1 %1868 }
 0x54b   :  { %1630 = vadd.xlane.f32.xlu1 %v1629_v1  ;;  %v1626_v54 = vsel %vm940_vm10, %v9575_v50, 0.0  ;;  %v1871_v59 = vsub.f32 %v9501_v18, %v1869_v27 }
 0x54d   :  { %v1874_v32 = vmul.f32 1.442695, %v1871_v59 }
 0x54e   :  { %v1219_v11 = vpop.permute.xlu1 %1218 }
 0x54f   :  { %1343 = vrot.lane.b32.xlu0 %v9391_v34, %s9181_s21  ;;  %v1224_v49 = vand.u32 %v1219_v11, %v9389_v33 }
 0x56d   :  { %v1741_v15 = vpop.xlane.xlu0 %1740 }
 0x56e   :  { %v1745_v23 = vsub.f32 %v9509_v24, %v1741_v15  ;;  %1627 = vadd.xlane.f32.xlu0 %v1626_v54 }
 0x570   :  { %v1747_v34 = vmul.f32 1.442695, %v1745_v23 }
 0x571   :  { %v1866_v57 = vpop.xlane.xlu0 %1865 }
 0x572   :  { %8942 = vpow2.f32 %v1747_v34  ;;  %v1870_v60 = vsub.f32 %v9511_v26, %v1866_v57  ;;  %v1508_v26 = vshrl.u32 %v9399_v44, 16 }
 0x573   :  { %8944 = vpow2.f32 %v1749_v56 }
 0x574   :  { %v1872_v61 = vmul.f32 1.442695, %v1870_v60  ;;  %v9595_v5 = vor.u32 %v1512_v4, %v1508_v26 }
 0x576   :  { %8946 = vpow2.f32 %v1872_v61  ;;  %v1518_v61 = vand.u32 %v9595_v5, %v9389_v33 }
 0x577   :  { %8948 = vpow2.f32 %v1874_v32 }
 0x57c   :  { %v9584_v0 = vpop.eup %8942 }
 0x57d   :  { %v1751_v24 = vsel %vm940_vm10, %v9584_v0, 0.0  ;;  %v9588_v3 = vpop.eup %8944 }
 0x57e   :  { %1752 = vadd.xlane.f32.xlu1 %v1751_v24  ;;  %v1754_v18 = vsel %vm944_vm11, %v9588_v3, 0.0 }
 0x580   :  { %v9593_v37 = vpop.eup %8946 }
 0x581   :  { %v1876_v8 = vsel %vm940_vm10, %v9593_v37, 0.0  ;;  %v9601_v42 = vpop.eup %8948 }
 0x582   :  { %1755 = vadd.xlane.f32.xlu1 %v1754_v18  ;;  %v1879_v44 = vsel %vm944_vm11, %v9601_v42, 0.0 }
 0x584   :  { %1637 = vrot.lane.b32.xlu0 %v9595_v5, %s9178_s18 }
 0x586   :  { %1877 = vadd.xlane.f32.xlu1 %v1876_v8 }
 0x588   :  { %1887 = vrot.lane.b32.xlu0 %v9595_v5, %s9181_s21 }
 0x58a   :  { %1880 = vadd.xlane.f32.xlu1 %v1879_v44 }
 0x59b   :  { %1762 = vrot.lane.b32.xlu1 %v9595_v5, %s9179_s19 }
 0x5ae   :  { %v956_v13 = vpop.xlane.xlu0 %955 }
 0x5af   :  { %8950 = vrcp.f32 %v956_v13 }
 0x5b0   :  { %v959_v46 = vpop.xlane.xlu1 %958 }
 0x5b1   :  { %8952 = vrcp.f32 %v959_v46 }
 0x5b6   :  { %v1083_v14 = vpop.xlane.xlu0 %1082 }
 0x5b7   :  { %8954 = vrcp.f32 %v1083_v14 }
 0x5b9   :  { %v8951_v16 = vpop.eup %8950 }
 0x5ba   :  { %v1086_v20 = vpop.xlane.xlu1 %1085  ;;  %v962_v52 = vmul.f32 %v8951_v16, %v9521_v48 }
 0x5bb   :  { %v8953_v28 = vpop.eup %8952  ;;  %8956 = vrcp.f32 %v1086_v20 }
 0x5bc   :  { %v963_v30 = vmul.f32 %v8953_v28, %v9525_v53 }
 0x5be   :  { %v964_v31 = vpack.c.bf16 %v963_v30, %v962_v52  ;;  %v1209_v55 = vpop.xlane.xlu0 %1208 }
 0x5bf   :  { %8958 = vrcp.f32 %v1209_v55 }
 0x5c0   :  { %v1212_v39 = vpop.xlane.xlu1 %1211  ;;  %8072 = vmatmul.mubr.msk.bf16.vlgmr.msra.gmra.mrb[12].mxu1 %vm940_vm10, %v964_v31 }
 0x5c1   :  { %8960 = vrcp.f32 %v1212_v39  ;;  %8082 = vmatpush3.bf16.msra.mxu1 %v1099_v36  ;;  %8083 = vmatprep.mubr.msk.bf16.mxu1 %vm9164_vm0, %v9163_v35  ;;  %v8955_v1 = vpop.eup %8954 }
 0x5c2   :  { %8093 = vmatprep.subr.bf16.mxu1 %v9163_v35  ;;  %v1089_v48 = vmul.f32 %v8955_v1, %v9531_v58 }
 0x5c5   :  { %v8957_v41 = vpop.eup %8956 }
 0x5c6   :  { %v1090_v53 = vmul.f32 %v8957_v41, %v9536_v2  ;;  %v1334_v43 = vpop.xlane.xlu0 %1333 }
 0x5c7   :  { %8962 = vrcp.f32 %v1334_v43 }
 0x5c8   :  { %v1337_v45 = vpop.xlane.xlu1 %1336  ;;  %v1091_v47 = vpack.c.bf16 %v1090_v53, %v1089_v48 }
 0x5c9   :  { %8964 = vrcp.f32 %v1337_v45  ;;  %v8959_v12 = vpop.eup %8958 }
 0x5ca   :  { %8084 = vmatmul.mubr.msk.bf16.vlgmr.msra.gmra.mrb[16].mxu1 %vm940_vm10, %v1091_v47  ;;  %v1215_v58 = vmul.f32 %v8959_v12, %v9541_v7  ;;  %v1344_v2 = vpop.permute.xlu0 %1343 }
 0x5cb   :  { %v8961_v15 = vpop.eup %8960  ;;  %8094 = vmatpush3.bf16.msra.mxu1 %v1224_v49  ;;  %8095 = vmatprep.mubr.msk.bf16.mxu1 %vm9164_vm0, %v9163_v35  ;;  %v1349_v34 = vand.u32 %v1344_v2, %v9389_v33 }
 0x5cc   :  { %v1216_v54 = vmul.f32 %v8961_v15, %v9545_v10  ;;  %8105 = vmatprep.subr.bf16.mxu1 %v9163_v35 }
 0x5ce   :  { %v1497_v23 = vpop.xlane.xlu1 %1496  ;;  %v1217_v56 = vpack.c.bf16 %v1216_v54, %v1215_v58 }
 0x5cf   :  { %8966 = vrcp.f32 %v1497_v23 }
 0x5d1   :  { %v8963_v27 = vpop.eup %8962 }
 0x5d2   :  { %v1500_v57 = vpop.xlane.xlu1 %1499  ;;  %8096 = vmatmul.mubr.msk.bf16.vlgmr.msra.gmra.mrb[20].mxu1 %vm940_vm10, %v1217_v56  ;;  %v1340_v7 = vmul.f32 %v8963_v27, %v9551_v22 }
 0x5d3   :  { %v8965_v60 = vpop.eup %8964  ;;  %8968 = vrcp.f32 %v1500_v57  ;;  %8106 = vmatpush3.bf16.msra.mxu1 %v1349_v34  ;;  %8107 = vmatprep.mubr.msk.bf16.mxu1 %vm9164_vm0, %v9163_v35 }
 0x5d4   :  { %v1341_v10 = vmul.f32 %v8965_v60, %v9555_v29  ;;  %8117 = vmatprep.subr.bf16.mxu1 %v9163_v35 }
 0x5d6   :  { %v1342_v59 = vpack.c.bf16 %v1341_v10, %v1340_v7 }
 0x5d8   :  { %v1631_v22 = vpop.xlane.xlu1 %1630 }
 0x5d9   :  { %v8967_v32 = vpop.eup %8966  ;;  %8970 = vrcp.f32 %v1631_v22  ;;  %v8748_v22 = vld [vmem:[%s9671_s25] sm:$0xff]  }
 0x5da   :  { %8108 = vmatmul.mubr.msk.bf16.vlgmr.msra.gmra.mrb[24].mxu1 %vm940_vm10, %v1342_v59  ;;  %v1503_v29 = vmul.f32 %v8967_v32, %v9560_v63  ;;  %8159 = vmatprep.subr.bf16.mxu0 %v8748_v22 }
 0x5db   :  { %8118 = vmatpush3.bf16.msra.mxu1 %v1518_v61  ;;  %8119 = vmatprep.mubr.msk.bf16.mxu1 %vm9164_vm0, %v9163_v35 }
 0x5dc   :  { %8129 = vmatprep.subr.bf16.mxu1 %v9163_v35  ;;  %8160 = vmatpush3.bf16.msra.mxu0 %v8748_v22 }
 0x5dd   :  { %v8969_v9 = vpop.eup %8968 }
 0x5de   :  { %v1504_v24 = vmul.f32 %v8969_v9, %v9564_v38 }
 0x5e0   :  { %v1505_v4 = vpack.c.bf16 %v1504_v24, %v1503_v29 }
 0x5e2   :  { %8120 = vmatmul.mubr.msk.bf16.vlgmr.msra.gmra.mrb[28].mxu1 %vm940_vm10, %v1505_v4 }
 0x5e3   :  { %8131 = vmatprep.mubr.msk.bf16.mxu1 %vm9164_vm0, %v9163_v35  ;;  %v8971_v8 = vpop.eup %8970 }
 0x5e4   :  { %v1635_v38 = vmul.f32 %v8971_v8, %v9568_v40 }
 0x5fb   :  { %v1628_v26 = vpop.xlane.xlu0 %1627 }
 0x5fc   :  { %8972 = vrcp.f32 %v1628_v26  ;;  %v8749_v26 = vld [vmem:[%s9671_s25 + $0x8] sm:$0xff]  }
 0x5fd   :  { %8161 = vmatprep.subr.bf16.mxu0 %v8749_v26 }
 0x5fe   :  { %8162 = vmatpush3.bf16.msra.mxu0 %v8749_v26 }
 0x5ff   :  { %v1638_v18 = vpop.permute.xlu0 %1637 }
 0x600   :  { %v1643_v5 = vand.u32 %v1638_v18, %v9389_v33 }
 0x602   :  { %8130 = vmatpush3.bf16.msra.mxu1 %v1643_v5 }
 0x603   :  { %8141 = vmatprep.subr.bf16.mxu1 %v9163_v35  ;;  %v1888_v30 = vpop.permute.xlu0 %1887 }
 0x604   :  { %v1893_v36 = vand.u32 %v1888_v30, %v9389_v33 }
 0x606   :  { %v8973_v63 = vpop.eup %8972 }
 0x607   :  { %v1634_v44 = vmul.f32 %v8973_v63, %v9575_v50  ;;  %v8750_v63 = vld [vmem:[%s9671_s25 + $0x10] sm:$0xff]  }
 0x608   :  { %8163 = vmatprep.subr.bf16.mxu0 %v8750_v63 }
 0x609   :  { %v1636_v11 = vpack.c.bf16 %v1635_v38, %v1634_v44  ;;  %8164 = vmatpush3.bf16.msra.mxu0 %v8750_v63 }
 0x60b   :  { %v1753_v13 = vpop.xlane.xlu1 %1752  ;;  %8132 = vmatmul.mubr.msk.bf16.vlgmr.msra.gmra.mrb[32].mxu1 %vm940_vm10, %v1636_v11  ;;  %v8751_v11 = vld [vmem:[%s9671_s25 + $0x18] sm:$0xff]  }
 0x60c   :  { %8143 = vmatprep.mubr.msk.bf16.mxu1 %vm9164_vm0, %v9163_v35  ;;  %8974 = vrcp.f32 %v1753_v13  ;;  %8165 = vmatprep.subr.bf16.mxu0 %v8751_v11 }
 0x60d   :  { %8166 = vmatpush3.bf16.msra.mxu0 %v8751_v11 }
 0x60f   :  { %v1756_v46 = vpop.xlane.xlu1 %1755 }
 0x610   :  { %8976 = vrcp.f32 %v1756_v46 }
 0x613   :  { %v1878_v14 = vpop.xlane.xlu1 %1877 }
 0x614   :  { %8978 = vrcp.f32 %v1878_v14 }
 0x616   :  { %v8975_v20 = vpop.eup %8974 }
 0x617   :  { %v1881_v16 = vpop.xlane.xlu1 %1880  ;;  %v1759_v31 = vmul.f32 %v8975_v20, %v9584_v0 }
 0x618   :  { %8980 = vrcp.f32 %v1881_v16 }
 0x61a   :  { %v8977_v28 = vpop.eup %8976 }
 0x61b   :  { %v1760_v40 = vmul.f32 %v8977_v28, %v9588_v3  ;;  %v1763_v52 = vpop.permute.xlu1 %1762 }
 0x61c   :  { %v1768_v50 = vand.u32 %v1763_v52, %v9389_v33 }
 0x61d   :  { %v1761_v55 = vpack.c.bf16 %v1760_v40, %v1759_v31 }
 0x61e   :  { %8142 = vmatpush3.bf16.msra.mxu1 %v1768_v50  ;;  %v8979_v39 = vpop.eup %8978 }
 0x61f   :  { %8153 = vmatprep.subr.bf16.mxu1 %v9163_v35  ;;  %v1884_v41 = vmul.f32 %v8979_v39, %v9593_v37 }
 0x621   :  { %8144 = vmatmul.mubr.msk.bf16.vlgmr.msra.gmra.mrb[36].mxu1 %vm940_vm10, %v1761_v55 }
 0x622   :  { %v8981_v1 = vpop.eup %8980  ;;  %8154 = vmatpush3.bf16.msra.mxu1 %v1893_v36  ;;  %8155 = vmatprep.mubr.msk.bf16.mxu1 %vm9164_vm0, %v9163_v35 }
 0x623   :  { %v1885_v3 = vmul.f32 %v8981_v1, %v9601_v42 }
 0x625   :  { %v1886_v48 = vpack.c.bf16 %v1885_v3, %v1884_v41 }
 0x629   :  { %8156 = vmatmul.mubr.msk.bf16.vlgmr.msra.gmra.mrb[40].mxu1 %vm940_vm10, %v1886_v48 }
 0x62a   :  { %2241 = vmatprep.mubr.bf16.mxu1 %v9170_v51 }
 0x693   :  { %v9662_v0 = vpop.f32.mrb[12].mxu1 }
 0x694   :  { %v8073_v53 = vpop.f32.mrb[13].mxu1 }
 0x695   :  { %v9664_v43 = vpop.f32.mrb[14].mxu1 }
 0x696   :  { %v8074_v45 = vpop.f32.mrb[15].mxu1 }
 0x69d   :  { %v1135_v47 = vpop.f32.mrb[16].mxu1 }
 0x69e   :  { %v8085_v49 = vpop.f32.mrb[17].mxu1 }
 0x69f   :  { %v1138_v12 = vpop.f32.mrb[18].mxu1 }
 0x6a0   :  { %v8627_v15 = vpack.i.bf16 %v1135_v47, %v1138_v12  ;;  %v8086_v54 = vpop.f32.mrb[19].mxu1 }
 0x6a2   :  { %8628 = vrot.lane.b32.xlu0 %v8627_v15, %s9173_s8 }
 0x6a5   :  { %v1260_v42 = vpop.f32.mrb[20].mxu1 }
 0x6a6   :  { %v8097_v37 = vpop.f32.mrb[21].mxu1 }
 0x6a7   :  { %v1263_v58 = vpop.f32.mrb[22].mxu1 }
 0x6a8   :  { %v8642_v2 = vpack.i.bf16 %v1260_v42, %v1263_v58  ;;  %v8098_v23 = vpop.f32.mrb[23].mxu1 }
 0x6ad   :  { %v1385_v56 = vpop.f32.mrb[24].mxu1 }
 0x6ae   :  { %v8109_v34 = vpop.f32.mrb[25].mxu1 }
 0x6af   :  { %v1388_v27 = vpop.f32.mrb[26].mxu1 }
 0x6b0   :  { %v8652_v57 = vpack.i.bf16 %v1385_v56, %v1388_v27  ;;  %v8110_v60 = vpop.f32.mrb[27].mxu1 }
 0x6b5   :  { %v1554_v10 = vpop.f32.mrb[28].mxu1 }
 0x6b6   :  { %v8121_v7 = vpop.f32.mrb[29].mxu1 }
 0x6b7   :  { %v1557_v59 = vpop.f32.mrb[30].mxu1 }
 0x6b8   :  { %v8122_v61 = vpop.f32.mrb[31].mxu1 }
 0x6de   :  { %v1679_v32 = vpop.f32.mrb[32].mxu1 }
 0x6df   :  { %v8133_v9 = vpop.f32.mrb[33].mxu1 }
 0x6e0   :  { %v1682_v29 = vpop.f32.mrb[34].mxu1 }
 0x6e1   :  { %v8632_v24 = vpack.i.bf16 %v1682_v29, %v1679_v32  ;;  %v8134_v4 = vpop.f32.mrb[35].mxu1 }
 0x6e3   :  { %8633 = vrot.lane.b32.xlu0 %v8632_v24, %s9173_s8  ;;  %v7382_v24 = vld [vmem:[%s9707_s5] ss:$0 sm:$0xff] }
 0x6f4   :  { %v1804_v18 = vpop.f32.mrb[36].mxu1 }
 0x6f5   :  { %v8145_v5 = vpop.f32.mrb[37].mxu1 }
 0x6f6   :  { %v1807_v8 = vpop.f32.mrb[38].mxu1 }
 0x6f7   :  { %v8637_v38 = vpack.i.bf16 %v1807_v8, %v1804_v18  ;;  %v8146_v44 = vpop.f32.mrb[39].mxu1 }
 0x6f9   :  { %8638 = vrot.lane.b32.xlu0 %v8637_v38, %s9180_s20 }
 0x6fc   :  { %v1929_v13 = vpop.f32.mrb[40].mxu1 }
 0x6fd   :  { %8643 = vrot.lane.b32.xlu0 %v8642_v2, %s9180_s20  ;;  %v8157_v46 = vpop.f32.mrb[41].mxu1 }
 0x6fe   :  { %v1932_v14 = vpop.f32.mrb[42].mxu1 }
 0x6ff   :  { %v8647_v16 = vpack.i.bf16 %v1932_v14, %v1929_v13  ;;  %v8158_v20 = vpop.f32.mrb[43].mxu1 }
 0x701   :  { %8648 = vrot.lane.b32.xlu1 %v8647_v16, %s9176_s16 }
 0x705   :  { %8653 = vrot.lane.b32.xlu1 %v8652_v57, %s9176_s16 }
 0x714   :  { %v8629_v28 = vpop.permute.xlu0 %8628 }
 0x715   :  { %v8631_v39 = vunpack.i.h.bf16 %v8629_v28  ;;  %v8630_v1 = vunpack.i.l.bf16 %v8629_v28 }
 0x717   :  { %v1416_v23 = vsel %vm890_vm9, %v9662_v0, %v8631_v39  ;;  %v1417_v56 = vsel %vm890_vm9, %v9664_v43, %v8630_v1  ;;  %v7375_v0 = vld [vmem:[%s9702_s30] ss:$0 sm:$0xff] }
 0x755   :  { %v8634_v40 = vpop.permute.xlu0 %8633 }
 0x756   :  { %v8636_v50 = vunpack.i.h.bf16 %v8634_v40  ;;  %v8635_v30 = vunpack.i.l.bf16 %v8634_v40 }
 0x758   :  { %v1961_v41 = vsel %vm890_vm9, %v1557_v59, %v8636_v50  ;;  %v1960_v48 = vsel %vm890_vm9, %v1554_v10, %v8635_v30 }
 0x76b   :  { %v8639_v52 = vpop.permute.xlu0 %8638 }
 0x76c   :  { %v8641_v31 = vunpack.i.h.bf16 %v8639_v52  ;;  %v8640_v55 = vunpack.i.l.bf16 %v8639_v52 }
 0x76e   :  { %v1962_v47 = vsel %vm1418_vm12, %v1960_v48, %v8640_v55  ;;  %v1963_v49 = vsel %vm1418_vm12, %v1961_v41, %v8641_v31  ;;  %v8754_v41 = vld [vmem:[%s9374_s11 + $0x4] ss:$8 sps:$4 sm:$0xff]   ;;  %v8752_v48 = vld [vmem:[%s9374_s11] ss:$8 sps:$4 sm:$0xff]  }
 0x76f   :  { %v8644_v36 = vpop.permute.xlu0 %8643  ;;  %2209 = vmatprep.subr.bf16.mxu1 %v8754_v41 }
 0x770   :  { %v8646_v12 = vunpack.i.h.bf16 %v8644_v36  ;;  %v8645_v15 = vunpack.i.l.bf16 %v8644_v36  ;;  %2210 = vmatpush1.bf16.msra.mxu1 %v8752_v48 }
 0x772   :  { %v1419_v57 = vsel %vm1418_vm12, %v1416_v23, %v8646_v12  ;;  %v1420_v60 = vsel %vm1418_vm12, %v1417_v56, %v8645_v15  ;;  %v8761_v12 = vld [vmem:[%s9374_s11 + $0x30] ss:$8 sps:$4 sm:$0xff]   ;;  %v8763_v15 = vld [vmem:[%s9374_s11 + $0x34] ss:$8 sps:$4 sm:$0xff]  }
 0x773   :  { %v8649_v3 = vpop.permute.xlu1 %8648 }
 0x774   :  { %v8651_v53 = vunpack.i.h.bf16 %v8649_v3  ;;  %v8650_v45 = vunpack.i.l.bf16 %v8649_v3 }
 0x776   :  { %v1964_v54 = vsel %vm1421_vm13, %v1962_v47, %v8650_v45  ;;  %v1965_v42 = vsel %vm1421_vm13, %v1963_v49, %v8651_v53  ;;  %v8757_v53 = vld [vmem:[%s9374_s11 + $0x14] ss:$8 sps:$4 sm:$0xff]   ;;  %v8755_v45 = vld [vmem:[%s9374_s11 + $0x10] ss:$8 sps:$4 sm:$0xff]   ;;  %v8760_v47 = vld [vmem:[%s9374_s11 + $0x24] ss:$8 sps:$4 sm:$0xff]  }
 0x777   :  { %v1968_v37 = vrot.slane %v1964_v54, 7  ;;  %v1969_v58 = vrot.slane %v1965_v42, 7  ;;  %v8654_v2 = vpop.permute.xlu1 %8653  ;;  %2211 = vmatprep.subr.bf16.mxu1 %v8757_v53  ;;  %v8758_v49 = vld [vmem:[%s9374_s11 + $0x20] ss:$8 sps:$4 sm:$0xff]  }
 0x778   :  { %v8656_v34 = vunpack.i.h.bf16 %v8654_v2  ;;  %v8655_v27 = vunpack.i.l.bf16 %v8654_v2  ;;  %2212 = vmatpush1.bf16.msra.mxu1 %v8755_v45 }
 0x779   :  { %v1970_v10 = vsel %vm697_vm3, %v1968_v37, %v1969_v58  ;;  %2213 = vmatprep.subr.bf16.mxu1 %v8760_v47 }
 0x77a   :  { %v1422_v7 = vsel %vm1421_vm13, %v1419_v57, %v8656_v34  ;;  %v1423_v59 = vsel %vm1421_vm13, %v1420_v60, %v8655_v27  ;;  %v1983_v9 = vpack.c.bf16 %v1970_v10, %v1970_v10  ;;  %v7383_v10 = vld [vmem:[%s9743_s12] ss:$0 sm:$0xff] }
 0x77b   :  { %v1973_v61 = vsel %vm697_vm3, %v1423_v59, %v1968_v37 }
 0x77c   :  { %v1982_v32 = vpack.c.bf16 %v1973_v61, %v1422_v7  ;;  %2214 = vmatpush1.bf16.msra.mxu1 %v8758_v49 }
 0x77d   :  { %2215 = vmatprep.subr.bf16.mxu1 %v8763_v15 }
 0x77e   :  { %8167 = vmatprep.mubr.msk.bf16.mxu0 %vm707_vm6, %v1982_v32 }
 0x77f   :  { %8168 = vmatmul.mubr.msk.bf16.vlgmr.msra.gmra.mrb[40].mxu0 %vm707_vm6, %v1983_v9  ;;  %v7384_v9 = vld [vmem:[%s9748_s23] ss:$0 sm:$0xff] }
 0x780   :  { %2216 = vmatpush1.bf16.msra.mxu1 %v8761_v12 }
 0x852   :  { %v8169_v43 = vpop.f32.mrb[40].mxu0 }
 0x853   :  { %v2064_v29 = vadd.f32 %v8169_v43, %v7375_v0  ;;  %v2055_v4 = vpop.f32.mrb[41].mxu0 }
 0x854   :  { %v2056_v22 = vadd.f32 %v7375_v0, %v2055_v4  ;;  %v8170_v26 = vpop.f32.mrb[42].mxu0 }
 0x855   :  { %v2058_v18 = vpop.f32.mrb[43].mxu0  ;;  %v2078_v5 = vmul.f32 %v7382_v24, %v2064_v29 }
 0x856   :  { %v2076_v8 = vmul.f32 %v7382_v24, %v2056_v22  ;;  %v2059_v63 = vadd.f32 %v7375_v0, %v2058_v18 }
 0x857   :  { %v9715_v11 = vadd.f32 %v2078_v5, %v9314_v19  ;;  %v8764_v5 = vld [vmem:[%s9759_s28 + $0x40] sm:$0xff]  }
 0x858   :  { %v9712_v38 = vadd.f32 %v2076_v8, %v9319_v21  ;;  %v2077_v44 = vmul.f32 %v7382_v24, %v2059_v63  ;;  %v8765_v8 = vld [vmem:[%s9759_s28] sm:$0xff]   ;;  %7824 = vmatprep.subr.bf16.mxu0 %v8764_v5  ;;  %v8766_v63 = vld [vmem:[%s9759_s28 + $0x48] sm:$0xff]  }
 0x859   :  { %v2090_v16 = vsel %vm714_vm4, %v9715_v11, 0.0  ;;  %7825 = vmatpush3.bf16.msra.mxu0 %v8765_v8 }
 0x85a   :  { %v9718_v13 = vadd.f32 %v2077_v44, %v9326_v25  ;;  %v2084_v46 = vsel %vm707_vm6, %v9712_v38, 0.0  ;;  %v8767_v44 = vld [vmem:[%s9759_s28 + $0x8] sm:$0xff]   ;;  %7826 = vmatprep.subr.bf16.mxu0 %v8766_v63 }
 0x85b   :  { %2085 = vadd.xlane.f32.xlu0 %v2084_v46  ;;  %v8768_v46 = vld [vmem:[%s9759_s28 + $0x50] sm:$0xff]  }
 0x85c   :  { %v2087_v14 = vsel %vm707_vm6, %v9718_v13, 0.0 }
 0x85d   :  { %2088 = vadd.xlane.f32.xlu1 %v2087_v14  ;;  %7827 = vmatpush3.bf16.msra.mxu0 %v8767_v44  ;;  %v8769_v14 = vld [vmem:[%s9759_s28 + $0x10] sm:$0xff]  }
 0x85e   :  { %7828 = vmatprep.subr.bf16.mxu0 %v8768_v46 }
 0x85f   :  { %2091 = vadd.xlane.f32.xlu0 %v2090_v16  ;;  %v8770_v16 = vld [vmem:[%s9759_s28 + $0x58] sm:$0xff]  }
 0x861   :  { %7829 = vmatpush3.bf16.msra.mxu0 %v8769_v14 }
 0x862   :  { %7830 = vmatprep.subr.bf16.mxu0 %v8770_v16 }
 0x8e8   :  { %v2086_v21 = vpop.xlane.xlu0 %2085 }
 0x8e9   :  { %v2093_v20 = vmul.f32 0.015625, %v2086_v21  ;;  %v8771_v21 = vld [vmem:[%s9759_s28 + $0x18] sm:$0xff]  }
 0x8ea   :  { %v2089_v28 = vpop.xlane.xlu1 %2088  ;;  %7831 = vmatpush3.bf16.msra.mxu0 %v8771_v21 }
 0x8eb   :  { %v2096_v19 = vsub.f32 %v9712_v38, %v2093_v20  ;;  %v2094_v25 = vmul.f32 0.015625, %v2089_v28  ;;  %v8772_v20 = vld [vmem:[%s9759_s28 + $0x60] sm:$0xff]  }
 0x8ec   :  { %v2092_v40 = vpop.xlane.xlu0 %2091  ;;  %v8773_v28 = vld [vmem:[%s9759_s28 + $0x20] sm:$0xff]   ;;  %7832 = vmatprep.subr.bf16.mxu0 %v8772_v20 }
 0x8ed   :  { %v2097_v52 = vsub.f32 %v9718_v13, %v2094_v25  ;;  %v2095_v50 = vmul.f32 0.015625, %v2092_v40  ;;  %v2099_v30 = vmul.f32 %v2096_v19, %v2096_v19  ;;  %v8775_v25 = vld [vmem:[%s9759_s28 + $0x28] sm:$0xff]   ;;  %v8776_v40 = vld [vmem:[%s9759_s28 + $0x70] sm:$0xff]  }
 0x8ee   :  { %7833 = vmatpush3.bf16.msra.mxu0 %v8773_v28 }
 0x8ef   :  { %v2098_v31 = vsub.f32 %v9715_v11, %v2095_v50  ;;  %v2102_v55 = vsel %vm707_vm6, %v2099_v30, 0.0  ;;  %v2100_v36 = vmul.f32 %v2097_v52, %v2097_v52  ;;  %v8778_v50 = vld [vmem:[%s9759_s28 + $0x78] sm:$0xff]  }
 0x8f0   :  { %2103 = vadd.xlane.f32.xlu0 %v2102_v55  ;;  %v8779_v30 = vld [vmem:[%s9759_s28 + $0x38] sm:$0xff]  }
 0x8f1   :  { %v2101_v39 = vmul.f32 %v2098_v31, %v2098_v31  ;;  %v2105_v1 = vsel %vm707_vm6, %v2100_v36, 0.0 }
 0x8f3   :  { %v2108_v3 = vsel %vm714_vm4, %v2101_v39, 0.0 }
 0x8f4   :  { %2106 = vadd.xlane.f32.xlu0 %v2105_v1  ;;  %2109 = vadd.xlane.f32.xlu1 %v2108_v3 }
 0x97d   :  { %v2104_v54 = vpop.xlane.xlu0 %2103 }
 0x97e   :  { %v2111_v42 = vmul.f32 0.015625, %v2104_v54 }
 0x980   :  { %v2114_v37 = vadd.f32 1e-06, %v2111_v42 }
 0x981   :  { %v2110_v58 = vpop.xlane.xlu1 %2109  ;;  %v2107_v2 = vpop.xlane.xlu0 %2106 }
 0x982   :  { %8982 = vrsqrt.f32 %v2114_v37  ;;  %v2113_v23 = vmul.f32 0.015625, %v2110_v58  ;;  %v2112_v56 = vmul.f32 0.015625, %v2107_v2 }
 0x984   :  { %v2116_v34 = vadd.f32 1e-06, %v2113_v23  ;;  %v2115_v27 = vadd.f32 1e-06, %v2112_v56 }
 0x986   :  { %8984 = vrsqrt.f32 %v2116_v34 }
 0x987   :  { %8986 = vrsqrt.f32 %v2115_v27 }
 0x98c   :  { %v8983_v57 = vpop.eup %8982 }
 0x98d   :  { %v2120_v60 = vmul.f32 %v8983_v57, %v2096_v19  ;;  %v8774_v19 = vld [vmem:[%s9759_s28 + $0x68] sm:$0xff]  }
 0x98e   :  { %7834 = vmatprep.subr.bf16.mxu0 %v8774_v19 }
 0x98f   :  { %v2129_v61 = vmul.f32 %v7383_v10, %v2120_v60  ;;  %7835 = vmatpush3.bf16.msra.mxu0 %v8775_v25 }
 0x990   :  { %v8985_v7 = vpop.eup %8984  ;;  %7836 = vmatprep.subr.bf16.mxu0 %v8776_v40 }
 0x991   :  { %v8987_v59 = vpop.eup %8986  ;;  %v2122_v43 = vmul.f32 %v8985_v7, %v2098_v31  ;;  %v2138_v29 = vadd.f32 %v7384_v9, %v2129_v61  ;;  %v2151_v31 = vld [vmem:[%s9781_s6] sm:$0x3] }
 0x992   :  { %v2121_v32 = vmul.f32 %v8987_v59, %v2097_v52  ;;  %v8777_v52 = vld [vmem:[%s9759_s28 + $0x30] sm:$0xff]   ;;  %v2156_v55 = vrot.slane %v2151_v31, %v9310_v6  ;;  %v2160_v36 = vrot.slane %v2151_v31, %v9383_v17 }
 0x993   :  { %v2131_v22 = vmul.f32 %v7383_v10, %v2122_v43  ;;  %7837 = vmatpush3.bf16.msra.mxu0 %v8777_v52 }
 0x994   :  { %v2130_v0 = vmul.f32 %v7383_v10, %v2121_v32  ;;  %7838 = vmatprep.subr.bf16.mxu0 %v8778_v50 }
 0x995   :  { %v2140_v26 = vadd.f32 %v7384_v9, %v2131_v22 }
 0x996   :  { %v2139_v24 = vadd.f32 %v7384_v9, %v2130_v0 }
 0x997   :  { %v2150_v18 = vpack.c.bf16 %v2140_v26, %v2140_v26  ;;  %7839 = vmatpush3.bf16.msra.mxu0 %v8779_v30 }
 0x998   :  { %v2149_v4 = vpack.c.bf16 %v2139_v24, %v2138_v29  ;;  %8183 = vmatprep.subr.bf16.mxu0 %v9163_v35 }
 0x99a   :  { %7393 = vmatmul.mubr.msk.bf16.vlgmr.msra.gmra.mrb[44].mxu1 %vm707_vm6, %v2149_v4 }
 0x99b   :  { %2251 = vmatprep.mubr.bf16.mxu1 %v9170_v51 }
 0x9a2   :  { %7394 = vmatmul.mubr.msk.bf16.gmra.mrb[48].mxu1 %vm707_vm6, %v2150_v18 }
 0x9a3   :  { %2677 = vmatprep.mubr.bf16.mxu1 %v9170_v51 }
 0xa6d   :  { %v2243_v39 = vpop.f32.mrb[44].mxu1 }
 0xa6e   :  { %v2244_v1 = vadd.f32 %v2243_v39, %v2156_v55  ;;  %v2245_v3 = vpop.f32.mrb[45].mxu1 }
 0xa6f   :  { %v2246_v41 = vadd.f32 %v2245_v3, %v2160_v36  ;;  %v2247_v48 = vpop.f32.mrb[46].mxu1 }
 0xa70   :  { %v2260_v53 = vmul.f32 %v2244_v1, %v2244_v1  ;;  %v2248_v45 = vadd.f32 %v2247_v48, %v2156_v55  ;;  %v2249_v47 = vpop.f32.mrb[47].mxu1 }
 0xa71   :  { %v2261_v49 = vmul.f32 %v2246_v41, %v2246_v41  ;;  %v2250_v12 = vadd.f32 %v2249_v47, %v2160_v36 }
 0xa72   :  { %v2266_v15 = vmul.f32 %v2260_v53, %v2244_v1  ;;  %v2262_v54 = vmul.f32 %v2248_v45, %v2248_v45 }
 0xa73   :  { %v2267_v42 = vmul.f32 %v2261_v49, %v2246_v41  ;;  %v2263_v37 = vmul.f32 %v2250_v12, %v2250_v12 }
 0xa74   :  { %v2272_v58 = vmul.f32 0.044715, %v2266_v15  ;;  %v2268_v2 = vmul.f32 %v2262_v54, %v2248_v45 }
 0xa75   :  { %v2273_v23 = vmul.f32 0.044715, %v2267_v42  ;;  %v2269_v56 = vmul.f32 %v2263_v37, %v2250_v12  ;;  %v2253_v34 = vpop.f32.mrb[48].mxu1 }
 0xa76   :  { %v2278_v27 = vadd.f32 %v2272_v58, %v2244_v1  ;;  %v2274_v57 = vmul.f32 0.044715, %v2268_v2  ;;  %v2254_v60 = vadd.f32 %v2253_v34, %v2156_v55  ;;  %v2255_v10 = vpop.f32.mrb[49].mxu1 }
 0xa77   :  { %v2279_v7 = vadd.f32 %v2273_v23, %v2246_v41  ;;  %v2275_v59 = vmul.f32 0.044715, %v2269_v56  ;;  %v2256_v61 = vadd.f32 %v2255_v10, %v2160_v36  ;;  %v2257_v32 = vpop.f32.mrb[50].mxu1  ;;  %v7412_v10 = vld [vmem:[%s9796_s27] ss:$0 sm:$0xff] }
 0xa78   :  { %v2284_v9 = vmul.f32 0.7978846, %v2278_v27  ;;  %v2280_v0 = vadd.f32 %v2274_v57, %v2248_v45  ;;  %v2264_v43 = vmul.f32 %v2254_v60, %v2254_v60  ;;  %v2258_v29 = vpop.f32.mrb[51].mxu1 }
 0xa79   :  { %v2285_v24 = vmul.f32 0.7978846, %v2279_v7  ;;  %v2281_v4 = vadd.f32 %v2275_v59, %v2250_v12  ;;  %v2265_v22 = vmul.f32 %v2256_v61, %v2256_v61 }
 0xa7a   :  { %8988 = vtanh.f32 %v2284_v9  ;;  %v2286_v26 = vmul.f32 0.7978846, %v2280_v0  ;;  %v2270_v18 = vmul.f32 %v2264_v43, %v2254_v60 }
 0xa7b   :  { %8990 = vtanh.f32 %v2285_v24  ;;  %v2287_v5 = vmul.f32 0.7978846, %v2281_v4  ;;  %v2271_v8 = vmul.f32 %v2265_v22, %v2256_v61 }
 0xa7c   :  { %8992 = vtanh.f32 %v2286_v26  ;;  %v2276_v63 = vmul.f32 0.044715, %v2270_v18 }
 0xa7d   :  { %8994 = vtanh.f32 %v2287_v5  ;;  %v2277_v44 = vmul.f32 0.044715, %v2271_v8 }
 0xa7e   :  { %v2282_v46 = vadd.f32 %v2276_v63, %v2254_v60 }
 0xa7f   :  { %v2283_v14 = vadd.f32 %v2277_v44, %v2256_v61 }
 0xa80   :  { %v2288_v16 = vmul.f32 0.7978846, %v2282_v46 }
 0xa81   :  { %v2289_v21 = vmul.f32 0.7978846, %v2283_v14 }
 0xa82   :  { %8996 = vtanh.f32 %v2288_v16 }
 0xa83   :  { %8998 = vtanh.f32 %v2289_v21 }
 0xa84   :  { %v8989_v20 = vpop.eup %8988 }
 0xa85   :  { %v8991_v28 = vpop.eup %8990  ;;  %v2296_v19 = vadd.f32 1.0, %v8989_v20 }
 0xa86   :  { %v8993_v25 = vpop.eup %8992  ;;  %v2297_v40 = vadd.f32 1.0, %v8991_v28 }
 0xa87   :  { %v8995_v52 = vpop.eup %8994  ;;  %v2302_v50 = vmul.f32 0.5, %v2296_v19  ;;  %v2298_v30 = vadd.f32 1.0, %v8993_v25 }
 0xa88   :  { %v2299_v31 = vadd.f32 1.0, %v8995_v52  ;;  %v2303_v55 = vmul.f32 0.5, %v2297_v40 }
 0xa89   :  { %v2304_v36 = vmul.f32 0.5, %v2298_v30  ;;  %v2308_v3 = vmul.f32 %v2302_v50, %v2244_v1 }
 0xa8a   :  { %v2305_v39 = vmul.f32 0.5, %v2299_v31  ;;  %v2309_v47 = vmul.f32 %v2303_v55, %v2246_v41  ;;  %v7395_v41 = vld [vmem:[%s9791_s14] ss:$0 sm:$0xff] }
 0xa8b   :  { %v2310_v48 = vmul.f32 %v2304_v36, %v2248_v45  ;;  %v8782_v36 = vld [vmem:[%s9339_s29 + $0x44] ss:$8 sps:$4 sm:$0xff]  }
 0xa8c   :  { %v8997_v53 = vpop.eup %8996  ;;  %v2311_v49 = vmul.f32 %v2305_v39, %v2250_v12  ;;  %v8780_v39 = vld [vmem:[%s9339_s29 + $0x40] ss:$8 sps:$4 sm:$0xff]   ;;  %2645 = vmatprep.subr.bf16.mxu1 %v8782_v36 }
 0xa8d   :  { %v8999_v15 = vpop.eup %8998  ;;  %v2346_v54 = vpack.c.bf16 %v2310_v48, %v2308_v3  ;;  %v2300_v42 = vadd.f32 1.0, %v8997_v53  ;;  %2646 = vmatpush1.bf16.msra.mxu1 %v8780_v39  ;;  %v8785_v3 = vld [vmem:[%s9339_s29 + $0x54] ss:$8 sps:$4 sm:$0xff]   ;;  %v8783_v48 = vld [vmem:[%s9339_s29 + $0x50] ss:$8 sps:$4 sm:$0xff]  }
 0xa8e   :  { %v2347_v37 = vpack.c.bf16 %v2311_v49, %v2309_v47  ;;  %v2301_v58 = vadd.f32 1.0, %v8999_v15  ;;  %2647 = vmatprep.subr.bf16.mxu1 %v8785_v3  ;;  %v8788_v53 = vld [vmem:[%s9339_s29 + $0x64] ss:$8 sps:$4 sm:$0xff]   ;;  %v8786_v47 = vld [vmem:[%s9339_s29 + $0x60] ss:$8 sps:$4 sm:$0xff]  }
 0xa8f   :  { %v2306_v2 = vmul.f32 0.5, %v2300_v42  ;;  %v8791_v49 = vld [vmem:[%s9339_s29 + $0x74] ss:$8 sps:$4 sm:$0xff]   ;;  %v8789_v15 = vld [vmem:[%s9339_s29 + $0x70] ss:$8 sps:$4 sm:$0xff]   ;;  %s9191_s29 = smov 1  }
 0xa90   :  { %2485 = vmatprep.mubr.bf16.mxu0 %v2347_v37  ;;  %v2307_v23 = vmul.f32 0.5, %v2301_v58 }
 0xa91   :  { %2486 = vmatmul.mubr.bf16.vlgmr.msra.gmra.mrb[44].mxu0 %v2346_v54  ;;  %v2312_v34 = vmul.f32 %v2306_v2, %v2254_v60  ;;  %2648 = vmatpush1.bf16.msra.mxu1 %v8783_v48 }
 0xa92   :  { %v2313_v56 = vmul.f32 %v2307_v23, %v2256_v61  ;;  %2649 = vmatprep.subr.bf16.mxu1 %v8788_v53 }
 0xa93   :  { %v2348_v57 = vpack.c.bf16 %v2312_v34, %v2312_v34 }
 0xa94   :  { %v2349_v27 = vpack.c.bf16 %v2313_v56, %v2313_v56 }
 0xa95   :  { %2650 = vmatpush1.bf16.msra.mxu1 %v8786_v47 }
 0xa96   :  { %2493 = vmatprep.mubr.bf16.mxu0 %v2349_v27  ;;  %2651 = vmatprep.subr.bf16.mxu1 %v8791_v49 }
 0xa99   :  { %2494 = vmatmul.mubr.bf16.gmra.mrb[48].mxu0 %v2348_v57  ;;  %2652 = vmatpush1.bf16.msra.mxu1 %v8789_v15 }
 0xa9a   :  { %8185 = vmatprep.mubr.msk.bf16.mxu0 %vm9164_vm0, %v9163_v35  ;;  %8171 = vmatprep.subr.bf16.mxu1 %v9163_v35 }
 0xb64   :  { %v7840_v1 = vpop.f32.mrb[44].mxu0 }
 0xb65   :  { %v7841_v45 = vpop.f32.mrb[45].mxu0 }
 0xb66   :  { %v7842_v12 = vadd.f32 %v7841_v45, %v7840_v1  ;;  %v7843_v60 = vpop.f32.mrb[46].mxu0  ;;  %v7415_v1 = vld [vmem:[%s9356_s3 + $0x1] ss:$0 sm:$0xff]  ;;  %s9203_s3 = smov 34  }
 0xb67   :  { %v7844_v7 = vpop.f32.mrb[47].mxu0 }
 0xb68   :  { %v2488_v59 = vadd.f32 %v7842_v12, %v7395_v41  ;;  %v7845_v61 = vadd.f32 %v7844_v7, %v7843_v60 }
 0xb6a   :  { %v2508_v32 = vmul.f32 %v7412_v10, %v2488_v59  ;;  %v2491_v9 = vadd.f32 %v7845_v61, %v7395_v41 }
 0xb6c   :  { %v2509_v0 = vmul.f32 %v7412_v10, %v2491_v9  ;;  %v7846_v43 = vpop.f32.mrb[48].mxu0  ;;  %v9801_v29 = vadd.f32 %v2508_v32, %v9712_v38 }
 0xb6d   :  { %v7847_v24 = vpop.f32.mrb[49].mxu0 }
 0xb6e   :  { %v7848_v4 = vadd.f32 %v7847_v24, %v7846_v43  ;;  %v7849_v22 = vpop.f32.mrb[50].mxu0  ;;  %v2518_v26 = vsel %vm707_vm6, %v9801_v29, 0.0  ;;  %v9806_v18 = vadd.f32 %v2509_v0, %v9718_v13 }
 0xb6f   :  { %v7850_v5 = vpop.f32.mrb[51].mxu0  ;;  %2519 = vadd.xlane.f32.xlu0 %v2518_v26  ;;  %v7425_v22 = vld [vmem:[%s9379_s15 + $0x2] sm:$0x3]  ;;  %s7253_s15 = sld [smem:[%s10752_s0 + %s9191_s29]]   ;;  %s9198_s29 = smov 25  }
 0xb70   :  { %v2496_v8 = vadd.f32 %v7848_v4, %v7395_v41  ;;  %v2521_v63 = vsel %vm707_vm6, %v9806_v18, 0.0  ;;  %v2592_v26 = vrot.slane %v7425_v22, %v9310_v6 }
 0xb71   :  { %2522 = vadd.xlane.f32.xlu1 %v2521_v63 }
 0xb72   :  { %v2510_v44 = vmul.f32 %v7412_v10, %v2496_v8  ;;  %v7416_v10 = vld [vmem:[%s9361_s7 + $0x1] ss:$0 sm:$0xff]  ;;  %v2596_v8 = vrot.slane %v7425_v22, %v9383_v17  ;;  %s10455_s7 = sld [smem:[%s10752_s0 + %s9207_s22]]  }
 0xb74   :  { %v9811_v38 = vadd.f32 %v2510_v44, %v9715_v11 }
 0xb76   :  { %v2524_v46 = vsel %vm714_vm4, %v9811_v38, 0.0 }
 0xb77   :  { %2525 = vadd.xlane.f32.xlu0 %v2524_v46 }
 0xbfc   :  { %v2520_v14 = vpop.xlane.xlu0 %2519 }
 0xbfd   :  { %v2527_v16 = vmul.f32 0.015625, %v2520_v14 }
 0xbfe   :  { %v2523_v21 = vpop.xlane.xlu1 %2522 }
 0xbff   :  { %v2530_v13 = vsub.f32 %v9801_v29, %v2527_v16  ;;  %v2528_v20 = vmul.f32 0.015625, %v2523_v21 }
 0xc01   :  { %v2531_v28 = vsub.f32 %v9806_v18, %v2528_v20  ;;  %v2533_v19 = vmul.f32 %v2530_v13, %v2530_v13 }
 0xc03   :  { %v2536_v25 = vsel %vm707_vm6, %v2533_v19, 0.0  ;;  %v2534_v11 = vmul.f32 %v2531_v28, %v2531_v28 }
 0xc04   :  { %2537 = vadd.xlane.f32.xlu1 %v2536_v25  ;;  %v2526_v40 = vpop.xlane.xlu0 %2525 }
 0xc05   :  { %v2529_v52 = vmul.f32 0.015625, %v2526_v40  ;;  %v2539_v50 = vsel %vm707_vm6, %v2534_v11, 0.0 }
 0xc06   :  { %2540 = vadd.xlane.f32.xlu0 %v2539_v50 }
 0xc07   :  { %v2532_v30 = vsub.f32 %v9811_v38, %v2529_v52 }
 0xc09   :  { %v2535_v31 = vmul.f32 %v2532_v30, %v2532_v30 }
 0xc0b   :  { %v2542_v55 = vsel %vm714_vm4, %v2535_v31, 0.0 }
 0xc0c   :  { %2543 = vadd.xlane.f32.xlu1 %v2542_v55 }
 0xc91   :  { %v2538_v54 = vpop.xlane.xlu1 %2537 }
 0xc92   :  { %v2545_v42 = vmul.f32 0.015625, %v2538_v54 }
 0xc93   :  { %v2541_v37 = vpop.xlane.xlu0 %2540 }
 0xc94   :  { %v2548_v58 = vadd.f32 1e-06, %v2545_v42  ;;  %v2546_v2 = vmul.f32 0.015625, %v2541_v37 }
 0xc96   :  { %9000 = vrsqrt.f32 %v2548_v58  ;;  %v2549_v23 = vadd.f32 1e-06, %v2546_v2 }
 0xc98   :  { %9002 = vrsqrt.f32 %v2549_v23 }
 0xc99   :  { %v2544_v56 = vpop.xlane.xlu1 %2543 }
 0xc9a   :  { %v2547_v34 = vmul.f32 0.015625, %v2544_v56 }
 0xc9c   :  { %v2550_v27 = vadd.f32 1e-06, %v2547_v34 }
 0xc9e   :  { %9004 = vrsqrt.f32 %v2550_v27 }
 0xca0   :  { %v9001_v57 = vpop.eup %9000 }
 0xca1   :  { %v2554_v41 = vmul.f32 %v9001_v57, %v2530_v13 }
 0xca2   :  { %v9003_v45 = vpop.eup %9002 }
 0xca3   :  { %v2563_v12 = vmul.f32 %v7415_v1, %v2554_v41  ;;  %v2555_v60 = vmul.f32 %v9003_v45, %v2531_v28 }
 0xca5   :  { %v2564_v7 = vmul.f32 %v7415_v1, %v2555_v60  ;;  %v2572_v59 = vadd.f32 %v7416_v10, %v2563_v12 }
 0xca7   :  { %v2573_v61 = vadd.f32 %v7416_v10, %v2564_v7 }
 0xca8   :  { %v9005_v32 = vpop.eup %9004 }
 0xca9   :  { %v2584_v9 = vpack.c.bf16 %v2573_v61, %v2572_v59  ;;  %v2556_v0 = vmul.f32 %v9005_v32, %v2532_v30 }
 0xcab   :  { %7434 = vmatmul.mubr.msk.bf16.vlgmr.msra.gmra.mrb[52].mxu1 %vm707_vm6, %v2584_v9  ;;  %v2565_v43 = vmul.f32 %v7415_v1, %v2556_v0 }
 0xcac   :  { %2687 = vmatprep.mubr.bf16.mxu1 %v9170_v51 }
 0xcad   :  { %v2574_v24 = vadd.f32 %v7416_v10, %v2565_v43 }
 0xcaf   :  { %v2585_v4 = vpack.c.bf16 %v2574_v24, %v2574_v24 }
 0xcb3   :  { %7435 = vmatmul.mubr.msk.bf16.gmra.mrb[56].mxu1 %vm707_vm6, %v2585_v4 }
 0xcb4   :  { %8173 = vmatprep.mubr.msk.bf16.mxu1 %vm9164_vm0, %v9163_v35 }
 0xd7e   :  { %v2679_v5 = vpop.f32.mrb[52].mxu1 }
 0xd7f   :  { %v2681_v63 = vpop.f32.mrb[53].mxu1  ;;  %v2680_v46 = vadd.f32 %v2679_v5, %v2592_v26 }
 0xd80   :  { %v2683_v44 = vpop.f32.mrb[54].mxu1  ;;  %v2682_v21 = vadd.f32 %v2681_v63, %v2596_v8 }
 0xd81   :  { %v2684_v14 = vadd.f32 %v2683_v44, %v2592_v26  ;;  %v2685_v16 = vpop.f32.mrb[55].mxu1 }
 0xd82   :  { %v2686_v13 = vadd.f32 %v2685_v16, %v2596_v8 }
 0xd83   :  { %v2696_v20 = vpack.c.bf16 %v2684_v14, %v2680_v46 }
 0xd84   :  { %v9840_v28 = vpack.c.bf16 %v2686_v13, %v2682_v21 }
 0xd85   :  { %2822 = vrot.lane.b32.xlu1 %v2696_v20, %s9176_s16  ;;  %2698 = vrot.lane.b32.xlu0 %v2696_v20, %s9177_s17 }
 0xd86   :  { %v2689_v19 = vpop.f32.mrb[56].mxu1  ;;  %v2777_v42 = vand.u32 %v9840_v28, %v9389_v33 }
 0xd87   :  { %v2690_v25 = vadd.f32 %v2689_v19, %v2592_v26  ;;  %v2691_v11 = vpop.f32.mrb[57].mxu1 }
 0xd88   :  { %v2692_v40 = vadd.f32 %v2691_v11, %v2596_v8  ;;  %v2693_v52 = vpop.f32.mrb[58].mxu1 }
 0xd89   :  { %v3226_v50 = vpack.c.bf16 %v2690_v25, %v2684_v14  ;;  %v2694_v30 = vpop.f32.mrb[59].mxu1  ;;  %2820 = vrot.lane.b32.xlu1 %v2696_v20, %s9178_s18  ;;  %2946 = vrot.lane.b32.xlu0 %v2696_v20, %s9179_s19 }
 0xd8a   :  { %v9846_v31 = vpack.c.bf16 %v2692_v40, %v2686_v13 }
 0xd8b   :  { %v3230_v55 = vshll.u32 %v3226_v50, 16  ;;  %v3228_v36 = vshrl.u32 %v3226_v50, 16 }
 0xd8d   :  { %v3232_v39 = vrot.slane %v3230_v55, 1  ;;  %2948 = vrot.lane.b32.xlu1 %v2696_v20, %s9180_s20  ;;  %3071 = vrot.lane.b32.xlu0 %v2696_v20, %s9181_s21 }
 0xd8f   :  { %v3233_v3 = vor.u32 %v3232_v39, %v3228_v36 }
 0xd91   :  { %3073 = vrot.lane.b32.xlu1 %v2696_v20, %s9173_s8  ;;  %3365 = vrot.lane.b32.xlu0 %v3233_v3, %s9176_s16 }
 0xd95   :  { %3234 = vrot.lane.b32.xlu1 %v3233_v3, %s9177_s17  ;;  %3490 = vrot.lane.b32.xlu0 %v3233_v3, %s9180_s20  ;;  %s9192_s17 = smov 23  }
 0xd99   :  { %3363 = vrot.lane.b32.xlu1 %v3233_v3, %s9178_s18  ;;  %3615 = vrot.lane.b32.xlu0 %v3233_v3, %s9173_s8 }
 0xd9d   :  { %3488 = vrot.lane.b32.xlu1 %v3233_v3, %s9179_s19 }
 0xda1   :  { %3613 = vrot.lane.b32.xlu1 %v3233_v3, %s9181_s21 }
 0xdf7   :  { %v2823_v48 = vpop.permute.xlu1 %2822  ;;  %v2699_v53 = vpop.permute.xlu0 %2698 }
 0xdf8   :  { %v2828_v47 = vsel %vm890_vm9, %v2823_v48, 0  ;;  %v2704_v49 = vsel %vm890_vm9, %v2699_v53, 0 }
 0xdf9   :  { %8172 = vmatpush3.bf16.xpose.msra.mxu1 %v2704_v49  ;;  %8184 = vmatpush3.bf16.xpose.msra.mxu0 %v2828_v47 }
 0xdfa   :  { %8177 = vmatprep.subr.bf16.mxu1 %v9163_v35  ;;  %8195 = vmatprep.subr.bf16.mxu0 %v9163_v35 }
 0xdfb   :  { %v2821_v15 = vpop.permute.xlu1 %2820  ;;  %v2947_v2 = vpop.permute.xlu0 %2946 }
 0xdff   :  { %v2949_v54 = vpop.permute.xlu1 %2948  ;;  %v3072_v34 = vpop.permute.xlu0 %3071 }
 0xe00   :  { %v2954_v37 = vsel %vm890_vm9, %v2949_v54, 0  ;;  %8174 = vmatmul.mubr.msk.bf16.vlgmr.msra.gmra.mrb[60].mxu1 %vm890_vm9, %v2696_v20  ;;  %8186 = vmatmul.mubr.msk.bf16.vlgmr.msra.gmra.mrb[52].mxu0 %vm890_vm9, %v2821_v15 }
 0xe01   :  { %8178 = vmatpush3.bf16.msra.mxu1 %v2777_v42  ;;  %8196 = vmatpush3.bf16.xpose.msra.mxu0 %v2954_v37 }
 0xe02   :  { %8197 = vmatprep.mubr.msk.bf16.mxu0 %vm9164_vm0, %v9163_v35  ;;  %8207 = vmatprep.subr.bf16.mxu0 %v9163_v35 }
 0xe03   :  { %8179 = vmatprep.mubr.msk.bf16.mxu1 %vm9164_vm0, %v9163_v35  ;;  %8189 = vmatprep.subr.bf16.mxu1 %v9163_v35  ;;  %v3074_v58 = vpop.permute.xlu1 %3073  ;;  %v3366_v57 = vpop.permute.xlu0 %3365 }
 0xe04   :  { %v3079_v23 = vsel %vm890_vm9, %v3074_v58, 0  ;;  %v3371_v1 = vsel %vm890_vm9, %v3366_v57, 0 }
 0xe07   :  { %v3235_v56 = vpop.permute.xlu1 %3234  ;;  %v3491_v41 = vpop.permute.xlu0 %3490 }
 0xe08   :  { %8198 = vmatmul.mubr.msk.bf16.vlgmr.msra.gmra.mrb[56].mxu0 %vm890_vm9, %v2947_v2  ;;  %v3240_v27 = vsel %vm890_vm9, %v3235_v56, 0  ;;  %v3496_v12 = vsel %vm890_vm9, %v3491_v41, 0 }
 0xe09   :  { %8208 = vmatpush3.bf16.xpose.msra.mxu0 %v3079_v23  ;;  %8209 = vmatprep.mubr.msk.bf16.mxu0 %vm9164_vm0, %v9163_v35 }
 0xe0a   :  { %8219 = vmatprep.subr.bf16.mxu0 %v9163_v35 }
 0xe0b   :  { %v3364_v45 = vpop.permute.xlu1 %3363  ;;  %v3616_v60 = vpop.permute.xlu0 %3615 }
 0xe0c   :  { %v3621_v7 = vsel %vm890_vm9, %v3616_v60, 0 }
 0xe0f   :  { %v3489_v10 = vpop.permute.xlu1 %3488 }
 0xe10   :  { %8210 = vmatmul.mubr.msk.bf16.vlgmr.msra.gmra.mrb[60].mxu0 %vm890_vm9, %v3072_v34 }
 0xe11   :  { %8220 = vmatpush3.bf16.xpose.msra.mxu0 %v3240_v27  ;;  %8221 = vmatprep.mubr.msk.bf16.mxu0 %vm9164_vm0, %v9163_v35 }
 0xe12   :  { %8231 = vmatprep.subr.bf16.mxu0 %v9163_v35 }
 0xe13   :  { %v3614_v59 = vpop.permute.xlu1 %3613 }
 0xe18   :  { %8222 = vmatmul.mubr.msk.bf16.vlgmr.msra.gmra.mrb[64].mxu0 %vm890_vm9, %v3233_v3 }
 0xe19   :  { %8232 = vmatpush3.bf16.xpose.msra.mxu0 %v3371_v1  ;;  %8233 = vmatprep.mubr.msk.bf16.mxu0 %vm9164_vm0, %v9163_v35 }
 0xe1a   :  { %8243 = vmatprep.subr.bf16.mxu0 %v9163_v35 }
 0xe20   :  { %8234 = vmatmul.mubr.msk.bf16.vlgmr.msra.gmra.mrb[68].mxu0 %vm890_vm9, %v3364_v45 }
 0xe21   :  { %8244 = vmatpush3.bf16.xpose.msra.mxu0 %v3496_v12  ;;  %8245 = vmatprep.mubr.msk.bf16.mxu0 %vm9164_vm0, %v9163_v35 }
 0xe22   :  { %8255 = vmatprep.subr.bf16.mxu0 %v9163_v35 }
 0xe28   :  { %8246 = vmatmul.mubr.msk.bf16.vlgmr.msra.gmra.mrb[72].mxu0 %vm890_vm9, %v3489_v10 }
 0xe29   :  { %8256 = vmatpush3.bf16.xpose.msra.mxu0 %v3621_v7  ;;  %8257 = vmatprep.mubr.msk.bf16.mxu0 %vm9164_vm0, %v9163_v35 }
 0xe30   :  { %8258 = vmatmul.mubr.msk.bf16.vlgmr.msra.gmra.mrb[76].mxu0 %vm890_vm9, %v3614_v59 }
 0xed3   :  { %v2740_v61 = vpop.f32.mrb[60].mxu1  ;;  %v2864_v32 = vpop.f32.mrb[52].mxu0 }
 0xed4   :  { %v9898_v9 = vmul.f32 0.25, %v2740_v61  ;;  %v8175_v0 = vpop.f32.mrb[61].mxu1  ;;  %v8187_v43 = vpop.f32.mrb[53].mxu0  ;;  %v9900_v22 = vmul.f32 0.25, %v2864_v32 }
 0xed5   :  { %v2743_v24 = vpop.f32.mrb[62].mxu1  ;;  %v2867_v4 = vpop.f32.mrb[54].mxu0 }
 0xed6   :  { %v9902_v26 = vmul.f32 0.25, %v2743_v24  ;;  %v8176_v5 = vpop.f32.mrb[63].mxu1  ;;  %v8188_v8 = vpop.f32.mrb[55].mxu0  ;;  %v2749_v63 = vsel %vm940_vm10, %v9898_v9, -inf  ;;  %v9908_v46 = vmul.f32 0.25, %v2867_v4  ;;  %v2873_v14 = vsel %vm940_vm10, %v9900_v22, -inf }
 0xed7   :  { %2750 = vmax.xlane.f32.xlu0 %v2749_v63 }
 0xed8   :  { %v2752_v44 = vsel %vm944_vm11, %v9902_v26, -inf  ;;  %v2876_v11 = vsel %vm944_vm11, %v9908_v46, -inf }
 0xed9   :  { %2753 = vmax.xlane.f32.xlu1 %v2752_v44 }
 0xedb   :  { %2874 = vmax.xlane.f32.xlu0 %v2873_v14  ;;  %v2990_v16 = vpop.f32.mrb[56].mxu0 }
 0xedc   :  { %v8199_v21 = vpop.f32.mrb[57].mxu0  ;;  %v9912_v20 = vmul.f32 0.25, %v2990_v16 }
 0xedd   :  { %v2993_v13 = vpop.f32.mrb[58].mxu0 }
 0xede   :  { %v9914_v19 = vmul.f32 0.25, %v2993_v13  ;;  %v8200_v25 = vpop.f32.mrb[59].mxu0  ;;  %v2999_v52 = vsel %vm940_vm10, %v9912_v20, -inf }
 0xedf   :  { %2877 = vmax.xlane.f32.xlu0 %v2876_v11 }
 0xee0   :  { %v3002_v40 = vsel %vm944_vm11, %v9914_v19, -inf }
 0xee1   :  { %3003 = vmax.xlane.f32.xlu1 %v3002_v40 }
 0xee3   :  { %3000 = vmax.xlane.f32.xlu0 %v2999_v52  ;;  %v3115_v50 = vpop.f32.mrb[60].mxu0 }
 0xee4   :  { %v9922_v30 = vmul.f32 0.25, %v3115_v50  ;;  %v8211_v55 = vpop.f32.mrb[61].mxu0 }
 0xee5   :  { %v3118_v36 = vpop.f32.mrb[62].mxu0 }
 0xee6   :  { %v9924_v39 = vmul.f32 0.25, %v3118_v36  ;;  %v8212_v3 = vpop.f32.mrb[63].mxu0  ;;  %v3124_v48 = vsel %vm940_vm10, %v9922_v30, -inf }
 0xee7   :  { %3125 = vmax.xlane.f32.xlu0 %v3124_v48 }
 0xee8   :  { %v3127_v53 = vsel %vm944_vm11, %v9924_v39, -inf }
 0xee9   :  { %3128 = vmax.xlane.f32.xlu1 %v3127_v53 }
 0xeeb   :  { %v3276_v47 = vpop.f32.mrb[64].mxu0 }
 0xeec   :  { %v9930_v49 = vmul.f32 0.25, %v3276_v47  ;;  %v8223_v15 = vpop.f32.mrb[65].mxu0 }
 0xeed   :  { %v3279_v54 = vpop.f32.mrb[66].mxu0 }
 0xeee   :  { %v9932_v42 = vmul.f32 0.25, %v3279_v54  ;;  %v8224_v37 = vpop.f32.mrb[67].mxu0  ;;  %v3285_v58 = vsel %vm940_vm10, %v9930_v49, -inf }
 0xeef   :  { %3286 = vmax.xlane.f32.xlu0 %v3285_v58 }
 0xef0   :  { %v3288_v2 = vsel %vm944_vm11, %v9932_v42, -inf }
 0xef1   :  { %3289 = vmax.xlane.f32.xlu1 %v3288_v2 }
 0xef3   :  { %v3407_v23 = vpop.f32.mrb[68].mxu0 }
 0xef4   :  { %v9938_v56 = vmul.f32 0.25, %v3407_v23  ;;  %v8235_v34 = vpop.f32.mrb[69].mxu0 }
 0xef5   :  { %v3410_v27 = vpop.f32.mrb[70].mxu0 }
 0xef6   :  { %v9940_v57 = vmul.f32 0.25, %v3410_v27  ;;  %v8236_v1 = vpop.f32.mrb[71].mxu0  ;;  %v3416_v41 = vsel %vm940_vm10, %v9938_v56, -inf }
 0xef7   :  { %3417 = vmax.xlane.f32.xlu0 %v3416_v41 }
 0xef8   :  { %v3419_v45 = vsel %vm944_vm11, %v9940_v57, -inf }
 0xef9   :  { %3420 = vmax.xlane.f32.xlu1 %v3419_v45 }
 0xefb   :  { %v3532_v12 = vpop.f32.mrb[72].mxu0 }
 0xefc   :  { %v8247_v60 = vpop.f32.mrb[73].mxu0  ;;  %v9958_v8 = vmul.f32 0.25, %v3532_v12 }
 0xefd   :  { %v3535_v10 = vpop.f32.mrb[74].mxu0 }
 0xefe   :  { %v9946_v7 = vmul.f32 0.25, %v3535_v10  ;;  %v8248_v59 = vpop.f32.mrb[75].mxu0  ;;  %v3541_v44 = vsel %vm940_vm10, %v9958_v8, -inf }
 0xf00   :  { %v3544_v61 = vsel %vm944_vm11, %v9946_v7, -inf }
 0xf01   :  { %3545 = vmax.xlane.f32.xlu1 %v3544_v61 }
 0xf03   :  { %v3657_v32 = vpop.f32.mrb[76].mxu0 }
 0xf04   :  { %v8259_v0 = vpop.f32.mrb[77].mxu0  ;;  %v9960_v63 = vmul.f32 0.25, %v3657_v32 }
 0xf05   :  { %v3660_v43 = vpop.f32.mrb[78].mxu0 }
 0xf06   :  { %v9950_v24 = vmul.f32 0.25, %v3660_v43  ;;  %v8260_v4 = vpop.f32.mrb[79].mxu0  ;;  %v3666_v14 = vsel %vm940_vm10, %v9960_v63, -inf }
 0xf08   :  { %v3669_v5 = vsel %vm944_vm11, %v9950_v24, -inf }
 0xf09   :  { %3670 = vmax.xlane.f32.xlu1 %v3669_v5 }
 0xf0d   :  { %2897 = vrot.lane.b32.xlu0 %v9840_v28, %s9178_s18 }
 0xf1a   :  { %3022 = vrot.lane.b32.xlu1 %v9840_v28, %s9179_s19 }
 0xf2c   :  { %3542 = vmax.xlane.f32.xlu0 %v3541_v44 }
 0xf30   :  { %3667 = vmax.xlane.f32.xlu0 %v3666_v14 }
 0xf64   :  { %v2751_v16 = vpop.xlane.xlu0 %2750 }
 0xf65   :  { %v2755_v21 = vsub.f32 %v9898_v9, %v2751_v16 }
 0xf66   :  { %v2754_v13 = vpop.xlane.xlu1 %2753 }
 0xf67   :  { %v2757_v25 = vmul.f32 1.442695, %v2755_v21  ;;  %v2756_v11 = vsub.f32 %v9902_v26, %v2754_v13 }
 0xf68   :  { %v2875_v40 = vpop.xlane.xlu0 %2874 }
 0xf69   :  { %9006 = vpow2.f32 %v2757_v25  ;;  %v2759_v52 = vmul.f32 1.442695, %v2756_v11  ;;  %v2879_v50 = vsub.f32 %v9900_v22, %v2875_v40 }
 0xf6b   :  { %9008 = vpow2.f32 %v2759_v52  ;;  %v2881_v55 = vmul.f32 1.442695, %v2879_v50 }
 0xf6c   :  { %v2878_v36 = vpop.xlane.xlu0 %2877 }
 0xf6d   :  { %9010 = vpow2.f32 %v2881_v55  ;;  %v2880_v3 = vsub.f32 %v9908_v46, %v2878_v36 }
 0xf6e   :  { %v3004_v48 = vpop.xlane.xlu1 %3003 }
 0xf6f   :  { %v2883_v53 = vmul.f32 1.442695, %v2880_v3  ;;  %v3006_v47 = vsub.f32 %v9914_v19, %v3004_v48 }
 0xf70   :  { %v3001_v9 = vpop.xlane.xlu0 %3000 }
 0xf71   :  { %9012 = vpow2.f32 %v2883_v53  ;;  %v3009_v15 = vmul.f32 1.442695, %v3006_v47  ;;  %v3005_v26 = vsub.f32 %v9912_v20, %v3001_v9 }
 0xf73   :  { %v9972_v54 = vpop.eup %9006  ;;  %9014 = vpow2.f32 %v3009_v15  ;;  %v3007_v37 = vmul.f32 1.442695, %v3005_v26 }
 0xf74   :  { %v3126_v22 = vpop.xlane.xlu0 %3125  ;;  %v2761_v58 = vsel %vm940_vm10, %v9972_v54, 0.0 }
 0xf75   :  { %v9976_v2 = vpop.eup %9008  ;;  %9016 = vpow2.f32 %v3007_v37  ;;  %v3130_v46 = vsub.f32 %v9922_v30, %v3126_v22  ;;  %2762 = vadd.xlane.f32.xlu0 %v2761_v58 }
 0xf76   :  { %v3129_v19 = vpop.xlane.xlu1 %3128  ;;  %v2764_v23 = vsel %vm944_vm11, %v9976_v2, 0.0 }
 0xf77   :  { %v9981_v34 = vpop.eup %9010  ;;  %v3132_v20 = vmul.f32 1.442695, %v3130_v46  ;;  %v3131_v27 = vsub.f32 %v9924_v39, %v3129_v19  ;;  %2765 = vadd.xlane.f32.xlu1 %v2764_v23 }
 0xf78   :  { %v2885_v1 = vsel %vm940_vm10, %v9981_v34, 0.0 }
 0xf79   :  { %9018 = vpow2.f32 %v3132_v20  ;;  %v3134_v41 = vmul.f32 1.442695, %v3131_v27  ;;  %2886 = vadd.xlane.f32.xlu0 %v2885_v1 }
 0xf7b   :  { %v9986_v45 = vpop.eup %9012  ;;  %9020 = vpow2.f32 %v3134_v41 }
 0xf7c   :  { %v3287_v30 = vpop.xlane.xlu0 %3286  ;;  %v2888_v12 = vsel %vm944_vm11, %v9986_v45, 0.0 }
 0xf7d   :  { %v9990_v60 = vpop.eup %9014  ;;  %v3291_v10 = vsub.f32 %v9930_v49, %v3287_v30  ;;  %2889 = vadd.xlane.f32.xlu1 %v2888_v12 }
 0xf7e   :  { %v3290_v39 = vpop.xlane.xlu1 %3289  ;;  %v3014_v0 = vsel %vm944_vm11, %v9990_v60, 0.0 }
 0xf7f   :  { %v9993_v59 = vpop.eup %9016  ;;  %v3293_v61 = vmul.f32 1.442695, %v3291_v10  ;;  %v3292_v32 = vsub.f32 %v9932_v42, %v3290_v39 }
 0xf80   :  { %v3011_v43 = vsel %vm940_vm10, %v9993_v59, 0.0 }
 0xf81   :  { %9022 = vpow2.f32 %v3293_v61  ;;  %v3295_v4 = vmul.f32 1.442695, %v3292_v32  ;;  %3015 = vadd.xlane.f32.xlu1 %v3014_v0  ;;  %3012 = vadd.xlane.f32.xlu0 %v3011_v43 }
 0xf83   :  { %v10000_v5 = vpop.eup %9018  ;;  %9024 = vpow2.f32 %v3295_v4 }
 0xf84   :  { %v3136_v49 = vsel %vm940_vm10, %v10000_v5, 0.0  ;;  %v3418_v50 = vpop.xlane.xlu0 %3417 }
 0xf85   :  { %v10004_v44 = vpop.eup %9020  ;;  %3137 = vadd.xlane.f32.xlu0 %v3136_v49  ;;  %v3422_v55 = vsub.f32 %v9938_v56, %v3418_v50 }
 0xf86   :  { %v3421_v42 = vpop.xlane.xlu1 %3420  ;;  %v3139_v14 = vsel %vm944_vm11, %v10004_v44, 0.0 }
 0xf87   :  { %v3423_v16 = vsub.f32 %v9940_v57, %v3421_v42  ;;  %3140 = vadd.xlane.f32.xlu1 %v3139_v14  ;;  %v3424_v36 = vmul.f32 1.442695, %v3422_v55 }
 0xf88   :  { %v2898_v3 = vpop.permute.xlu0 %2897 }
 0xf89   :  { %v3426_v21 = vmul.f32 1.442695, %v3423_v16 }
 0xf8b   :  { %v10009_v13 = vpop.eup %9022  ;;  %9026 = vpow2.f32 %v3426_v21 }
 0xf8c   :  { %v3297_v25 = vsel %vm940_vm10, %v10009_v13, 0.0  ;;  %9028 = vpow2.f32 %v3424_v36 }
 0xf8d   :  { %v10013_v11 = vpop.eup %9024  ;;  %3298 = vadd.xlane.f32.xlu1 %v3297_v25 }
 0xf8e   :  { %v3300_v40 = vsel %vm944_vm11, %v10013_v11, 0.0  ;;  %v3546_v48 = vpop.xlane.xlu1 %3545 }
 0xf8f   :  { %v3548_v47 = vsub.f32 %v9946_v7, %v3546_v48  ;;  %v3312_v7 = vshll.u32 %v9846_v31, 16 }
 0xf91   :  { %3301 = vadd.xlane.f32.xlu1 %v3300_v40  ;;  %v3551_v37 = vmul.f32 1.442695, %v3548_v47  ;;  %v3314_v1 = vrot.slane %v3312_v7, 1  ;;  %v2903_v40 = vand.u32 %v2898_v3, %v9389_v33 }
 0xf95   :  { %v10017_v52 = vpop.eup %9026 }
 0xf96   :  { %v3431_v57 = vsel %vm944_vm11, %v10017_v52, 0.0  ;;  %v10024_v53 = vpop.eup %9028  ;;  %v3671_v22 = vpop.xlane.xlu1 %3670 }
 0xf97   :  { %3432 = vadd.xlane.f32.xlu1 %v3431_v57  ;;  %v3428_v15 = vsel %vm940_vm10, %v10024_v53, 0.0  ;;  %v3673_v46 = vsub.f32 %v9950_v24, %v3671_v22 }
 0xf99   :  { %v3676_v23 = vmul.f32 1.442695, %v3673_v46 }
 0xf9a   :  { %v3023_v39 = vpop.permute.xlu1 %3022 }
 0xf9b   :  { %3147 = vrot.lane.b32.xlu0 %v9840_v28, %s9181_s21 }
 0xfb9   :  { %v3543_v9 = vpop.xlane.xlu0 %3542 }
 0xfba   :  { %v3547_v26 = vsub.f32 %v9958_v8, %v3543_v9  ;;  %3429 = vadd.xlane.f32.xlu0 %v3428_v15  ;;  %v3028_v15 = vand.u32 %v3023_v39, %v9389_v33 }
 0xfbc   :  { %v3549_v28 = vmul.f32 1.442695, %v3547_v26 }
 0xfbd   :  { %v3668_v58 = vpop.xlane.xlu0 %3667 }
 0xfbe   :  { %9030 = vpow2.f32 %v3549_v28  ;;  %v3672_v56 = vsub.f32 %v9960_v63, %v3668_v58  ;;  %v3310_v63 = vshrl.u32 %v9846_v31, 16 }
 0xfbf   :  { %9032 = vpow2.f32 %v3551_v37 }
 0xfc0   :  { %v3674_v19 = vmul.f32 1.442695, %v3672_v56  ;;  %v10044_v30 = vor.u32 %v3314_v1, %v3310_v63 }
 0xfc2   :  { %9034 = vpow2.f32 %v3674_v19 }
 0xfc3   :  { %9036 = vpow2.f32 %v3676_v23  ;;  %v3320_v23 = vand.u32 %v10044_v30, %v9389_v33 }
 0xfc8   :  { %v10033_v20 = vpop.eup %9030 }
 0xfc9   :  { %v3553_v8 = vsel %vm940_vm10, %v10033_v20, 0.0  ;;  %v10037_v27 = vpop.eup %9032 }
 0xfca   :  { %3554 = vadd.xlane.f32.xlu1 %v3553_v8  ;;  %v3556_v24 = vsel %vm944_vm11, %v10037_v27, 0.0 }
 0xfcc   :  { %v10042_v41 = vpop.eup %9034 }
 0xfcd   :  { %v3678_v12 = vsel %vm940_vm10, %v10042_v41, 0.0  ;;  %v10050_v10 = vpop.eup %9036 }
 0xfce   :  { %3557 = vadd.xlane.f32.xlu1 %v3556_v24  ;;  %v3681_v31 = vsel %vm944_vm11, %v10050_v10, 0.0 }
 0xfd0   :  { %3439 = vrot.lane.b32.xlu0 %v10044_v30, %s9178_s18 }
 0xfd2   :  { %3679 = vadd.xlane.f32.xlu1 %v3678_v12 }
 0xfd4   :  { %3689 = vrot.lane.b32.xlu0 %v10044_v30, %s9181_s21 }
 0xfd6   :  { %3682 = vadd.xlane.f32.xlu1 %v3681_v31 }
 0xfe7   :  { %3564 = vrot.lane.b32.xlu1 %v10044_v30, %s9179_s19  ;;  %s9204_s19 = smov 37  }
0x1002   :  { %v2763_v61 = vpop.xlane.xlu0 %2762 }
0x1003   :  { %9038 = vrcp.f32 %v2763_v61 }
0x1004   :  { %v2766_v32 = vpop.xlane.xlu1 %2765 }
0x1005   :  { %9040 = vrcp.f32 %v2766_v32 }
0x1006   :  { %v2887_v0 = vpop.xlane.xlu0 %2886 }
0x1007   :  { %9042 = vrcp.f32 %v2887_v0 }
0x100a   :  { %v2890_v43 = vpop.xlane.xlu1 %2889 }
0x100b   :  { %9044 = vrcp.f32 %v2890_v43 }
0x100d   :  { %v9039_v4 = vpop.eup %9038 }
0x100e   :  { %v3016_v49 = vpop.xlane.xlu1 %3015  ;;  %v3013_v42 = vpop.xlane.xlu0 %3012  ;;  %v2769_v16 = vmul.f32 %v9039_v4, %v9972_v54 }
0x100f   :  { %v9041_v14 = vpop.eup %9040  ;;  %9046 = vrcp.f32 %v3016_v49 }
0x1010   :  { %v2770_v21 = vmul.f32 %v9041_v14, %v9976_v2  ;;  %9048 = vrcp.f32 %v3013_v42 }
0x1011   :  { %v9043_v57 = vpop.eup %9042 }
0x1012   :  { %v2771_v25 = vpack.c.bf16 %v2770_v21, %v2769_v16  ;;  %v2893_v54 = vmul.f32 %v9043_v57, %v9981_v34  ;;  %v3138_v2 = vpop.xlane.xlu0 %3137 }
0x1014   :  { %8180 = vmatmul.mubr.msk.bf16.vlgmr.msra.gmra.mrb[64].mxu1 %vm940_vm10, %v2771_v25  ;;  %v3141_v36 = vpop.xlane.xlu1 %3140 }
0x1015   :  { %v9045_v50 = vpop.eup %9044  ;;  %8190 = vmatpush3.bf16.msra.mxu1 %v2903_v40  ;;  %8191 = vmatprep.mubr.msk.bf16.mxu1 %vm9164_vm0, %v9163_v35  ;;  %9050 = vrcp.f32 %v3141_v36 }
0x1016   :  { %v2894_v55 = vmul.f32 %v9045_v50, %v9986_v45  ;;  %8201 = vmatprep.subr.bf16.mxu1 %v9163_v35  ;;  %9052 = vrcp.f32 %v3138_v2  ;;  %v3148_v37 = vpop.permute.xlu0 %3147 }
0x1017   :  { %v3153_v58 = vand.u32 %v3148_v37, %v9389_v33 }
0x1018   :  { %v2895_v3 = vpack.c.bf16 %v2894_v55, %v2893_v54 }
0x1019   :  { %v9047_v48 = vpop.eup %9046 }
0x101a   :  { %v3299_v47 = vpop.xlane.xlu1 %3298  ;;  %v9049_v9 = vpop.eup %9048  ;;  %v3020_v45 = vmul.f32 %v9047_v48, %v9990_v60 }
0x101b   :  { %v3019_v26 = vmul.f32 %v9049_v9, %v9993_v59 }
0x101c   :  { %8192 = vmatmul.mubr.msk.bf16.vlgmr.msra.gmra.mrb[68].mxu1 %vm940_vm10, %v2895_v3 }
0x101d   :  { %8202 = vmatpush3.bf16.msra.mxu1 %v3028_v15  ;;  %8203 = vmatprep.mubr.msk.bf16.mxu1 %vm9164_vm0, %v9163_v35  ;;  %v3021_v28 = vpack.c.bf16 %v3020_v45, %v3019_v26 }
0x101e   :  { %v3302_v34 = vpop.xlane.xlu1 %3301  ;;  %8213 = vmatprep.subr.bf16.mxu1 %v9163_v35 }
0x101f   :  { %9054 = vrcp.f32 %v3302_v34  ;;  %v9051_v22 = vpop.eup %9050 }
0x1020   :  { %9056 = vrcp.f32 %v3299_v47  ;;  %v9053_v56 = vpop.eup %9052  ;;  %v3145_v60 = vmul.f32 %v9051_v22, %v10004_v44 }
0x1021   :  { %v3144_v59 = vmul.f32 %v9053_v56, %v10000_v5 }
0x1023   :  { %v3146_v46 = vpack.c.bf16 %v3145_v60, %v3144_v59 }
0x1024   :  { %8204 = vmatmul.mubr.msk.bf16.vlgmr.msra.gmra.mrb[72].mxu1 %vm940_vm10, %v3021_v28  ;;  %v3433_v5 = vpop.xlane.xlu1 %3432 }
0x1025   :  { %8214 = vmatpush3.bf16.msra.mxu1 %v3153_v58  ;;  %8215 = vmatprep.mubr.msk.bf16.mxu1 %vm9164_vm0, %v9163_v35  ;;  %9058 = vrcp.f32 %v3433_v5  ;;  %v8793_v5 = vld [vmem:[%s9671_s25 + $0x28] sm:$0xff]  }
0x1026   :  { %8225 = vmatprep.subr.bf16.mxu1 %v9163_v35 }
0x1029   :  { %v9055_v19 = vpop.eup %9054 }
0x102a   :  { %v9057_v7 = vpop.eup %9056  ;;  %v3306_v8 = vmul.f32 %v9055_v19, %v10013_v11 }
0x102b   :  { %v3305_v44 = vmul.f32 %v9057_v7, %v10009_v13 }
0x102c   :  { %8216 = vmatmul.mubr.msk.bf16.vlgmr.msra.gmra.mrb[76].mxu1 %vm940_vm10, %v3146_v46 }
0x102d   :  { %8226 = vmatpush3.bf16.msra.mxu1 %v3320_v23  ;;  %8227 = vmatprep.mubr.msk.bf16.mxu1 %vm9164_vm0, %v9163_v35  ;;  %v3307_v1 = vpack.c.bf16 %v3306_v8, %v3305_v44 }
0x102e   :  { %8237 = vmatprep.subr.bf16.mxu1 %v9163_v35 }
0x102f   :  { %v9059_v11 = vpop.eup %9058 }
0x1030   :  { %v3437_v13 = vmul.f32 %v9059_v11, %v10017_v52  ;;  %v8794_v11 = vld [vmem:[%s9671_s25 + $0x30] sm:$0xff]  }
0x1034   :  { %8228 = vmatmul.mubr.msk.bf16.vlgmr.msra.gmra.mrb[80].mxu1 %vm940_vm10, %v3307_v1  ;;  %v8792_v1 = vld [vmem:[%s9671_s25 + $0x20] sm:$0xff]  }
0x1035   :  { %8239 = vmatprep.mubr.msk.bf16.mxu1 %vm9164_vm0, %v9163_v35  ;;  %8267 = vmatprep.subr.bf16.mxu0 %v8792_v1 }
0x1036   :  { %8268 = vmatpush3.bf16.msra.mxu0 %v8792_v1 }
0x1037   :  { %8269 = vmatprep.subr.bf16.mxu0 %v8793_v5 }
0x103a   :  { %8270 = vmatpush3.bf16.msra.mxu0 %v8793_v5 }
0x103b   :  { %8271 = vmatprep.subr.bf16.mxu0 %v8794_v11 }
0x103e   :  { %8272 = vmatpush3.bf16.msra.mxu0 %v8794_v11 }
0x1047   :  { %v3430_v63 = vpop.xlane.xlu0 %3429 }
0x1048   :  { %9060 = vrcp.f32 %v3430_v63 }
0x104b   :  { %v3440_v24 = vpop.permute.xlu0 %3439 }
0x104c   :  { %v3445_v30 = vand.u32 %v3440_v24, %v9389_v33 }
0x104e   :  { %8238 = vmatpush3.bf16.msra.mxu1 %v3445_v30 }
0x104f   :  { %8249 = vmatprep.subr.bf16.mxu1 %v9163_v35  ;;  %v3690_v14 = vpop.permute.xlu0 %3689 }
0x1050   :  { %v3695_v25 = vand.u32 %v3690_v14, %v9389_v33 }
0x1052   :  { %v9061_v12 = vpop.eup %9060 }
0x1053   :  { %v3436_v31 = vmul.f32 %v9061_v12, %v10024_v53 }
0x1055   :  { %v3438_v39 = vpack.c.bf16 %v3437_v13, %v3436_v31  ;;  %v8795_v31 = vld [vmem:[%s9671_s25 + $0x38] sm:$0xff]   ;;  %s10174_s25 = sld [smem:[%s10752_s0 + %s9192_s17]]   ;;  %s9199_s17 = smov 26  }
0x1056   :  { %8273 = vmatprep.subr.bf16.mxu0 %v8795_v31 }
0x1057   :  { %v3555_v61 = vpop.xlane.xlu1 %3554  ;;  %8240 = vmatmul.mubr.msk.bf16.vlgmr.msra.gmra.mrb[84].mxu1 %vm940_vm10, %v3438_v39  ;;  %8274 = vmatpush3.bf16.msra.mxu0 %v8795_v31 }
0x1058   :  { %8251 = vmatprep.mubr.msk.bf16.mxu1 %vm9164_vm0, %v9163_v35  ;;  %9062 = vrcp.f32 %v3555_v61 }
0x105b   :  { %v3558_v32 = vpop.xlane.xlu1 %3557 }
0x105c   :  { %9064 = vrcp.f32 %v3558_v32 }
0x105f   :  { %v3680_v0 = vpop.xlane.xlu1 %3679 }
0x1060   :  { %9066 = vrcp.f32 %v3680_v0 }
0x1062   :  { %v9063_v4 = vpop.eup %9062 }
0x1063   :  { %v3683_v43 = vpop.xlane.xlu1 %3682  ;;  %v3561_v16 = vmul.f32 %v9063_v4, %v10033_v20 }
0x1064   :  { %9068 = vrcp.f32 %v3683_v43 }
0x1066   :  { %v9065_v49 = vpop.eup %9064 }
0x1067   :  { %v3562_v52 = vmul.f32 %v9065_v49, %v10037_v27  ;;  %v3565_v42 = vpop.permute.xlu1 %3564 }
0x1068   :  { %v3570_v53 = vand.u32 %v3565_v42, %v9389_v33 }
0x1069   :  { %v3563_v21 = vpack.c.bf16 %v3562_v52, %v3561_v16 }
0x106a   :  { %8250 = vmatpush3.bf16.msra.mxu1 %v3570_v53  ;;  %v9067_v40 = vpop.eup %9066 }
0x106b   :  { %8261 = vmatprep.subr.bf16.mxu1 %v9163_v35  ;;  %v3686_v50 = vmul.f32 %v9067_v40, %v10042_v41 }
0x106d   :  { %8252 = vmatmul.mubr.msk.bf16.vlgmr.msra.gmra.mrb[88].mxu1 %vm940_vm10, %v3563_v21 }
0x106e   :  { %v9069_v57 = vpop.eup %9068  ;;  %8262 = vmatpush3.bf16.msra.mxu1 %v3695_v25  ;;  %8263 = vmatprep.mubr.msk.bf16.mxu1 %vm9164_vm0, %v9163_v35 }
0x106f   :  { %v3687_v27 = vmul.f32 %v9069_v57, %v10050_v10 }
0x1071   :  { %v3688_v55 = vpack.c.bf16 %v3687_v27, %v3686_v50 }
0x1075   :  { %8264 = vmatmul.mubr.msk.bf16.vlgmr.msra.gmra.mrb[92].mxu1 %vm940_vm10, %v3688_v55 }
0x1076   :  { %4050 = vmatprep.mubr.bf16.mxu1 %v9170_v51 }
0x10e7   :  { %v10111_v20 = vpop.f32.mrb[64].mxu1 }
0x10e8   :  { %v8181_v33 = vpop.f32.mrb[65].mxu1 }
0x10e9   :  { %v10113_v36 = vpop.f32.mrb[66].mxu1 }
0x10ea   :  { %v8182_v54 = vpop.f32.mrb[67].mxu1 }
0x10ef   :  { %v2939_v2 = vpop.f32.mrb[68].mxu1 }
0x10f0   :  { %v8193_v48 = vpop.f32.mrb[69].mxu1 }
0x10f1   :  { %v2942_v47 = vpop.f32.mrb[70].mxu1 }
0x10f2   :  { %v8657_v3 = vpack.i.bf16 %v2939_v2, %v2942_v47  ;;  %v8194_v9 = vpop.f32.mrb[71].mxu1 }
0x10f4   :  { %8658 = vrot.lane.b32.xlu0 %v8657_v3, %s9173_s8 }
0x10f7   :  { %v3064_v10 = vpop.f32.mrb[72].mxu1 }
0x10f8   :  { %v8205_v41 = vpop.f32.mrb[73].mxu1 }
0x10f9   :  { %v3067_v15 = vpop.f32.mrb[74].mxu1 }
0x10fa   :  { %v8672_v45 = vpack.i.bf16 %v3064_v10, %v3067_v15  ;;  %v8206_v26 = vpop.f32.mrb[75].mxu1 }
0x10ff   :  { %v3189_v34 = vpop.f32.mrb[76].mxu1 }
0x1100   :  { %v8217_v37 = vpop.f32.mrb[77].mxu1 }
0x1101   :  { %v3192_v28 = vpop.f32.mrb[78].mxu1 }
0x1102   :  { %v8682_v22 = vpack.i.bf16 %v3189_v34, %v3192_v28  ;;  %v8218_v58 = vpop.f32.mrb[79].mxu1 }
0x1107   :  { %v3356_v56 = vpop.f32.mrb[80].mxu1 }
0x1108   :  { %v8229_v60 = vpop.f32.mrb[81].mxu1 }
0x1109   :  { %v3359_v59 = vpop.f32.mrb[82].mxu1 }
0x110a   :  { %v8230_v46 = vpop.f32.mrb[83].mxu1 }
0x112a   :  { %v3481_v19 = vpop.f32.mrb[84].mxu1 }
0x112b   :  { %v8241_v23 = vpop.f32.mrb[85].mxu1 }
0x112c   :  { %v3484_v7 = vpop.f32.mrb[86].mxu1 }
0x112d   :  { %v8662_v8 = vpack.i.bf16 %v3484_v7, %v3481_v19  ;;  %v8242_v44 = vpop.f32.mrb[87].mxu1  ;;  %v7469_v7 = vld [vmem:[%s9707_s5 + $0x1] ss:$0 sm:$0xff] }
0x112f   :  { %8663 = vrot.lane.b32.xlu0 %v8662_v8, %s9173_s8 }
0x1140   :  { %v3606_v63 = vpop.f32.mrb[88].mxu1 }
0x1141   :  { %v8253_v24 = vpop.f32.mrb[89].mxu1 }
0x1142   :  { %v3609_v30 = vpop.f32.mrb[90].mxu1 }
0x1143   :  { %v8667_v12 = vpack.i.bf16 %v3609_v30, %v3606_v63  ;;  %v8254_v13 = vpop.f32.mrb[91].mxu1 }
0x1145   :  { %8668 = vrot.lane.b32.xlu0 %v8667_v12, %s9180_s20 }
0x1148   :  { %v3731_v39 = vpop.f32.mrb[92].mxu1 }
0x1149   :  { %8673 = vrot.lane.b32.xlu0 %v8672_v45, %s9180_s20  ;;  %v8265_v61 = vpop.f32.mrb[93].mxu1  ;;  %s9202_s20 = smov 33  }
0x114a   :  { %v3734_v32 = vpop.f32.mrb[94].mxu1 }
0x114b   :  { %v8677_v0 = vpack.i.bf16 %v3734_v32, %v3731_v39  ;;  %v8266_v43 = vpop.f32.mrb[95].mxu1 }
0x114d   :  { %8678 = vrot.lane.b32.xlu1 %v8677_v0, %s9176_s16 }
0x1151   :  { %8683 = vrot.lane.b32.xlu1 %v8682_v22, %s9176_s16 }
0x1166   :  { %v8659_v4 = vpop.permute.xlu0 %8658 }
0x1167   :  { %v8661_v25 = vunpack.i.h.bf16 %v8659_v4  ;;  %v8660_v40 = vunpack.i.l.bf16 %v8659_v4 }
0x1169   :  { %v3220_v45 = vsel %vm890_vm9, %v10111_v20, %v8661_v25  ;;  %v3221_v26 = vsel %vm890_vm9, %v10113_v36, %v8660_v40  ;;  %v7461_v36 = vld [vmem:[%s9702_s30 + $0x1] ss:$0 sm:$0xff]  ;;  %s9205_s30 = smov 35  }
0x11a1   :  { %v8664_v49 = vpop.permute.xlu0 %8663 }
0x11a2   :  { %v8666_v42 = vunpack.i.h.bf16 %v8664_v49  ;;  %v8665_v53 = vunpack.i.l.bf16 %v8664_v49 }
0x11a4   :  { %v3763_v27 = vsel %vm890_vm9, %v3359_v59, %v8666_v42  ;;  %v3762_v50 = vsel %vm890_vm9, %v3356_v56, %v8665_v53 }
0x11b7   :  { %v8669_v52 = vpop.permute.xlu0 %8668 }
0x11b8   :  { %v8671_v14 = vunpack.i.h.bf16 %v8669_v52  ;;  %v8670_v16 = vunpack.i.l.bf16 %v8669_v52 }
0x11ba   :  { %v3764_v54 = vsel %vm1418_vm12, %v3762_v50, %v8670_v16  ;;  %v3765_v2 = vsel %vm1418_vm12, %v3763_v27, %v8671_v14  ;;  %v4368_v27 = vld [vmem:[%s7253_s15] sm:$0xff] }
0x11bb   :  { %v8674_v21 = vpop.permute.xlu0 %8673  ;;  %v8798_v50 = vld [vmem:[%s9374_s11 + $0x44] ss:$8 sps:$4 sm:$0xff]  }
0x11bc   :  { %v8676_v48 = vunpack.i.h.bf16 %v8674_v21  ;;  %v8675_v47 = vunpack.i.l.bf16 %v8674_v21  ;;  %4018 = vmatprep.subr.bf16.mxu1 %v8798_v50  ;;  %v8829_v50 = vld [vmem:[%s9759_s28 + $0xb0] sm:$0xff]  }
0x11be   :  { %v3222_v28 = vsel %vm1418_vm12, %v3220_v45, %v8676_v48  ;;  %v3223_v22 = vsel %vm1418_vm12, %v3221_v26, %v8675_v47  ;;  %v8802_v48 = vld [vmem:[%s9374_s11 + $0x60] ss:$8 sps:$4 sm:$0xff]   ;;  %v8807_v47 = vld [vmem:[%s9374_s11 + $0x74] ss:$8 sps:$4 sm:$0xff]  }
0x11bf   :  { %v8679_v57 = vpop.permute.xlu1 %8678 }
0x11c0   :  { %v8681_v55 = vunpack.i.h.bf16 %v8679_v57  ;;  %v8680_v33 = vunpack.i.l.bf16 %v8679_v57  ;;  %v4369_v57 = vld [vmem:[%s7253_s15 + $0x8] sm:$0xff]  ;;  %s7277_s15 = sld [smem:[%s10752_s0 + %s9198_s29]]  }
0x11c1   :  { %s10398_s29 = sld [smem:[%s10752_s0 + %s9202_s20]]  }
0x11c2   :  { %v3766_v3 = vsel %vm1421_vm13, %v3764_v54, %v8680_v33  ;;  %v3767_v9 = vsel %vm1421_vm13, %v3765_v2, %v8681_v55  ;;  %v8796_v55 = vld [vmem:[%s9374_s11 + $0x40] ss:$8 sps:$4 sm:$0xff]   ;;  %v8801_v33 = vld [vmem:[%s9374_s11 + $0x54] ss:$8 sps:$4 sm:$0xff]   ;;  %v8799_v54 = vld [vmem:[%s9374_s11 + $0x50] ss:$8 sps:$4 sm:$0xff]   ;;  %s10439_s20 = sld [smem:[%s10752_s0 + %s9206_s1]]  }
0x11c3   :  { %v3770_v10 = vrot.slane %v3766_v3, 7  ;;  %v3771_v41 = vrot.slane %v3767_v9, 7  ;;  %v8684_v15 = vpop.permute.xlu1 %8683  ;;  %4019 = vmatpush1.bf16.msra.mxu1 %v8796_v55  ;;  %v8804_v2 = vld [vmem:[%s9374_s11 + $0x64] ss:$8 sps:$4 sm:$0xff]   ;;  %v8805_v3 = vld [vmem:[%s9374_s11 + $0x70] ss:$8 sps:$4 sm:$0xff]  }
0x11c4   :  { %v8686_v34 = vunpack.i.h.bf16 %v8684_v15  ;;  %v8685_v37 = vunpack.i.l.bf16 %v8684_v15  ;;  %4020 = vmatprep.subr.bf16.mxu1 %v8801_v33  ;;  %v8830_v55 = vld [vmem:[%s9759_s28 + $0xf8] sm:$0xff]   ;;  %s9194_s11 = smov 24  }
0x11c5   :  { %v3772_v58 = vsel %vm697_vm3, %v3770_v10, %v3771_v41  ;;  %v8831_v33 = vld [vmem:[%s9759_s28 + $0xb8] sm:$0xff]  }
0x11c6   :  { %v3224_v56 = vsel %vm1421_vm13, %v3222_v28, %v8686_v34  ;;  %v3225_v60 = vsel %vm1421_vm13, %v3223_v22, %v8685_v37  ;;  %v3786_v20 = vpack.c.bf16 %v3772_v58, %v3772_v58 }
0x11c7   :  { %v3775_v59 = vsel %vm697_vm3, %v3225_v60, %v3770_v10  ;;  %4021 = vmatpush1.bf16.msra.mxu1 %v8799_v54  ;;  %v7482_v54 = vld [vmem:[%s9781_s6 + $0x2] sm:$0x3]  ;;  %s9210_s6 = smov 41  }
0x11c8   :  { %v3785_v46 = vpack.c.bf16 %v3775_v59, %v3224_v56  ;;  %4022 = vmatprep.subr.bf16.mxu1 %v8804_v2  ;;  %v7472_v56 = vld [vmem:[%s9743_s12 + $0x1] ss:$0 sm:$0xff]  ;;  %v3965_v2 = vrot.slane %v7482_v54, %v9310_v6  ;;  %s7276_s12 = sld [smem:[%s10752_s0 + %s9194_s11]]   ;;  %s9200_s11 = smov 28  }
0x11c9   :  { %s10500_s24 = sld [smem:[%s10752_s0 + %s9210_s6]]   ;;  %s9224_s6 = smov 52  }
0x11ca   :  { %8275 = vmatprep.mubr.msk.bf16.mxu0 %vm707_vm6, %v3785_v46 }
0x11cb   :  { %8276 = vmatmul.mubr.msk.bf16.vlgmr.msra.gmra.mrb[80].mxu0 %vm707_vm6, %v3786_v20  ;;  %4023 = vmatpush1.bf16.msra.mxu1 %v8802_v48  ;;  %v3969_v48 = vrot.slane %v7482_v54, %v9383_v17 }
0x11cc   :  { %4024 = vmatprep.subr.bf16.mxu1 %v8807_v47 }
0x11cf   :  { %4025 = vmatpush1.bf16.msra.mxu1 %v8805_v3 }
0x11d0   :  { %8279 = vmatprep.subr.bf16.mxu1 %v9163_v35 }
0x129e   :  { %v8277_v19 = vpop.f32.mrb[80].mxu0 }
0x129f   :  { %v3868_v23 = vadd.f32 %v8277_v19, %v7461_v36  ;;  %v3859_v8 = vpop.f32.mrb[81].mxu0 }
0x12a0   :  { %v3860_v44 = vadd.f32 %v7461_v36, %v3859_v8  ;;  %v8278_v1 = vpop.f32.mrb[82].mxu0 }
0x12a1   :  { %v3862_v5 = vpop.f32.mrb[83].mxu0  ;;  %v3883_v63 = vmul.f32 %v7469_v7, %v3868_v23 }
0x12a2   :  { %v3881_v24 = vmul.f32 %v7469_v7, %v3860_v44  ;;  %v3863_v30 = vadd.f32 %v7461_v36, %v3862_v5  ;;  %v7473_v36 = vld [vmem:[%s9748_s23 + $0x1] ss:$0 sm:$0xff]  ;;  %s9195_s23 = smov 27  }
0x12a3   :  { %v3886_v39 = vadd.f32 %v3883_v63, %v9811_v38  ;;  %v8808_v44 = vld [vmem:[%s10174_s25] sm:$0xff]   ;;  %v8809_v63 = vld [vmem:[%s10174_s25 + $0x8] sm:$0xff]   ;;  %s10265_s2 = sld [smem:[%s10752_s0 + %s9195_s23]]   ;;  %s9201_s23 = smov 30  }
0x12a4   :  { %v10146_v11 = vadd.f32 %v3881_v24, %v9801_v29  ;;  %v3882_v12 = vmul.f32 %v7469_v7, %v3863_v30  ;;  %v8810_v30 = vld [vmem:[%s10174_s25 + $0x10] sm:$0xff]   ;;  %s10322_s4 = sld [smem:[%s10752_s0 + %s9201_s23]]  }
0x12a5   :  { %v3897_v32 = vsel %vm714_vm4, %v3886_v39, 0.0 }
0x12a6   :  { %v10149_v13 = vadd.f32 %v3882_v12, %v9806_v18  ;;  %v3891_v31 = vsel %vm707_vm6, %v10146_v11, 0.0 }
0x12a7   :  { %3892 = vadd.xlane.f32.xlu0 %v3891_v31  ;;  %v8811_v31 = vld [vmem:[%s10174_s25 + $0x18] sm:$0xff]  }
0x12a8   :  { %v3894_v61 = vsel %vm707_vm6, %v10149_v13, 0.0 }
0x12a9   :  { %3895 = vadd.xlane.f32.xlu1 %v3894_v61  ;;  %v8813_v61 = vld [vmem:[%s10174_s25 + $0x28] sm:$0xff]  }
0x12ab   :  { %3898 = vadd.xlane.f32.xlu0 %v3897_v32  ;;  %v8814_v32 = vld [vmem:[%s10174_s25 + $0x30] sm:$0xff]  }
0x1334   :  { %v3893_v0 = vpop.xlane.xlu0 %3892 }
0x1335   :  { %v3900_v29 = vmul.f32 0.015625, %v3893_v0  ;;  %v4371_v0 = vand.u32 127, %v687_v62  ;;  %v8816_v62 = vld [vmem:[%s9759_s28 + $0xc0] sm:$0xff]  }
0x1336   :  { %v3896_v43 = vpop.xlane.xlu1 %3895  ;;  %7890 = vmatprep.subr.bf16.mxu0 %v8816_v62 }
0x1337   :  { %v3903_v4 = vsub.f32 %v10146_v11, %v3900_v29  ;;  %v3901_v18 = vmul.f32 0.015625, %v3896_v43 }
0x1338   :  { %v3899_v49 = vpop.xlane.xlu0 %3898 }
0x1339   :  { %v3904_v52 = vsub.f32 %v10149_v13, %v3901_v18  ;;  %v3902_v42 = vmul.f32 0.015625, %v3899_v49  ;;  %v3906_v38 = vmul.f32 %v3903_v4, %v3903_v4  ;;  %v9193_v18 = vmov 1.0|1.0   ;;  %v8817_v49 = vld [vmem:[%s9759_s28 + $0x80] sm:$0xff]  }
0x133a   :  { %7891 = vmatpush3.bf16.msra.mxu0 %v8817_v49 }
0x133b   :  { %v3905_v53 = vsub.f32 %v3886_v39, %v3902_v42  ;;  %v3909_v14 = vsel %vm707_vm6, %v3906_v38, 0.0  ;;  %v3907_v16 = vmul.f32 %v3904_v52, %v3904_v52  ;;  %v8812_v39 = vld [vmem:[%s10174_s25 + $0x20] sm:$0xff]   ;;  %v8819_v42 = vld [vmem:[%s9759_s28 + $0x88] sm:$0xff]   ;;  %v8820_v38 = vld [vmem:[%s9759_s28 + $0xd0] sm:$0xff]  }
0x133c   :  { %3910 = vadd.xlane.f32.xlu0 %v3909_v14  ;;  %v8822_v14 = vld [vmem:[%s9759_s28 + $0xd8] sm:$0xff]  }
0x133d   :  { %v3908_v21 = vmul.f32 %v3905_v53, %v3905_v53  ;;  %v3912_v25 = vsel %vm707_vm6, %v3907_v16, 0.0  ;;  %v8823_v16 = vld [vmem:[%s9759_s28 + $0x98] sm:$0xff]  }
0x133f   :  { %v3915_v40 = vsel %vm714_vm4, %v3908_v21, 0.0  ;;  %v8824_v21 = vld [vmem:[%s9759_s28 + $0xe0] sm:$0xff]  }
0x1340   :  { %3913 = vadd.xlane.f32.xlu0 %v3912_v25  ;;  %3916 = vadd.xlane.f32.xlu1 %v3915_v40  ;;  %v8825_v25 = vld [vmem:[%s9759_s28 + $0xa0] sm:$0xff]   ;;  %v8826_v40 = vld [vmem:[%s9759_s28 + $0xe8] sm:$0xff]  }
0x1351   :  { %4376 = vperm.xlu1 %8688, %v4369_v57   ;;  %v8827_v57 = vld [vmem:[%s9759_s28 + $0xa8] sm:$0xff]  }
0x1356   :  { %4373 = vperm.xlu0 %8687, %v4368_v27   ;;  %v8828_v27 = vld [vmem:[%s9759_s28 + $0xf0] sm:$0xff]  }
0x13c9   :  { %v3911_v9 = vpop.xlane.xlu0 %3910 }
0x13ca   :  { %v3918_v10 = vmul.f32 0.015625, %v3911_v9 }
0x13cc   :  { %v3921_v41 = vadd.f32 1e-06, %v3918_v10 }
0x13cd   :  { %v3917_v15 = vpop.xlane.xlu1 %3916  ;;  %v3914_v45 = vpop.xlane.xlu0 %3913 }
0x13ce   :  { %9070 = vrsqrt.f32 %v3921_v41  ;;  %v3920_v26 = vmul.f32 0.015625, %v3917_v15  ;;  %v3919_v34 = vmul.f32 0.015625, %v3914_v45 }
0x13d0   :  { %v3923_v37 = vadd.f32 1e-06, %v3920_v26  ;;  %v3922_v28 = vadd.f32 1e-06, %v3919_v34 }
0x13d1   :  { %v4377_v29 = vpop.permute.xlu1 %4376 }
0x13d2   :  { %9072 = vrsqrt.f32 %v3923_v37  ;;  %vm4379_vm14 = vcmp.eq.s32.totalorder %v4377_v29, %v4371_v0 }
0x13d3   :  { %9074 = vrsqrt.f32 %v3922_v28 }
0x13d5   :  { %v4374_v43 = vpop.permute.xlu0 %4373 }
0x13d6   :  { %vm4378_vm15 = vcmp.eq.s32.totalorder %v4374_v43, %v4371_v0 }
0x13d7   :  { %vm7555_vm1 = vmpackc.low %vm4379_vm14, %vm4378_vm15 }
0x13d8   :  { %v9071_v22 = vpop.eup %9070 }
0x13d9   :  { %v3927_v58 = vmul.f32 %v9071_v22, %v3903_v4  ;;  %v8815_v4 = vld [vmem:[%s10174_s25 + $0x38] sm:$0xff]   ;;  %s7278_s25 = sld [smem:[%s10752_s0 + %s9199_s17]]  }
0x13da   :  { %s10413_s17 = sld [smem:[%s10752_s0 + %s9203_s3]]  }
0x13db   :  { %v3936_v46 = vmul.f32 %v7472_v56, %v3927_v58 }
0x13dc   :  { %v9073_v60 = vpop.eup %9072 }
0x13dd   :  { %v9075_v59 = vpop.eup %9074  ;;  %v3929_v23 = vmul.f32 %v9073_v60, %v3905_v53  ;;  %v3945_v7 = vadd.f32 %v7473_v36, %v3936_v46  ;;  %v8821_v53 = vld [vmem:[%s9759_s28 + $0x90] sm:$0xff]  }
0x13de   :  { %v3928_v20 = vmul.f32 %v9075_v59, %v3904_v52  ;;  %v8818_v52 = vld [vmem:[%s9759_s28 + $0xc8] sm:$0xff]   ;;  %s10434_s28 = sld [smem:[%s10752_s0 + %s9205_s30]]   ;;  %s9209_s30 = smov 40  }
0x13df   :  { %v3938_v5 = vmul.f32 %v7472_v56, %v3929_v23  ;;  %7892 = vmatprep.subr.bf16.mxu0 %v8818_v52  ;;  %s10484_s1 = sld [smem:[%s10752_s0 + %s9209_s30]]   ;;  %s9223_s30 = smov 54  }
0x13e0   :  { %v3937_v19 = vmul.f32 %v7472_v56, %v3928_v20  ;;  %7893 = vmatpush3.bf16.msra.mxu0 %v8819_v42 }
0x13e1   :  { %v3947_v24 = vadd.f32 %v7473_v36, %v3938_v5  ;;  %7894 = vmatprep.subr.bf16.mxu0 %v8820_v38 }
0x13e2   :  { %v3946_v8 = vadd.f32 %v7473_v36, %v3937_v19 }
0x13e3   :  { %v3958_v12 = vpack.c.bf16 %v3947_v24, %v3947_v24 }
0x13e4   :  { %v3957_v1 = vpack.c.bf16 %v3946_v8, %v3945_v7  ;;  %7895 = vmatpush3.bf16.msra.mxu0 %v8821_v53 }
0x13e5   :  { %7896 = vmatprep.subr.bf16.mxu0 %v8822_v14 }
0x13e6   :  { %7491 = vmatmul.mubr.msk.bf16.vlgmr.msra.gmra.mrb[96].mxu1 %vm707_vm6, %v3957_v1 }
0x13e7   :  { %8280 = vmatpush3.bf16.msra.mxu1 %v8808_v44  ;;  %4060 = vmatprep.mubr.bf16.mxu1 %v9170_v51 }
0x13e8   :  { %8281 = vmatprep.subr.bf16.mxu1 %v9163_v35  ;;  %7897 = vmatpush3.bf16.msra.mxu0 %v8823_v16 }
0x13e9   :  { %7898 = vmatprep.subr.bf16.mxu0 %v8824_v21 }
0x13eb   :  { %8282 = vmatpush3.bf16.msra.mxu1 %v8809_v63 }
0x13ec   :  { %8283 = vmatprep.subr.bf16.mxu1 %v9163_v35  ;;  %7899 = vmatpush3.bf16.msra.mxu0 %v8825_v25 }
0x13ed   :  { %7900 = vmatprep.subr.bf16.mxu0 %v8826_v40 }
0x13ee   :  { %7492 = vmatmul.mubr.msk.bf16.gmra.mrb[100].mxu1 %vm707_vm6, %v3958_v12 }
0x13ef   :  { %8284 = vmatpush3.bf16.msra.mxu1 %v8810_v30  ;;  %8295 = vmatprep.mubr.msk.bf16.mxu1 %vm9164_vm0, %v9163_v35 }
0x13f0   :  { %8285 = vmatprep.subr.bf16.mxu1 %v9163_v35  ;;  %7901 = vmatpush3.bf16.msra.mxu0 %v8827_v57 }
0x13f1   :  { %7902 = vmatprep.subr.bf16.mxu0 %v8828_v27 }
0x13f3   :  { %8286 = vmatpush3.bf16.msra.mxu1 %v8811_v31 }
0x13f4   :  { %8287 = vmatprep.subr.bf16.mxu1 %v9163_v35  ;;  %7903 = vmatpush3.bf16.msra.mxu0 %v8829_v50 }
0x13f5   :  { %7904 = vmatprep.subr.bf16.mxu0 %v8830_v55 }
0x13f7   :  { %8288 = vmatpush3.bf16.msra.mxu1 %v8812_v39 }
0x13f8   :  { %8289 = vmatprep.subr.bf16.mxu1 %v9163_v35  ;;  %7905 = vmatpush3.bf16.msra.mxu0 %v8831_v33 }
0x13f9   :  { %8307 = vmatprep.subr.bf16.mxu0 %v9163_v35 }
0x13fb   :  { %8290 = vmatpush3.bf16.msra.mxu1 %v8813_v61 }
0x13fc   :  { %8291 = vmatprep.subr.bf16.mxu1 %v9163_v35 }
0x13ff   :  { %8292 = vmatpush3.bf16.msra.mxu1 %v8814_v32 }
0x1400   :  { %8293 = vmatprep.subr.bf16.mxu1 %v9163_v35 }
0x1403   :  { %8294 = vmatpush3.bf16.msra.mxu1 %v8815_v4 }
0x1404   :  { %8299 = vmatprep.subr.bf16.mxu1 %v9163_v35 }
0x1406   :  { %8296 = vmatmul.mubr.msk.bf16.vlgmr.msra.gmra.mrb[104].mxu1 %vm7555_vm1, %v9193_v18 }
0x1407   :  { %8303 = vmatprep.mubr.msk.bf16.mxu1 %vm9164_vm0, %v9163_v35 }
0x14b9   :  { %v4052_v47 = vpop.f32.mrb[96].mxu1 }
0x14ba   :  { %v10225_v3 = vadd.f32 %v4052_v47, %v3965_v2  ;;  %v4054_v9 = vpop.f32.mrb[97].mxu1  ;;  %v4399_v47 = vld [vmem:[%s7276_s12] sm:$0xff]  ;;  %s10317_s12 = sld [smem:[%s10752_s0 + %s9200_s11]]  }
0x14bb   :  { %v10227_v10 = vadd.f32 %v4054_v9, %v3969_v48  ;;  %v4056_v41 = vpop.f32.mrb[98].mxu1  ;;  %s10425_s11 = sld [smem:[%s10752_s0 + %s9204_s19]]  }
0x14bc   :  { %v4069_v15 = vmul.f32 %v10225_v3, %v10225_v3  ;;  %v4057_v45 = vadd.f32 %v4056_v41, %v3965_v2  ;;  %v4058_v26 = vpop.f32.mrb[99].mxu1 }
0x14bd   :  { %v4070_v34 = vmul.f32 %v10227_v10, %v10227_v10  ;;  %v4059_v37 = vadd.f32 %v4058_v26, %v3969_v48 }
0x14be   :  { %v4075_v28 = vmul.f32 %v4069_v15, %v10225_v3  ;;  %v4071_v22 = vmul.f32 %v4057_v45, %v4057_v45 }
0x14bf   :  { %v4076_v58 = vmul.f32 %v4070_v34, %v10227_v10  ;;  %v4072_v56 = vmul.f32 %v4059_v37, %v4059_v37 }
0x14c0   :  { %v4081_v60 = vmul.f32 0.044715, %v4075_v28  ;;  %v4077_v59 = vmul.f32 %v4071_v22, %v4057_v45 }
0x14c1   :  { %v4082_v46 = vmul.f32 0.044715, %v4076_v58  ;;  %v4078_v20 = vmul.f32 %v4072_v56, %v4059_v37  ;;  %v4062_v36 = vpop.f32.mrb[100].mxu1 }
0x14c2   :  { %v4087_v19 = vadd.f32 %v4081_v60, %v10225_v3  ;;  %v4083_v23 = vmul.f32 0.044715, %v4077_v59  ;;  %v10236_v7 = vadd.f32 %v4062_v36, %v3965_v2  ;;  %v4064_v8 = vpop.f32.mrb[101].mxu1 }
0x14c3   :  { %v4088_v44 = vadd.f32 %v4082_v46, %v10227_v10  ;;  %v4084_v1 = vmul.f32 0.044715, %v4078_v20  ;;  %v10239_v5 = vadd.f32 %v4064_v8, %v3969_v48  ;;  %v4066_v63 = vpop.f32.mrb[102].mxu1 }
0x14c4   :  { %v4093_v24 = vmul.f32 0.7978846, %v4087_v19  ;;  %v4089_v30 = vadd.f32 %v4083_v23, %v4057_v45  ;;  %v4073_v12 = vmul.f32 %v10236_v7, %v10236_v7  ;;  %v4067_v31 = vpop.f32.mrb[103].mxu1 }
0x14c5   :  { %v4094_v39 = vmul.f32 0.7978846, %v4088_v44  ;;  %v4090_v61 = vadd.f32 %v4084_v1, %v4059_v37  ;;  %v4074_v32 = vmul.f32 %v10239_v5, %v10239_v5 }
0x14c6   :  { %9076 = vtanh.f32 %v4093_v24  ;;  %v4095_v0 = vmul.f32 0.7978846, %v4089_v30  ;;  %v4079_v29 = vmul.f32 %v4073_v12, %v10236_v7 }
0x14c7   :  { %9078 = vtanh.f32 %v4094_v39  ;;  %v4096_v43 = vmul.f32 0.7978846, %v4090_v61  ;;  %v4080_v4 = vmul.f32 %v4074_v32, %v10239_v5  ;;  %v8832_v32 = vld [vmem:[%s10265_s2] sm:$0xff]  }
0x14c8   :  { %9080 = vtanh.f32 %v4095_v0  ;;  %v4085_v18 = vmul.f32 0.044715, %v4079_v29  ;;  %v8833_v0 = vld [vmem:[%s10270_s10] sm:$0xff]   ;;  %8300 = vmatpush3.bf16.msra.mxu1 %v8832_v32  ;;  %v8834_v29 = vld [vmem:[%s10265_s2 + $0x8] sm:$0xff]  }
0x14c9   :  { %9082 = vtanh.f32 %v4096_v43  ;;  %v4086_v62 = vmul.f32 0.044715, %v4080_v4  ;;  %8301 = vmatprep.subr.bf16.mxu1 %v9163_v35  ;;  %v8835_v43 = vld [vmem:[%s10270_s10 + $0x8] sm:$0xff]  }
0x14ca   :  { %v4091_v49 = vadd.f32 %v4085_v18, %v10236_v7 }
0x14cb   :  { %v4092_v52 = vadd.f32 %v4086_v62, %v10239_v5 }
0x14cc   :  { %v4097_v42 = vmul.f32 0.7978846, %v4091_v49  ;;  %8302 = vmatpush3.bf16.msra.mxu1 %v8834_v29 }
0x14cd   :  { %v4098_v38 = vmul.f32 0.7978846, %v4092_v52  ;;  %8315 = vmatprep.subr.bf16.mxu1 %v9163_v35 }
0x14ce   :  { %9084 = vtanh.f32 %v4097_v42 }
0x14cf   :  { %9086 = vtanh.f32 %v4098_v38 }
0x14d0   :  { %v9077_v53 = vpop.eup %9076 }
0x14d1   :  { %v9079_v14 = vpop.eup %9078  ;;  %v4105_v16 = vadd.f32 1.0, %v9077_v53 }
0x14d2   :  { %v9081_v21 = vpop.eup %9080  ;;  %v4106_v25 = vadd.f32 1.0, %v9079_v14 }
0x14d3   :  { %v9083_v40 = vpop.eup %9082  ;;  %v4111_v57 = vmul.f32 0.5, %v4105_v16  ;;  %v4107_v27 = vadd.f32 1.0, %v9081_v21 }
0x14d4   :  { %v4108_v50 = vadd.f32 1.0, %v9083_v40  ;;  %v4112_v55 = vmul.f32 0.5, %v4106_v25 }
0x14d5   :  { %v4113_v33 = vmul.f32 0.5, %v4107_v27  ;;  %v4117_v2 = vmul.f32 %v4111_v57, %v10225_v3 }
0x14d6   :  { %v4114_v54 = vmul.f32 0.5, %v4108_v50  ;;  %v4118_v41 = vmul.f32 %v4112_v55, %v10227_v10 }
0x14d7   :  { %v4119_v48 = vmul.f32 %v4113_v33, %v4057_v45 }
0x14d8   :  { %v9085_v9 = vpop.eup %9084  ;;  %v4120_v15 = vmul.f32 %v4114_v54, %v4059_v37  ;;  %v7557_v54 = vld [vmem:[%s7277_s15] ss:$0 sm:$0xff]  ;;  %s9208_s15 = smov 38  }
0x14d9   :  { %v9087_v26 = vpop.eup %9086  ;;  %v4482_v34 = vpop.f32.mrb[104].mxu1  ;;  %v4156_v28 = vpack.c.bf16 %v4119_v48, %v4117_v2  ;;  %v4109_v22 = vadd.f32 1.0, %v9085_v9  ;;  %v7558_v9 = vld [vmem:[%s7278_s25] ss:$0 sm:$0xff]  ;;  %s10476_s25 = sld [smem:[%s10752_s0 + %s9208_s15]]  }
0x14da   :  { %v4483_v58 = vadd.f32 %v4482_v34, %v4399_v47  ;;  %v8297_v56 = vpop.f32.mrb[105].mxu1  ;;  %v4157_v60 = vpack.c.bf16 %v4120_v15, %v4118_v41  ;;  %v4110_v59 = vadd.f32 1.0, %v9087_v26  ;;  %v8836_v34 = vld [vmem:[%s10277_s26] sm:$0xff]  }
0x14db   :  { %v4485_v46 = vpop.f32.mrb[106].mxu1  ;;  %v4115_v20 = vmul.f32 0.5, %v4109_v22  ;;  %v8837_v22 = vld [vmem:[%s10277_s26 + $0x8] sm:$0xff]   ;;  %v7563_v56 = vld [vmem:[%s10322_s4] ss:$0 sm:$0xff] }
0x14dc   :  { %v4486_v36 = vadd.f32 %v4485_v46, %v4399_v47  ;;  %4296 = vmatprep.mubr.bf16.mxu0 %v4157_v60  ;;  %v4491_v3 = vsel %vm1418_vm12, %v4483_v58, 0.0  ;;  %v8298_v45 = vpop.f32.mrb[107].mxu1  ;;  %v4116_v19 = vmul.f32 0.5, %v4110_v59 }
0x14dd   :  { %4492 = vadd.xlane.f32.xlu1 %v4491_v3  ;;  %4297 = vmatmul.mubr.bf16.vlgmr.msra.gmra.mrb[84].mxu0 %v4156_v28  ;;  %v4121_v23 = vmul.f32 %v4115_v20, %v10236_v7 }
0x14de   :  { %v4494_v10 = vsel %vm1418_vm12, %v4486_v36, 0.0  ;;  %v4122_v37 = vmul.f32 %v4116_v19, %v10239_v5  ;;  %8308 = vmatpush3.bf16.msra.mxu0 %v8833_v0 }
0x14df   :  { %4495 = vadd.xlane.f32.xlu0 %v4494_v10  ;;  %v4158_v44 = vpack.c.bf16 %v4121_v23, %v4121_v23  ;;  %8309 = vmatprep.subr.bf16.mxu0 %v9163_v35 }
0x14e0   :  { %v4159_v8 = vpack.c.bf16 %v4122_v37, %v4122_v37 }
0x14e2   :  { %4304 = vmatprep.mubr.bf16.mxu0 %v4159_v8  ;;  %8310 = vmatpush3.bf16.msra.mxu0 %v8835_v43 }
0x14e3   :  { %8323 = vmatprep.subr.bf16.mxu0 %v9163_v35 }
0x14e5   :  { %4305 = vmatmul.mubr.bf16.gmra.mrb[88].mxu0 %v4158_v44 }
0x14e6   :  { %8311 = vmatprep.mubr.msk.bf16.mxu0 %vm9164_vm0, %v9163_v35 }
0x156a   :  { %v4493_v1 = vpop.xlane.xlu1 %4492 }
0x156b   :  { %v4498_v63 = vmul.f32 0.03125, %v4493_v1 }
0x156c   :  { %v4496_v24 = vpop.xlane.xlu0 %4495 }
0x156d   :  { %v4500_v30 = vsub.f32 %v4483_v58, %v4498_v63  ;;  %v4499_v12 = vmul.f32 0.03125, %v4496_v24  ;;  %v7559_v58 = vld [vmem:[%s10317_s12] ss:$0 sm:$0xff] }
0x156e   :  { %v7567_v63 = vld [vmem:[%s10330_s13] ss:$0 sm:$0xff] }
0x156f   :  { %v4501_v31 = vsub.f32 %v4486_v36, %v4499_v12  ;;  %v4502_v39 = vmul.f32 %v4500_v30, %v4500_v30 }
0x1571   :  { %v4504_v61 = vsel %vm1418_vm12, %v4502_v39, 0.0  ;;  %v4503_v5 = vmul.f32 %v4501_v31, %v4501_v31 }
0x1572   :  { %4505 = vadd.xlane.f32.xlu1 %v4504_v61 }
0x1573   :  { %v4507_v7 = vsel %vm1418_vm12, %v4503_v5, 0.0 }
0x1576   :  { %4508 = vadd.xlane.f32.xlu1 %v4507_v7 }
0x15b0   :  { %v7906_v4 = vpop.f32.mrb[84].mxu0 }
0x15b1   :  { %v7907_v18 = vpop.f32.mrb[85].mxu0 }
0x15b2   :  { %v10285_v62 = vadd.f32 %v7907_v18, %v7906_v4  ;;  %v7909_v49 = vpop.f32.mrb[86].mxu0 }
0x15b3   :  { %v7910_v52 = vpop.f32.mrb[87].mxu0 }
0x15b4   :  { %v10287_v42 = vadd.f32 %v7910_v52, %v7909_v49 }
0x15b8   :  { %v7912_v38 = vpop.f32.mrb[88].mxu0 }
0x15b9   :  { %v7913_v53 = vpop.f32.mrb[89].mxu0 }
0x15ba   :  { %v7915_v14 = vpop.f32.mrb[90].mxu0 }
0x15bb   :  { %v7916_v16 = vpop.f32.mrb[91].mxu0 }
0x15ff   :  { %v4506_v21 = vpop.xlane.xlu1 %4505 }
0x1600   :  { %v4510_v25 = vmul.f32 0.03125, %v4506_v21 }
0x1602   :  { %v4512_v40 = vadd.f32 1e-12, %v4510_v25 }
0x1603   :  { %v4509_v57 = vpop.xlane.xlu1 %4508 }
0x1604   :  { %9088 = vrsqrt.f32 %v4512_v40  ;;  %v4511_v27 = vmul.f32 0.03125, %v4509_v57 }
0x1606   :  { %v4513_v50 = vadd.f32 1e-12, %v4511_v27 }
0x1608   :  { %9090 = vrsqrt.f32 %v4513_v50 }
0x160e   :  { %v9089_v55 = vpop.eup %9088 }
0x160f   :  { %v4516_v33 = vmul.f32 %v9089_v55, %v4500_v30 }
0x1611   :  { %v4524_v48 = vmul.f32 %v7557_v54, %v4516_v33 }
0x1612   :  { %v9091_v2 = vpop.eup %9090 }
0x1613   :  { %v4517_v47 = vmul.f32 %v9091_v2, %v4501_v31  ;;  %v10295_v15 = vadd.f32 %v7558_v9, %v4524_v48 }
0x1615   :  { %v4525_v41 = vmul.f32 %v7557_v54, %v4517_v47 }
0x1617   :  { %v10297_v26 = vadd.f32 %v7558_v9, %v4525_v41 }
0x1619   :  { %v4538_v28 = vpack.c.bf16 %v10297_v26, %v10295_v15 }
0x161b   :  { %8304 = vmatmul.mubr.msk.bf16.vlgmr.msra.gmra.mrb[108].mxu1 %vm1418_vm12, %v4538_v28  ;;  %8312 = vmatmul.mubr.msk.bf16.vlgmr.msra.gmra.mrb[92].mxu0 %vm1418_vm12, %v4538_v28 }
0x161c   :  { %8316 = vmatpush3.bf16.msra.mxu1 %v8836_v34  ;;  %8319 = vmatprep.mubr.msk.bf16.mxu1 %vm9164_vm0, %v9163_v35 }
0x161d   :  { %8317 = vmatprep.subr.bf16.mxu1 %v9163_v35  ;;  %8325 = vmatprep.mubr.msk.bf16.mxu0 %vm9164_vm0, %v9163_v35 }
0x1620   :  { %8318 = vmatpush3.bf16.msra.mxu1 %v8837_v22 }
0x1621   :  { %8329 = vmatprep.subr.bf16.mxu1 %v9163_v35 }
0x1623   :  { %8320 = vmatmul.mubr.msk.bf16.vlgmr.msra.gmra.mrb[112].mxu1 %vm1418_vm12, %v4538_v28 }
0x1624   :  { %8331 = vmatprep.mubr.msk.bf16.mxu1 %vm9164_vm0, %v9163_v35 }
0x16ee   :  { %v4595_v60 = vpop.f32.mrb[108].mxu1  ;;  %v4659_v59 = vpop.f32.mrb[92].mxu0 }
0x16ef   :  { %v4596_v46 = vadd.f32 %v7559_v58, %v4595_v60  ;;  %v4660_v20 = vadd.f32 %v7563_v56, %v4659_v59  ;;  %v8305_v36 = vpop.f32.mrb[109].mxu1  ;;  %v8313_v3 = vpop.f32.mrb[93].mxu0 }
0x16f0   :  { %v4598_v45 = vpop.f32.mrb[110].mxu1  ;;  %v4662_v19 = vpop.f32.mrb[94].mxu0 }
0x16f1   :  { %v4730_v10 = vpack.c.bf16 %v4596_v46, %v4596_v46  ;;  %v4731_v37 = vpack.c.bf16 %v4660_v20, %v4660_v20  ;;  %v4663_v23 = vadd.f32 %v7563_v56, %v4662_v19  ;;  %v8306_v8 = vpop.f32.mrb[111].mxu1  ;;  %v8314_v44 = vpop.f32.mrb[95].mxu0  ;;  %v4599_v24 = vadd.f32 %v7559_v58, %v4598_v45 }
0x16f3   :  { %v4736_v1 = vsel %vm890_vm9, %v4731_v37, 0  ;;  %4843 = vrot.lane.b32.xlu1 %v4731_v37, %s9178_s18  ;;  %4840 = vrot.lane.b32.xlu0 %v4730_v10, %s9178_s18  ;;  %v4959_v30 = vpack.c.bf16 %v4663_v23, %v4663_v23  ;;  %v4958_v5 = vpack.c.bf16 %v4599_v24, %v4599_v24 }
0x16f4   :  { %8324 = vmatpush3.bf16.xpose.msra.mxu0 %v4736_v1 }
0x16f5   :  { %8335 = vmatprep.subr.bf16.mxu0 %v9163_v35  ;;  %v4964_v49 = vsel %vm890_vm9, %v4959_v30, 0 }
0x16f6   :  { %v4723_v12 = vpop.f32.mrb[112].mxu1 }
0x16f7   :  { %v4724_v31 = vadd.f32 %v7567_v63, %v4723_v12  ;;  %5070 = vrot.lane.b32.xlu1 %v4959_v30, %s9178_s18  ;;  %v8321_v39 = vpop.f32.mrb[113].mxu1 }
0x16f8   :  { %v4726_v61 = vpop.f32.mrb[114].mxu1 }
0x16f9   :  { %v10338_v7 = vpack.c.bf16 %v4724_v31, %v4724_v31  ;;  %v10340_v32 = vadd.f32 %v7567_v63, %v4726_v61  ;;  %v8322_v0 = vpop.f32.mrb[115].mxu1 }
0x16fb   :  { %v4797_v29 = vsel %vm969_vm8, %v10338_v7, 0  ;;  %8326 = vmatmul.mubr.msk.bf16.vlgmr.msra.gmra.mrb[96].mxu0 %vm890_vm9, %v4730_v10  ;;  %5067 = vrot.lane.b32.xlu1 %v4958_v5, %s9178_s18 }
0x16fc   :  { %8330 = vmatpush3.bf16.msra.mxu1 %v4797_v29  ;;  %8337 = vmatprep.mubr.msk.bf16.mxu0 %vm9164_vm0, %v9163_v35 }
0x16fd   :  { %8341 = vmatprep.subr.bf16.mxu1 %v9163_v35 }
0x1765   :  { %v4844_v43 = vpop.permute.xlu1 %4843  ;;  %v4841_v18 = vpop.permute.xlu0 %4840 }
0x1766   :  { %v4849_v4 = vsel %vm890_vm9, %v4844_v43, 0  ;;  %v5019_v43 = vpack.c.bf16 %v10340_v32, %v10340_v32 }
0x1767   :  { %8336 = vmatpush3.bf16.xpose.msra.mxu0 %v4849_v4 }
0x1768   :  { %8347 = vmatprep.subr.bf16.mxu0 %v9163_v35 }
0x1769   :  { %v5071_v52 = vpop.permute.xlu1 %5070 }
0x176a   :  { %v5076_v38 = vsel %vm890_vm9, %v5071_v52, 0 }
0x176d   :  { %v5068_v53 = vpop.permute.xlu1 %5067 }
0x176e   :  { %8338 = vmatmul.mubr.msk.bf16.vlgmr.msra.gmra.mrb[100].mxu0 %vm890_vm9, %v4841_v18 }
0x176f   :  { %8348 = vmatpush3.bf16.xpose.msra.mxu0 %v4964_v49  ;;  %8349 = vmatprep.mubr.msk.bf16.mxu0 %vm9164_vm0, %v9163_v35 }
0x1770   :  { %8359 = vmatprep.subr.bf16.mxu0 %v9163_v35 }
0x1776   :  { %8350 = vmatmul.mubr.msk.bf16.vlgmr.msra.gmra.mrb[104].mxu0 %vm890_vm9, %v4958_v5 }
0x1777   :  { %8360 = vmatpush3.bf16.xpose.msra.mxu0 %v5076_v38  ;;  %8361 = vmatprep.mubr.msk.bf16.mxu0 %vm9164_vm0, %v9163_v35 }
0x1778   :  { %8371 = vmatprep.subr.bf16.mxu0 %v9163_v35 }
0x177e   :  { %8362 = vmatmul.mubr.msk.bf16.vlgmr.msra.gmra.mrb[108].mxu0 %vm890_vm9, %v5068_v53 }
0x177f   :  { %8375 = vmatprep.mubr.msk.bf16.mxu0 %vm9164_vm0, %v9163_v35 }
0x17ce   :  { %v4772_v14 = vpop.f32.mrb[96].mxu0 }
0x17cf   :  { %v4778_v16 = vmul.f32 0.25, %v4772_v14  ;;  %v8327_v21 = vpop.f32.mrb[97].mxu0 }
0x17d0   :  { %v4775_v25 = vpop.f32.mrb[98].mxu0 }
0x17d1   :  { %v8328_v40 = vpop.f32.mrb[99].mxu0  ;;  %v4780_v57 = vsel %vm4779_vm2, %v4778_v16, -inf  ;;  %v5024_v25 = vsel %vm969_vm8, %v5019_v43, 0 }
0x17d2   :  { %4781 = vmax.xlane.f32.xlu1 %v4780_v57 }
0x1841   :  { %v4885_v27 = vpop.f32.mrb[100].mxu0 }
0x1842   :  { %v4891_v50 = vmul.f32 0.25, %v4885_v27  ;;  %v8339_v55 = vpop.f32.mrb[101].mxu0 }
0x1843   :  { %v4888_v33 = vpop.f32.mrb[102].mxu0 }
0x1844   :  { %v8340_v54 = vpop.f32.mrb[103].mxu0  ;;  %v4892_v2 = vsel %vm4779_vm2, %v4891_v50, -inf }
0x1845   :  { %4893 = vmax.xlane.f32.xlu0 %v4892_v2 }
0x1849   :  { %v5000_v48 = vpop.f32.mrb[104].mxu0 }
0x184a   :  { %v5006_v47 = vmul.f32 0.25, %v5000_v48  ;;  %v8351_v9 = vpop.f32.mrb[105].mxu0 }
0x184b   :  { %v5003_v41 = vpop.f32.mrb[106].mxu0 }
0x184c   :  { %v8352_v34 = vpop.f32.mrb[107].mxu0  ;;  %v5007_v28 = vsel %vm4779_vm2, %v5006_v47, -inf }
0x184d   :  { %5008 = vmax.xlane.f32.xlu1 %v5007_v28  ;;  %v8838_v34 = vld [vmem:[%s10398_s29] sm:$0xff]  }
0x184e   :  { %8372 = vmatpush3.bf16.msra.mxu0 %v8838_v34  ;;  %v7584_v34 = vld [vmem:[%s10439_s20] ss:$0 sm:$0xff] }
0x184f   :  { %8373 = vmatprep.subr.bf16.mxu0 %v9163_v35 }
0x1851   :  { %v5112_v22 = vpop.f32.mrb[108].mxu0 }
0x1852   :  { %v5118_v58 = vmul.f32 0.25, %v5112_v22  ;;  %v8363_v56 = vpop.f32.mrb[109].mxu0 }
0x1853   :  { %v5115_v60 = vpop.f32.mrb[110].mxu0 }
0x1854   :  { %v8364_v59 = vpop.f32.mrb[111].mxu0  ;;  %v5119_v46 = vsel %vm4779_vm2, %v5118_v58, -inf  ;;  %v8839_v60 = vld [vmem:[%s10398_s29 + $0x8] sm:$0xff]  }
0x1855   :  { %5120 = vmax.xlane.f32.xlu1 %v5119_v46  ;;  %8374 = vmatpush3.bf16.msra.mxu0 %v8839_v60  ;;  %v8842_v60 = vld [vmem:[%s10455_s7] sm:$0xff]  }
0x1856   :  { %8387 = vmatprep.subr.bf16.mxu0 %v9163_v35 }
0x185f   :  { %v4782_v20 = vpop.xlane.xlu1 %4781 }
0x1860   :  { %v4783_v36 = vsub.f32 %v4778_v16, %v4782_v20 }
0x1862   :  { %v4784_v3 = vmul.f32 1.442695, %v4783_v36 }
0x1864   :  { %9092 = vpow2.f32 %v4784_v3 }
0x186e   :  { %v9093_v45 = vpop.eup %9092 }
0x186f   :  { %v4786_v19 = vsel %vm4779_vm2, %v9093_v45, 0.0 }
0x1870   :  { %4787 = vadd.xlane.f32.xlu0 %v4786_v19 }
0x18d2   :  { %v4894_v10 = vpop.xlane.xlu0 %4893 }
0x18d3   :  { %v4895_v37 = vsub.f32 %v4891_v50, %v4894_v10 }
0x18d5   :  { %v4896_v23 = vmul.f32 1.442695, %v4895_v37 }
0x18d7   :  { %9094 = vpow2.f32 %v4896_v23 }
0x18da   :  { %v5009_v8 = vpop.xlane.xlu1 %5008 }
0x18db   :  { %v5010_v44 = vsub.f32 %v5006_v47, %v5009_v8 }
0x18dd   :  { %v5011_v1 = vmul.f32 1.442695, %v5010_v44 }
0x18df   :  { %9096 = vpow2.f32 %v5011_v1 }
0x18e1   :  { %v9095_v63 = vpop.eup %9094 }
0x18e2   :  { %v5121_v24 = vpop.xlane.xlu1 %5120  ;;  %v4898_v30 = vsel %vm4779_vm2, %v9095_v63, 0.0 }
0x18e3   :  { %v5122_v12 = vsub.f32 %v5118_v58, %v5121_v24  ;;  %4899 = vadd.xlane.f32.xlu1 %v4898_v30  ;;  %v7579_v30 = vld [vmem:[%s10413_s17] ss:$0 sm:$0xff] }
0x18e5   :  { %v5123_v31 = vmul.f32 1.442695, %v5122_v12 }
0x18e7   :  { %9098 = vpow2.f32 %v5123_v31 }
0x18e9   :  { %v9097_v39 = vpop.eup %9096 }
0x18ea   :  { %v5013_v61 = vsel %vm4779_vm2, %v9097_v39, 0.0 }
0x18eb   :  { %5014 = vadd.xlane.f32.xlu0 %v5013_v61 }
0x18f1   :  { %v9099_v5 = vpop.eup %9098 }
0x18f2   :  { %v5125_v0 = vsel %vm4779_vm2, %v9099_v5, 0.0 }
0x18f3   :  { %5126 = vadd.xlane.f32.xlu1 %v5125_v0 }
0x18fd   :  { %v4788_v29 = vpop.xlane.xlu0 %4787 }
0x18fe   :  { %9100 = vrcp.f32 %v4788_v29 }
0x1901   :  { %4905 = vrot.lane.b32.xlu0 %v10338_v7, %s9178_s18 }
0x1904   :  { %5132 = vrot.lane.b32.xlu1 %v5019_v43, %s9178_s18 }
0x1908   :  { %v9101_v4 = vpop.eup %9100 }
0x1909   :  { %v4790_v18 = vmul.f32 %v9101_v4, %v9093_v45 }
0x190b   :  { %v4791_v49 = vpack.c.bf16 %v4790_v18, %v4790_v18 }
0x190d   :  { %8332 = vmatmul.mubr.msk.bf16.vlgmr.msra.gmra.mrb[116].mxu1 %vm4779_vm2, %v4791_v49 }
0x190e   :  { %8343 = vmatprep.mubr.msk.bf16.mxu1 %vm9164_vm0, %v9163_v35 }
0x1970   :  { %v4900_v52 = vpop.xlane.xlu1 %4899 }
0x1971   :  { %9102 = vrcp.f32 %v4900_v52 }
0x1978   :  { %v5015_v38 = vpop.xlane.xlu0 %5014 }
0x1979   :  { %9104 = vrcp.f32 %v5015_v38 }
0x197b   :  { %v9103_v53 = vpop.eup %9102 }
0x197c   :  { %v4902_v14 = vmul.f32 %v9103_v53, %v9095_v63  ;;  %v4906_v7 = vpop.permute.xlu0 %4905 }
0x197d   :  { %v4911_v16 = vsel %vm969_vm8, %v4906_v7, 0 }
0x197e   :  { %8342 = vmatpush3.bf16.msra.mxu1 %v4911_v16  ;;  %v4903_v32 = vpack.c.bf16 %v4902_v14, %v4902_v14 }
0x197f   :  { %8353 = vmatprep.subr.bf16.mxu1 %v9163_v35 }
0x1980   :  { %v5127_v21 = vpop.xlane.xlu1 %5126 }
0x1981   :  { %9106 = vrcp.f32 %v5127_v21  ;;  %8344 = vmatmul.mubr.msk.bf16.vlgmr.msra.gmra.mrb[120].mxu1 %vm4779_vm2, %v4903_v32 }
0x1982   :  { %8354 = vmatpush3.bf16.msra.mxu1 %v5024_v25  ;;  %8355 = vmatprep.mubr.msk.bf16.mxu1 %vm9164_vm0, %v9163_v35  ;;  %v8841_v25 = vld [vmem:[%s10425_s11 + $0x8] sm:$0xff]  }
0x1983   :  { %v9105_v40 = vpop.eup %9104  ;;  %8365 = vmatprep.subr.bf16.mxu1 %v9163_v35 }
0x1984   :  { %v5017_v57 = vmul.f32 %v9105_v40, %v9097_v39  ;;  %v5133_v27 = vpop.permute.xlu1 %5132 }
0x1985   :  { %v5138_v55 = vsel %vm969_vm8, %v5133_v27, 0 }
0x1986   :  { %v5018_v50 = vpack.c.bf16 %v5017_v57, %v5017_v57 }
0x1989   :  { %8356 = vmatmul.mubr.msk.bf16.vlgmr.msra.gmra.mrb[124].mxu1 %vm4779_vm2, %v5018_v50 }
0x198a   :  { %8366 = vmatpush3.bf16.msra.mxu1 %v5138_v55  ;;  %8367 = vmatprep.mubr.msk.bf16.mxu1 %vm9164_vm0, %v9163_v35 }
0x198b   :  { %v9107_v33 = vpop.eup %9106  ;;  %8379 = vmatprep.subr.bf16.mxu1 %v9163_v35 }
0x198c   :  { %v5129_v54 = vmul.f32 %v9107_v33, %v9099_v5 }
0x198e   :  { %v5130_v2 = vpack.c.bf16 %v5129_v54, %v5129_v54 }
0x1991   :  { %8368 = vmatmul.mubr.msk.bf16.vlgmr.msra.gmra.mrb[128].mxu1 %vm4779_vm2, %v5130_v2 }
0x1992   :  { %8383 = vmatprep.mubr.msk.bf16.mxu1 %vm9164_vm0, %v9163_v35 }
0x19e0   :  { %v4833_v48 = vpop.f32.mrb[116].mxu1 }
0x19e1   :  { %v8333_v47 = vpop.f32.mrb[117].mxu1 }
0x19e2   :  { %v4836_v9 = vpop.f32.mrb[118].mxu1 }
0x19e3   :  { %v8334_v41 = vpop.f32.mrb[119].mxu1 }
0x1a54   :  { %v4947_v28 = vpop.f32.mrb[120].mxu1 }
0x1a55   :  { %v8345_v22 = vpop.f32.mrb[121].mxu1 }
0x1a56   :  { %v4950_v58 = vpop.f32.mrb[122].mxu1 }
0x1a57   :  { %v8346_v56 = vpop.f32.mrb[123].mxu1 }
0x1a5c   :  { %v5060_v59 = vpop.f32.mrb[124].mxu1 }
0x1a5d   :  { %v8357_v46 = vpop.f32.mrb[125].mxu1 }
0x1a5e   :  { %v5063_v20 = vpop.f32.mrb[126].mxu1  ;;  %v8844_v46 = vld [vmem:[%s10455_s7 + $0x10] sm:$0xff]  }
0x1a5f   :  { %v8358_v36 = vpop.f32.mrb[127].mxu1  ;;  %v8845_v20 = vld [vmem:[%s10455_s7 + $0x18] sm:$0xff]  }
0x1a60   :  { %v8846_v36 = vld [vmem:[%s10455_s7 + $0x20] sm:$0xff]  }
0x1a64   :  { %v5174_v3 = vpop.f32.mrb[128].mxu1 }
0x1a65   :  { %v8689_v45 = vpack.i.bf16 %v5174_v3, %v4947_v28  ;;  %v8369_v19 = vpop.f32.mrb[129].mxu1  ;;  %v8847_v3 = vld [vmem:[%s10455_s7 + $0x28] sm:$0xff]  }
0x1a66   :  { %v5177_v10 = vpop.f32.mrb[130].mxu1  ;;  %v8849_v19 = vld [vmem:[%s10455_s7 + $0x38] sm:$0xff]  }
0x1a67   :  { %8690 = vrot.lane.b32.xlu1 %v8689_v45, %s9173_s8  ;;  %v8370_v37 = vpop.f32.mrb[131].mxu1  ;;  %v8848_v45 = vld [vmem:[%s10455_s7 + $0x30] sm:$0xff]   ;;  %v7585_v10 = vld [vmem:[%s10476_s25] ss:$0 sm:$0xff] }
0x1ad9   :  { %v8691_v23 = vpop.permute.xlu1 %8690 }
0x1ada   :  { %v8693_v8 = vunpack.i.h.bf16 %v8691_v23  ;;  %v8692_v44 = vunpack.i.l.bf16 %v8691_v23 }
0x1adc   :  { %v5184_v1 = vsel %vm890_vm9, %v5060_v59, %v8693_v8  ;;  %v4957_v63 = vsel %vm890_vm9, %v4833_v48, %v8692_v44  ;;  %v7583_v48 = vld [vmem:[%s10434_s28] ss:$0 sm:$0xff]  ;;  %v8843_v59 = vld [vmem:[%s10455_s7 + $0x8] sm:$0xff]  }
0x1add   :  { %v5189_v24 = vpack.c.bf16 %v5184_v1, %v4957_v63 }
0x1adf   :  { %8376 = vmatmul.mubr.msk.bf16.vlgmr.msra.gmra.mrb[112].mxu0 %vm1418_vm12, %v5189_v24 }
0x1ae0   :  { %8403 = vmatprep.mubr.msk.bf16.mxu0 %vm9164_vm0, %v9163_v35  ;;  %8388 = vmatpush3.bf16.msra.mxu0 %v8842_v60  ;;  %v8851_v60 = vld [vmem:[%s10265_s2 + $0x18] sm:$0xff]  }
0x1ae1   :  { %8389 = vmatprep.subr.bf16.mxu0 %v9163_v35 }
0x1ae4   :  { %8390 = vmatpush3.bf16.msra.mxu0 %v8843_v59 }
0x1ae5   :  { %8391 = vmatprep.subr.bf16.mxu0 %v9163_v35 }
0x1ae8   :  { %8392 = vmatpush3.bf16.msra.mxu0 %v8844_v46 }
0x1ae9   :  { %8393 = vmatprep.subr.bf16.mxu0 %v9163_v35 }
0x1aec   :  { %8394 = vmatpush3.bf16.msra.mxu0 %v8845_v20 }
0x1aed   :  { %8395 = vmatprep.subr.bf16.mxu0 %v9163_v35 }
0x1af0   :  { %8396 = vmatpush3.bf16.msra.mxu0 %v8846_v36 }
0x1af1   :  { %8397 = vmatprep.subr.bf16.mxu0 %v9163_v35 }
0x1af4   :  { %8398 = vmatpush3.bf16.msra.mxu0 %v8847_v3 }
0x1af5   :  { %8399 = vmatprep.subr.bf16.mxu0 %v9163_v35 }
0x1af8   :  { %8400 = vmatpush3.bf16.msra.mxu0 %v8848_v45 }
0x1af9   :  { %8401 = vmatprep.subr.bf16.mxu0 %v9163_v35 }
0x1afc   :  { %8402 = vmatpush3.bf16.msra.mxu0 %v8849_v19 }
0x1afd   :  { %8437 = vmatprep.subr.bf16.mxu0 %v9163_v35 }
0x1bb2   :  { %v5246_v12 = vpop.f32.mrb[112].mxu0 }
0x1bb3   :  { %v5247_v31 = vadd.f32 %v7579_v30, %v5246_v12  ;;  %v8377_v39 = vpop.f32.mrb[113].mxu0 }
0x1bb4   :  { %v5249_v61 = vpop.f32.mrb[114].mxu0 }
0x1bb5   :  { %v5253_v5 = vadd.f32 %v5247_v31, %v10295_v15  ;;  %v5250_v0 = vadd.f32 %v7579_v30, %v5249_v61  ;;  %v8378_v29 = vpop.f32.mrb[115].mxu0 }
0x1bb7   :  { %v5254_v43 = vadd.f32 %v5250_v0, %v10297_v26  ;;  %v5257_v4 = vsel %vm1418_vm12, %v5253_v5, 0.0  ;;  %v8840_v26 = vld [vmem:[%s10425_s11] sm:$0xff]  }
0x1bb8   :  { %5258 = vadd.xlane.f32.xlu0 %v5257_v4  ;;  %8380 = vmatpush3.bf16.msra.mxu1 %v8840_v26 }
0x1bb9   :  { %v5260_v18 = vsel %vm1418_vm12, %v5254_v43, 0.0  ;;  %8381 = vmatprep.subr.bf16.mxu1 %v9163_v35 }
0x1bba   :  { %5261 = vadd.xlane.f32.xlu1 %v5260_v18 }
0x1bbc   :  { %8382 = vmatpush3.bf16.msra.mxu1 %v8841_v25 }
0x1bbd   :  { %8407 = vmatprep.subr.bf16.mxu1 %v9163_v35 }
0x1c45   :  { %v5259_v49 = vpop.xlane.xlu0 %5258 }
0x1c46   :  { %v5263_v52 = vmul.f32 0.03125, %v5259_v49 }
0x1c47   :  { %v5262_v38 = vpop.xlane.xlu1 %5261 }
0x1c48   :  { %v5265_v53 = vsub.f32 %v5253_v5, %v5263_v52  ;;  %v5264_v14 = vmul.f32 0.03125, %v5262_v38 }
0x1c4a   :  { %v5266_v7 = vsub.f32 %v5254_v43, %v5264_v14  ;;  %v5267_v16 = vmul.f32 %v5265_v53, %v5265_v53 }
0x1c4c   :  { %v5269_v32 = vsel %vm1418_vm12, %v5267_v16, 0.0  ;;  %v5268_v15 = vmul.f32 %v5266_v7, %v5266_v7 }
0x1c4d   :  { %5270 = vadd.xlane.f32.xlu0 %v5269_v32  ;;  %v7589_v32 = vld [vmem:[%s10484_s1] ss:$0 sm:$0xff] }
0x1c4e   :  { %v5272_v21 = vsel %vm1418_vm12, %v5268_v15, 0.0 }
0x1c51   :  { %5273 = vadd.xlane.f32.xlu0 %v5272_v21 }
0x1cda   :  { %v5271_v40 = vpop.xlane.xlu0 %5270 }
0x1cdb   :  { %v5275_v57 = vmul.f32 0.03125, %v5271_v40 }
0x1cdd   :  { %v5277_v27 = vadd.f32 1e-12, %v5275_v57 }
0x1cde   :  { %v5274_v50 = vpop.xlane.xlu0 %5273 }
0x1cdf   :  { %9108 = vrsqrt.f32 %v5277_v27  ;;  %v5276_v55 = vmul.f32 0.03125, %v5274_v50 }
0x1ce1   :  { %v5278_v33 = vadd.f32 1e-12, %v5276_v55 }
0x1ce3   :  { %9110 = vrsqrt.f32 %v5278_v33 }
0x1ce9   :  { %v9109_v54 = vpop.eup %9108 }
0x1cea   :  { %v5281_v2 = vmul.f32 %v9109_v54, %v5265_v53 }
0x1cec   :  { %v5289_v9 = vmul.f32 %v7583_v48, %v5281_v2 }
0x1ced   :  { %v9111_v47 = vpop.eup %9110 }
0x1cee   :  { %v5282_v41 = vmul.f32 %v9111_v47, %v5266_v7  ;;  %v10443_v22 = vadd.f32 %v7584_v34, %v5289_v9 }
0x1cf0   :  { %v5290_v28 = vmul.f32 %v7583_v48, %v5282_v41 }
0x1cf2   :  { %v10445_v58 = vadd.f32 %v7584_v34, %v5290_v28 }
0x1cf4   :  { %v5303_v56 = vpack.c.bf16 %v10445_v58, %v10443_v22 }
0x1cf6   :  { %8384 = vmatmul.mubr.msk.bf16.vlgmr.msra.gmra.mrb[132].mxu1 %vm1418_vm12, %v5303_v56  ;;  %v8850_v56 = vld [vmem:[%s10265_s2 + $0x10] sm:$0xff]   ;;  %s9211_s2 = smov 42  }
0x1cf7   :  { %8411 = vmatprep.mubr.msk.bf16.mxu1 %vm9164_vm0, %v9163_v35  ;;  %8408 = vmatpush3.bf16.msra.mxu1 %v8850_v56  ;;  %s10505_s19 = sld [smem:[%s10752_s0 + %s9211_s2]]   ;;  %s9225_s2 = smov 55  }
0x1cf8   :  { %8409 = vmatprep.subr.bf16.mxu1 %v9163_v35 }
0x1cfb   :  { %8410 = vmatpush3.bf16.msra.mxu1 %v8851_v60 }
0x1cfc   :  { %8415 = vmatprep.subr.bf16.mxu1 %v9163_v35 }
0x1dc9   :  { %v5360_v37 = vpop.f32.mrb[132].mxu1 }
0x1dca   :  { %v5361_v23 = vadd.f32 %v7585_v10, %v5360_v37  ;;  %v8385_v8 = vpop.f32.mrb[133].mxu1 }
0x1dcb   :  { %v5363_v44 = vpop.f32.mrb[134].mxu1 }
0x1dcc   :  { %v5367_v1 = vmul.f32 %v5361_v23, %v5361_v23  ;;  %v5364_v63 = vadd.f32 %v7585_v10, %v5363_v44  ;;  %v8386_v24 = vpop.f32.mrb[135].mxu1  ;;  %v7598_v10 = vld [vmem:[%s10500_s24] ss:$0 sm:$0xff] }
0x1dce   :  { %v5369_v30 = vmul.f32 %v5367_v1, %v5361_v23  ;;  %v5368_v12 = vmul.f32 %v5364_v63, %v5364_v63  ;;  %v7599_v1 = vld [vmem:[%s10505_s19] ss:$0 sm:$0xff] }
0x1dd0   :  { %v5371_v31 = vmul.f32 0.044715, %v5369_v30  ;;  %v5370_v39 = vmul.f32 %v5368_v12, %v5364_v63  ;;  %v8852_v12 = vld [vmem:[%s10270_s10 + $0x10] sm:$0xff]  }
0x1dd2   :  { %v5373_v61 = vadd.f32 %v5371_v31, %v5361_v23  ;;  %v5372_v5 = vmul.f32 0.044715, %v5370_v39  ;;  %v8853_v39 = vld [vmem:[%s10270_s10 + $0x18] sm:$0xff]   ;;  %s9213_s10 = smov 45  }
0x1dd4   :  { %v5375_v0 = vmul.f32 0.7978846, %v5373_v61  ;;  %v5374_v29 = vadd.f32 %v5372_v5, %v5364_v63  ;;  %v8854_v61 = vld [vmem:[%s10277_s26 + $0x10] sm:$0xff]   ;;  %v8855_v5 = vld [vmem:[%s10277_s26 + $0x18] sm:$0xff]   ;;  %s7300_s26 = sld [smem:[%s10752_s0 + %s9176_s16]]   ;;  %s9220_s16 = smov 51  }
0x1dd6   :  { %9112 = vtanh.f32 %v5375_v0  ;;  %v5376_v43 = vmul.f32 0.7978846, %v5374_v29  ;;  %v7605_v0 = vld [vmem:[%s10317_s12 + $0x1] ss:$0 sm:$0xff] }
0x1dd8   :  { %9114 = vtanh.f32 %v5376_v43 }
0x1de0   :  { %v9113_v4 = vpop.eup %9112 }
0x1de1   :  { %v5379_v18 = vadd.f32 1.0, %v9113_v4 }
0x1de2   :  { %v9115_v49 = vpop.eup %9114 }
0x1de3   :  { %v5381_v52 = vmul.f32 0.5, %v5379_v18  ;;  %v5380_v38 = vadd.f32 1.0, %v9115_v49 }
0x1de5   :  { %v5382_v53 = vmul.f32 0.5, %v5380_v38  ;;  %v5383_v14 = vmul.f32 %v5381_v52, %v5361_v23  ;;  %v7614_v38 = vld [vmem:[%s10322_s4 + $0x1] ss:$0 sm:$0xff]  ;;  %s7297_s4 = sld [smem:[%s10752_s0 + %s9213_s10]]  }
0x1de7   :  { %v5384_v7 = vmul.f32 %v5382_v53, %v5364_v63 }
0x1de9   :  { %v5401_v16 = vpack.c.bf16 %v5384_v7, %v5383_v14 }
0x1deb   :  { %8404 = vmatmul.mubr.bf16.vlgmr.msra.gmra.mrb[116].mxu0 %v5401_v16 }
0x1dec   :  { %8439 = vmatprep.mubr.msk.bf16.mxu0 %vm9164_vm0, %v9163_v35 }
0x1ebe   :  { %v5491_v15 = vpop.f32.mrb[116].mxu0 }
0x1ebf   :  { %v5492_v21 = vadd.f32 %v7589_v32, %v5491_v15  ;;  %v8405_v26 = vpop.f32.mrb[117].mxu0 }
0x1ec0   :  { %v5494_v25 = vpop.f32.mrb[118].mxu0 }
0x1ec1   :  { %v5498_v40 = vadd.f32 %v5492_v21, %v10443_v22  ;;  %v5495_v57 = vadd.f32 %v7589_v32, %v5494_v25  ;;  %v8406_v27 = vpop.f32.mrb[119].mxu0  ;;  %v7623_v25 = vld [vmem:[%s10330_s13 + $0x1] ss:$0 sm:$0xff]  ;;  %s9214_s13 = smov 21  }
0x1ec3   :  { %v5499_v50 = vadd.f32 %v5495_v57, %v10445_v58  ;;  %v5502_v55 = vsel %vm1418_vm12, %v5498_v40, 0.0 }
0x1ec4   :  { %5503 = vadd.xlane.f32.xlu1 %v5502_v55 }
0x1ec5   :  { %v5505_v33 = vsel %vm1418_vm12, %v5499_v50, 0.0 }
0x1ec6   :  { %5506 = vadd.xlane.f32.xlu0 %v5505_v33 }
0x1f51   :  { %v5504_v54 = vpop.xlane.xlu1 %5503 }
0x1f52   :  { %v5508_v2 = vmul.f32 0.03125, %v5504_v54 }
0x1f53   :  { %v5507_v48 = vpop.xlane.xlu0 %5506 }
0x1f54   :  { %v5510_v47 = vsub.f32 %v5498_v40, %v5508_v2  ;;  %v5509_v9 = vmul.f32 0.03125, %v5507_v48 }
0x1f56   :  { %v5511_v41 = vsub.f32 %v5499_v50, %v5509_v9  ;;  %v5512_v34 = vmul.f32 %v5510_v47, %v5510_v47 }
0x1f58   :  { %v5514_v28 = vsel %vm1418_vm12, %v5512_v34, 0.0  ;;  %v5513_v22 = vmul.f32 %v5511_v41, %v5511_v41 }
0x1f59   :  { %5515 = vadd.xlane.f32.xlu1 %v5514_v28 }
0x1f5a   :  { %v5517_v58 = vsel %vm1418_vm12, %v5513_v22, 0.0 }
0x1f5b   :  { %5518 = vadd.xlane.f32.xlu0 %v5517_v58 }
0x1fe6   :  { %v5516_v59 = vpop.xlane.xlu1 %5515 }
0x1fe7   :  { %v5520_v46 = vmul.f32 0.03125, %v5516_v59 }
0x1fe8   :  { %v5519_v20 = vpop.xlane.xlu0 %5518 }
0x1fe9   :  { %v5522_v36 = vadd.f32 1e-12, %v5520_v46  ;;  %v5521_v3 = vmul.f32 0.03125, %v5519_v20 }
0x1feb   :  { %9116 = vrsqrt.f32 %v5522_v36  ;;  %v5523_v45 = vadd.f32 1e-12, %v5521_v3 }
0x1fed   :  { %9118 = vrsqrt.f32 %v5523_v45 }
0x1ff5   :  { %v9117_v19 = vpop.eup %9116 }
0x1ff6   :  { %v5526_v37 = vmul.f32 %v9117_v19, %v5510_v47 }
0x1ff7   :  { %v9119_v23 = vpop.eup %9118 }
0x1ff8   :  { %v5534_v8 = vmul.f32 %v7598_v10, %v5526_v37  ;;  %v5527_v44 = vmul.f32 %v9119_v23, %v5511_v41 }
0x1ffa   :  { %v5535_v63 = vmul.f32 %v7598_v10, %v5527_v44  ;;  %v10509_v24 = vadd.f32 %v7599_v1, %v5534_v8 }
0x1ffc   :  { %v10511_v30 = vadd.f32 %v7599_v1, %v5535_v63 }
0x1ffe   :  { %v5549_v31 = vpack.c.bf16 %v10511_v30, %v10509_v24 }
0x2000   :  { %8412 = vmatmul.mubr.msk.bf16.vlgmr.msra.gmra.mrb[136].mxu1 %vm1418_vm12, %v5549_v31 }
0x2001   :  { %8416 = vmatpush3.bf16.msra.mxu1 %v8852_v12  ;;  %8419 = vmatprep.mubr.msk.bf16.mxu1 %vm9164_vm0, %v9163_v35 }
0x2002   :  { %8417 = vmatprep.subr.bf16.mxu1 %v9163_v35 }
0x2005   :  { %8418 = vmatpush3.bf16.msra.mxu1 %v8853_v39 }
0x2006   :  { %8423 = vmatprep.subr.bf16.mxu1 %v9163_v35 }
0x2008   :  { %8420 = vmatmul.mubr.msk.bf16.vlgmr.msra.gmra.mrb[140].mxu1 %vm1418_vm12, %v5549_v31 }
0x2009   :  { %8424 = vmatpush3.bf16.msra.mxu1 %v8854_v61  ;;  %8427 = vmatprep.mubr.msk.bf16.mxu1 %vm9164_vm0, %v9163_v35 }
0x200a   :  { %8425 = vmatprep.subr.bf16.mxu1 %v9163_v35 }
0x200d   :  { %8426 = vmatpush3.bf16.msra.mxu1 %v8855_v5 }
0x200e   :  { %8431 = vmatprep.subr.bf16.mxu1 %v9163_v35 }
0x2010   :  { %8428 = vmatmul.mubr.msk.bf16.vlgmr.msra.gmra.mrb[144].mxu1 %vm1418_vm12, %v5549_v31 }
0x2011   :  { %8433 = vmatprep.mubr.msk.bf16.mxu1 %vm9164_vm0, %v9163_v35 }
0x20d3   :  { %v5607_v29 = vpop.f32.mrb[136].mxu1 }
0x20d4   :  { %v5608_v43 = vadd.f32 %v7605_v0, %v5607_v29  ;;  %v8413_v4 = vpop.f32.mrb[137].mxu1 }
0x20d5   :  { %v5610_v18 = vpop.f32.mrb[138].mxu1 }
0x20d6   :  { %v5746_v49 = vpack.c.bf16 %v5608_v43, %v5608_v43  ;;  %v8414_v52 = vpop.f32.mrb[139].mxu1  ;;  %v5611_v40 = vadd.f32 %v7605_v0, %v5610_v18 }
0x20d8   :  { %5855 = vrot.lane.b32.xlu0 %v5746_v49, %s9178_s18  ;;  %v5973_v54 = vpack.c.bf16 %v5611_v40, %v5611_v40 }
0x20db   :  { %v5673_v53 = vpop.f32.mrb[140].mxu1 }
0x20dc   :  { %v5674_v14 = vadd.f32 %v7614_v38, %v5673_v53  ;;  %v8421_v7 = vpop.f32.mrb[141].mxu1 }
0x20dd   :  { %v5676_v16 = vpop.f32.mrb[142].mxu1 }
0x20de   :  { %v5747_v32 = vpack.c.bf16 %v5674_v14, %v5674_v14  ;;  %v5677_v15 = vadd.f32 %v7614_v38, %v5676_v16  ;;  %v8422_v21 = vpop.f32.mrb[143].mxu1 }
0x20e0   :  { %v5752_v26 = vsel %vm890_vm9, %v5747_v32, 0  ;;  %5858 = vrot.lane.b32.xlu1 %v5747_v32, %s9178_s18  ;;  %v5974_v57 = vpack.c.bf16 %v5677_v15, %v5677_v15 }
0x20e1   :  { %8432 = vmatpush3.bf16.xpose.msra.mxu1 %v5752_v26 }
0x20e2   :  { %8443 = vmatprep.subr.bf16.mxu1 %v9163_v35  ;;  %v5979_v22 = vsel %vm890_vm9, %v5974_v57, 0 }
0x20e3   :  { %v5739_v27 = vpop.f32.mrb[144].mxu1 }
0x20e4   :  { %v5740_v50 = vadd.f32 %v7623_v25, %v5739_v27  ;;  %6085 = vrot.lane.b32.xlu1 %v5974_v57, %s9178_s18  ;;  %v8429_v55 = vpop.f32.mrb[145].mxu1 }
0x20e5   :  { %v5742_v33 = vpop.f32.mrb[146].mxu1 }
0x20e6   :  { %v10540_v2 = vpack.c.bf16 %v5740_v50, %v5740_v50  ;;  %v10542_v48 = vadd.f32 %v7623_v25, %v5742_v33  ;;  %v8430_v47 = vpop.f32.mrb[147].mxu1 }
0x20e8   :  { %v5812_v9 = vsel %vm969_vm8, %v10540_v2, 0  ;;  %8434 = vmatmul.mubr.msk.bf16.vlgmr.msra.gmra.mrb[148].mxu1 %vm890_vm9, %v5746_v49  ;;  %6082 = vrot.lane.b32.xlu1 %v5973_v54, %s9178_s18 }
0x20e9   :  { %8438 = vmatpush3.bf16.msra.mxu0 %v5812_v9  ;;  %8445 = vmatprep.mubr.msk.bf16.mxu1 %vm9164_vm0, %v9163_v35 }
0x20ea   :  { %8449 = vmatprep.subr.bf16.mxu0 %v9163_v35 }
0x214a   :  { %v5856_v28 = vpop.permute.xlu0 %5855 }
0x2152   :  { %v5859_v41 = vpop.permute.xlu1 %5858 }
0x2153   :  { %v5864_v34 = vsel %vm890_vm9, %v5859_v41, 0  ;;  %v6034_v41 = vpack.c.bf16 %v10542_v48, %v10542_v48 }
0x2154   :  { %8444 = vmatpush3.bf16.xpose.msra.mxu1 %v5864_v34 }
0x2155   :  { %8455 = vmatprep.subr.bf16.mxu1 %v9163_v35 }
0x2156   :  { %v6086_v58 = vpop.permute.xlu1 %6085 }
0x2157   :  { %v6091_v56 = vsel %vm890_vm9, %v6086_v58, 0 }
0x215a   :  { %v6083_v60 = vpop.permute.xlu1 %6082 }
0x215b   :  { %8446 = vmatmul.mubr.msk.bf16.vlgmr.msra.gmra.mrb[152].mxu1 %vm890_vm9, %v5856_v28 }
0x215c   :  { %8456 = vmatpush3.bf16.xpose.msra.mxu1 %v5979_v22  ;;  %8457 = vmatprep.mubr.msk.bf16.mxu1 %vm9164_vm0, %v9163_v35 }
0x215d   :  { %8467 = vmatprep.subr.bf16.mxu1 %v9163_v35 }
0x2163   :  { %8458 = vmatmul.mubr.msk.bf16.vlgmr.msra.gmra.mrb[156].mxu1 %vm890_vm9, %v5973_v54 }
0x2164   :  { %8468 = vmatpush3.bf16.xpose.msra.mxu1 %v6091_v56  ;;  %8469 = vmatprep.mubr.msk.bf16.mxu1 %vm9164_vm0, %v9163_v35 }
0x2165   :  { %8479 = vmatprep.subr.bf16.mxu1 %v9163_v35 }
0x216b   :  { %8470 = vmatmul.mubr.msk.bf16.vlgmr.msra.gmra.mrb[160].mxu1 %vm890_vm9, %v6083_v60 }
0x216c   :  { %8483 = vmatprep.mubr.msk.bf16.mxu1 %vm9164_vm0, %v9163_v35 }
0x21bb   :  { %v5788_v59 = vpop.f32.mrb[148].mxu1 }
0x21bc   :  { %v5794_v46 = vmul.f32 0.25, %v5788_v59  ;;  %v8435_v20 = vpop.f32.mrb[149].mxu1 }
0x21bd   :  { %v5791_v36 = vpop.f32.mrb[150].mxu1 }
0x21be   :  { %v8436_v3 = vpop.f32.mrb[151].mxu1  ;;  %v5795_v45 = vsel %vm4779_vm2, %v5794_v46, -inf  ;;  %v6039_v36 = vsel %vm969_vm8, %v6034_v41, 0 }
0x21bf   :  { %5796 = vmax.xlane.f32.xlu0 %v5795_v45 }
0x222e   :  { %v5900_v19 = vpop.f32.mrb[152].mxu1 }
0x222f   :  { %v5906_v10 = vmul.f32 0.25, %v5900_v19  ;;  %v8447_v37 = vpop.f32.mrb[153].mxu1 }
0x2230   :  { %v5903_v23 = vpop.f32.mrb[154].mxu1 }
0x2231   :  { %v8448_v8 = vpop.f32.mrb[155].mxu1  ;;  %v5907_v44 = vsel %vm4779_vm2, %v5906_v10, -inf }
0x2232   :  { %5908 = vmax.xlane.f32.xlu1 %v5907_v44 }
0x2236   :  { %v6015_v1 = vpop.f32.mrb[156].mxu1 }
0x2237   :  { %v6021_v63 = vmul.f32 0.25, %v6015_v1  ;;  %v8459_v12 = vpop.f32.mrb[157].mxu1 }
0x2238   :  { %v6018_v31 = vpop.f32.mrb[158].mxu1 }
0x2239   :  { %v8460_v39 = vpop.f32.mrb[159].mxu1  ;;  %v6022_v61 = vsel %vm4779_vm2, %v6021_v63, -inf }
0x223a   :  { %6023 = vmax.xlane.f32.xlu0 %v6022_v61  ;;  %v8856_v39 = vld [vmem:[%s10398_s29 + $0x10] sm:$0xff]  }
0x223b   :  { %8480 = vmatpush3.bf16.msra.mxu1 %v8856_v39  ;;  %v7647_v39 = vld [vmem:[%s10439_s20 + $0x1] ss:$0 sm:$0xff]  ;;  %s9222_s20 = smov 53  }
0x223c   :  { %8481 = vmatprep.subr.bf16.mxu1 %v9163_v35 }
0x223e   :  { %v6127_v5 = vpop.f32.mrb[160].mxu1 }
0x223f   :  { %v6133_v0 = vmul.f32 0.25, %v6127_v5  ;;  %v8471_v29 = vpop.f32.mrb[161].mxu1 }
0x2240   :  { %v6130_v43 = vpop.f32.mrb[162].mxu1 }
0x2241   :  { %v8472_v4 = vpop.f32.mrb[163].mxu1  ;;  %v6134_v18 = vsel %vm4779_vm2, %v6133_v0, -inf  ;;  %v8857_v43 = vld [vmem:[%s10398_s29 + $0x18] sm:$0xff]   ;;  %s9221_s29 = smov 50  }
0x2242   :  { %6135 = vmax.xlane.f32.xlu0 %v6134_v18  ;;  %8482 = vmatpush3.bf16.msra.mxu1 %v8857_v43  ;;  %v8860_v43 = vld [vmem:[%s10455_s7 + $0x40] sm:$0xff]  }
0x2243   :  { %8495 = vmatprep.subr.bf16.mxu1 %v9163_v35 }
0x224c   :  { %v5797_v49 = vpop.xlane.xlu0 %5796 }
0x224d   :  { %v5798_v52 = vsub.f32 %v5794_v46, %v5797_v49 }
0x224f   :  { %v5799_v38 = vmul.f32 1.442695, %v5798_v52 }
0x2251   :  { %9120 = vpow2.f32 %v5799_v38 }
0x225b   :  { %v9121_v53 = vpop.eup %9120 }
0x225c   :  { %v5801_v14 = vsel %vm4779_vm2, %v9121_v53, 0.0 }
0x225d   :  { %5802 = vadd.xlane.f32.xlu1 %v5801_v14 }
0x22bf   :  { %v5909_v7 = vpop.xlane.xlu1 %5908 }
0x22c0   :  { %v5910_v16 = vsub.f32 %v5906_v10, %v5909_v7 }
0x22c2   :  { %v5911_v32 = vmul.f32 1.442695, %v5910_v16 }
0x22c4   :  { %9122 = vpow2.f32 %v5911_v32 }
0x22c7   :  { %v6024_v15 = vpop.xlane.xlu0 %6023 }
0x22c8   :  { %v6025_v21 = vsub.f32 %v6021_v63, %v6024_v15 }
0x22ca   :  { %v6026_v26 = vmul.f32 1.442695, %v6025_v21 }
0x22cc   :  { %9124 = vpow2.f32 %v6026_v26 }
0x22ce   :  { %v9123_v25 = vpop.eup %9122 }
0x22cf   :  { %v6136_v40 = vpop.xlane.xlu0 %6135  ;;  %v5913_v57 = vsel %vm4779_vm2, %v9123_v25, 0.0 }
0x22d0   :  { %v6137_v27 = vsub.f32 %v6133_v0, %v6136_v40  ;;  %5914 = vadd.xlane.f32.xlu0 %v5913_v57  ;;  %v7640_v57 = vld [vmem:[%s10413_s17 + $0x1] ss:$0 sm:$0xff] }
0x22d2   :  { %v6138_v50 = vmul.f32 1.442695, %v6137_v27 }
0x22d4   :  { %9126 = vpow2.f32 %v6138_v50 }
0x22d6   :  { %v9125_v55 = vpop.eup %9124 }
0x22d7   :  { %v6028_v33 = vsel %vm4779_vm2, %v9125_v55, 0.0 }
0x22d8   :  { %6029 = vadd.xlane.f32.xlu1 %v6028_v33 }
0x22de   :  { %v9127_v54 = vpop.eup %9126 }
0x22df   :  { %v6140_v47 = vsel %vm4779_vm2, %v9127_v54, 0.0 }
0x22e0   :  { %6141 = vadd.xlane.f32.xlu0 %v6140_v47 }
0x22e9   :  { %5920 = vrot.lane.b32.xlu1 %v10540_v2, %s9178_s18 }
0x22ea   :  { %v5803_v9 = vpop.xlane.xlu1 %5802 }
0x22eb   :  { %9128 = vrcp.f32 %v5803_v9 }
0x22f5   :  { %v9129_v34 = vpop.eup %9128 }
0x22f6   :  { %v5805_v28 = vmul.f32 %v9129_v34, %v9121_v53  ;;  %6147 = vrot.lane.b32.xlu0 %v6034_v41, %s9178_s18 }
0x22f8   :  { %v5806_v22 = vpack.c.bf16 %v5805_v28, %v5805_v28 }
0x22fa   :  { %8440 = vmatmul.mubr.msk.bf16.vlgmr.msra.gmra.mrb[120].mxu0 %vm4779_vm2, %v5806_v22 }
0x22fb   :  { %8451 = vmatprep.mubr.msk.bf16.mxu0 %vm9164_vm0, %v9163_v35 }
0x235d   :  { %v5915_v58 = vpop.xlane.xlu0 %5914 }
0x235e   :  { %9130 = vrcp.f32 %v5915_v58 }
0x2365   :  { %v6030_v56 = vpop.xlane.xlu1 %6029 }
0x2366   :  { %9132 = vrcp.f32 %v6030_v56 }
0x2368   :  { %v9131_v2 = vpop.eup %9130 }
0x2369   :  { %v5917_v60 = vmul.f32 %v9131_v2, %v9123_v25  ;;  %v5921_v59 = vpop.permute.xlu1 %5920 }
0x236a   :  { %v5926_v46 = vsel %vm969_vm8, %v5921_v59, 0 }
0x236b   :  { %8450 = vmatpush3.bf16.msra.mxu0 %v5926_v46  ;;  %v5918_v48 = vpack.c.bf16 %v5917_v60, %v5917_v60 }
0x236c   :  { %8461 = vmatprep.subr.bf16.mxu0 %v9163_v35 }
0x236d   :  { %v6142_v20 = vpop.xlane.xlu0 %6141 }
0x236e   :  { %9134 = vrcp.f32 %v6142_v20  ;;  %8452 = vmatmul.mubr.msk.bf16.vlgmr.msra.gmra.mrb[124].mxu0 %vm4779_vm2, %v5918_v48  ;;  %v8858_v20 = vld [vmem:[%s10425_s11 + $0x10] sm:$0xff]  }
0x236f   :  { %8462 = vmatpush3.bf16.msra.mxu0 %v6039_v36  ;;  %8463 = vmatprep.mubr.msk.bf16.mxu0 %vm9164_vm0, %v9163_v35  ;;  %v8859_v36 = vld [vmem:[%s10425_s11 + $0x18] sm:$0xff]   ;;  %s7273_s11 = sld [smem:[%s10752_s0 + %s9214_s13]]  }
0x2370   :  { %v9133_v3 = vpop.eup %9132  ;;  %8473 = vmatprep.subr.bf16.mxu0 %v9163_v35  ;;  %s7303_s13 = sld [smem:[%s10752_s0 + %s9220_s16]]  }
0x2371   :  { %v6032_v45 = vmul.f32 %v9133_v3, %v9125_v55  ;;  %v6148_v19 = vpop.permute.xlu0 %6147 }
0x2372   :  { %v6153_v37 = vsel %vm969_vm8, %v6148_v19, 0 }
0x2373   :  { %v6033_v10 = vpack.c.bf16 %v6032_v45, %v6032_v45 }
0x2376   :  { %8464 = vmatmul.mubr.msk.bf16.vlgmr.msra.gmra.mrb[128].mxu0 %vm4779_vm2, %v6033_v10 }
0x2377   :  { %8474 = vmatpush3.bf16.msra.mxu0 %v6153_v37  ;;  %8475 = vmatprep.mubr.msk.bf16.mxu0 %vm9164_vm0, %v9163_v35 }
0x2378   :  { %v9135_v23 = vpop.eup %9134  ;;  %8487 = vmatprep.subr.bf16.mxu0 %v9163_v35 }
0x2379   :  { %v6144_v8 = vmul.f32 %v9135_v23, %v9127_v54 }
0x237b   :  { %v6145_v44 = vpack.c.bf16 %v6144_v8, %v6144_v8 }
0x237e   :  { %8476 = vmatmul.mubr.msk.bf16.vlgmr.msra.gmra.mrb[132].mxu0 %vm4779_vm2, %v6145_v44  ;;  %v7646_v44 = vld [vmem:[%s10434_s28 + $0x1] ss:$0 sm:$0xff]  ;;  %s9215_s28 = smov 22  }
0x237f   :  { %8491 = vmatprep.mubr.msk.bf16.mxu0 %vm9164_vm0, %v9163_v35  ;;  %8488 = vmatpush3.bf16.msra.mxu0 %v8858_v20  ;;  %s7274_s21 = sld [smem:[%s10752_s0 + %s9215_s28]]  }
0x2380   :  { %8489 = vmatprep.subr.bf16.mxu0 %v9163_v35  ;;  %s7302_s28 = sld [smem:[%s10752_s0 + %s9221_s29]]  }
0x2383   :  { %8490 = vmatpush3.bf16.msra.mxu0 %v8859_v36 }
0x2384   :  { %8515 = vmatprep.subr.bf16.mxu0 %v9163_v35 }
0x23cd   :  { %v5848_v1 = vpop.f32.mrb[120].mxu0 }
0x23ce   :  { %v8441_v63 = vpop.f32.mrb[121].mxu0 }
0x23cf   :  { %v5851_v12 = vpop.f32.mrb[122].mxu0 }
0x23d0   :  { %v8442_v31 = vpop.f32.mrb[123].mxu0 }
0x2441   :  { %v5962_v61 = vpop.f32.mrb[124].mxu0 }
0x2442   :  { %v8453_v5 = vpop.f32.mrb[125].mxu0 }
0x2443   :  { %v5965_v0 = vpop.f32.mrb[126].mxu0 }
0x2444   :  { %v8454_v29 = vpop.f32.mrb[127].mxu0 }
0x2449   :  { %v6075_v4 = vpop.f32.mrb[128].mxu0 }
0x244a   :  { %v8465_v18 = vpop.f32.mrb[129].mxu0 }
0x244b   :  { %v6078_v49 = vpop.f32.mrb[130].mxu0  ;;  %v8862_v18 = vld [vmem:[%s10455_s7 + $0x50] sm:$0xff]  }
0x244c   :  { %v8466_v52 = vpop.f32.mrb[131].mxu0  ;;  %v8863_v49 = vld [vmem:[%s10455_s7 + $0x58] sm:$0xff]  }
0x244d   :  { %v8864_v52 = vld [vmem:[%s10455_s7 + $0x60] sm:$0xff]  }
0x2451   :  { %v6189_v38 = vpop.f32.mrb[132].mxu0 }
0x2452   :  { %v8694_v53 = vpack.i.bf16 %v6189_v38, %v5962_v61  ;;  %v8477_v14 = vpop.f32.mrb[133].mxu0  ;;  %v8865_v38 = vld [vmem:[%s10455_s7 + $0x68] sm:$0xff]  }
0x2453   :  { %v6192_v7 = vpop.f32.mrb[134].mxu0  ;;  %v8867_v14 = vld [vmem:[%s10455_s7 + $0x78] sm:$0xff]  }
0x2454   :  { %8695 = vrot.lane.b32.xlu1 %v8694_v53, %s9173_s8  ;;  %v8478_v16 = vpop.f32.mrb[135].mxu0  ;;  %v8866_v53 = vld [vmem:[%s10455_s7 + $0x70] sm:$0xff]   ;;  %v7653_v7 = vld [vmem:[%s10476_s25 + $0x1] ss:$0 sm:$0xff]  ;;  %s9212_s8 = smov 43   ;;  %s9216_s25 = smov 44  }
0x2455   :  { %s7296_s23 = sld [smem:[%s10752_s0 + %s9216_s25]]  }
0x2456   :  { %s7305_s25 = sld [smem:[%s10752_s0 + %s9222_s20]]  }
0x24c6   :  { %v8696_v32 = vpop.permute.xlu1 %8695 }
0x24c7   :  { %v8698_v15 = vunpack.i.h.bf16 %v8696_v32  ;;  %v8697_v21 = vunpack.i.l.bf16 %v8696_v32 }
0x24c9   :  { %v6199_v26 = vsel %vm890_vm9, %v6075_v4, %v8698_v15  ;;  %v5972_v25 = vsel %vm890_vm9, %v5848_v1, %v8697_v21  ;;  %v8861_v4 = vld [vmem:[%s10455_s7 + $0x48] sm:$0xff]  }
0x24ca   :  { %v6205_v40 = vpack.c.bf16 %v6199_v26, %v5972_v25 }
0x24cc   :  { %8484 = vmatmul.mubr.msk.bf16.vlgmr.msra.gmra.mrb[164].mxu1 %vm1418_vm12, %v6205_v40 }
0x24cd   :  { %8511 = vmatprep.mubr.msk.bf16.mxu1 %vm9164_vm0, %v9163_v35  ;;  %8496 = vmatpush3.bf16.msra.mxu1 %v8860_v43 }
0x24ce   :  { %8497 = vmatprep.subr.bf16.mxu1 %v9163_v35 }
0x24d1   :  { %8498 = vmatpush3.bf16.msra.mxu1 %v8861_v4 }
0x24d2   :  { %8499 = vmatprep.subr.bf16.mxu1 %v9163_v35 }
0x24d5   :  { %8500 = vmatpush3.bf16.msra.mxu1 %v8862_v18 }
0x24d6   :  { %8501 = vmatprep.subr.bf16.mxu1 %v9163_v35 }
0x24d9   :  { %8502 = vmatpush3.bf16.msra.mxu1 %v8863_v49 }
0x24da   :  { %8503 = vmatprep.subr.bf16.mxu1 %v9163_v35 }
0x24dd   :  { %8504 = vmatpush3.bf16.msra.mxu1 %v8864_v52 }
0x24de   :  { %8505 = vmatprep.subr.bf16.mxu1 %v9163_v35 }
0x24e1   :  { %8506 = vmatpush3.bf16.msra.mxu1 %v8865_v38 }
0x24e2   :  { %8507 = vmatprep.subr.bf16.mxu1 %v9163_v35 }
0x24e5   :  { %8508 = vmatpush3.bf16.msra.mxu1 %v8866_v53 }
0x24e6   :  { %8509 = vmatprep.subr.bf16.mxu1 %v9163_v35 }
0x24e9   :  { %8510 = vmatpush3.bf16.msra.mxu1 %v8867_v14 }
0x24ea   :  { %8523 = vmatprep.subr.bf16.mxu1 %v9163_v35 }
0x259f   :  { %v6263_v27 = vpop.f32.mrb[164].mxu1 }
0x25a0   :  { %v6264_v50 = vadd.f32 %v7640_v57, %v6263_v27  ;;  %v8485_v55 = vpop.f32.mrb[165].mxu1 }
0x25a1   :  { %v6266_v33 = vpop.f32.mrb[166].mxu1 }
0x25a2   :  { %v6270_v54 = vadd.f32 %v6264_v50, %v10509_v24  ;;  %v6267_v47 = vadd.f32 %v7640_v57, %v6266_v33  ;;  %v8486_v9 = vpop.f32.mrb[167].mxu1 }
0x25a4   :  { %v6271_v41 = vadd.f32 %v6267_v47, %v10511_v30  ;;  %v6276_v34 = vsel %vm1418_vm12, %v6270_v54, 0.0 }
0x25a5   :  { %6277 = vadd.xlane.f32.xlu1 %v6276_v34 }
0x25a6   :  { %v6279_v28 = vsel %vm1418_vm12, %v6271_v41, 0.0 }
0x25a7   :  { %6280 = vadd.xlane.f32.xlu0 %v6279_v28 }
0x2632   :  { %v6278_v22 = vpop.xlane.xlu1 %6277 }
0x2633   :  { %v6282_v58 = vmul.f32 0.03125, %v6278_v22 }
0x2634   :  { %v6281_v56 = vpop.xlane.xlu0 %6280 }
0x2635   :  { %v6284_v2 = vsub.f32 %v6270_v54, %v6282_v58  ;;  %v6283_v60 = vmul.f32 0.03125, %v6281_v56 }
0x2637   :  { %v6285_v59 = vsub.f32 %v6271_v41, %v6283_v60  ;;  %v6286_v46 = vmul.f32 %v6284_v2, %v6284_v2 }
0x2639   :  { %v6288_v24 = vsel %vm1418_vm12, %v6286_v46, 0.0  ;;  %v6287_v48 = vmul.f32 %v6285_v59, %v6285_v59 }
0x263a   :  { %6289 = vadd.xlane.f32.xlu0 %v6288_v24  ;;  %v7674_v24 = vld [vmem:[%s10484_s1 + $0x1] ss:$0 sm:$0xff]  ;;  %s9217_s1 = smov 47  }
0x263b   :  { %v6291_v30 = vsel %vm1418_vm12, %v6287_v48, 0.0  ;;  %s7299_s22 = sld [smem:[%s10752_s0 + %s9217_s1]]  }
0x263c   :  { %6292 = vadd.xlane.f32.xlu1 %v6291_v30  ;;  %s7306_s1 = sld [smem:[%s10752_s0 + %s9223_s30]]  }
0x26c7   :  { %v6290_v3 = vpop.xlane.xlu0 %6289 }
0x26c8   :  { %v6294_v45 = vmul.f32 0.03125, %v6290_v3 }
0x26c9   :  { %v6293_v19 = vpop.xlane.xlu1 %6292 }
0x26ca   :  { %v6296_v10 = vadd.f32 1e-12, %v6294_v45  ;;  %v6295_v37 = vmul.f32 0.03125, %v6293_v19 }
0x26cc   :  { %9136 = vrsqrt.f32 %v6296_v10  ;;  %v6297_v23 = vadd.f32 1e-12, %v6295_v37 }
0x26ce   :  { %9138 = vrsqrt.f32 %v6297_v23 }
0x26d6   :  { %v9137_v8 = vpop.eup %9136 }
0x26d7   :  { %v6300_v1 = vmul.f32 %v9137_v8, %v6284_v2  ;;  %v7526_v8 = vld [vmem:[%s9791_s14 + $0x1] ss:$0 sm:$0xff] }
0x26d8   :  { %v9139_v63 = vpop.eup %9138 }
0x26d9   :  { %v6308_v12 = vmul.f32 %v7646_v44, %v6300_v1  ;;  %v6301_v31 = vmul.f32 %v9139_v63, %v6285_v59  ;;  %v7544_v1 = vld [vmem:[%s9796_s27 + $0x1] ss:$0 sm:$0xff]  ;;  %s7295_s27 = sld [smem:[%s10752_s0 + %s9212_s8]]  }
0x26db   :  { %v6309_v61 = vmul.f32 %v7646_v44, %v6301_v31  ;;  %v10620_v5 = vadd.f32 %v7647_v39, %v6308_v12  ;;  %v4299_v44 = vadd.f32 %v10285_v62, %v7526_v8  ;;  %v4302_v12 = vadd.f32 %v10287_v42, %v7526_v8 }
0x26dd   :  { %v10622_v0 = vadd.f32 %v7647_v39, %v6309_v61  ;;  %v4319_v61 = vmul.f32 %v7544_v1, %v4299_v44  ;;  %v4320_v43 = vmul.f32 %v7544_v1, %v4302_v12 }
0x26df   :  { %v6323_v29 = vpack.c.bf16 %v10622_v0, %v10620_v5  ;;  %v4321_v52 = vadd.f32 %v4319_v61, %v10146_v11  ;;  %v4322_v38 = vadd.f32 %v4320_v43, %v10149_v13  ;;  %v8868_v14 = vld [vmem:[%s7295_s27] sm:$0xff]   ;;  %v8869_v11 = vld [vmem:[%s7295_s27 + $0x8] sm:$0xff]  }
0x26e0   :  { %v8872_v61 = vld [vmem:[%s7297_s4 + $0x4] ss:$8 sps:$4 sm:$0xff]  }
0x26e1   :  { %8492 = vmatmul.mubr.msk.bf16.vlgmr.msra.gmra.mrb[136].mxu0 %vm1418_vm12, %v6323_v29  ;;  %v4325_v42 = vsel %vm707_vm6, %v4321_v52, 0.0  ;;  %v4328_v53 = vsel %vm707_vm6, %v4322_v38, 0.0  ;;  %v8878_v43 = vld [vmem:[%s7297_s4 + $0x24] ss:$8 sps:$4 sm:$0xff]  }
0x26e2   :  { %8519 = vmatprep.mubr.msk.bf16.mxu0 %vm9164_vm0, %v9163_v35  ;;  %8516 = vmatpush3.bf16.msra.mxu0 %v8868_v14 }
0x26e3   :  { %8517 = vmatprep.subr.bf16.mxu0 %v9163_v35 }
0x26e6   :  { %8518 = vmatpush3.bf16.msra.mxu0 %v8869_v11 }
0x26e7   :  { %6721 = vmatprep.subr.bf16.mxu0 %v8872_v61 }
0x27b4   :  { %v6381_v16 = vpop.f32.mrb[136].mxu0 }
0x27b5   :  { %v6382_v32 = vadd.f32 %v7653_v7, %v6381_v16  ;;  %v8493_v15 = vpop.f32.mrb[137].mxu0 }
0x27b6   :  { %v6384_v21 = vpop.f32.mrb[138].mxu0 }
0x27b7   :  { %v6388_v26 = vmul.f32 %v6382_v32, %v6382_v32  ;;  %v6385_v25 = vadd.f32 %v7653_v7, %v6384_v21  ;;  %v8494_v40 = vpop.f32.mrb[139].mxu0 }
0x27b9   :  { %v6390_v57 = vmul.f32 %v6388_v26, %v6382_v32  ;;  %v6389_v27 = vmul.f32 %v6385_v25, %v6385_v25 }
0x27bb   :  { %v6392_v50 = vmul.f32 0.044715, %v6390_v57  ;;  %v6391_v55 = vmul.f32 %v6389_v27, %v6385_v25 }
0x27bd   :  { %v6394_v33 = vadd.f32 %v6392_v50, %v6382_v32  ;;  %v6393_v54 = vmul.f32 0.044715, %v6391_v55 }
0x27bf   :  { %v6396_v47 = vmul.f32 0.7978846, %v6394_v33  ;;  %v6395_v9 = vadd.f32 %v6393_v54, %v6385_v25 }
0x27c1   :  { %9140 = vtanh.f32 %v6396_v47  ;;  %v6397_v41 = vmul.f32 0.7978846, %v6395_v9 }
0x27c3   :  { %9142 = vtanh.f32 %v6397_v41  ;;  %v7685_v41 = vld [vmem:[%s10500_s24 + $0x1] ss:$0 sm:$0xff]  ;;  %s9218_s24 = smov 46  }
0x27c4   :  { %s7298_s15 = sld [smem:[%s10752_s0 + %s9218_s24]]  }
0x27c5   :  { %s7304_s24 = sld [smem:[%s10752_s0 + %s9224_s6]]  }
0x27cb   :  { %v9141_v34 = vpop.eup %9140 }
0x27cc   :  { %v6400_v28 = vadd.f32 1.0, %v9141_v34 }
0x27cd   :  { %v9143_v22 = vpop.eup %9142 }
0x27ce   :  { %v6402_v58 = vmul.f32 0.5, %v6400_v28  ;;  %v6401_v56 = vadd.f32 1.0, %v9143_v22  ;;  %v7686_v22 = vld [vmem:[%s10505_s19 + $0x1] ss:$0 sm:$0xff]  ;;  %s9219_s19 = smov 49  }
0x27cf   :  { %s7301_s14 = sld [smem:[%s10752_s0 + %s9219_s19]]  }
0x27d0   :  { %v6403_v2 = vmul.f32 0.5, %v6401_v56  ;;  %v6404_v60 = vmul.f32 %v6402_v58, %v6382_v32  ;;  %s7307_s19 = sld [smem:[%s10752_s0 + %s9225_s2]]  }
0x27d2   :  { %v6405_v59 = vmul.f32 %v6403_v2, %v6385_v25 }
0x27d4   :  { %v6423_v46 = vpack.c.bf16 %v6405_v59, %v6404_v60 }
0x27d6   :  { %8512 = vmatmul.mubr.bf16.vlgmr.msra.gmra.mrb[168].mxu1 %v6423_v46 }
0x27d7   :  { %8539 = vmatprep.mubr.msk.bf16.mxu1 %vm9164_vm0, %v9163_v35 }
0x28a9   :  { %v6514_v48 = vpop.f32.mrb[168].mxu1 }
0x28aa   :  { %v6515_v30 = vadd.f32 %v7674_v24, %v6514_v48  ;;  %v8513_v20 = vpop.f32.mrb[169].mxu1 }
0x28ab   :  { %v6517_v36 = vpop.f32.mrb[170].mxu1 }
0x28ac   :  { %v6521_v3 = vadd.f32 %v6515_v30, %v10620_v5  ;;  %v6518_v45 = vadd.f32 %v7674_v24, %v6517_v36  ;;  %v8514_v19 = vpop.f32.mrb[171].mxu1 }
0x28ae   :  { %v6522_v10 = vadd.f32 %v6518_v45, %v10622_v0  ;;  %v6527_v37 = vsel %vm1418_vm12, %v6521_v3, 0.0 }
0x28af   :  { %6528 = vadd.xlane.f32.xlu0 %v6527_v37 }
0x28b0   :  { %v6530_v23 = vsel %vm1418_vm12, %v6522_v10, 0.0 }
0x28b1   :  { %6531 = vadd.xlane.f32.xlu1 %v6530_v23 }
0x293c   :  { %v6529_v63 = vpop.xlane.xlu0 %6528 }
0x293d   :  { %v6533_v31 = vmul.f32 0.03125, %v6529_v63 }
0x293e   :  { %v6532_v39 = vpop.xlane.xlu1 %6531 }
0x293f   :  { %v6535_v5 = vsub.f32 %v6521_v3, %v6533_v31  ;;  %v6534_v29 = vmul.f32 0.03125, %v6532_v39  ;;  %v8870_v39 = vld [vmem:[%s7297_s4] ss:$8 sps:$4 sm:$0xff]  }
0x2941   :  { %v6536_v0 = vsub.f32 %v6522_v10, %v6534_v29  ;;  %v6537_v4 = vmul.f32 %v6535_v5, %v6535_v5  ;;  %v8873_v29 = vld [vmem:[%s7297_s4 + $0x10] ss:$8 sps:$4 sm:$0xff]  }
0x2943   :  { %v6539_v18 = vsel %vm1418_vm12, %v6537_v4, 0.0  ;;  %v6538_v49 = vmul.f32 %v6536_v0, %v6536_v0  ;;  %v8881_v4 = vld [vmem:[%s7297_s4 + $0x34] ss:$8 sps:$4 sm:$0xff]  }
0x2944   :  { %6540 = vadd.xlane.f32.xlu0 %v6539_v18  ;;  %v8879_v18 = vld [vmem:[%s7297_s4 + $0x30] ss:$8 sps:$4 sm:$0xff]  }
0x2945   :  { %v6542_v62 = vsel %vm1418_vm12, %v6538_v49, 0.0 }
0x2946   :  { %6543 = vadd.xlane.f32.xlu1 %v6542_v62 }
0x2948   :  { %4326 = vadd.xlane.f32.xlu0 %v4325_v42 }
0x294a   :  { %4329 = vadd.xlane.f32.xlu1 %v4328_v53 }
0x29d1   :  { %v6541_v7 = vpop.xlane.xlu0 %6540 }
0x29d2   :  { %v6545_v13 = vmul.f32 0.03125, %v6541_v7 }
0x29d3   :  { %v6544_v16 = vpop.xlane.xlu1 %6543 }
0x29d4   :  { %v6547_v32 = vadd.f32 1e-12, %v6545_v13  ;;  %v6546_v15 = vmul.f32 0.03125, %v6544_v16  ;;  %v7545_v13 = vld [vmem:[%s7273_s11] ss:$0 sm:$0xff] }
0x29d5   :  { %v4327_v21 = vpop.xlane.xlu0 %4326 }
0x29d6   :  { %9144 = vrsqrt.f32 %v6547_v32  ;;  %v6548_v26 = vadd.f32 1e-12, %v6546_v15  ;;  %v4331_v25 = vmul.f32 0.015625, %v4327_v21  ;;  %v7546_v15 = vld [vmem:[%s7274_s21] ss:$0 sm:$0xff] }
0x29d7   :  { %v4330_v40 = vpop.xlane.xlu1 %4329 }
0x29d8   :  { %9146 = vrsqrt.f32 %v6548_v26  ;;  %v10667_v57 = vsub.f32 %v4321_v52, %v4331_v25  ;;  %v4332_v27 = vmul.f32 0.015625, %v4330_v40  ;;  %v7687_v25 = vld [vmem:[%s7296_s23] ss:$0 sm:$0xff] }
0x29da   :  { %v10669_v50 = vsub.f32 %v4322_v38, %v4332_v27  ;;  %v4335_v55 = vmul.f32 %v10667_v57, %v10667_v57 }
0x29dc   :  { %v4337_v33 = vsel %vm707_vm6, %v4335_v55, 0.0  ;;  %v4336_v54 = vmul.f32 %v10669_v50, %v10669_v50 }
0x29dd   :  { %4338 = vadd.xlane.f32.xlu0 %v4337_v33 }
0x29de   :  { %v4340_v47 = vsel %vm707_vm6, %v4336_v54, 0.0 }
0x29df   :  { %4341 = vadd.xlane.f32.xlu1 %v4340_v47 }
0x29e0   :  { %v9145_v9 = vpop.eup %9144 }
0x29e1   :  { %v6551_v34 = vmul.f32 %v9145_v9, %v6535_v5  ;;  %v8875_v5 = vld [vmem:[%s7297_s4 + $0x14] ss:$8 sps:$4 sm:$0xff]  }
0x29e2   :  { %v9147_v28 = vpop.eup %9146 }
0x29e3   :  { %v6559_v58 = vmul.f32 %v7685_v41, %v6551_v34  ;;  %v6552_v56 = vmul.f32 %v9147_v28, %v6536_v0  ;;  %v8876_v0 = vld [vmem:[%s7297_s4 + $0x20] ss:$8 sps:$4 sm:$0xff]  }
0x29e4   :  { %v8882_v34 = vld [vmem:[%s7299_s22 + $0x40] sm:$0xff]  }
0x29e5   :  { %v6567_v2 = vadd.f32 %v7686_v22, %v6559_v58  ;;  %v6560_v60 = vmul.f32 %v7685_v41, %v6552_v56  ;;  %v8883_v28 = vld [vmem:[%s7299_s22] sm:$0xff]   ;;  %v8885_v58 = vld [vmem:[%s7299_s22 + $0x8] sm:$0xff]   ;;  %v8886_v56 = vld [vmem:[%s7299_s22 + $0x50] sm:$0xff]  }
0x29e7   :  { %v6569_v59 = vsel %vm1418_vm12, %v6567_v2, 0.0  ;;  %v6568_v46 = vadd.f32 %v7686_v22, %v6560_v60  ;;  %v8884_v22 = vld [vmem:[%s7299_s22 + $0x48] sm:$0xff]   ;;  %v8887_v2 = vld [vmem:[%s7299_s22 + $0x10] sm:$0xff]   ;;  %v8888_v60 = vld [vmem:[%s7299_s22 + $0x58] sm:$0xff]  }
0x29e8   :  { %v6570_v24 = vrot.slane %v6569_v59, 4 }
0x29e9   :  { %v6578_v48 = vsel %vm1418_vm12, %v6568_v46, 0.0  ;;  %v8890_v46 = vld [vmem:[%s7299_s22 + $0x60] sm:$0xff]  }
0x29ea   :  { %v6571_v30 = vadd.f32 %v6570_v24, %v6569_v59  ;;  %v6579_v20 = vrot.slane %v6578_v48, 4  ;;  %v8889_v59 = vld [vmem:[%s7299_s22 + $0x18] sm:$0xff]   ;;  %v8891_v24 = vld [vmem:[%s7299_s22 + $0x20] sm:$0xff]  }
0x29ec   :  { %v6580_v36 = vadd.f32 %v6579_v20, %v6578_v48  ;;  %v6572_v3 = vrot.slane %v6571_v30, 2  ;;  %v8892_v48 = vld [vmem:[%s7299_s22 + $0x68] sm:$0xff]   ;;  %v8894_v20 = vld [vmem:[%s7299_s22 + $0x70] sm:$0xff]  }
0x29ee   :  { %v6573_v45 = vadd.f32 %v6572_v3, %v6571_v30  ;;  %v6581_v19 = vrot.slane %v6580_v36, 2  ;;  %v8893_v30 = vld [vmem:[%s7299_s22 + $0x28] sm:$0xff]   ;;  %v8896_v3 = vld [vmem:[%s7299_s22 + $0x78] sm:$0xff]  }
0x29f0   :  { %v6574_v10 = vrot.slane %v6573_v45, 1  ;;  %v6582_v37 = vadd.f32 %v6581_v19, %v6580_v36  ;;  %v8895_v36 = vld [vmem:[%s7299_s22 + $0x30] sm:$0xff]   ;;  %v6666_v19 = vld [vmem:[%s7298_s15] sm:$0x3] }
0x29f2   :  { %v6575_v23 = vadd.f32 %v6574_v10, %v6573_v45  ;;  %v6583_v8 = vrot.slane %v6582_v37, 1  ;;  %v8897_v45 = vld [vmem:[%s7299_s22 + $0x38] sm:$0xff]   ;;  %v6671_v10 = vrot.slane %v6666_v19, %v9310_v6 }
0x29f4   :  { %v6584_v44 = vadd.f32 %v6583_v8, %v6582_v37  ;;  %v6577_v1 = vmul.f32 0.125, %v6575_v23  ;;  %v6675_v37 = vrot.slane %v6666_v19, %v9383_v17 }
0x29f6   :  { %v6585_v63 = vmul.f32 0.125, %v6584_v44 }
0x29f8   :  { %v6586_v12 = vsel %vm697_vm3, %v6577_v1, %v6585_v63 }
0x29f9   :  { %v6591_v31 = vpack.c.bf16 %v6586_v12, %v6586_v12 }
0x29fb   :  { %8520 = vmatmul.mubr.msk.bf16.vlgmr.msra.gmra.mrb[140].mxu0 %vm1418_vm12, %v6591_v31 }
0x29fc   :  { %6753 = vmatprep.mubr.bf16.mxu0 %v9170_v51  ;;  %6722 = vmatpush1.bf16.msra.mxu0 %v8870_v39 }
0x29fd   :  { %6723 = vmatprep.subr.bf16.mxu0 %v8875_v5 }
0x2a00   :  { %6724 = vmatpush1.bf16.msra.mxu0 %v8873_v29 }
0x2a01   :  { %6725 = vmatprep.subr.bf16.mxu0 %v8878_v43 }
0x2a04   :  { %6726 = vmatpush1.bf16.msra.mxu0 %v8876_v0 }
0x2a05   :  { %6727 = vmatprep.subr.bf16.mxu0 %v8881_v4 }
0x2a08   :  { %6728 = vmatpush1.bf16.msra.mxu0 %v8879_v18 }
0x2a09   :  { %8010 = vmatprep.subr.bf16.mxu0 %v8882_v34 }
0x2a6a   :  { %v4339_v49 = vpop.xlane.xlu0 %4338 }
0x2a6b   :  { %v4343_v62 = vmul.f32 0.015625, %v4339_v49 }
0x2a6c   :  { %v4342_v51 = vpop.xlane.xlu1 %4341 }
0x2a6d   :  { %v4344_v52 = vmul.f32 0.015625, %v4342_v51  ;;  %v4345_v42 = vadd.f32 1e-06, %v4343_v62 }
0x2a6f   :  { %v4346_v38 = vadd.f32 1e-06, %v4344_v52 }
0x2a71   :  { %9148 = vrsqrt.f32 %v4346_v38 }
0x2a72   :  { %9150 = vrsqrt.f32 %v4345_v42 }
0x2a7b   :  { %v9149_v53 = vpop.eup %9148 }
0x2a7c   :  { %v9151_v14 = vpop.eup %9150  ;;  %v4350_v11 = vmul.f32 %v9149_v53, %v10669_v50 }
0x2a7d   :  { %v4349_v7 = vmul.f32 %v9151_v14, %v10667_v57 }
0x2a7e   :  { %v4358_v16 = vmul.f32 %v7545_v13, %v4350_v11 }
0x2a7f   :  { %v4357_v32 = vmul.f32 %v7545_v13, %v4349_v7  ;;  %v8898_v7 = vld [vmem:[%s7301_s14] sm:$0xff]   ;;  %v8899_v13 = vld [vmem:[%s7301_s14 + $0x8] sm:$0xff]  }
0x2a80   :  { %v4366_v21 = vadd.f32 %v7546_v15, %v4358_v16  ;;  %8524 = vmatpush3.bf16.msra.mxu1 %v8898_v7  ;;  %v8900_v16 = vld [vmem:[%s7301_s14 + $0x10] sm:$0xff]  }
0x2a81   :  { %v4365_v26 = vadd.f32 %v7546_v15, %v4357_v32  ;;  %8525 = vmatprep.subr.bf16.mxu1 %v9163_v35  ;;  %v8901_v32 = vld [vmem:[%s7301_s14 + $0x18] sm:$0xff]   ;;  %v8902_v15 = vld [vmem:[%s7301_s14 + $0x20] sm:$0xff]  }
0x2a83   :  { %v4367_v40 = vsel %vm697_vm3, %v4365_v26, %v4366_v21  ;;  %v8903_v21 = vld [vmem:[%s7301_s14 + $0x28] sm:$0xff]   ;;  %v8904_v26 = vld [vmem:[%s7301_s14 + $0x30] sm:$0xff]  }
0x2a84   :  { %v6654_v54 = vmul.f32 0.75, %v4367_v40  ;;  %8526 = vmatpush3.bf16.msra.mxu1 %v8899_v13 }
0x2a85   :  { %8527 = vmatprep.subr.bf16.mxu1 %v9163_v35 }
0x2a88   :  { %8528 = vmatpush3.bf16.msra.mxu1 %v8900_v16 }
0x2a89   :  { %8529 = vmatprep.subr.bf16.mxu1 %v9163_v35 }
0x2a8c   :  { %8530 = vmatpush3.bf16.msra.mxu1 %v8901_v32 }
0x2a8d   :  { %8531 = vmatprep.subr.bf16.mxu1 %v9163_v35 }
0x2a90   :  { %8532 = vmatpush3.bf16.msra.mxu1 %v8902_v15 }
0x2a91   :  { %8533 = vmatprep.subr.bf16.mxu1 %v9163_v35 }
0x2a94   :  { %8534 = vmatpush3.bf16.msra.mxu1 %v8903_v21 }
0x2a95   :  { %8535 = vmatprep.subr.bf16.mxu1 %v9163_v35 }
0x2a98   :  { %8536 = vmatpush3.bf16.msra.mxu1 %v8904_v26 }
0x2a99   :  { %8537 = vmatprep.subr.bf16.mxu1 %v9163_v35 }
0x2ace   :  { %v6648_v27 = vpop.f32.mrb[140].mxu0 }
0x2acf   :  { %v6649_v55 = vadd.f32 %v7687_v25, %v6648_v27  ;;  %v8521_v33 = vpop.f32.mrb[141].mxu0  ;;  %v8905_v25 = vld [vmem:[%s7301_s14 + $0x38] sm:$0xff]   ;;  %v7700_v27 = vld [vmem:[%s7300_s26] ss:$0 sm:$0xff] }
0x2ad0   :  { %v6651_v50 = vpop.f32.mrb[142].mxu0  ;;  %8538 = vmatpush3.bf16.msra.mxu1 %v8905_v25 }
0x2ad1   :  { %v6655_v57 = vmul.f32 0.25, %v6649_v55  ;;  %v8522_v47 = vpop.f32.mrb[143].mxu0  ;;  %8555 = vmatprep.subr.bf16.mxu1 %v9163_v35 }
0x2ad3   :  { %v6656_v9 = vadd.f32 %v6655_v57, %v6654_v54 }
0x2ad5   :  { %v6665_v41 = vpack.c.bf16 %v6656_v9, %v6656_v9 }
0x2ad7   :  { %7699 = vmatmul.mubr.msk.bf16.vlgmr.msra.gmra.mrb[144].mxu0 %vm707_vm6, %v6665_v41 }
0x2ad8   :  { %8011 = vmatpush3.bf16.msra.mxu0 %v8883_v28 }
0x2ad9   :  { %8012 = vmatprep.subr.bf16.mxu0 %v8884_v22 }
0x2adc   :  { %8013 = vmatpush3.bf16.msra.mxu0 %v8885_v58 }
0x2add   :  { %8014 = vmatprep.subr.bf16.mxu0 %v8886_v56 }
0x2ae0   :  { %8015 = vmatpush3.bf16.msra.mxu0 %v8887_v2 }
0x2ae1   :  { %8016 = vmatprep.subr.bf16.mxu0 %v8888_v60 }
0x2ae4   :  { %8017 = vmatpush3.bf16.msra.mxu0 %v8889_v59  ;;  %v8906_v59 = vld [vmem:[%s7303_s13] sm:$0xff]  }
0x2ae5   :  { %8018 = vmatprep.subr.bf16.mxu0 %v8890_v46  ;;  %v8907_v46 = vld [vmem:[%s7303_s13 + $0x8] sm:$0xff]  }
0x2ae8   :  { %8019 = vmatpush3.bf16.msra.mxu0 %v8891_v24  ;;  %v8908_v24 = vld [vmem:[%s7303_s13 + $0x10] sm:$0xff]  }
0x2ae9   :  { %8020 = vmatprep.subr.bf16.mxu0 %v8892_v48  ;;  %v8909_v48 = vld [vmem:[%s7303_s13 + $0x18] sm:$0xff]  }
0x2aec   :  { %8021 = vmatpush3.bf16.msra.mxu0 %v8893_v30  ;;  %v7717_v30 = vld [vmem:[%s7302_s28] ss:$0 sm:$0xff] }
0x2aed   :  { %8022 = vmatprep.subr.bf16.mxu0 %v8894_v20 }
0x2af0   :  { %8023 = vmatpush3.bf16.msra.mxu0 %v8895_v36 }
0x2af1   :  { %8024 = vmatprep.subr.bf16.mxu0 %v8896_v3 }
0x2af4   :  { %8025 = vmatpush3.bf16.msra.mxu0 %v8897_v45 }
0x2af5   :  { %8543 = vmatprep.subr.bf16.mxu0 %v9163_v35 }
0x2baa   :  { %v6755_v23 = vpop.f32.mrb[144].mxu0 }
0x2bab   :  { %v6756_v8 = vadd.f32 %v6755_v23, %v6671_v10  ;;  %v6757_v44 = vpop.f32.mrb[145].mxu0 }
0x2bac   :  { %v6758_v1 = vadd.f32 %v6757_v44, %v6675_v37  ;;  %v6759_v63 = vpop.f32.mrb[146].mxu0 }
0x2bad   :  { %v6762_v12 = vmul.f32 %v6756_v8, %v6756_v8  ;;  %v6760_v31 = vpop.f32.mrb[147].mxu0 }
0x2bae   :  { %v6763_v39 = vmul.f32 %v6758_v1, %v6758_v1 }
0x2baf   :  { %v6764_v61 = vmul.f32 %v6762_v12, %v6756_v8 }
0x2bb0   :  { %v6765_v5 = vmul.f32 %v6763_v39, %v6758_v1 }
0x2bb1   :  { %v6766_v29 = vmul.f32 0.044715, %v6764_v61  ;;  %v8910_v61 = vld [vmem:[%s7305_s25] sm:$0xff]  }
0x2bb2   :  { %v6767_v43 = vmul.f32 0.044715, %v6765_v5  ;;  %v8911_v5 = vld [vmem:[%s7305_s25 + $0x8] sm:$0xff]  }
0x2bb3   :  { %v6768_v0 = vadd.f32 %v6766_v29, %v6756_v8  ;;  %v116_v29 = vstv %s7306_s1 }
0x2bb4   :  { %v6769_v4 = vadd.f32 %v6767_v43, %v6758_v1  ;;  %117 = vst [vmem:[#allocation2] sm:$0x1] %v116_v29  ;;  %v7726_v43 = vld [vmem:[%s7304_s24] ss:$0 sm:$0xff] }
0x2bb5   :  { %v6770_v18 = vmul.f32 0.7978846, %v6768_v0 }
0x2bb6   :  { %v6771_v51 = vmul.f32 0.7978846, %v6769_v4 }
0x2bb7   :  { %9152 = vtanh.f32 %v6770_v18 }
0x2bb8   :  { %9154 = vtanh.f32 %v6771_v51 }
0x2bbb   :  { %v7732_v7 = vld [vmem:[#allocation2] ss:$0 sm:$0xff] }
0x2bc1   :  { %v9153_v6 = vpop.eup %9152 }
0x2bc2   :  { %v9155_v17 = vpop.eup %9154  ;;  %v6774_v49 = vadd.f32 1.0, %v9153_v6 }
0x2bc3   :  { %v6775_v52 = vadd.f32 1.0, %v9155_v17 }
0x2bc4   :  { %v6776_v62 = vmul.f32 0.5, %v6774_v49 }
0x2bc5   :  { %v6777_v38 = vmul.f32 0.5, %v6775_v52 }
0x2bc6   :  { %v6778_v42 = vmul.f32 %v6776_v62, %v6756_v8 }
0x2bc7   :  { %v6779_v53 = vmul.f32 %v6777_v38, %v6758_v1 }
0x2bc8   :  { %v6812_v11 = vpack.c.bf16 %v6778_v42, %v6778_v42 }
0x2bc9   :  { %v6813_v14 = vpack.c.bf16 %v6779_v53, %v6779_v53 }
0x2bcb   :  { %6949 = vmatprep.mubr.bf16.mxu0 %v6813_v14 }
0x2bcc   :  { %6950 = vmatmul.mubr.bf16.vlgmr.msra.gmra.mrb[148].mxu0 %v6812_v11 }
0x2bcd   :  { %8551 = vmatprep.mubr.msk.bf16.mxu0 %vm9164_vm0, %v9163_v35  ;;  %8544 = vmatpush3.bf16.msra.mxu0 %v8906_v59 }
0x2bce   :  { %8545 = vmatprep.subr.bf16.mxu0 %v9163_v35 }
0x2bd1   :  { %8546 = vmatpush3.bf16.msra.mxu0 %v8907_v46 }
0x2bd2   :  { %8547 = vmatprep.subr.bf16.mxu0 %v9163_v35 }
0x2bd5   :  { %8548 = vmatpush3.bf16.msra.mxu0 %v8908_v24 }
0x2bd6   :  { %8549 = vmatprep.subr.bf16.mxu0 %v9163_v35 }
0x2bd9   :  { %8550 = vmatpush3.bf16.msra.mxu0 %v8909_v48 }
0x2c9f   :  { %v8026_v40 = vpop.f32.mrb[148].mxu0 }
0x2ca0   :  { %v8027_v55 = vpop.f32.mrb[149].mxu0 }
0x2ca1   :  { %v8028_v33 = vadd.f32 %v8027_v55, %v8026_v40  ;;  %v8029_v50 = vpop.f32.mrb[150].mxu0 }
0x2ca2   :  { %v8030_v54 = vpop.f32.mrb[151].mxu0 }
0x2ca3   :  { %v6952_v57 = vadd.f32 %v8028_v33, %v7700_v27 }
0x2ca5   :  { %v6957_v47 = vmul.f32 %v6952_v57, %v6952_v57 }
0x2ca7   :  { %v6958_v9 = vmul.f32 %v6957_v47, %v6952_v57 }
0x2ca9   :  { %v6959_v41 = vmul.f32 0.044715, %v6958_v9 }
0x2cab   :  { %v6960_v34 = vadd.f32 %v6959_v41, %v6952_v57 }
0x2cad   :  { %v6961_v28 = vmul.f32 0.7978846, %v6960_v34 }
0x2caf   :  { %9156 = vtanh.f32 %v6961_v28 }
0x2cb9   :  { %v9157_v22 = vpop.eup %9156 }
0x2cba   :  { %v6963_v58 = vadd.f32 1.0, %v9157_v22 }
0x2cbc   :  { %v6964_v56 = vmul.f32 0.5, %v6963_v58 }
0x2cbe   :  { %v6965_v2 = vmul.f32 %v6964_v56, %v6952_v57 }
0x2cc0   :  { %v6982_v60 = vpack.c.bf16 %v6965_v2, %v6965_v2 }
0x2cc2   :  { %8540 = vmatmul.mubr.bf16.vlgmr.msra.gmra.mrb[172].mxu1 %v6982_v60 }
0x2cc3   :  { %8559 = vmatprep.mubr.msk.bf16.mxu1 %vm9164_vm0, %v9163_v35  ;;  %8556 = vmatpush3.bf16.msra.mxu1 %v8910_v61  ;;  %vm7247_vm0 = vcmask 1024  }
0x2cc4   :  { %8557 = vmatprep.subr.bf16.mxu1 %v9163_v35 }
0x2cc7   :  { %8558 = vmatpush3.bf16.msra.mxu1 %v8911_v5 }
0x2d95   :  { %v7072_v20 = vpop.f32.mrb[172].mxu1 }
0x2d96   :  { %v7073_v36 = vadd.f32 %v7717_v30, %v7072_v20  ;;  %v8541_v3 = vpop.f32.mrb[173].mxu1 }
0x2d97   :  { %v7075_v45 = vpop.f32.mrb[174].mxu1 }
0x2d98   :  { %v7078_v19 = vmul.f32 %v7073_v36, %v7073_v36  ;;  %v8542_v10 = vpop.f32.mrb[175].mxu1 }
0x2d9a   :  { %v7079_v37 = vmul.f32 %v7078_v19, %v7073_v36 }
0x2d9c   :  { %v7080_v23 = vmul.f32 0.044715, %v7079_v37 }
0x2d9e   :  { %v7081_v8 = vadd.f32 %v7080_v23, %v7073_v36 }
0x2da0   :  { %v7082_v44 = vmul.f32 0.7978846, %v7081_v8 }
0x2da2   :  { %9158 = vtanh.f32 %v7082_v44 }
0x2dac   :  { %v9159_v1 = vpop.eup %9158 }
0x2dad   :  { %v7084_v63 = vadd.f32 1.0, %v9159_v1 }
0x2daf   :  { %v7085_v12 = vmul.f32 0.5, %v7084_v63 }
0x2db1   :  { %v7086_v31 = vmul.f32 %v7085_v12, %v7073_v36 }
0x2db3   :  { %v7095_v39 = vpack.c.bf16 %v7086_v31, %v7086_v31 }
0x2db5   :  { %8552 = vmatmul.mubr.msk.bf16.vlgmr.msra.gmra.mrb[152].mxu0 %vm707_vm6, %v7095_v39 }
0x2e88   :  { %v7164_v0 = vpop.f32.mrb[152].mxu0 }
0x2e89   :  { %v7165_v4 = vadd.f32 %v7726_v43, %v7164_v0  ;;  %v8553_v18 = vpop.f32.mrb[153].mxu0 }
0x2e8a   :  { %v7167_v51 = vpop.f32.mrb[154].mxu0 }
0x2e8b   :  { %v7170_v35 = vmul.f32 %v7165_v4, %v7165_v4  ;;  %v8554_v6 = vpop.f32.mrb[155].mxu0 }
0x2e8d   :  { %v7171_v17 = vmul.f32 %v7170_v35, %v7165_v4 }
0x2e8f   :  { %v7172_v49 = vmul.f32 0.044715, %v7171_v17 }
0x2e91   :  { %v7173_v52 = vadd.f32 %v7172_v49, %v7165_v4 }
0x2e93   :  { %v7174_v62 = vmul.f32 0.7978846, %v7173_v52 }
0x2e95   :  { %9160 = vtanh.f32 %v7174_v62 }
0x2e9f   :  { %v9161_v38 = vpop.eup %9160 }
0x2ea0   :  { %v7176_v42 = vadd.f32 1.0, %v9161_v38 }
0x2ea2   :  { %v7177_v53 = vmul.f32 0.5, %v7176_v42 }
0x2ea4   :  { %v7178_v14 = vmul.f32 %v7177_v53, %v7165_v4 }
0x2ea6   :  { %v7183_v11 = vpack.c.bf16 %v7178_v14, %v7178_v14 }
0x2ea8   :  { %8560 = vmatmul.mubr.msk.bf16.vlgmr.msra.gmra.mrb[176].mxu1 %vm1418_vm12, %v7183_v11 }
0x2f7b   :  { %v7240_v13 = vpop.f32.mrb[176].mxu1 }
0x2f7c   :  { %v7241_v16 = vadd.f32 %v7732_v7, %v7240_v13  ;;  %v8561_v32 = vpop.f32.mrb[177].mxu1 }
0x2f7d   :  { %v7243_v15 = vpop.f32.mrb[178].mxu1 }
0x2f7e   :  { %v7246_v21 = vmax.f32 %v7241_v16, 0.0  ;;  %v8562_v26 = vpop.f32.mrb[179].mxu1 }
0x2f80   :  { %7248 = vst.msk [vmem:[%s7307_s19] sm:$0x3] %vm7247_vm0, %v7246_v21 }

</bundles_post_ra>
